<compile_context>
chip_gen: v5e
topology: v5e:2x2
jax: 0.10.0
libtpu: 0.0.40
codegen_flags: <defaults>
</compile_context>

<pallas_src>
import functools

import jax
import jax.numpy as jnp
from jax.experimental import pallas as pl
from jax.experimental.pallas import tpu as pltpu


# ----------------------------------------------------------------------------
# Fused ESPCN kernel (one grid step = one batch element).
# ----------------------------------------------------------------------------
def _espcn_kernel(pat_ref, mask_ref, w1_ref, b1_ref, w2_ref, b2_ref,
                  w3_ref, b3_ref, w4_ref, b4_ref, o_ref,
                  pa_ref, pb_ref, pc_ref, im_ref, *, H, W):
    Wp = W + 2                 # padded width used by the flat row layout
    M = H * Wp                 # rows of every per-layer output matrix

    def pad_store(p_ref, act):
        # Zero the whole padded buffer (border stays 0), then write the
        # row-masked interior (mask kills the w >= W garbage columns so the
        # next layer's zero padding is exact).
        p_ref[...] = jnp.zeros_like(p_ref)
        p_ref[Wp + 1:Wp + 1 + M, :] = act * mask_ref[...]

    def conv3x3(p_ref, w_ref, b_ref, relu):
        cin = p_ref.shape[-1]
        k = 9 * cin
        # im2col via 9 contiguous row-shifted copies of the padded buffer.
        for kh in range(3):
            for kw in range(3):
                t = kh * 3 + kw
                d = kh * Wp + kw
                im_ref[:, t * cin:(t + 1) * cin] = p_ref[d:d + M, :]
        out = jnp.dot(im_ref[:, :k], w_ref[...],
                      preferred_element_type=jnp.float32) + b_ref[...]
        return jnp.maximum(out, 0.0) if relu else out

    # conv1: single (M, 25) @ (25, 64) matmul on the prebuilt patch matrix.
    a = jnp.dot(pat_ref[...], w1_ref[...], preferred_element_type=jnp.float32)
    a = jnp.maximum(a + b1_ref[...], 0.0)
    pad_store(pa_ref, a)

    pad_store(pb_ref, conv3x3(pa_ref, w2_ref, b2_ref, relu=True))
    pad_store(pc_ref, conv3x3(pb_ref, w3_ref, b3_ref, relu=True))
    # conv4: no ReLU (matches the PyTorch forward); store raw (M, r*r).
    o_ref[...] = conv3x3(pc_ref, w4_ref, b4_ref, relu=False).astype(o_ref.dtype)


# ----------------------------------------------------------------------------
# Forward wrapper: NCHW in, NCHW out (matches nn.PixelShuffle semantics).
# ----------------------------------------------------------------------------
def espcn_forward(x_nchw, params, r):
    N, cin0, H, W = x_nchw.shape
    assert cin0 == 1
    rr = r * r
    Wp = W + 2
    M = H * Wp
    # padded-buffer rows: covers max im2col read index, rounded up to 8.
    prows = ((M + 2 * Wp + 2 + 7) // 8) * 8

    (w1, b1), (w2, b2), (w3, b3), (w4, b4) = params

    # ---- conv1 im2col patches, built wrapper-side on the tiny 1-ch input ----
    x = x_nchw[:, 0]                                    # (N, H, W)
    xp = jnp.pad(x, ((0, 0), (2, 2), (2, 2)))           # (N, H+4, W+4)
    taps = [xp[:, kh:kh + H, kw:kw + W] for kh in range(5) for kw in range(5)]
    pat = jnp.stack(taps, axis=-1)                      # (N, H, W, 25)
    pat = jnp.pad(pat, ((0, 0), (0, 0), (0, Wp - W), (0, 0)))
    pat = pat.reshape(N, M, 25)                         # row j = h*Wp + w

    # ---- weights flattened so every conv is one matmul ----
    w1f = w1.reshape(25, 64)
    w2f = w2.reshape(9 * 64, 64)
    w3f = w3.reshape(9 * 64, 32)
    w4f = w4.reshape(9 * 32, rr)

    # row-validity mask for the padded-width flat layout (valid iff w < W)
    row_mask = ((jnp.arange(M, dtype=jnp.int32) % Wp) < W)
    row_mask = row_mask.astype(jnp.float32).reshape(M, 1)

    kernel = functools.partial(_espcn_kernel, H=H, W=W)

    flops = 2 * N * M * (25 * 64 + 9 * 64 * 64 + 9 * 64 * 32 + 9 * 32 * rr)
    bytes_accessed = 4 * (N * M * 25 + M + w1f.size + w2f.size + w3f.size
                          + w4f.size + 64 + 64 + 32 + rr + N * M * rr)

    def full(shape):
        return pl.BlockSpec(shape, lambda n: (0,) * len(shape))

    out = pl.pallas_call(
        kernel,
        out_shape=jax.ShapeDtypeStruct((N, M, rr), jnp.float32),
        grid=(N,),
        in_specs=[
            pl.BlockSpec((pl.Squeezed(), M, 25), lambda n: (n, 0, 0)),
            full((M, 1)),
            full((25, 64)), full((1, 64)),
            full((9 * 64, 64)), full((1, 64)),
            full((9 * 64, 32)), full((1, 32)),
            full((9 * 32, rr)), full((1, rr)),
        ],
        out_specs=pl.BlockSpec((pl.Squeezed(), M, rr), lambda n: (n, 0, 0)),
        scratch_shapes=[
            pltpu.VMEM((prows, 64), jnp.float32),   # padded conv2 input
            pltpu.VMEM((prows, 64), jnp.float32),   # padded conv3 input
            pltpu.VMEM((prows, 32), jnp.float32),   # padded conv4 input
            pltpu.VMEM((M, 9 * 64), jnp.float32),   # im2col matrix (reused)
        ],
        compiler_params=pltpu.CompilerParams(
            dimension_semantics=("parallel",)),
        cost_estimate=pl.CostEstimate(
            flops=int(flops), transcendentals=0,
            bytes_accessed=int(bytes_accessed)),
    )(pat, row_mask, w1f, b1.reshape(1, 64), w2f, b2.reshape(1, 64),
      w3f, b3.reshape(1, 32), w4f, b4.reshape(1, rr))

    # Drop the padded-width garbage columns, then pixel shuffle
    # (pure reshape/transpose layout plumbing).
    y = out.reshape(N, H, Wp, rr)[:, :, :W, :]          # (N, H, W, r*r)
    y = y.reshape(N, H, W, r, r)
    y = jnp.transpose(y, (0, 1, 3, 2, 4)).reshape(N, H * r, W * r)
    return y[:, None, :, :]                             # (N, 1, H*r, W*r)


# ----------------------------------------------------------------------------
# Parameter init (synthetic).
# ----------------------------------------------------------------------------
def init_params(key, r):
    # Conv shapes as in ESPCNModel.__init__ (converted to KH,KW,Cin,Cout).
    # TODO(synk): PyTorch uses init.orthogonal_; deterministic scaled-normal
    # init is used here (synthetic weights, not a checkpoint load).
    shapes = [(5, 5, 1, 64), (3, 3, 64, 64), (3, 3, 64, 32), (3, 3, 32, r * r)]
    params = []
    for s in shapes:
        key, kw, kb = jax.random.split(key, 3)
        fan_in = s[0] * s[1] * s[2]
        w = jax.random.normal(kw, s, jnp.float32) * (2.0 / fan_in) ** 0.5
        b = jax.random.normal(kb, (s[3],), jnp.float32) * 0.01
        params.append((w, b))
    return params


# ----------------------------------------------------------------------------
# Pure-JAX reference (correctness check of the Pallas kernel).
# ----------------------------------------------------------------------------
def _pixel_shuffle_nhwc(x, r):
    N, H, W, C = x.shape
    x = x.reshape(N, H, W, r, r)
    x = jnp.transpose(x, (0, 1, 3, 2, 4))
    return x.reshape(N, H * r, W * r)


def _ref_forward(x_nchw, params, r):
    x = jnp.transpose(x_nchw, (0, 2, 3, 1))
    dn = jax.lax.conv_dimension_numbers(x.shape, (1, 1, 1, 1),
                                        ('NHWC', 'HWIO', 'NHWC'))
    for i, (w, b) in enumerate(params):
        kh, kw_, _, _ = w.shape
        x = jax.lax.conv_general_dilated(
            x, w, window_strides=(1, 1),
            padding=((kh // 2, kh // 2), (kw_ // 2, kw_ // 2)),
            dimension_numbers=dn) + b
        if i < 3:
            x = jnp.maximum(x, 0.0)
    y = _pixel_shuffle_nhwc(x, r)
    return y[:, None, :, :]


if __name__ == "__main__":
    upscale_factor = 3
    key = jax.random.PRNGKey(0)
    k_params, k_x = jax.random.split(key)

    params = init_params(k_params, upscale_factor)
    # ESPCN takes single-channel (Y) images: (N, 1, H, W)
    x = jax.random.normal(k_x, (2, 1, 16, 16), jnp.float32)

    out = jax.block_until_ready(espcn_forward(x, params, upscale_factor))
    assert out.shape == (2, 1, 16 * upscale_factor, 16 * upscale_factor), out.shape

    ref = jax.block_until_ready(_ref_forward(x, params, upscale_factor))
    assert jnp.allclose(out, ref, rtol=1e-4, atol=5e-4), float(
        jnp.max(jnp.abs(out - ref)))

    print("KERNEL_OK")
</pallas_src>

<mosaic_0001>
module attributes {stable_mosaic.version = 11 : i64} {
  func.func @_espcn_kernel(%arg0: i32, %arg1: memref<1x288x25xf32, #tpu.memory_space<vmem>>, %arg2: memref<288x1xf32, #tpu.memory_space<vmem>>, %arg3: memref<25x64xf32, #tpu.memory_space<vmem>>, %arg4: memref<1x64xf32, #tpu.memory_space<vmem>>, %arg5: memref<576x64xf32, #tpu.memory_space<vmem>>, %arg6: memref<1x64xf32, #tpu.memory_space<vmem>>, %arg7: memref<576x32xf32, #tpu.memory_space<vmem>>, %arg8: memref<1x32xf32, #tpu.memory_space<vmem>>, %arg9: memref<288x9xf32, #tpu.memory_space<vmem>>, %arg10: memref<1x9xf32, #tpu.memory_space<vmem>>, %arg11: memref<1x288x9xf32, #tpu.memory_space<vmem>>, %arg12: memref<328x64xf32, #tpu.memory_space<vmem>>, %arg13: memref<328x64xf32, #tpu.memory_space<vmem>>, %arg14: memref<328x32xf32, #tpu.memory_space<vmem>>, %arg15: memref<288x576xf32, #tpu.memory_space<vmem>>) attributes {dimension_semantics = [#tpu.dimension_semantics<parallel>], iteration_bounds = array<i64: 2>, scalar_prefetch = 0 : i64, scratch_operands = 4 : i64, tpu.core_type = #tpu.core_type<tc>, window_params = [{transform_indices = @transform_0, window_bounds = array<i64: 1, 288, 25>}, {pipeline_mode = #tpu.pipeline_mode<synchronous>, transform_indices = @transform_1, window_bounds = array<i64: 288, 1>}, {pipeline_mode = #tpu.pipeline_mode<synchronous>, transform_indices = @transform_2, window_bounds = array<i64: 25, 64>}, {pipeline_mode = #tpu.pipeline_mode<synchronous>, transform_indices = @transform_3, window_bounds = array<i64: 1, 64>}, {pipeline_mode = #tpu.pipeline_mode<synchronous>, transform_indices = @transform_4, window_bounds = array<i64: 576, 64>}, {pipeline_mode = #tpu.pipeline_mode<synchronous>, transform_indices = @transform_5, window_bounds = array<i64: 1, 64>}, {pipeline_mode = #tpu.pipeline_mode<synchronous>, transform_indices = @transform_6, window_bounds = array<i64: 576, 32>}, {pipeline_mode = #tpu.pipeline_mode<synchronous>, transform_indices = @transform_7, window_bounds = array<i64: 1, 32>}, {pipeline_mode = #tpu.pipeline_mode<synchronous>, transform_indices = @transform_8, window_bounds = array<i64: 288, 9>}, {pipeline_mode = #tpu.pipeline_mode<synchronous>, transform_indices = @transform_9, window_bounds = array<i64: 1, 9>}, {transform_indices = @transform_10, window_bounds = array<i64: 1, 288, 9>}]} {
    %c0 = arith.constant 0 : index
    %c0_0 = arith.constant 0 : index
    %c0_1 = arith.constant 0 : index
    %0 = vector.load %arg1[%c0, %c0_0, %c0_1] : memref<1x288x25xf32, #tpu.memory_space<vmem>>, vector<1x288x25xf32>
    %1 = vector.shape_cast %0 : vector<1x288x25xf32> to vector<288x25xf32>
    %c0_2 = arith.constant 0 : index
    %c0_3 = arith.constant 0 : index
    %2 = vector.load %arg3[%c0_2, %c0_3] : memref<25x64xf32, #tpu.memory_space<vmem>>, vector<25x64xf32>
    %cst = arith.constant dense<0.000000e+00> : vector<288x64xf32>
    %3 = tpu.matmul %1, %2, %cst {dimension_numbers = #tpu.dot_dimension_numbers<[1], [0], [0], [1], [0, 0, 1, 1], [], []>} : vector<288x25xf32>, vector<25x64xf32>, vector<288x64xf32> -> vector<288x64xf32>
    %c0_4 = arith.constant 0 : index
    %c0_5 = arith.constant 0 : index
    %4 = vector.load %arg4[%c0_4, %c0_5] : memref<1x64xf32, #tpu.memory_space<vmem>>, vector<1x64xf32>
    %5 = vector.broadcast %4 : vector<1x64xf32> to vector<288x64xf32>
    %6 = arith.addf %3, %5 : vector<288x64xf32>
    %cst_6 = arith.constant 0.000000e+00 : f32
    %7 = vector.broadcast %cst_6 : f32 to vector<288x64xf32>
    %8 = arith.maximumf %6, %7 : vector<288x64xf32>
    %cst_7 = arith.constant 0.000000e+00 : f32
    %9 = vector.broadcast %cst_7 : f32 to vector<328x64xf32>
    %c0_8 = arith.constant 0 : index
    %c0_9 = arith.constant 0 : index
    %10 = vector.load %arg12[%c0_8, %c0_9] : memref<328x64xf32, #tpu.memory_space<vmem>>, vector<328x64xf32>
    tpu.vector_store %arg12[%c0_8, %c0_9], %9 {strides = array<i32>} : memref<328x64xf32, #tpu.memory_space<vmem>>, vector<328x64xf32>,
    %c0_10 = arith.constant 0 : index
    %c0_11 = arith.constant 0 : index
    %11 = vector.load %arg2[%c0_10, %c0_11] : memref<288x1xf32, #tpu.memory_space<vmem>>, vector<288x1xf32>
    %12 = vector.broadcast %11 : vector<288x1xf32> to vector<288x64xf32>
    %13 = arith.mulf %8, %12 : vector<288x64xf32>
    %c19 = arith.constant 19 : index
    %c0_12 = arith.constant 0 : index
    %14 = vector.load %arg12[%c19, %c0_12] : memref<328x64xf32, #tpu.memory_space<vmem>>, vector<288x64xf32>
    tpu.vector_store %arg12[%c19, %c0_12], %13 {strides = array<i32>} : memref<328x64xf32, #tpu.memory_space<vmem>>, vector<288x64xf32>,
    %c0_13 = arith.constant 0 : index
    %c0_14 = arith.constant 0 : index
    %15 = vector.load %arg12[%c0_13, %c0_14] : memref<328x64xf32, #tpu.memory_space<vmem>>, vector<288x64xf32>
    %c0_15 = arith.constant 0 : index
    %c0_16 = arith.constant 0 : index
    %16 = vector.load %arg15[%c0_15, %c0_16] : memref<288x576xf32, #tpu.memory_space<vmem>>, vector<288x64xf32>
    tpu.vector_store %arg15[%c0_15, %c0_16], %15 {strides = array<i32>} : memref<288x576xf32, #tpu.memory_space<vmem>>, vector<288x64xf32>,
    %c1 = arith.constant 1 : index
    %c0_17 = arith.constant 0 : index
    %17 = vector.load %arg12[%c1, %c0_17] : memref<328x64xf32, #tpu.memory_space<vmem>>, vector<288x64xf32>
    %c0_18 = arith.constant 0 : index
    %c64 = arith.constant 64 : index
    %18 = vector.load %arg15[%c0_18, %c64] : memref<288x576xf32, #tpu.memory_space<vmem>>, vector<288x64xf32>
    tpu.vector_store %arg15[%c0_18, %c64], %17 {strides = array<i32>} : memref<288x576xf32, #tpu.memory_space<vmem>>, vector<288x64xf32>,
    %c2 = arith.constant 2 : index
    %c0_19 = arith.constant 0 : index
    %19 = vector.load %arg12[%c2, %c0_19] : memref<328x64xf32, #tpu.memory_space<vmem>>, vector<288x64xf32>
    %c0_20 = arith.constant 0 : index
    %c128 = arith.constant 128 : index
    %20 = vector.load %arg15[%c0_20, %c128] : memref<288x576xf32, #tpu.memory_space<vmem>>, vector<288x64xf32>
    tpu.vector_store %arg15[%c0_20, %c128], %19 {strides = array<i32>} : memref<288x576xf32, #tpu.memory_space<vmem>>, vector<288x64xf32>,
    %c18 = arith.constant 18 : index
    %c0_21 = arith.constant 0 : index
    %21 = vector.load %arg12[%c18, %c0_21] : memref<328x64xf32, #tpu.memory_space<vmem>>, vector<288x64xf32>
    %c0_22 = arith.constant 0 : index
    %c192 = arith.constant 192 : index
    %22 = vector.load %arg15[%c0_22, %c192] : memref<288x576xf32, #tpu.memory_space<vmem>>, vector<288x64xf32>
    tpu.vector_store %arg15[%c0_22, %c192], %21 {strides = array<i32>} : memref<288x576xf32, #tpu.memory_space<vmem>>, vector<288x64xf32>,
    %c19_23 = arith.constant 19 : index
    %c0_24 = arith.constant 0 : index
    %23 = vector.load %arg12[%c19_23, %c0_24] : memref<328x64xf32, #tpu.memory_space<vmem>>, vector<288x64xf32>
    %c0_25 = arith.constant 0 : index
    %c256 = arith.constant 256 : index
    %24 = vector.load %arg15[%c0_25, %c256] : memref<288x576xf32, #tpu.memory_space<vmem>>, vector<288x64xf32>
    tpu.vector_store %arg15[%c0_25, %c256], %23 {strides = array<i32>} : memref<288x576xf32, #tpu.memory_space<vmem>>, vector<288x64xf32>,
    %c20 = arith.constant 20 : index
    %c0_26 = arith.constant 0 : index
    %25 = vector.load %arg12[%c20, %c0_26] : memref<328x64xf32, #tpu.memory_space<vmem>>, vector<288x64xf32>
    %c0_27 = arith.constant 0 : index
    %c320 = arith.constant 320 : index
    %26 = vector.load %arg15[%c0_27, %c320] : memref<288x576xf32, #tpu.memory_space<vmem>>, vector<288x64xf32>
    tpu.vector_store %arg15[%c0_27, %c320], %25 {strides = array<i32>} : memref<288x576xf32, #tpu.memory_space<vmem>>, vector<288x64xf32>,
    %c36 = arith.constant 36 : index
    %c0_28 = arith.constant 0 : index
    %27 = vector.load %arg12[%c36, %c0_28] : memref<328x64xf32, #tpu.memory_space<vmem>>, vector<288x64xf32>
    %c0_29 = arith.constant 0 : index
    %c384 = arith.constant 384 : index
    %28 = vector.load %arg15[%c0_29, %c384] : memref<288x576xf32, #tpu.memory_space<vmem>>, vector<288x64xf32>
    tpu.vector_store %arg15[%c0_29, %c384], %27 {strides = array<i32>} : memref<288x576xf32, #tpu.memory_space<vmem>>, vector<288x64xf32>,
    %c37 = arith.constant 37 : index
    %c0_30 = arith.constant 0 : index
    %29 = vector.load %arg12[%c37, %c0_30] : memref<328x64xf32, #tpu.memory_space<vmem>>, vector<288x64xf32>
    %c0_31 = arith.constant 0 : index
    %c448 = arith.constant 448 : index
    %30 = vector.load %arg15[%c0_31, %c448] : memref<288x576xf32, #tpu.memory_space<vmem>>, vector<288x64xf32>
    tpu.vector_store %arg15[%c0_31, %c448], %29 {strides = array<i32>} : memref<288x576xf32, #tpu.memory_space<vmem>>, vector<288x64xf32>,
    %c38 = arith.constant 38 : index
    %c0_32 = arith.constant 0 : index
    %31 = vector.load %arg12[%c38, %c0_32] : memref<328x64xf32, #tpu.memory_space<vmem>>, vector<288x64xf32>
    %c0_33 = arith.constant 0 : index
    %c512 = arith.constant 512 : index
    %32 = vector.load %arg15[%c0_33, %c512] : memref<288x576xf32, #tpu.memory_space<vmem>>, vector<288x64xf32>
    tpu.vector_store %arg15[%c0_33, %c512], %31 {strides = array<i32>} : memref<288x576xf32, #tpu.memory_space<vmem>>, vector<288x64xf32>,
    %c0_34 = arith.constant 0 : index
    %c0_35 = arith.constant 0 : index
    %33 = vector.load %arg15[%c0_34, %c0_35] : memref<288x576xf32, #tpu.memory_space<vmem>>, vector<288x576xf32>
    %c0_36 = arith.constant 0 : index
    %c0_37 = arith.constant 0 : index
    %34 = vector.load %arg5[%c0_36, %c0_37] : memref<576x64xf32, #tpu.memory_space<vmem>>, vector<576x64xf32>
    %cst_38 = arith.constant dense<0.000000e+00> : vector<288x64xf32>
    %35 = tpu.matmul %33, %34, %cst_38 {dimension_numbers = #tpu.dot_dimension_numbers<[1], [0], [0], [1], [0, 0, 1, 1], [], []>} : vector<288x576xf32>, vector<576x64xf32>, vector<288x64xf32> -> vector<288x64xf32>
    %c0_39 = arith.constant 0 : index
    %c0_40 = arith.constant 0 : index
    %36 = vector.load %arg6[%c0_39, %c0_40] : memref<1x64xf32, #tpu.memory_space<vmem>>, vector<1x64xf32>
    %37 = vector.broadcast %36 : vector<1x64xf32> to vector<288x64xf32>
    %38 = arith.addf %35, %37 : vector<288x64xf32>
    %cst_41 = arith.constant 0.000000e+00 : f32
    %39 = vector.broadcast %cst_41 : f32 to vector<288x64xf32>
    %40 = arith.maximumf %38, %39 : vector<288x64xf32>
    %cst_42 = arith.constant 0.000000e+00 : f32
    %41 = vector.broadcast %cst_42 : f32 to vector<328x64xf32>
    %c0_43 = arith.constant 0 : index
    %c0_44 = arith.constant 0 : index
    %42 = vector.load %arg13[%c0_43, %c0_44] : memref<328x64xf32, #tpu.memory_space<vmem>>, vector<328x64xf32>
    tpu.vector_store %arg13[%c0_43, %c0_44], %41 {strides = array<i32>} : memref<328x64xf32, #tpu.memory_space<vmem>>, vector<328x64xf32>,
    %c0_45 = arith.constant 0 : index
    %c0_46 = arith.constant 0 : index
    %43 = vector.load %arg2[%c0_45, %c0_46] : memref<288x1xf32, #tpu.memory_space<vmem>>, vector<288x1xf32>
    %44 = vector.broadcast %43 : vector<288x1xf32> to vector<288x64xf32>
    %45 = arith.mulf %40, %44 : vector<288x64xf32>
    %c19_47 = arith.constant 19 : index
    %c0_48 = arith.constant 0 : index
    %46 = vector.load %arg13[%c19_47, %c0_48] : memref<328x64xf32, #tpu.memory_space<vmem>>, vector<288x64xf32>
    tpu.vector_store %arg13[%c19_47, %c0_48], %45 {strides = array<i32>} : memref<328x64xf32, #tpu.memory_space<vmem>>, vector<288x64xf32>,
    %c0_49 = arith.constant 0 : index
    %c0_50 = arith.constant 0 : index
    %47 = vector.load %arg13[%c0_49, %c0_50] : memref<328x64xf32, #tpu.memory_space<vmem>>, vector<288x64xf32>
    %c0_51 = arith.constant 0 : index
    %c0_52 = arith.constant 0 : index
    %48 = vector.load %arg15[%c0_51, %c0_52] : memref<288x576xf32, #tpu.memory_space<vmem>>, vector<288x64xf32>
    tpu.vector_store %arg15[%c0_51, %c0_52], %47 {strides = array<i32>} : memref<288x576xf32, #tpu.memory_space<vmem>>, vector<288x64xf32>,
    %c1_53 = arith.constant 1 : index
    %c0_54 = arith.constant 0 : index
    %49 = vector.load %arg13[%c1_53, %c0_54] : memref<328x64xf32, #tpu.memory_space<vmem>>, vector<288x64xf32>
    %c0_55 = arith.constant 0 : index
    %c64_56 = arith.constant 64 : index
    %50 = vector.load %arg15[%c0_55, %c64_56] : memref<288x576xf32, #tpu.memory_space<vmem>>, vector<288x64xf32>
    tpu.vector_store %arg15[%c0_55, %c64_56], %49 {strides = array<i32>} : memref<288x576xf32, #tpu.memory_space<vmem>>, vector<288x64xf32>,
    %c2_57 = arith.constant 2 : index
    %c0_58 = arith.constant 0 : index
    %51 = vector.load %arg13[%c2_57, %c0_58] : memref<328x64xf32, #tpu.memory_space<vmem>>, vector<288x64xf32>
    %c0_59 = arith.constant 0 : index
    %c128_60 = arith.constant 128 : index
    %52 = vector.load %arg15[%c0_59, %c128_60] : memref<288x576xf32, #tpu.memory_space<vmem>>, vector<288x64xf32>
    tpu.vector_store %arg15[%c0_59, %c128_60], %51 {strides = array<i32>} : memref<288x576xf32, #tpu.memory_space<vmem>>, vector<288x64xf32>,
    %c18_61 = arith.constant 18 : index
    %c0_62 = arith.constant 0 : index
    %53 = vector.load %arg13[%c18_61, %c0_62] : memref<328x64xf32, #tpu.memory_space<vmem>>, vector<288x64xf32>
    %c0_63 = arith.constant 0 : index
    %c192_64 = arith.constant 192 : index
    %54 = vector.load %arg15[%c0_63, %c192_64] : memref<288x576xf32, #tpu.memory_space<vmem>>, vector<288x64xf32>
    tpu.vector_store %arg15[%c0_63, %c192_64], %53 {strides = array<i32>} : memref<288x576xf32, #tpu.memory_space<vmem>>, vector<288x64xf32>,
    %c19_65 = arith.constant 19 : index
    %c0_66 = arith.constant 0 : index
    %55 = vector.load %arg13[%c19_65, %c0_66] : memref<328x64xf32, #tpu.memory_space<vmem>>, vector<288x64xf32>
    %c0_67 = arith.constant 0 : index
    %c256_68 = arith.constant 256 : index
    %56 = vector.load %arg15[%c0_67, %c256_68] : memref<288x576xf32, #tpu.memory_space<vmem>>, vector<288x64xf32>
    tpu.vector_store %arg15[%c0_67, %c256_68], %55 {strides = array<i32>} : memref<288x576xf32, #tpu.memory_space<vmem>>, vector<288x64xf32>,
    %c20_69 = arith.constant 20 : index
    %c0_70 = arith.constant 0 : index
    %57 = vector.load %arg13[%c20_69, %c0_70] : memref<328x64xf32, #tpu.memory_space<vmem>>, vector<288x64xf32>
    %c0_71 = arith.constant 0 : index
    %c320_72 = arith.constant 320 : index
    %58 = vector.load %arg15[%c0_71, %c320_72] : memref<288x576xf32, #tpu.memory_space<vmem>>, vector<288x64xf32>
    tpu.vector_store %arg15[%c0_71, %c320_72], %57 {strides = array<i32>} : memref<288x576xf32, #tpu.memory_space<vmem>>, vector<288x64xf32>,
    %c36_73 = arith.constant 36 : index
    %c0_74 = arith.constant 0 : index
    %59 = vector.load %arg13[%c36_73, %c0_74] : memref<328x64xf32, #tpu.memory_space<vmem>>, vector<288x64xf32>
    %c0_75 = arith.constant 0 : index
    %c384_76 = arith.constant 384 : index
    %60 = vector.load %arg15[%c0_75, %c384_76] : memref<288x576xf32, #tpu.memory_space<vmem>>, vector<288x64xf32>
    tpu.vector_store %arg15[%c0_75, %c384_76], %59 {strides = array<i32>} : memref<288x576xf32, #tpu.memory_space<vmem>>, vector<288x64xf32>,
    %c37_77 = arith.constant 37 : index
    %c0_78 = arith.constant 0 : index
    %61 = vector.load %arg13[%c37_77, %c0_78] : memref<328x64xf32, #tpu.memory_space<vmem>>, vector<288x64xf32>
    %c0_79 = arith.constant 0 : index
    %c448_80 = arith.constant 448 : index
    %62 = vector.load %arg15[%c0_79, %c448_80] : memref<288x576xf32, #tpu.memory_space<vmem>>, vector<288x64xf32>
    tpu.vector_store %arg15[%c0_79, %c448_80], %61 {strides = array<i32>} : memref<288x576xf32, #tpu.memory_space<vmem>>, vector<288x64xf32>,
    %c38_81 = arith.constant 38 : index
    %c0_82 = arith.constant 0 : index
    %63 = vector.load %arg13[%c38_81, %c0_82] : memref<328x64xf32, #tpu.memory_space<vmem>>, vector<288x64xf32>
    %c0_83 = arith.constant 0 : index
    %c512_84 = arith.constant 512 : index
    %64 = vector.load %arg15[%c0_83, %c512_84] : memref<288x576xf32, #tpu.memory_space<vmem>>, vector<288x64xf32>
    tpu.vector_store %arg15[%c0_83, %c512_84], %63 {strides = array<i32>} : memref<288x576xf32, #tpu.memory_space<vmem>>, vector<288x64xf32>,
    %c0_85 = arith.constant 0 : index
    %c0_86 = arith.constant 0 : index
    %65 = vector.load %arg15[%c0_85, %c0_86] : memref<288x576xf32, #tpu.memory_space<vmem>>, vector<288x576xf32>
    %c0_87 = arith.constant 0 : index
    %c0_88 = arith.constant 0 : index
    %66 = vector.load %arg7[%c0_87, %c0_88] : memref<576x32xf32, #tpu.memory_space<vmem>>, vector<576x32xf32>
    %cst_89 = arith.constant dense<0.000000e+00> : vector<288x32xf32>
    %67 = tpu.matmul %65, %66, %cst_89 {dimension_numbers = #tpu.dot_dimension_numbers<[1], [0], [0], [1], [0, 0, 1, 1], [], []>} : vector<288x576xf32>, vector<576x32xf32>, vector<288x32xf32> -> vector<288x32xf32>
    %c0_90 = arith.constant 0 : index
    %c0_91 = arith.constant 0 : index
    %68 = vector.load %arg8[%c0_90, %c0_91] : memref<1x32xf32, #tpu.memory_space<vmem>>, vector<1x32xf32>
    %69 = vector.broadcast %68 : vector<1x32xf32> to vector<288x32xf32>
    %70 = arith.addf %67, %69 : vector<288x32xf32>
    %cst_92 = arith.constant 0.000000e+00 : f32
    %71 = vector.broadcast %cst_92 : f32 to vector<288x32xf32>
    %72 = arith.maximumf %70, %71 : vector<288x32xf32>
    %cst_93 = arith.constant 0.000000e+00 : f32
    %73 = vector.broadcast %cst_93 : f32 to vector<328x32xf32>
    %c0_94 = arith.constant 0 : index
    %c0_95 = arith.constant 0 : index
    %74 = vector.load %arg14[%c0_94, %c0_95] : memref<328x32xf32, #tpu.memory_space<vmem>>, vector<328x32xf32>
    tpu.vector_store %arg14[%c0_94, %c0_95], %73 {strides = array<i32>} : memref<328x32xf32, #tpu.memory_space<vmem>>, vector<328x32xf32>,
    %c0_96 = arith.constant 0 : index
    %c0_97 = arith.constant 0 : index
    %75 = vector.load %arg2[%c0_96, %c0_97] : memref<288x1xf32, #tpu.memory_space<vmem>>, vector<288x1xf32>
    %76 = vector.broadcast %75 : vector<288x1xf32> to vector<288x32xf32>
    %77 = arith.mulf %72, %76 : vector<288x32xf32>
    %c19_98 = arith.constant 19 : index
    %c0_99 = arith.constant 0 : index
    %78 = vector.load %arg14[%c19_98, %c0_99] : memref<328x32xf32, #tpu.memory_space<vmem>>, vector<288x32xf32>
    tpu.vector_store %arg14[%c19_98, %c0_99], %77 {strides = array<i32>} : memref<328x32xf32, #tpu.memory_space<vmem>>, vector<288x32xf32>,
    %c0_100 = arith.constant 0 : index
    %c0_101 = arith.constant 0 : index
    %79 = vector.load %arg14[%c0_100, %c0_101] : memref<328x32xf32, #tpu.memory_space<vmem>>, vector<288x32xf32>
    %c0_102 = arith.constant 0 : index
    %c0_103 = arith.constant 0 : index
    %80 = vector.load %arg15[%c0_102, %c0_103] : memref<288x576xf32, #tpu.memory_space<vmem>>, vector<288x32xf32>
    tpu.vector_store %arg15[%c0_102, %c0_103], %79 {strides = array<i32>} : memref<288x576xf32, #tpu.memory_space<vmem>>, vector<288x32xf32>,
    %c1_104 = arith.constant 1 : index
    %c0_105 = arith.constant 0 : index
    %81 = vector.load %arg14[%c1_104, %c0_105] : memref<328x32xf32, #tpu.memory_space<vmem>>, vector<288x32xf32>
    %c0_106 = arith.constant 0 : index
    %c32 = arith.constant 32 : index
    %82 = vector.load %arg15[%c0_106, %c32] : memref<288x576xf32, #tpu.memory_space<vmem>>, vector<288x32xf32>
    tpu.vector_store %arg15[%c0_106, %c32], %81 {strides = array<i32>} : memref<288x576xf32, #tpu.memory_space<vmem>>, vector<288x32xf32>,
    %c2_107 = arith.constant 2 : index
    %c0_108 = arith.constant 0 : index
    %83 = vector.load %arg14[%c2_107, %c0_108] : memref<328x32xf32, #tpu.memory_space<vmem>>, vector<288x32xf32>
    %c0_109 = arith.constant 0 : index
    %c64_110 = arith.constant 64 : index
    %84 = vector.load %arg15[%c0_109, %c64_110] : memref<288x576xf32, #tpu.memory_space<vmem>>, vector<288x32xf32>
    tpu.vector_store %arg15[%c0_109, %c64_110], %83 {strides = array<i32>} : memref<288x576xf32, #tpu.memory_space<vmem>>, vector<288x32xf32>,
    %c18_111 = arith.constant 18 : index
    %c0_112 = arith.constant 0 : index
    %85 = vector.load %arg14[%c18_111, %c0_112] : memref<328x32xf32, #tpu.memory_space<vmem>>, vector<288x32xf32>
    %c0_113 = arith.constant 0 : index
    %c96 = arith.constant 96 : index
    %86 = vector.load %arg15[%c0_113, %c96] : memref<288x576xf32, #tpu.memory_space<vmem>>, vector<288x32xf32>
    tpu.vector_store %arg15[%c0_113, %c96], %85 {strides = array<i32>} : memref<288x576xf32, #tpu.memory_space<vmem>>, vector<288x32xf32>,
    %c19_114 = arith.constant 19 : index
    %c0_115 = arith.constant 0 : index
    %87 = vector.load %arg14[%c19_114, %c0_115] : memref<328x32xf32, #tpu.memory_space<vmem>>, vector<288x32xf32>
    %c0_116 = arith.constant 0 : index
    %c128_117 = arith.constant 128 : index
    %88 = vector.load %arg15[%c0_116, %c128_117] : memref<288x576xf32, #tpu.memory_space<vmem>>, vector<288x32xf32>
    tpu.vector_store %arg15[%c0_116, %c128_117], %87 {strides = array<i32>} : memref<288x576xf32, #tpu.memory_space<vmem>>, vector<288x32xf32>,
    %c20_118 = arith.constant 20 : index
    %c0_119 = arith.constant 0 : index
    %89 = vector.load %arg14[%c20_118, %c0_119] : memref<328x32xf32, #tpu.memory_space<vmem>>, vector<288x32xf32>
    %c0_120 = arith.constant 0 : index
    %c160 = arith.constant 160 : index
    %90 = vector.load %arg15[%c0_120, %c160] : memref<288x576xf32, #tpu.memory_space<vmem>>, vector<288x32xf32>
    tpu.vector_store %arg15[%c0_120, %c160], %89 {strides = array<i32>} : memref<288x576xf32, #tpu.memory_space<vmem>>, vector<288x32xf32>,
    %c36_121 = arith.constant 36 : index
    %c0_122 = arith.constant 0 : index
    %91 = vector.load %arg14[%c36_121, %c0_122] : memref<328x32xf32, #tpu.memory_space<vmem>>, vector<288x32xf32>
    %c0_123 = arith.constant 0 : index
    %c192_124 = arith.constant 192 : index
    %92 = vector.load %arg15[%c0_123, %c192_124] : memref<288x576xf32, #tpu.memory_space<vmem>>, vector<288x32xf32>
    tpu.vector_store %arg15[%c0_123, %c192_124], %91 {strides = array<i32>} : memref<288x576xf32, #tpu.memory_space<vmem>>, vector<288x32xf32>,
    %c37_125 = arith.constant 37 : index
    %c0_126 = arith.constant 0 : index
    %93 = vector.load %arg14[%c37_125, %c0_126] : memref<328x32xf32, #tpu.memory_space<vmem>>, vector<288x32xf32>
    %c0_127 = arith.constant 0 : index
    %c224 = arith.constant 224 : index
    %94 = vector.load %arg15[%c0_127, %c224] : memref<288x576xf32, #tpu.memory_space<vmem>>, vector<288x32xf32>
    tpu.vector_store %arg15[%c0_127, %c224], %93 {strides = array<i32>} : memref<288x576xf32, #tpu.memory_space<vmem>>, vector<288x32xf32>,
    %c38_128 = arith.constant 38 : index
    %c0_129 = arith.constant 0 : index
    %95 = vector.load %arg14[%c38_128, %c0_129] : memref<328x32xf32, #tpu.memory_space<vmem>>, vector<288x32xf32>
    %c0_130 = arith.constant 0 : index
    %c256_131 = arith.constant 256 : index
    %96 = vector.load %arg15[%c0_130, %c256_131] : memref<288x576xf32, #tpu.memory_space<vmem>>, vector<288x32xf32>
    tpu.vector_store %arg15[%c0_130, %c256_131], %95 {strides = array<i32>} : memref<288x576xf32, #tpu.memory_space<vmem>>, vector<288x32xf32>,
    %c0_132 = arith.constant 0 : index
    %c0_133 = arith.constant 0 : index
    %97 = vector.load %arg15[%c0_132, %c0_133] : memref<288x576xf32, #tpu.memory_space<vmem>>, vector<288x288xf32>
    %c0_134 = arith.constant 0 : index
    %c0_135 = arith.constant 0 : index
    %98 = vector.load %arg9[%c0_134, %c0_135] : memref<288x9xf32, #tpu.memory_space<vmem>>, vector<288x9xf32>
    %cst_136 = arith.constant dense<0.000000e+00> : vector<288x9xf32>
    %99 = tpu.matmul %97, %98, %cst_136 {dimension_numbers = #tpu.dot_dimension_numbers<[1], [0], [0], [1], [0, 0, 1, 1], [], []>} : vector<288x288xf32>, vector<288x9xf32>, vector<288x9xf32> -> vector<288x9xf32>
    %c0_137 = arith.constant 0 : index
    %c0_138 = arith.constant 0 : index
    %100 = vector.load %arg10[%c0_137, %c0_138] : memref<1x9xf32, #tpu.memory_space<vmem>>, vector<1x9xf32>
    %101 = vector.broadcast %100 : vector<1x9xf32> to vector<288x9xf32>
    %102 = arith.addf %99, %101 : vector<288x9xf32>
    %c0_139 = arith.constant 0 : index
    %c0_140 = arith.constant 0 : index
    %c0_141 = arith.constant 0 : index
    %103 = vector.load %arg11[%c0_139, %c0_140, %c0_141] : memref<1x288x9xf32, #tpu.memory_space<vmem>>, vector<1x288x9xf32>
    %104 = vector.shape_cast %103 : vector<1x288x9xf32> to vector<288x9xf32>
    %105 = vector.shape_cast %102 : vector<288x9xf32> to vector<1x288x9xf32>
    tpu.vector_store %arg11[%c0_139, %c0_140, %c0_141], %105 {strides = array<i32>} : memref<1x288x9xf32, #tpu.memory_space<vmem>>, vector<1x288x9xf32>,
    return
  }
  func.func @transform_0(%arg0: i32) -> (i32, i32, i32) {
    %c0_i32 = arith.constant 0 : i32
    %c0_i32_0 = arith.constant 0 : i32
    %c0_i32_1 = arith.constant 0 : i32
    return %arg0, %c0_i32, %c0_i32_0 : i32, i32, i32
  }
  func.func @transform_1(%arg0: i32) -> (i32, i32) {
    %c0_i32 = arith.constant 0 : i32
    %c0_i32_0 = arith.constant 0 : i32
    %c0_i32_1 = arith.constant 0 : i32
    return %c0_i32, %c0_i32_0 : i32, i32
  }
  func.func @transform_2(%arg0: i32) -> (i32, i32) {
    %c0_i32 = arith.constant 0 : i32
    %c0_i32_0 = arith.constant 0 : i32
    %c0_i32_1 = arith.constant 0 : i32
    return %c0_i32, %c0_i32_0 : i32, i32
  }
  func.func @transform_3(%arg0: i32) -> (i32, i32) {
    %c0_i32 = arith.constant 0 : i32
    %c0_i32_0 = arith.constant 0 : i32
    %c0_i32_1 = arith.constant 0 : i32
    return %c0_i32, %c0_i32_0 : i32, i32
  }
  func.func @transform_4(%arg0: i32) -> (i32, i32) {
    %c0_i32 = arith.constant 0 : i32
    %c0_i32_0 = arith.constant 0 : i32
    %c0_i32_1 = arith.constant 0 : i32
    return %c0_i32, %c0_i32_0 : i32, i32
  }
  func.func @transform_5(%arg0: i32) -> (i32, i32) {
    %c0_i32 = arith.constant 0 : i32
    %c0_i32_0 = arith.constant 0 : i32
    %c0_i32_1 = arith.constant 0 : i32
    return %c0_i32, %c0_i32_0 : i32, i32
  }
  func.func @transform_6(%arg0: i32) -> (i32, i32) {
    %c0_i32 = arith.constant 0 : i32
    %c0_i32_0 = arith.constant 0 : i32
    %c0_i32_1 = arith.constant 0 : i32
    return %c0_i32, %c0_i32_0 : i32, i32
  }
  func.func @transform_7(%arg0: i32) -> (i32, i32) {
    %c0_i32 = arith.constant 0 : i32
    %c0_i32_0 = arith.constant 0 : i32
    %c0_i32_1 = arith.constant 0 : i32
    return %c0_i32, %c0_i32_0 : i32, i32
  }
  func.func @transform_8(%arg0: i32) -> (i32, i32) {
    %c0_i32 = arith.constant 0 : i32
    %c0_i32_0 = arith.constant 0 : i32
    %c0_i32_1 = arith.constant 0 : i32
    return %c0_i32, %c0_i32_0 : i32, i32
  }
  func.func @transform_9(%arg0: i32) -> (i32, i32) {
    %c0_i32 = arith.constant 0 : i32
    %c0_i32_0 = arith.constant 0 : i32
    %c0_i32_1 = arith.constant 0 : i32
    return %c0_i32, %c0_i32_0 : i32, i32
  }
  func.func @transform_10(%arg0: i32) -> (i32, i32, i32) {
    %c0_i32 = arith.constant 0 : i32
    %c0_i32_0 = arith.constant 0 : i32
    %c0_i32_1 = arith.constant 0 : i32
    return %arg0, %c0_i32, %c0_i32_0 : i32, i32, i32
  }
}

</mosaic_0001>

<bundles_post_ra>
// kernel: tpu_custom_call.1
= control target key start
LH: loop header
LB: loop body
LE: loop exit
PB: predicated region body
PF: predicated region fallthrough
CT: control target
= control target key end

     0   :  { %s8676_s13 = smov 0   ;;  %s13317_s0 = inlined_call_operand.vmem [shape: f32[2,288,25], index: 0, kind: input, shape index: {}]   ;;  %s13318_s1 = inlined_call_operand.vmem [shape: f32[288,1], index: 1, kind: input, shape index: {}]   ;;  %s13319_s2 = inlined_call_operand.vmem [shape: f32[25,64], index: 2, kind: input, shape index: {}]   ;;  %s13320_s3 = inlined_call_operand.vmem [shape: f32[1,64], index: 3, kind: input, shape index: {}]   ;;  %s13321_s4 = inlined_call_operand.vmem [shape: f32[576,64], index: 4, kind: input, shape index: {}]   ;;  %s13322_s5 = inlined_call_operand.vmem [shape: f32[1,64], index: 5, kind: input, shape index: {}]   ;;  %s13323_s6 = inlined_call_operand.vmem [shape: f32[576,32], index: 6, kind: input, shape index: {}]   ;;  %s13324_s7 = inlined_call_operand.vmem [shape: f32[1,32], index: 7, kind: input, shape index: {}]   ;;  %s13325_s8 = inlined_call_operand.vmem [shape: f32[288,9], index: 8, kind: input, shape index: {}]   ;;  %s13326_s9 = inlined_call_operand.vmem [shape: f32[1,9], index: 9, kind: input, shape index: {}]   ;;  %s13327_s10 = inlined_call_operand.vmem [shape: f32[2,288,9], index: 10, kind: output, shape index: {}]  }
   0x1 LB: > { %s8404_s14 = sadd.s32 4294967295, %s8614_s13   ;;  %p8408_p0 = scmp.ge.s32.totalorder %s8614_s13, 1  ;;  %s8614_s13 = sphi %s8676_s13, %s20_s13  }
   0x2   : > { %p312_p1 = scmp.lt.s32.totalorder %s8614_s13, 3 }
   0x4   : > { %p313_p2 = pnand %p8408_p0, %p312_p1 }
   0x6   : > { %316 = sbr.rel (%p313_p2) target bundleno = 2202 (0x89a), region = 60 }
   0xb   : > { %v399_v0 = vld [vmem:[%s13319_s2 + $0x18] sm:$0x1]  ;;  %vm513_vm0 = vcmask 1040384   ;;  %v724_v1 = vld [vmem:[%s13318_s1 + $0x20] sm:$0xff]  ;;  %v8616_v2 = vmov 0   ;;  %v722_v3 = vld [vmem:[%s13318_s1 + $0x10] sm:$0xff] }
   0xc   : > { %8598 = vset.pattern.permute.xlu2 %v8616_v2  ;;  %8597 = vset.pattern.permute.xlu1 %v8616_v2  ;;  %v720_v4 = vld [vmem:[%s13318_s1] sm:$0xff]  ;;  %p350_p3 = scmp.lt.s32.totalorder %s8404_s14, 1  ;;  %v398_v5 = vld [vmem:[%s13319_s2 + $0x10] sm:$0xff]  ;;  %v397_v6 = vld [vmem:[%s13319_s2 + $0x8] sm:$0xff]  ;;  %vm404_vm1 = vcmask 203776   ;;  %vm678_vm2 = vcmask 523264  }
   0xd   : > { %8596 = vset.pattern.permute.xlu0 %v8616_v2  ;;  %8411 = vmatpush.msk.msra.mxu0 %vm513_vm0, %v399_v0  ;;  %v396_v7 = vld [vmem:[%s13319_s2] sm:$0xff]  ;;  %v725_v10 = vld [vmem:[%s13318_s1 + $0x28] sm:$0xff]  ;;  %v723_v11 = vld [vmem:[%s13318_s1 + $0x18] sm:$0xff]  ;;  %v13328_v48 = vmov 0.0   ;;  %s8618_s17 = smov 64   ;;  %vm1260_vm3 = vcmask 1048064  }
   0xe   : > { %8558 = vmatpush.msk.msra.mxu3 %vm513_vm0, %v399_v0  ;;  %778 = vperm.xlu2 %8598, %v724_v1   ;;  %s13484_s14 = smov (!%p350_p3, %s8404_s14), 1  ;;  %v721_v12 = vld [vmem:[%s13318_s1 + $0x8] sm:$0xff]  ;;  %v728_v15 = vld [vmem:[%s13318_s1 + $0x40] sm:$0xff]  ;;  %v727_v16 = vld [vmem:[%s13318_s1 + $0x38] sm:$0xff]  ;;  %679 = vst.msk [vmem:[#allocation2] sm:$0xff] %vm678_vm2, %v13328_v48  ;;  %vm5836_vm4 = vcmask 261120  }
   0xf   : > { %768 = vperm.xlu1 %8597, %v722_v3   ;;  %758 = vperm.xlu0 %8596, %v720_v4   ;;  %s8582_s27 = smul.u32 288, %s13484_s14  ;;  %v726_v17 = vld [vmem:[%s13318_s1 + $0x30] sm:$0xff]  ;;  %v731_v20 = vld [vmem:[%s13318_s1 + $0x58] sm:$0xff]  ;;  %v729_v22 = vld [vmem:[%s13318_s1 + $0x48] sm:$0xff]  ;;  %680 = vst.msk [vmem:[#allocation2 + $0x8] sm:$0xff] %vm678_vm2, %v13328_v48  ;;  %s8619_s15 = smov 32  }
  0x10   : > { %530 = vmatpush.msra.mxu0 %v398_v5  ;;  %8559 = vmatpush.msra.mxu3 %v398_v5  ;;  %v730_v21 = vld [vmem:[%s13318_s1 + $0x50] sm:$0xff]  ;;  %v733_v26 = vld [vmem:[%s13318_s1 + $0x68] sm:$0xff]  ;;  %v732_v27 = vld [vmem:[%s13318_s1 + $0x60] sm:$0xff]  ;;  %681 = vst.msk [vmem:[#allocation2 + $0x10] sm:$0xff] %vm678_vm2, %v13328_v48  ;;  %s8620_s19 = smov 96   ;;  %vm6418_vm5 = vcmask 523520  }
  0x11   : > { %s8713_s12 = scalar_lea.vmem %s13317_s0, %s8582_s27  ;;  %v734_v25 = vld [vmem:[%s13318_s1 + $0x70] sm:$0xff]  ;;  %v737_v30 = vld [vmem:[%s13318_s1 + $0x88] sm:$0xff]  ;;  %v736_v31 = vld [vmem:[%s13318_s1 + $0x80] sm:$0xff]  ;;  %682 = vst.msk [vmem:[#allocation2 + $0x18] sm:$0xff] %vm678_vm2, %v13328_v48  ;;  %vm6635_vm6 = vcmask 785920   ;;  %vm6852_vm7 = vcmask 1048320   ;;  %s12835_s28 = scalar_lea.vmem %s13327_s10, %s8582_s27 }
  0x12   : > { %531 = vmatpush.msra.mxu0 %v397_v6  ;;  %8560 = vmatpush.msra.mxu3 %v397_v6  ;;  %v360_v8 = vld [vmem:[%s8713_s12] sm:$0xff]  ;;  %v361_v13 = vld [vmem:[%s8713_s12 + $0x8] sm:$0xff]  ;;  %v362_v18 = vld [vmem:[%s8713_s12 + $0x10] sm:$0xff]  ;;  %683 = vst.msk [vmem:[#allocation2 + $0x20] sm:$0xff] %vm678_vm2, %v13328_v48  ;;  %vm8312_vm8 = vcmask 72704  }
  0x13   : > { %v380_v9 = vld [vmem:[%s8713_s12 + $0xa0] sm:$0xff]  ;;  %v381_v14 = vld [vmem:[%s8713_s12 + $0xa8] sm:$0xff]  ;;  %v382_v19 = vld [vmem:[%s8713_s12 + $0xb0] sm:$0xff]  ;;  %684 = vst.msk [vmem:[#allocation2 + $0x28] sm:$0xff] %vm678_vm2, %v13328_v48 }
  0x14   : > { %532 = vmatpush.msra.mxu0 %v396_v7  ;;  %8561 = vmatpush.msra.mxu3 %v396_v7  ;;  %v363_v23 = vld [vmem:[%s8713_s12 + $0x18] sm:$0xff]  ;;  %v364_v28 = vld [vmem:[%s8713_s12 + $0x20] sm:$0xff]  ;;  %v365_v33 = vld [vmem:[%s8713_s12 + $0x28] sm:$0xff]  ;;  %685 = vst.msk [vmem:[#allocation2 + $0x30] sm:$0xff] %vm678_vm2, %v13328_v48 }
  0x15   : > { %8412 = vmatmul.msk.f32.vlgmr.msra.gmra.mxu0 %vm404_vm1, %v360_v8  ;;  %8432 = vmatmul.msk.f32.vlgmr.msra.gmra.mxu3 %vm404_vm1, %v380_v9  ;;  %v383_v24 = vld [vmem:[%s8713_s12 + $0xb8] sm:$0xff]  ;;  %v384_v29 = vld [vmem:[%s8713_s12 + $0xc0] sm:$0xff]  ;;  %v385_v34 = vld [vmem:[%s8713_s12 + $0xc8] sm:$0xff]  ;;  %686 = vst.msk [vmem:[#allocation2 + $0x38] sm:$0xff] %vm678_vm2, %v13328_v48 }
  0x16   : > { %783 = vperm.xlu2 %8598, %v725_v10   ;;  %v735_v32 = vld [vmem:[%s13318_s1 + $0x78] sm:$0xff]  ;;  %v740_v35 = vld [vmem:[%s13318_s1 + $0xa0] sm:$0xff]  ;;  %v738_v37 = vld [vmem:[%s13318_s1 + $0x90] sm:$0xff]  ;;  %687 = vst.msk [vmem:[#allocation2 + $0x40] sm:$0xff] %vm678_vm2, %v13328_v48 }
  0x17   : > { %773 = vperm.xlu1 %8597, %v723_v11   ;;  %763 = vperm.xlu0 %8596, %v721_v12   ;;  %v739_v36 = vld [vmem:[%s13318_s1 + $0x98] sm:$0xff]  ;;  %v366_v38 = vld [vmem:[%s8713_s12 + $0x30] sm:$0xff]  ;;  %v741_v42 = vld [vmem:[%s13318_s1 + $0xa8] sm:$0xff]  ;;  %688 = vst.msk [vmem:[#allocation2 + $0x48] sm:$0xff] %vm678_vm2, %v13328_v48 }
  0x18   : > { %v386_v39 = vld [vmem:[%s8713_s12 + $0xd0] sm:$0xff]  ;;  %v743_v40 = vld [vmem:[%s13318_s1 + $0xb8] sm:$0xff]  ;;  %v745_v46 = vld [vmem:[%s13318_s1 + $0xc8] sm:$0xff]  ;;  %689 = vst.msk [vmem:[#allocation2 + $0x50] sm:$0xff] %vm678_vm2, %v13328_v48 }
  0x19   : > { %v742_v41 = vld [vmem:[%s13318_s1 + $0xb0] sm:$0xff]  ;;  %v367_v43 = vld [vmem:[%s8713_s12 + $0x38] sm:$0xff]  ;;  %v744_v47 = vld [vmem:[%s13318_s1 + $0xc0] sm:$0xff]  ;;  %690 = vst.msk [vmem:[#allocation2 + $0x58] sm:$0xff] %vm678_vm2, %v13328_v48 }
  0x1a   : > { %v387_v44 = vld [vmem:[%s8713_s12 + $0xd8] sm:$0xff]  ;;  %v746_v45 = vld [vmem:[%s13318_s1 + $0xd0] sm:$0xff]  ;;  %v368_v49 = vld [vmem:[%s8713_s12 + $0x40] sm:$0xff]  ;;  %691 = vst.msk [vmem:[#allocation2 + $0x60] sm:$0xff] %vm678_vm2, %v13328_v48 }
  0x1b   : > { %v388_v50 = vld [vmem:[%s8713_s12 + $0xe0] sm:$0xff]  ;;  %v749_v51 = vld [vmem:[%s13318_s1 + $0xe8] sm:$0xff]  ;;  %v747_v53 = vld [vmem:[%s13318_s1 + $0xd8] sm:$0xff]  ;;  %692 = vst.msk [vmem:[#allocation2 + $0x68] sm:$0xff] %vm678_vm2, %v13328_v48 }
  0x1c   : > { %v748_v52 = vld [vmem:[%s13318_s1 + $0xe0] sm:$0xff]  ;;  %v369_v54 = vld [vmem:[%s8713_s12 + $0x48] sm:$0xff]  ;;  %v751_v57 = vld [vmem:[%s13318_s1 + $0xf8] sm:$0xff]  ;;  %693 = vst.msk [vmem:[#allocation2 + $0x70] sm:$0xff] %vm678_vm2, %v13328_v48 }
  0x1d   : > { %8413 = vmatmul.msk.f32.gmra.mxu0 %vm404_vm1, %v361_v13  ;;  %8433 = vmatmul.msk.f32.gmra.mxu3 %vm404_vm1, %v381_v14  ;;  %v389_v55 = vld [vmem:[%s8713_s12 + $0xe8] sm:$0xff]  ;;  %v752_v56 = vld [vmem:[%s13318_s1 + $0x100] sm:$0xff]  ;;  %v750_v58 = vld [vmem:[%s13318_s1 + $0xf0] sm:$0xff]  ;;  %694 = vst.msk [vmem:[#allocation2 + $0x78] sm:$0xff] %vm678_vm2, %v13328_v48 }
  0x1e   : > { %798 = vperm.xlu2 %8598, %v728_v15   ;;  %695 = vst.msk [vmem:[#allocation2 + $0x80] sm:$0xff] %vm678_vm2, %v13328_v48  ;;  %v370_v59 = vld [vmem:[%s8713_s12 + $0x50] sm:$0xff]  ;;  %v755_v61 = vld [vmem:[%s13318_s1 + $0x118] sm:$0xff]  ;;  %v753_v63 = vld [vmem:[%s13318_s1 + $0x108] sm:$0xff] }
  0x1f   : > { %793 = vperm.xlu1 %8597, %v727_v16   ;;  %788 = vperm.xlu0 %8596, %v726_v17   ;;  %v390_v60 = vld [vmem:[%s8713_s12 + $0xf0] sm:$0xff]  ;;  %696 = vst.msk [vmem:[#allocation2 + $0x88] sm:$0xff] %vm678_vm2, %v13328_v48  ;;  %v371_v1 = vld [vmem:[%s8713_s12 + $0x58] sm:$0xff]  ;;  %v1080_v3 = vld [vmem:[#allocation2 + $0x1] sm:$0xff] }
  0x20   : > { %697 = vst.msk [vmem:[#allocation2 + $0x90] sm:$0xff] %vm678_vm2, %v13328_v48  ;;  %v754_v62 = vld [vmem:[%s13318_s1 + $0x110] sm:$0xff]  ;;  %v391_v2 = vld [vmem:[%s8713_s12 + $0xf8] sm:$0xff]  ;;  %v372_v6 = vld [vmem:[%s8713_s12 + $0x60] sm:$0xff] }
  0x21   : > { %698 = vst.msk [vmem:[#allocation2 + $0x98] sm:$0xff] %vm678_vm2, %v13328_v48  ;;  %v1081_v4 = vld [vmem:[#allocation2 + $0x9] sm:$0xff]  ;;  %v392_v7 = vld [vmem:[%s8713_s12 + $0x100] sm:$0xff] }
  0x22   : > { %699 = vst.msk [vmem:[#allocation2 + $0xa0] sm:$0xff] %vm678_vm2, %v13328_v48  ;;  %v373_v9 = vld [vmem:[%s8713_s12 + $0x68] sm:$0xff]  ;;  %v374_v14 = vld [vmem:[%s8713_s12 + $0x70] sm:$0xff] }
  0x23   : > { %700 = vst.msk [vmem:[#allocation2 + $0xa8] sm:$0xff] %vm678_vm2, %v13328_v48  ;;  %v393_v10 = vld [vmem:[%s8713_s12 + $0x108] sm:$0xff]  ;;  %v394_v15 = vld [vmem:[%s8713_s12 + $0x110] sm:$0xff] }
  0x24   : > { %701 = vst.msk [vmem:[#allocation2 + $0xb0] sm:$0xff] %vm678_vm2, %v13328_v48 }
  0x25   : > { %8414 = vmatmul.msk.f32.gmra.mxu0 %vm404_vm1, %v362_v18  ;;  %8434 = vmatmul.msk.f32.gmra.mxu3 %vm404_vm1, %v382_v19  ;;  %702 = vst.msk [vmem:[#allocation2 + $0xb8] sm:$0xff] %vm678_vm2, %v13328_v48  ;;  %v375_v18 = vld [vmem:[%s8713_s12 + $0x78] sm:$0xff] }
  0x26   : > { %813 = vperm.xlu2 %8598, %v731_v20   ;;  %703 = vst.msk [vmem:[#allocation2 + $0xc0] sm:$0xff] %vm678_vm2, %v13328_v48  ;;  %v395_v19 = vld [vmem:[%s8713_s12 + $0x118] sm:$0xff] }
  0x27   : > { %808 = vperm.xlu1 %8597, %v730_v21   ;;  %803 = vperm.xlu0 %8596, %v729_v22   ;;  %704 = vst.msk [vmem:[#allocation2 + $0xc8] sm:$0xff] %vm678_vm2, %v13328_v48 }
  0x28   : > { %705 = vst.msk [vmem:[#allocation2 + $0xd0] sm:$0xff] %vm678_vm2, %v13328_v48 }
  0x29   : > { %706 = vst.msk [vmem:[#allocation2 + $0xd8] sm:$0xff] %vm678_vm2, %v13328_v48 }
  0x2a   : > { %707 = vst.msk [vmem:[#allocation2 + $0xe0] sm:$0xff] %vm678_vm2, %v13328_v48 }
  0x2b   : > { %708 = vst.msk [vmem:[#allocation2 + $0xe8] sm:$0xff] %vm678_vm2, %v13328_v48 }
  0x2c   : > { %709 = vst.msk [vmem:[#allocation2 + $0xf0] sm:$0xff] %vm678_vm2, %v13328_v48 }
  0x2d   : > { %8415 = vmatmul.msk.f32.gmra.mxu0 %vm404_vm1, %v363_v23  ;;  %8435 = vmatmul.msk.f32.gmra.mxu3 %vm404_vm1, %v383_v24  ;;  %710 = vst.msk [vmem:[#allocation2 + $0xf8] sm:$0xff] %vm678_vm2, %v13328_v48  ;;  %v376_v24 = vld [vmem:[%s8713_s12 + $0x80] sm:$0xff] }
  0x2e   : > { %828 = vperm.xlu2 %8598, %v734_v25   ;;  %711 = vst.msk [vmem:[#allocation2 + $0x100] sm:$0xff] %vm678_vm2, %v13328_v48  ;;  %v9036_v25 = vld [vmem:[%s13320_s3] ss:$0 sm:$0xff] }
  0x2f   : > { %823 = vperm.xlu1 %8597, %v733_v26   ;;  %818 = vperm.xlu0 %8596, %v732_v27   ;;  %712 = vst.msk [vmem:[#allocation2 + $0x108] sm:$0xff] %vm678_vm2, %v13328_v48 }
  0x30   : > { %713 = vst.msk [vmem:[#allocation2 + $0x110] sm:$0xff] %vm678_vm2, %v13328_v48 }
  0x31   : > { %714 = vst.msk [vmem:[#allocation2 + $0x118] sm:$0xff] %vm678_vm2, %v13328_v48 }
  0x32   : > { %715 = vst.msk [vmem:[#allocation2 + $0x120] sm:$0xff] %vm678_vm2, %v13328_v48 }
  0x33   : > { %716 = vst.msk [vmem:[#allocation2 + $0x128] sm:$0xff] %vm678_vm2, %v13328_v48 }
  0x34   : > { %717 = vst.msk [vmem:[#allocation2 + $0x130] sm:$0xff] %vm678_vm2, %v13328_v48 }
  0x35   : > { %8416 = vmatmul.msk.f32.gmra.mxu0 %vm404_vm1, %v364_v28  ;;  %8436 = vmatmul.msk.f32.gmra.mxu3 %vm404_vm1, %v384_v29  ;;  %718 = vst.msk [vmem:[#allocation2 + $0x138] sm:$0xff] %vm678_vm2, %v13328_v48 }
  0x36   : > { %843 = vperm.xlu2 %8598, %v737_v30   ;;  %719 = vst.msk [vmem:[#allocation2 + $0x140] sm:$0xff] %vm678_vm2, %v13328_v48 }
  0x37   : > { %838 = vperm.xlu1 %8597, %v736_v31   ;;  %833 = vperm.xlu0 %8596, %v735_v32   ;;  %3258 = vst.msk [vmem:[#allocation3] sm:$0xff] %vm678_vm2, %v13328_v48 }
  0x38   : > { %3259 = vst.msk [vmem:[#allocation3 + $0x8] sm:$0xff] %vm678_vm2, %v13328_v48 }
  0x39   : > { %3260 = vst.msk [vmem:[#allocation3 + $0x10] sm:$0xff] %vm678_vm2, %v13328_v48 }
  0x3a   : > { %3261 = vst.msk [vmem:[#allocation3 + $0x18] sm:$0xff] %vm678_vm2, %v13328_v48 }
  0x3b   : > { %3262 = vst.msk [vmem:[#allocation3 + $0x20] sm:$0xff] %vm678_vm2, %v13328_v48 }
  0x3c   : > { %3263 = vst.msk [vmem:[#allocation3 + $0x28] sm:$0xff] %vm678_vm2, %v13328_v48 }
  0x3d   : > { %8417 = vmatmul.msk.f32.gmra.mxu0 %vm404_vm1, %v365_v33  ;;  %8437 = vmatmul.msk.f32.gmra.mxu3 %vm404_vm1, %v385_v34  ;;  %3264 = vst.msk [vmem:[#allocation3 + $0x30] sm:$0xff] %vm678_vm2, %v13328_v48  ;;  %v377_v33 = vld [vmem:[%s8713_s12 + $0x88] sm:$0xff] }
  0x3e   : > { %858 = vperm.xlu2 %8598, %v740_v35   ;;  %3265 = vst.msk [vmem:[#allocation3 + $0x38] sm:$0xff] %vm678_vm2, %v13328_v48 }
  0x3f   : > { %853 = vperm.xlu1 %8597, %v739_v36   ;;  %848 = vperm.xlu0 %8596, %v738_v37   ;;  %3266 = vst.msk [vmem:[#allocation3 + $0x40] sm:$0xff] %vm678_vm2, %v13328_v48 }
  0x40   : > { %3267 = vst.msk [vmem:[#allocation3 + $0x48] sm:$0xff] %vm678_vm2, %v13328_v48 }
  0x41   : > { %3268 = vst.msk [vmem:[#allocation3 + $0x50] sm:$0xff] %vm678_vm2, %v13328_v48 }
  0x42   : > { %3269 = vst.msk [vmem:[#allocation3 + $0x58] sm:$0xff] %vm678_vm2, %v13328_v48 }
  0x43   : > { %3270 = vst.msk [vmem:[#allocation3 + $0x60] sm:$0xff] %vm678_vm2, %v13328_v48 }
  0x44   : > { %3271 = vst.msk [vmem:[#allocation3 + $0x68] sm:$0xff] %vm678_vm2, %v13328_v48 }
  0x45   : > { %8418 = vmatmul.msk.f32.gmra.mxu0 %vm404_vm1, %v366_v38  ;;  %8438 = vmatmul.msk.f32.gmra.mxu3 %vm404_vm1, %v386_v39  ;;  %3272 = vst.msk [vmem:[#allocation3 + $0x70] sm:$0xff] %vm678_vm2, %v13328_v48 }
  0x46   : > { %873 = vperm.xlu2 %8598, %v743_v40   ;;  %3273 = vst.msk [vmem:[#allocation3 + $0x78] sm:$0xff] %vm678_vm2, %v13328_v48 }
  0x47   : > { %868 = vperm.xlu1 %8597, %v742_v41   ;;  %863 = vperm.xlu0 %8596, %v741_v42   ;;  %3274 = vst.msk [vmem:[#allocation3 + $0x80] sm:$0xff] %vm678_vm2, %v13328_v48 }
  0x48   : > { %3275 = vst.msk [vmem:[#allocation3 + $0x88] sm:$0xff] %vm678_vm2, %v13328_v48 }
  0x49   : > { %3276 = vst.msk [vmem:[#allocation3 + $0x90] sm:$0xff] %vm678_vm2, %v13328_v48 }
  0x4a   : > { %3277 = vst.msk [vmem:[#allocation3 + $0x98] sm:$0xff] %vm678_vm2, %v13328_v48 }
  0x4b   : > { %3278 = vst.msk [vmem:[#allocation3 + $0xa0] sm:$0xff] %vm678_vm2, %v13328_v48 }
  0x4c   : > { %3279 = vst.msk [vmem:[#allocation3 + $0xa8] sm:$0xff] %vm678_vm2, %v13328_v48 }
  0x4d   : > { %8419 = vmatmul.msk.f32.gmra.mxu0 %vm404_vm1, %v367_v43  ;;  %8439 = vmatmul.msk.f32.gmra.mxu3 %vm404_vm1, %v387_v44  ;;  %3280 = vst.msk [vmem:[#allocation3 + $0xb0] sm:$0xff] %vm678_vm2, %v13328_v48 }
  0x4e   : > { %888 = vperm.xlu2 %8598, %v746_v45   ;;  %3281 = vst.msk [vmem:[#allocation3 + $0xb8] sm:$0xff] %vm678_vm2, %v13328_v48 }
  0x4f   : > { %883 = vperm.xlu1 %8597, %v745_v46   ;;  %878 = vperm.xlu0 %8596, %v744_v47   ;;  %3282 = vst.msk [vmem:[#allocation3 + $0xc0] sm:$0xff] %vm678_vm2, %v13328_v48  ;;  %v378_v46 = vld [vmem:[%s8713_s12 + $0x90] sm:$0xff] }
  0x50   : > { %3283 = vst.msk [vmem:[#allocation3 + $0xc8] sm:$0xff] %vm678_vm2, %v13328_v48 }
  0x51   : > { %3284 = vst.msk [vmem:[#allocation3 + $0xd0] sm:$0xff] %vm678_vm2, %v13328_v48 }
  0x52   : > { %3285 = vst.msk [vmem:[#allocation3 + $0xd8] sm:$0xff] %vm678_vm2, %v13328_v48 }
  0x53   : > { %3286 = vst.msk [vmem:[#allocation3 + $0xe0] sm:$0xff] %vm678_vm2, %v13328_v48 }
  0x54   : > { %3287 = vst.msk [vmem:[#allocation3 + $0xe8] sm:$0xff] %vm678_vm2, %v13328_v48 }
  0x55   : > { %8420 = vmatmul.msk.f32.gmra.mxu0 %vm404_vm1, %v368_v49  ;;  %8440 = vmatmul.msk.f32.gmra.mxu3 %vm404_vm1, %v388_v50  ;;  %3288 = vst.msk [vmem:[#allocation3 + $0xf0] sm:$0xff] %vm678_vm2, %v13328_v48 }
  0x56   : > { %903 = vperm.xlu2 %8598, %v749_v51   ;;  %3289 = vst.msk [vmem:[#allocation3 + $0xf8] sm:$0xff] %vm678_vm2, %v13328_v48 }
  0x57   : > { %898 = vperm.xlu1 %8597, %v748_v52   ;;  %893 = vperm.xlu0 %8596, %v747_v53   ;;  %3290 = vst.msk [vmem:[#allocation3 + $0x100] sm:$0xff] %vm678_vm2, %v13328_v48 }
  0x58   : > { %3291 = vst.msk [vmem:[#allocation3 + $0x108] sm:$0xff] %vm678_vm2, %v13328_v48 }
  0x59   : > { %3292 = vst.msk [vmem:[#allocation3 + $0x110] sm:$0xff] %vm678_vm2, %v13328_v48 }
  0x5a   : > { %3293 = vst.msk [vmem:[#allocation3 + $0x118] sm:$0xff] %vm678_vm2, %v13328_v48 }
  0x5b   : > { %3294 = vst.msk [vmem:[#allocation3 + $0x120] sm:$0xff] %vm678_vm2, %v13328_v48 }
  0x5c   : > { %3295 = vst.msk [vmem:[#allocation3 + $0x128] sm:$0xff] %vm678_vm2, %v13328_v48 }
  0x5d   : > { %8421 = vmatmul.msk.f32.gmra.mxu0 %vm404_vm1, %v369_v54  ;;  %8441 = vmatmul.msk.f32.gmra.mxu3 %vm404_vm1, %v389_v55  ;;  %3296 = vst.msk [vmem:[#allocation3 + $0x130] sm:$0xff] %vm678_vm2, %v13328_v48  ;;  %v379_v54 = vld [vmem:[%s8713_s12 + $0x98] sm:$0xff] }
  0x5e   : > { %918 = vperm.xlu2 %8598, %v752_v56   ;;  %3297 = vst.msk [vmem:[#allocation3 + $0x138] sm:$0xff] %vm678_vm2, %v13328_v48 }
  0x5f   : > { %913 = vperm.xlu1 %8597, %v751_v57   ;;  %908 = vperm.xlu0 %8596, %v750_v58   ;;  %3298 = vst.msk [vmem:[#allocation3 + $0x140] sm:$0xff] %vm678_vm2, %v13328_v48 }
  0x65   : > { %8422 = vmatmul.msk.f32.gmra.mxu0 %vm404_vm1, %v370_v59  ;;  %8442 = vmatmul.msk.f32.gmra.mxu3 %vm404_vm1, %v390_v60 }
  0x66   : > { %933 = vperm.xlu2 %8598, %v755_v61  }
  0x67   : > { %928 = vperm.xlu1 %8597, %v754_v62   ;;  %923 = vperm.xlu0 %8596, %v753_v63  }
  0x68   : > { %v8904_v0 = vpop.permute.xlu2 %778 }
  0x6d   : > { %8423 = vmatmul.msk.f32.gmra.mxu0 %vm404_vm1, %v371_v1  ;;  %8443 = vmatmul.msk.f32.gmra.mxu3 %vm404_vm1, %v391_v2 }
  0x6f   : > { %1152 = vrot.lane.b32.xlu0 %v1080_v3, %s8618_s17  ;;  %1154 = vrot.lane.b32.xlu1 %v1081_v4, %s8618_s17 }
  0x70   : > { %v8928_v5 = vpop.permute.xlu2 %783 }
  0x75   : > { %8424 = vmatmul.msk.f32.gmra.mxu0 %vm404_vm1, %v372_v6  ;;  %8444 = vmatmul.msk.f32.gmra.mxu3 %vm404_vm1, %v392_v7 }
  0x78   : > { %v8950_v8 = vpop.permute.xlu2 %798 }
  0x7d   : > { %8425 = vmatmul.msk.f32.gmra.mxu0 %vm404_vm1, %v373_v9  ;;  %8445 = vmatmul.msk.f32.gmra.mxu3 %vm404_vm1, %v393_v10 }
  0x80   : > { %v8974_v11 = vpop.permute.xlu2 %813 }
  0x81   : > { %v8978_v12 = vpop.permute.xlu1 %768  ;;  %v759_v13 = vpop.permute.xlu0 %758 }
  0x85   : > { %8426 = vmatmul.msk.f32.gmra.mxu0 %vm404_vm1, %v374_v14  ;;  %8446 = vmatmul.msk.f32.gmra.mxu3 %vm404_vm1, %v394_v15 }
  0x88   : > { %v9008_v20 = vpop.permute.xlu2 %828 }
  0x89   : > { %v9000_v16 = vpop.permute.xlu1 %773  ;;  %v764_v17 = vpop.permute.xlu0 %763 }
  0x8d   : > { %8427 = vmatmul.msk.f32.gmra.mxu0 %vm404_vm1, %v375_v18  ;;  %8447 = vmatmul.msk.f32.gmra.mxu3 %vm404_vm1, %v395_v19 }
  0x90   : > { %v9042_v26 = vpop.permute.xlu2 %843 }
  0x91   : > { %v9024_v21 = vpop.permute.xlu1 %793  ;;  %v9026_v22 = vpop.permute.xlu0 %788 }
  0x92   : > { %v534_v23 = vpop.f32.mrf.mxu0 }
  0x93   : > { %v535_v27 = vadd.f32 %v9036_v25, %v534_v23 }
  0x95   : > { %8428 = vmatmul.msk.f32.gmra.mxu0 %vm404_vm1, %v376_v24  ;;  %v642_v34 = vmax.f32 %v535_v27, 0.0 }
  0x97   : > { %v936_v38 = vmul.f32 %v759_v13, %v642_v34 }
  0x98   : > { %v594_v28 = vpop.f32.mrf.mxu3  ;;  %v859_v39 = vpop.permute.xlu2 %858 }
  0x99   : > { %v595_v29 = vadd.f32 %v9036_v25, %v594_v28  ;;  %v9055_v30 = vpop.permute.xlu1 %808  ;;  %v9057_v31 = vpop.permute.xlu0 %803  ;;  %972 = vst.msk [vmem:[#allocation2 + $0x13] sm:$0xff] %vm678_vm2, %v936_v38  ;;  %v2427_v38 = vld [vmem:[%s13321_s4 + $0x70] sm:$0xff] }
  0x9a   : > { %v537_v32 = vpop.f32.mrf.mxu0 }
  0x9b   : > { %v538_v35 = vadd.f32 %v9036_v25, %v537_v32  ;;  %v662_v36 = vmax.f32 %v595_v29, 0.0 }
  0x9d   : > { %v643_v37 = vmax.f32 %v538_v35, 0.0  ;;  %8429 = vmatmul.msk.f32.gmra.mxu0 %vm404_vm1, %v377_v33  ;;  %v956_v40 = vmul.f32 %v859_v39, %v662_v36 }
  0x9f   : > { %v937_v42 = vmul.f32 %v764_v17, %v643_v37  ;;  %992 = vst.msk [vmem:[#allocation2 + $0xb3] sm:$0xff] %vm678_vm2, %v956_v40  ;;  %v2428_v37 = vld [vmem:[%s13321_s4 + $0x78] sm:$0xff] }
  0xa0   : > { %v597_v41 = vpop.f32.mrf.mxu3  ;;  %v1369_v55 = vld [vmem:[#allocation2 + $0x12] sm:$0xff]  ;;  %v874_v23 = vpop.permute.xlu2 %873  ;;  %2597 = vmatpush.msra.mxu1 %v2428_v37  ;;  %8562 = vmatpush.msra.mxu2 %v2428_v37 }
  0xa1   : > { %v9078_v43 = vpop.permute.xlu1 %823  ;;  %v9080_v44 = vpop.permute.xlu0 %818  ;;  %973 = vst.msk [vmem:[#allocation2 + $0x1b] sm:$0xff] %vm678_vm2, %v937_v42  ;;  %v1082_v56 = vld [vmem:[#allocation2 + $0x11] sm:$0xff]  ;;  %1441 = vrot.lane.b32.xlu0 %v1369_v55, %s8618_s17  ;;  %v598_v19 = vadd.f32 %v9036_v25, %v597_v41 }
  0xa2   : > { %v540_v45 = vpop.f32.mrf.mxu0  ;;  %v1010_v58 = vld [vmem:[#allocation2 + $0x10] sm:$0xff]  ;;  %1156 = vrot.lane.b32.xlu2 %v1082_v56, %s8618_s17  ;;  %1335 = vst.msk [vmem:[#allocation5 + $0x58] sm:$0xff] %vm678_vm2, %v1369_v55  ;;  %2598 = vmatpush.msra.mxu1 %v2427_v38 }
  0xa3   : > { %v541_v47 = vadd.f32 %v9036_v25, %v540_v45  ;;  %1046 = vst.msk [vmem:[#allocation5 + $0x50] sm:$0xff] %vm678_vm2, %v1010_v58  ;;  %v1585_v60 = vld [vmem:[#allocation2 + $0x13] sm:$0xff]  ;;  %v663_v32 = vmax.f32 %v598_v19, 0.0  ;;  %8563 = vmatpush.msra.mxu2 %v2427_v38  ;;  %v2422_v19 = vld [vmem:[%s13321_s4 + $0x48] sm:$0xff] }
  0xa4   : > { %1621 = vst.msk [vmem:[#allocation5 + $0x10] sm:$0xff] %vm678_vm2, %v1585_v60  ;;  %v2419_v38 = vld [vmem:[%s13321_s4 + $0x30] sm:$0xff] }
  0xa5   : > { %v644_v49 = vmax.f32 %v541_v47, 0.0  ;;  %8430 = vmatmul.msk.f32.gmra.mxu0 %vm404_vm1, %v378_v46 }
  0xa7   : > { %v938_v50 = vmul.f32 %v8978_v12, %v644_v49 }
  0xa8   : > { %v600_v51 = vpop.f32.mrf.mxu3  ;;  %v1370_v61 = vld [vmem:[#allocation2 + $0x1a] sm:$0xff] }
  0xa9   : > { %974 = vst.msk [vmem:[#allocation2 + $0x23] sm:$0xff] %vm678_vm2, %v938_v50  ;;  %v9092_v52 = vpop.permute.xlu1 %838  ;;  %v9094_v53 = vpop.permute.xlu0 %833  ;;  %1443 = vrot.lane.b32.xlu1 %v1370_v61, %s8618_s17  ;;  %v1011_v63 = vld [vmem:[#allocation2 + $0x18] sm:$0xff]  ;;  %v601_v14 = vadd.f32 %v9036_v25, %v600_v51 }
  0xaa   : > { %v543_v57 = vpop.f32.mrf.mxu0  ;;  %v1586_v1 = vld [vmem:[#allocation2 + $0x1b] sm:$0xff]  ;;  %1047 = vst.msk [vmem:[#allocation5 + $0x78] sm:$0xff] %vm678_vm2, %v1011_v63 }
  0xab   : > { %v544_v59 = vadd.f32 %v9036_v25, %v543_v57  ;;  %1622 = vst.msk [vmem:[#allocation5 + $0x38] sm:$0xff] %vm678_vm2, %v1586_v1  ;;  %v1083_v3 = vld [vmem:[#allocation2 + $0x19] sm:$0xff]  ;;  %v664_v28 = vmax.f32 %v601_v14, 0.0 }
  0xac   : > { %1336 = vst.msk [vmem:[#allocation5 + $0x80] sm:$0xff] %vm678_vm2, %v1370_v61  ;;  %1158 = vrot.lane.b32.xlu0 %v1083_v3, %s8618_s17  ;;  %v1657_v40 = vld [vmem:[#allocation2 + $0x14] sm:$0xff] }
  0xad   : > { %v645_v62 = vmax.f32 %v544_v59, 0.0  ;;  %8431 = vmatmul.msk.f32.gmra.mxu0 %vm404_vm1, %v379_v54  ;;  %v2426_v54 = vld [vmem:[%s13321_s4 + $0x68] sm:$0xff]  ;;  %v2424_v61 = vld [vmem:[%s13321_s4 + $0x58] sm:$0xff]  ;;  %v2423_v3 = vld [vmem:[%s13321_s4 + $0x50] sm:$0xff] }
  0xae   : > { %2599 = vmatpush.msra.mxu1 %v2426_v54  ;;  %8564 = vmatpush.msra.mxu2 %v2426_v54 }
  0xaf   : > { %v939_v2 = vmul.f32 %v9000_v16, %v645_v62 }
  0xb0   : > { %v603_v4 = vpop.f32.mrf.mxu3  ;;  %v9115_v10 = vld [vmem:[#allocation2 + $0x22] sm:$0xff] }
  0xb1   : > { %975 = vst.msk [vmem:[#allocation2 + $0x2b] sm:$0xff] %vm678_vm2, %v939_v2  ;;  %v604_v6 = vadd.f32 %v9036_v25, %v603_v4  ;;  %v9111_v7 = vpop.permute.xlu1 %853  ;;  %v9113_v9 = vpop.permute.xlu0 %848  ;;  %v1012_v12 = vld [vmem:[#allocation2 + $0x20] sm:$0xff] }
  0xb2   : > { %v1587_v13 = vld [vmem:[#allocation2 + $0x23] sm:$0xff]  ;;  %v546_v16 = vpop.f32.mrf.mxu0  ;;  %1048 = vst.msk [vmem:[#allocation5 + $0xa0] sm:$0xff] %vm678_vm2, %v1012_v12 }
  0xb3   : > { %v1084_v15 = vld [vmem:[#allocation2 + $0x21] sm:$0xff]  ;;  %v665_v17 = vmax.f32 %v604_v6, 0.0  ;;  %v547_v18 = vadd.f32 %v9036_v25, %v546_v16  ;;  %1623 = vst.msk [vmem:[#allocation5 + $0x60] sm:$0xff] %vm678_vm2, %v1587_v13 }
  0xb4   : > { %1337 = vst.msk [vmem:[#allocation5 + $0xa8] sm:$0xff] %vm678_vm2, %v9115_v10  ;;  %1160 = vrot.lane.b32.xlu1 %v1084_v15, %s8618_s17  ;;  %1729 = vrot.lane.b32.xlu0 %v1657_v40, %s8618_s17  ;;  %v1658_v47 = vld [vmem:[#allocation2 + $0x1c] sm:$0xff]  ;;  %v889_v40 = vpop.permute.xlu2 %888 }
  0xb5   : > { %v959_v24 = vmul.f32 %v874_v23, %v665_v17  ;;  %v646_v27 = vmax.f32 %v547_v18, 0.0 }
  0xb7   : > { %995 = vst.msk [vmem:[#allocation2 + $0xcb] sm:$0xff] %vm678_vm2, %v959_v24  ;;  %v940_v29 = vmul.f32 %v8904_v0, %v646_v27 }
  0xb8   : > { %v606_v33 = vpop.f32.mrf.mxu3  ;;  %v9128_v34 = vld [vmem:[#allocation2 + $0x2a] sm:$0xff] }
  0xb9   : > { %976 = vst.msk [vmem:[#allocation2 + $0x33] sm:$0xff] %vm678_vm2, %v940_v29  ;;  %v869_v35 = vpop.permute.xlu1 %868  ;;  %v864_v36 = vpop.permute.xlu0 %863  ;;  %v1013_v39 = vld [vmem:[#allocation2 + $0x28] sm:$0xff]  ;;  %v607_v0 = vadd.f32 %v9036_v25, %v606_v33  ;;  %v2420_v29 = vld [vmem:[%s13321_s4 + $0x38] sm:$0xff] }
  0xba   : > { %v958_v41 = vmul.f32 %v869_v35, %v664_v28  ;;  %v957_v42 = vmul.f32 %v864_v36, %v663_v32  ;;  %v549_v45 = vpop.f32.mrf.mxu0  ;;  %1049 = vst.msk [vmem:[#allocation5 + $0xc8] sm:$0xff] %vm678_vm2, %v1013_v39 }
  0xbb   : > { %v550_v46 = vadd.f32 %v9036_v25, %v549_v45  ;;  %1338 = vst.msk [vmem:[#allocation5 + $0xd0] sm:$0xff] %vm678_vm2, %v9128_v34  ;;  %v666_v50 = vmax.f32 %v607_v0, 0.0 }
  0xbc   : > { %994 = vst.msk [vmem:[#allocation2 + $0xc3] sm:$0xff] %vm678_vm2, %v958_v41  ;;  %1731 = vrot.lane.b32.xlu1 %v1658_v47, %s8618_s17 }
  0xbd   : > { %993 = vst.msk [vmem:[#allocation2 + $0xbb] sm:$0xff] %vm678_vm2, %v957_v42  ;;  %v647_v49 = vmax.f32 %v550_v46, 0.0 }
  0xbf   : > { %v941_v51 = vmul.f32 %v8928_v5, %v647_v49  ;;  %v2425_v5 = vld [vmem:[%s13321_s4 + $0x60] sm:$0xff]  ;;  %v2418_v49 = vld [vmem:[%s13321_s4 + $0x28] sm:$0xff] }
  0xc0   : > { %v609_v55 = vpop.f32.mrf.mxu3  ;;  %v9150_v56 = vld [vmem:[#allocation2 + $0x32] sm:$0xff]  ;;  %2600 = vmatpush.msra.mxu1 %v2425_v5  ;;  %8565 = vmatpush.msra.mxu2 %v2425_v5 }
  0xc1   : > { %v1014_v57 = vld [vmem:[#allocation2 + $0x30] sm:$0xff]  ;;  %977 = vst.msk [vmem:[#allocation2 + $0x3b] sm:$0xff] %vm678_vm2, %v941_v51  ;;  %v610_v58 = vadd.f32 %v9036_v25, %v609_v55  ;;  %v884_v59 = vpop.permute.xlu1 %883  ;;  %v879_v60 = vpop.permute.xlu0 %878 }
  0xc2   : > { %v960_v62 = vmul.f32 %v879_v60, %v666_v50  ;;  %v552_v63 = vpop.f32.mrf.mxu0  ;;  %1050 = vst.msk [vmem:[#allocation5 + $0xf0] sm:$0xff] %vm678_vm2, %v1014_v57  ;;  %2601 = vmatpush.msra.mxu1 %v2424_v61  ;;  %8566 = vmatpush.msra.mxu2 %v2424_v61 }
  0xc3   : > { %v667_v1 = vmax.f32 %v610_v58, 0.0  ;;  %v553_v2 = vadd.f32 %v9036_v25, %v552_v63  ;;  %v1033_v4 = vld [vmem:[#allocation2 + $0xc8] sm:$0xff]  ;;  %1339 = vst.msk [vmem:[#allocation5 + $0xf8] sm:$0xff] %vm678_vm2, %v9150_v56  ;;  %v1008_v58 = vld [vmem:[#allocation2] sm:$0xff]  ;;  %v2415_v63 = vld [vmem:[%s13321_s4 + $0x10] sm:$0xff] }
  0xc4   : > { %996 = vst.msk [vmem:[#allocation2 + $0xd3] sm:$0xff] %vm678_vm2, %v960_v62  ;;  %v1391_v6 = vld [vmem:[#allocation2 + $0xc2] sm:$0xff]  ;;  %v1390_v12 = vld [vmem:[#allocation2 + $0xba] sm:$0xff]  ;;  %2602 = vmatpush.msra.mxu1 %v2423_v3  ;;  %8567 = vmatpush.msra.mxu2 %v2423_v3  ;;  %v9189_v33 = vld [vmem:[#allocation2 + $0xca] sm:$0xff] }
  0xc5   : > { %v1103_v13 = vld [vmem:[#allocation2 + $0xb9] sm:$0xff]  ;;  %v961_v14 = vmul.f32 %v884_v59, %v667_v1  ;;  %v648_v15 = vmax.f32 %v553_v2, 0.0  ;;  %1485 = vrot.lane.b32.xlu1 %v1391_v6, %s8618_s17  ;;  %1483 = vrot.lane.b32.xlu0 %v1390_v12, %s8618_s17  ;;  %1069 = vst.msk [vmem:[#allocation5 + $0x3e8] sm:$0xff] %vm678_vm2, %v1033_v4  ;;  %v1105_v0 = vld [vmem:[#allocation2 + $0xc9] sm:$0xff]  ;;  %v1104_v41 = vld [vmem:[#allocation2 + $0xc1] sm:$0xff] }
  0xc6   : > { %v1031_v16 = vld [vmem:[#allocation2 + $0xb8] sm:$0xff]  ;;  %v1032_v17 = vld [vmem:[#allocation2 + $0xc0] sm:$0xff]  ;;  %1198 = vrot.lane.b32.xlu2 %v1103_v13, %s8618_s17  ;;  %2603 = vmatpush.msra.mxu1 %v2422_v19  ;;  %1356 = vst.msk [vmem:[#allocation5 + $0x3a0] sm:$0xff] %vm678_vm2, %v1390_v12  ;;  %v1085_v4 = vld [vmem:[#allocation2 + $0x29] sm:$0xff] }
  0xc7   : > { %1067 = vst.msk [vmem:[#allocation5 + $0x398] sm:$0xff] %vm678_vm2, %v1031_v16  ;;  %v942_v18 = vmul.f32 %v9026_v22, %v648_v15  ;;  %v2421_v22 = vld [vmem:[%s13321_s4 + $0x40] sm:$0xff]  ;;  %8568 = vmatpush.msra.mxu2 %v2422_v19  ;;  %v2416_v59 = vld [vmem:[%s13321_s4 + $0x18] sm:$0xff] }
  0xc8   : > { %997 = vst.msk [vmem:[#allocation2 + $0xdb] sm:$0xff] %vm678_vm2, %v961_v14  ;;  %v612_v23 = vpop.f32.mrf.mxu3  ;;  %2604 = vmatpush.msra.mxu1 %v2421_v22  ;;  %v1015_v35 = vld [vmem:[#allocation2 + $0x38] sm:$0xff] }
  0xc9   : > { %1068 = vst.msk [vmem:[#allocation5 + $0x3c0] sm:$0xff] %vm678_vm2, %v1032_v17  ;;  %v613_v24 = vadd.f32 %v9036_v25, %v612_v23  ;;  %v9181_v27 = vpop.permute.xlu1 %898  ;;  %v894_v28 = vpop.permute.xlu0 %893  ;;  %8569 = vmatpush.msra.mxu2 %v2421_v22  ;;  %v9226_v5 = vld [vmem:[#allocation2 + $0x3a] sm:$0xff]  ;;  %v1009_v17 = vld [vmem:[#allocation2 + $0x8] sm:$0xff] }
  0xca   : > { %978 = vst.msk [vmem:[#allocation2 + $0x43] sm:$0xff] %vm678_vm2, %v942_v18  ;;  %v555_v32 = vpop.f32.mrf.mxu0  ;;  %2605 = vmatpush.msra.mxu1 %v2420_v29 }
  0xcb   : > { %v668_v36 = vmax.f32 %v613_v24, 0.0  ;;  %v556_v37 = vadd.f32 %v9036_v25, %v555_v32  ;;  %v1034_v39 = vld [vmem:[#allocation2 + $0xd0] sm:$0xff]  ;;  %1051 = vst.msk [vmem:[#allocation5 + $0x118] sm:$0xff] %vm678_vm2, %v1015_v35  ;;  %8570 = vmatpush.msra.mxu2 %v2420_v29  ;;  %v1087_v29 = vld [vmem:[#allocation2 + $0x39] sm:$0xff] }
  0xcc   : > { %1070 = vst.msk [vmem:[#allocation5 + $0x410] sm:$0xff] %vm678_vm2, %v1034_v39  ;;  %2606 = vmatpush.msra.mxu1 %v2419_v38  ;;  %v9210_v51 = vld [vmem:[#allocation2 + $0xd2] sm:$0xff] }
  0xcd   : > { %v962_v42 = vmul.f32 %v889_v40, %v668_v36  ;;  %v649_v45 = vmax.f32 %v556_v37, 0.0  ;;  %1202 = vrot.lane.b32.xlu1 %v1105_v0, %s8618_s17  ;;  %1200 = vrot.lane.b32.xlu0 %v1104_v41, %s8618_s17  ;;  %1358 = vst.msk [vmem:[#allocation5 + $0x3f0] sm:$0xff] %vm678_vm2, %v9189_v33  ;;  %v1086_v32 = vld [vmem:[#allocation2 + $0x31] sm:$0xff]  ;;  %v1659_v37 = vld [vmem:[#allocation2 + $0x24] sm:$0xff] }
  0xce   : > { %1445 = vrot.lane.b32.xlu2 %v9115_v10, %s8618_s17  ;;  %1357 = vst.msk [vmem:[#allocation5 + $0x3c8] sm:$0xff] %vm678_vm2, %v1391_v6  ;;  %2607 = vmatpush.msra.mxu1 %v2418_v49 }
  0xcf   : > { %v1035_v46 = vld [vmem:[#allocation2 + $0xd8] sm:$0xff]  ;;  %998 = vst.msk [vmem:[#allocation2 + $0xe3] sm:$0xff] %vm678_vm2, %v962_v42  ;;  %v943_v47 = vmul.f32 %v9024_v21, %v649_v45  ;;  %v2417_v21 = vld [vmem:[%s13321_s4 + $0x20] sm:$0xff]  ;;  %8571 = vmatpush.msra.mxu2 %v2419_v38 }
  0xd0   : > { %v615_v50 = vpop.f32.mrf.mxu3  ;;  %1071 = vst.msk [vmem:[#allocation5 + $0x438] sm:$0xff] %vm678_vm2, %v1035_v46  ;;  %2608 = vmatpush.msra.mxu1 %v2417_v21  ;;  %v1394_v23 = vld [vmem:[#allocation2 + $0xda] sm:$0xff] }
  0xd1   : > { %v1016_v54 = vld [vmem:[#allocation2 + $0x40] sm:$0xff]  ;;  %979 = vst.msk [vmem:[#allocation2 + $0x4b] sm:$0xff] %vm678_vm2, %v943_v47  ;;  %v616_v10 = vadd.f32 %v9036_v25, %v615_v50  ;;  %v9215_v55 = vpop.permute.xlu1 %913  ;;  %v9217_v57 = vpop.permute.xlu0 %908  ;;  %8572 = vmatpush.msra.mxu2 %v2418_v49 }
  0xd2   : > { %v558_v60 = vpop.f32.mrf.mxu0  ;;  %1044 = vst.msk [vmem:[#allocation5] sm:$0xff] %vm678_vm2, %v1008_v58  ;;  %v9232_v1 = vld [vmem:[#allocation2 + $0x42] sm:$0xff]  ;;  %2609 = vmatpush.msra.mxu1 %v2416_v59  ;;  %v904_v50 = vpop.permute.xlu2 %903 }
  0xd3   : > { %v669_v61 = vmax.f32 %v616_v10, 0.0  ;;  %v559_v62 = vadd.f32 %v9036_v25, %v558_v60  ;;  %1052 = vst.msk [vmem:[#allocation5 + $0x140] sm:$0xff] %vm678_vm2, %v1016_v54  ;;  %8573 = vmatpush.msra.mxu2 %v2417_v21 }
  0xd4   : > { %1359 = vst.msk [vmem:[#allocation5 + $0x418] sm:$0xff] %vm678_vm2, %v9210_v51  ;;  %2610 = vmatpush.msra.mxu1 %v2415_v63 }
  0xd5   : > { %v963_v2 = vmul.f32 %v894_v28, %v669_v61  ;;  %v650_v3 = vmax.f32 %v559_v62, 0.0  ;;  %1449 = vrot.lane.b32.xlu1 %v9150_v56, %s8618_s17  ;;  %1447 = vrot.lane.b32.xlu0 %v9128_v34, %s8618_s17  ;;  %1340 = vst.msk [vmem:[#allocation5 + $0x120] sm:$0xff] %vm678_vm2, %v9226_v5  ;;  %v2414_v56 = vld [vmem:[%s13321_s4 + $0x8] sm:$0xff] }
  0xd6   : > { %1162 = vrot.lane.b32.xlu2 %v1085_v4, %s8618_s17  ;;  %v1036_v6 = vld [vmem:[#allocation2 + $0xe0] sm:$0xff]  ;;  %1341 = vst.msk [vmem:[#allocation5 + $0x148] sm:$0xff] %vm678_vm2, %v9232_v1  ;;  %2611 = vmatpush.msra.mxu1 %v2414_v56 }
  0xd7   : > { %999 = vst.msk [vmem:[#allocation2 + $0xeb] sm:$0xff] %vm678_vm2, %v963_v2  ;;  %v944_v12 = vmul.f32 %v8950_v8, %v650_v3  ;;  %v2413_v8 = vld [vmem:[%s13321_s4] sm:$0xff]  ;;  %8574 = vmatpush.msra.mxu2 %v2416_v59  ;;  %v1589_v2 = vld [vmem:[#allocation2 + $0x33] sm:$0xff] }
  0xd8   : > { %v618_v34 = vpop.f32.mrf.mxu3  ;;  %1072 = vst.msk [vmem:[#allocation5 + $0x460] sm:$0xff] %vm678_vm2, %v1036_v6  ;;  %v1017_v13 = vld [vmem:[#allocation2 + $0x48] sm:$0xff]  ;;  %2612 = vmatpush.msra.mxu1 %v2413_v8  ;;  %v1590_v4 = vld [vmem:[#allocation2 + $0x3b] sm:$0xff] }
  0xd9   : > { %980 = vst.msk [vmem:[#allocation2 + $0x53] sm:$0xff] %vm678_vm2, %v944_v12  ;;  %v619_v14 = vadd.f32 %v9036_v25, %v618_v34  ;;  %v9254_v15 = vpop.permute.xlu1 %928  ;;  %v9256_v16 = vpop.permute.xlu0 %923  ;;  %v9261_v18 = vld [vmem:[#allocation2 + $0xe2] sm:$0xff]  ;;  %v9265_v22 = vld [vmem:[#allocation2 + $0x4a] sm:$0xff]  ;;  %8575 = vmatpush.msra.mxu2 %v2415_v63  ;;  %v1107_v12 = vld [vmem:[#allocation2 + $0xd9] sm:$0xff] }
  0xda   : > { %v561_v19 = vpop.f32.mrf.mxu0  ;;  %1045 = vst.msk [vmem:[#allocation5 + $0x28] sm:$0xff] %vm678_vm2, %v1009_v17  ;;  %v1108_v6 = vld [vmem:[#allocation2 + $0xe1] sm:$0xff] }
  0xdb   : > { %v670_v24 = vmax.f32 %v619_v14, 0.0  ;;  %v562_v28 = vadd.f32 %v9036_v25, %v561_v19  ;;  %1053 = vst.msk [vmem:[#allocation5 + $0x168] sm:$0xff] %vm678_vm2, %v1017_v13  ;;  %8576 = vmatpush.msra.mxu2 %v2414_v56  ;;  %v1106_v13 = vld [vmem:[#allocation2 + $0xd1] sm:$0xff] }
  0xdc   : > { %1361 = vst.msk [vmem:[#allocation5 + $0x468] sm:$0xff] %vm678_vm2, %v9261_v18 }
  0xdd   : > { %v964_v35 = vmul.f32 %v9181_v27, %v670_v24  ;;  %v651_v36 = vmax.f32 %v562_v28, 0.0  ;;  %1166 = vrot.lane.b32.xlu1 %v1087_v29, %s8618_s17  ;;  %1164 = vrot.lane.b32.xlu0 %v1086_v32, %s8618_s17  ;;  %1360 = vst.msk [vmem:[#allocation5 + $0x440] sm:$0xff] %vm678_vm2, %v1394_v23  ;;  %v2460_v28 = vld [vmem:[%s13321_s4 + $0x178] sm:$0xff] }
  0xde   : > { %1733 = vrot.lane.b32.xlu2 %v1659_v37, %s8618_s17  ;;  %v1037_v38 = vld [vmem:[#allocation2 + $0xe8] sm:$0xff]  ;;  %1342 = vst.msk [vmem:[#allocation5 + $0x170] sm:$0xff] %vm678_vm2, %v9265_v22  ;;  %8577 = vmatpush.msra.mxu2 %v2413_v8 }
  0xdf   : > { %1000 = vst.msk [vmem:[#allocation2 + $0xf3] sm:$0xff] %vm678_vm2, %v964_v35  ;;  %v945_v39 = vmul.f32 %v9057_v31, %v651_v36  ;;  %v9283_v46 = vld [vmem:[#allocation2 + $0xea] sm:$0xff]  ;;  %2847 = vmatpush.msrb.mxu3 %v2460_v28  ;;  %v919_v36 = vpop.permute.xlu2 %918 }
  0xe0   : > { %v621_v27 = vpop.f32.mrf.mxu3  ;;  %1073 = vst.msk [vmem:[#allocation5 + $0x488] sm:$0xff] %vm678_vm2, %v1037_v38  ;;  %v1018_v42 = vld [vmem:[#allocation2 + $0x50] sm:$0xff] }
  0xe1   : > { %981 = vst.msk [vmem:[#allocation2 + $0x5b] sm:$0xff] %vm678_vm2, %v945_v39  ;;  %v622_v40 = vadd.f32 %v9036_v25, %v621_v27  ;;  %v1153_v0 = vpop.permute.xlu0 %1152  ;;  %v1155_v41 = vpop.permute.xlu1 %1154  ;;  %v9287_v49 = vld [vmem:[#allocation2 + $0x52] sm:$0xff]  ;;  %v2161_v39 = vld [vmem:[#allocation2 + $0x26] sm:$0xff] }
  0xe2   : > { %v564_v45 = vpop.f32.mrf.mxu0  ;;  %1261 = vst.msk [vmem:[#allocation5] sm:$0xff] %vm1260_vm3, %v1153_v0  ;;  %v1588_v35 = vld [vmem:[#allocation2 + $0x2b] sm:$0xff] }
  0xe3   : > { %v671_v47 = vmax.f32 %v622_v40, 0.0  ;;  %v565_v31 = vadd.f32 %v9036_v25, %v564_v45  ;;  %1262 = vst.msk [vmem:[#allocation5 + $0x28] sm:$0xff] %vm1260_vm3, %v1155_v41  ;;  %v1297_v45 = vld [vmem:[#allocation2 + $0x2] sm:$0xff] }
  0xe4   : > { %1054 = vst.msk [vmem:[#allocation5 + $0x190] sm:$0xff] %vm678_vm2, %v1018_v42 }
  0xe5   : > { %v965_v54 = vmul.f32 %v904_v50, %v671_v47  ;;  %v652_v10 = vmax.f32 %v565_v31, 0.0  ;;  %1491 = vrot.lane.b32.xlu1 %v1394_v23, %s8618_s17  ;;  %1489 = vrot.lane.b32.xlu0 %v9210_v51, %s8618_s17  ;;  %1362 = vst.msk [vmem:[#allocation5 + $0x490] sm:$0xff] %vm678_vm2, %v9283_v46 }
  0xe6   : > { %1487 = vrot.lane.b32.xlu2 %v9189_v33, %s8618_s17  ;;  %v1038_v21 = vld [vmem:[#allocation2 + $0xf0] sm:$0xff]  ;;  %1343 = vst.msk [vmem:[#allocation5 + $0x198] sm:$0xff] %vm678_vm2, %v9287_v49 }
  0xe7   : > { %1001 = vst.msk [vmem:[#allocation2 + $0xfb] sm:$0xff] %vm678_vm2, %v965_v54  ;;  %v946_v58 = vmul.f32 %v9055_v30, %v652_v10  ;;  %v9306_v33 = vld [vmem:[#allocation2 + $0xf2] sm:$0xff] }
  0xe8   : > { %v624_v59 = vpop.f32.mrf.mxu3  ;;  %v9301_v60 = vld [vmem:[#allocation2 + $0x5a] sm:$0xff]  ;;  %1074 = vst.msk [vmem:[#allocation5 + $0x4b0] sm:$0xff] %vm678_vm2, %v1038_v21  ;;  %v2162_v10 = vld [vmem:[#allocation2 + $0x2e] sm:$0xff] }
  0xe9   : > { %v1019_v61 = vld [vmem:[#allocation2 + $0x58] sm:$0xff]  ;;  %982 = vst.msk [vmem:[#allocation2 + $0x63] sm:$0xff] %vm678_vm2, %v946_v58  ;;  %v625_v51 = vadd.f32 %v9036_v25, %v624_v59  ;;  %v1089_v58 = vld [vmem:[#allocation2 + $0x49] sm:$0xff]  ;;  %v9370_v59 = vpop.permute.xlu2 %933 }
  0xea   : > { %v2233_v62 = vld [vmem:[#allocation5] sm:$0xff]  ;;  %v567_v63 = vpop.f32.mrf.mxu0  ;;  %1055 = vst.msk [vmem:[#allocation5 + $0x1b8] sm:$0xff] %vm678_vm2, %v1019_v61  ;;  %v2238_v17 = vld [vmem:[#allocation5 + $0x28] sm:$0xff] }
  0xeb   : > { %2613 = vmatmul.f32.vlgmr.msra.gmra.mxu1 %v2233_v62  ;;  %v672_v3 = vmax.f32 %v625_v51, 0.0  ;;  %v568_v30 = vadd.f32 %v9036_v25, %v567_v63  ;;  %1344 = vst.msk [vmem:[#allocation5 + $0x1c0] sm:$0xff] %vm678_vm2, %v9301_v60  ;;  %v1090_v21 = vld [vmem:[#allocation2 + $0x51] sm:$0xff]  ;;  %v1088_v62 = vld [vmem:[#allocation2 + $0x41] sm:$0xff] }
  0xec   : > { %1363 = vst.msk [vmem:[#allocation5 + $0x4b8] sm:$0xff] %vm678_vm2, %v9306_v33  ;;  %v2456_v63 = vld [vmem:[%s13321_s4 + $0x158] sm:$0xff] }
  0xed   : > { %v966_v56 = vmul.f32 %v9217_v57, %v672_v3  ;;  %v653_v34 = vmax.f32 %v568_v30, 0.0  ;;  %1208 = vrot.lane.b32.xlu1 %v1108_v6, %s8618_s17  ;;  %1206 = vrot.lane.b32.xlu0 %v1107_v12, %s8618_s17  ;;  %1625 = vst.msk [vmem:[#allocation5 + $0xb0] sm:$0xff] %vm678_vm2, %v1589_v2  ;;  %v2455_v2 = vld [vmem:[%s13321_s4 + $0x150] sm:$0xff]  ;;  %v2454_v6 = vld [vmem:[%s13321_s4 + $0x148] sm:$0xff] }
  0xee   : > { %1204 = vrot.lane.b32.xlu2 %v1106_v13, %s8618_s17  ;;  %v1039_v14 = vld [vmem:[#allocation2 + $0xf8] sm:$0xff]  ;;  %1626 = vst.msk [vmem:[#allocation5 + $0xd8] sm:$0xff] %vm678_vm2, %v1590_v4 }
  0xef   : > { %1002 = vst.msk [vmem:[#allocation2 + $0x103] sm:$0xff] %vm678_vm2, %v966_v56  ;;  %v947_v8 = vmul.f32 %v8974_v11, %v653_v34  ;;  %v9324_v23 = vld [vmem:[#allocation2 + $0xfa] sm:$0xff]  ;;  %v2459_v11 = vld [vmem:[%s13321_s4 + $0x170] sm:$0xff] }
  0xf0   : > { %v627_v19 = vpop.f32.mrf.mxu3  ;;  %v9322_v57 = vld [vmem:[#allocation2 + $0x62] sm:$0xff]  ;;  %1075 = vst.msk [vmem:[#allocation5 + $0x4d8] sm:$0xff] %vm678_vm2, %v1039_v14  ;;  %2848 = vmatpush.msrb.mxu3 %v2459_v11  ;;  %v1298_v56 = vld [vmem:[#allocation2 + $0xa] sm:$0xff] }
  0xf1   : > { %983 = vst.msk [vmem:[#allocation2 + $0x6b] sm:$0xff] %vm678_vm2, %v947_v8  ;;  %v628_v24 = vadd.f32 %v9036_v25, %v627_v19  ;;  %v1020_v29 = vld [vmem:[#allocation2 + $0x60] sm:$0xff] }
  0xf2   : > { %v570_v32 = vpop.f32.mrf.mxu0  ;;  %1056 = vst.msk [vmem:[#allocation5 + $0x1e0] sm:$0xff] %vm678_vm2, %v1020_v29  ;;  %v2453_v19 = vld [vmem:[%s13321_s4 + $0x140] sm:$0xff] }
  0xf3   : > { %2616 = vmatmul.f32.gmra.mxu1 %v2238_v17  ;;  %v673_v37 = vmax.f32 %v628_v24, 0.0  ;;  %v571_v38 = vadd.f32 %v9036_v25, %v570_v32  ;;  %1364 = vst.msk [vmem:[#allocation5 + $0x4e0] sm:$0xff] %vm678_vm2, %v9324_v23 }
  0xf4   : > { %1345 = vst.msk [vmem:[#allocation5 + $0x1e8] sm:$0xff] %vm678_vm2, %v9322_v57 }
  0xf5   : > { %v967_v27 = vmul.f32 %v9215_v55, %v673_v37  ;;  %v654_v40 = vmax.f32 %v571_v38, 0.0  ;;  %1455 = vrot.lane.b32.xlu1 %v9265_v22, %s8618_s17  ;;  %1453 = vrot.lane.b32.xlu0 %v9232_v1, %s8618_s17  ;;  %1624 = vst.msk [vmem:[#allocation5 + $0x88] sm:$0xff] %vm678_vm2, %v1588_v35  ;;  %v2458_v55 = vld [vmem:[%s13321_s4 + $0x168] sm:$0xff]  ;;  %v2457_v1 = vld [vmem:[%s13321_s4 + $0x160] sm:$0xff] }
  0xf6   : > { %1451 = vrot.lane.b32.xlu2 %v9226_v5, %s8618_s17  ;;  %v1040_v0 = vld [vmem:[#allocation2 + $0x100] sm:$0xff]  ;;  %2197 = vst.msk [vmem:[#allocation5 + $0x20] sm:$0xff] %vm678_vm2, %v2161_v39  ;;  %2849 = vmatpush.msrb.mxu3 %v2458_v55  ;;  %v2163_v39 = vld [vmem:[#allocation2 + $0x36] sm:$0xff] }
  0xf7   : > { %1003 = vst.msk [vmem:[#allocation2 + $0x10b] sm:$0xff] %vm678_vm2, %v967_v27  ;;  %v948_v41 = vmul.f32 %v9080_v44, %v654_v40  ;;  %v9355_v42 = vld [vmem:[#allocation2 + $0x102] sm:$0xff]  ;;  %v1110_v55 = vld [vmem:[#allocation2 + $0xf1] sm:$0xff] }
  0xf8   : > { %v630_v22 = vpop.f32.mrf.mxu3  ;;  %1076 = vst.msk [vmem:[#allocation5 + $0x500] sm:$0xff] %vm678_vm2, %v1040_v0  ;;  %v1021_v44 = vld [vmem:[#allocation2 + $0x68] sm:$0xff]  ;;  %2850 = vmatpush.msrb.mxu3 %v2457_v1 }
  0xf9   : > { %984 = vst.msk [vmem:[#allocation2 + $0x73] sm:$0xff] %vm678_vm2, %v948_v41  ;;  %v631_v5 = vadd.f32 %v9036_v25, %v630_v22  ;;  %v9364_v31 = vld [vmem:[#allocation2 + $0x6a] sm:$0xff]  ;;  %v1111_v41 = vld [vmem:[#allocation2 + $0xf9] sm:$0xff] }
  0xfa   : > { %v573_v47 = vpop.f32.mrf.mxu0  ;;  %1333 = vst.msk [vmem:[#allocation5 + $0x8] sm:$0xff] %vm678_vm2, %v1297_v45  ;;  %2851 = vmatpush.msrb.mxu3 %v2456_v63  ;;  %v1592_v0 = vld [vmem:[#allocation2 + $0x4b] sm:$0xff]  ;;  %v2449_v22 = vld [vmem:[%s13321_s4 + $0x120] sm:$0xff] }
  0xfb   : > { %v674_v50 = vmax.f32 %v631_v5, 0.0  ;;  %v574_v54 = vadd.f32 %v9036_v25, %v573_v47  ;;  %1057 = vst.msk [vmem:[#allocation5 + $0x208] sm:$0xff] %vm678_vm2, %v1021_v44  ;;  %v1109_v44 = vld [vmem:[#allocation2 + $0xe9] sm:$0xff]  ;;  %v2448_v47 = vld [vmem:[%s13321_s4 + $0x118] sm:$0xff] }
  0xfc   : > { %1365 = vst.msk [vmem:[#allocation5 + $0x508] sm:$0xff] %vm678_vm2, %v9355_v42  ;;  %2852 = vmatpush.msrb.mxu3 %v2455_v2  ;;  %v1157_v24 = vpop.permute.xlu2 %1156 }
  0xfd   : > { %v968_v61 = vmul.f32 %v919_v36, %v674_v50  ;;  %v655_v51 = vmax.f32 %v574_v54, 0.0  ;;  %1172 = vrot.lane.b32.xlu1 %v1090_v21, %s8618_s17  ;;  %1170 = vrot.lane.b32.xlu0 %v1089_v58, %s8618_s17  ;;  %1346 = vst.msk [vmem:[#allocation5 + $0x210] sm:$0xff] %vm678_vm2, %v9364_v31  ;;  %v2450_v36 = vld [vmem:[%s13321_s4 + $0x128] sm:$0xff] }
  0xfe   : > { %1168 = vrot.lane.b32.xlu2 %v1088_v62, %s8618_s17  ;;  %2198 = vst.msk [vmem:[#allocation5 + $0x48] sm:$0xff] %vm678_vm2, %v2162_v10  ;;  %v1041_v30 = vld [vmem:[#allocation2 + $0x108] sm:$0xff]  ;;  %2853 = vmatpush.msrb.mxu3 %v2454_v6  ;;  %v2447_v10 = vld [vmem:[%s13321_s4 + $0x110] sm:$0xff] }
  0xff   : > { %1004 = vst.msk [vmem:[#allocation2 + $0x113] sm:$0xff] %vm678_vm2, %v968_v61  ;;  %v949_v3 = vmul.f32 %v9078_v43, %v655_v51  ;;  %v9395_v43 = vld [vmem:[#allocation2 + $0x10a] sm:$0xff] }
 0x100   : > { %v633_v4 = vpop.f32.mrf.mxu3  ;;  %1077 = vst.msk [vmem:[#allocation5 + $0x528] sm:$0xff] %vm678_vm2, %v1041_v30  ;;  %v9392_v34 = vld [vmem:[#allocation2 + $0x72] sm:$0xff]  ;;  %2854 = vmatpush.msrb.mxu3 %v2453_v19  ;;  %v1591_v62 = vld [vmem:[#allocation2 + $0x43] sm:$0xff] }
 0x101   : > { %985 = vst.msk [vmem:[#allocation2 + $0x7b] sm:$0xff] %vm678_vm2, %v949_v3  ;;  %v634_v12 = vadd.f32 %v9036_v25, %v633_v4  ;;  %v1022_v13 = vld [vmem:[#allocation2 + $0x70] sm:$0xff]  ;;  %v2446_v3 = vld [vmem:[%s13321_s4 + $0x108] sm:$0xff] }
 0x102   : > { %v576_v14 = vpop.f32.mrf.mxu0  ;;  %1334 = vst.msk [vmem:[#allocation5 + $0x30] sm:$0xff] %vm678_vm2, %v1298_v56  ;;  %v1593_v30 = vld [vmem:[#allocation2 + $0x53] sm:$0xff]  ;;  %v1595_v56 = vld [vmem:[#allocation2 + $0x63] sm:$0xff] }
 0x103   : > { %v675_v8 = vmax.f32 %v634_v12, 0.0  ;;  %v577_v17 = vadd.f32 %v9036_v25, %v576_v14  ;;  %1058 = vst.msk [vmem:[#allocation5 + $0x230] sm:$0xff] %vm678_vm2, %v1022_v13  ;;  %v2164_v12 = vld [vmem:[#allocation2 + $0x3e] sm:$0xff]  ;;  %v2165_v19 = vld [vmem:[#allocation2 + $0x46] sm:$0xff] }
 0x104   : > { %1347 = vst.msk [vmem:[#allocation5 + $0x238] sm:$0xff] %vm678_vm2, %v9392_v34  ;;  %v8603_v14 = vld [vmem:[%s13320_s3] ss:$0 sm:$0xff] }
 0x105   : > { %v969_v28 = vmul.f32 %v9256_v16, %v675_v8  ;;  %v656_v11 = vmax.f32 %v577_v17, 0.0  ;;  %1497 = vrot.lane.b32.xlu1 %v9306_v33, %s8618_s17  ;;  %1495 = vrot.lane.b32.xlu0 %v9283_v46, %s8618_s17  ;;  %1366 = vst.msk [vmem:[#allocation5 + $0x530] sm:$0xff] %vm678_vm2, %v9395_v43  ;;  %v2452_v16 = vld [vmem:[%s13321_s4 + $0x138] sm:$0xff]  ;;  %v2451_v46 = vld [vmem:[%s13321_s4 + $0x130] sm:$0xff]  ;;  %v1092_v17 = vld [vmem:[#allocation2 + $0x61] sm:$0xff] }
 0x106   : > { %1263 = vst.msk [vmem:[#allocation5 + $0x50] sm:$0xff] %vm1260_vm3, %v1157_v24  ;;  %1493 = vrot.lane.b32.xlu2 %v9261_v18, %s8618_s17  ;;  %v1042_v29 = vld [vmem:[#allocation2 + $0x110] sm:$0xff]  ;;  %2855 = vmatpush.msrb.mxu3 %v2452_v16 }
 0x107   : > { %1005 = vst.msk [vmem:[#allocation2 + $0x11b] sm:$0xff] %vm678_vm2, %v969_v28  ;;  %v950_v33 = vmul.f32 %v9008_v20, %v656_v11  ;;  %v9422_v35 = vld [vmem:[#allocation2 + $0x112] sm:$0xff] }
 0x108   : > { %v636_v32 = vpop.f32.mrf.mxu3  ;;  %1078 = vst.msk [vmem:[#allocation5 + $0x550] sm:$0xff] %vm678_vm2, %v1042_v29  ;;  %v9430_v20 = vld [vmem:[#allocation2 + $0x7a] sm:$0xff]  ;;  %2856 = vmatpush.msrb.mxu3 %v2451_v46 }
 0x109   : > { %986 = vst.msk [vmem:[#allocation2 + $0x83] sm:$0xff] %vm678_vm2, %v950_v33  ;;  %v637_v18 = vadd.f32 %v9036_v25, %v636_v32  ;;  %v1023_v37 = vld [vmem:[#allocation2 + $0x78] sm:$0xff]  ;;  %v1596_v32 = vld [vmem:[#allocation2 + $0x6b] sm:$0xff] }
 0x10a   : > { %v579_v38 = vpop.f32.mrf.mxu0  ;;  %1059 = vst.msk [vmem:[#allocation5 + $0x258] sm:$0xff] %vm678_vm2, %v1023_v37  ;;  %2857 = vmatpush.msrb.mxu3 %v2450_v36  ;;  %v1091_v11 = vld [vmem:[#allocation2 + $0x59] sm:$0xff]  ;;  %v2166_v36 = vld [vmem:[#allocation2 + $0x4e] sm:$0xff] }
 0x10b   : > { %v676_v27 = vmax.f32 %v637_v18, 0.0  ;;  %v580_v40 = vadd.f32 %v9036_v25, %v579_v38  ;;  %1367 = vst.msk [vmem:[#allocation5 + $0x558] sm:$0xff] %vm678_vm2, %v9422_v35 }
 0x10c   : > { %1348 = vst.msk [vmem:[#allocation5 + $0x260] sm:$0xff] %vm678_vm2, %v9430_v20  ;;  %2858 = vmatpush.msrb.mxu3 %v2449_v22  ;;  %v1113_v22 = vld [vmem:[#allocation2 + $0x109] sm:$0xff] }
 0x10d   : > { %v2243_v5 = vld [vmem:[#allocation5 + $0x50] sm:$0xff]  ;;  %v970_v1 = vmul.f32 %v9254_v15, %v676_v27  ;;  %v657_v45 = vmax.f32 %v580_v40, 0.0  ;;  %1214 = vrot.lane.b32.xlu1 %v1111_v41, %s8618_s17  ;;  %1212 = vrot.lane.b32.xlu0 %v1110_v55, %s8618_s17  ;;  %2199 = vst.msk [vmem:[#allocation5 + $0x70] sm:$0xff] %vm678_vm2, %v2163_v39 }
 0x10e   : > { %2619 = vmatmul.f32.gmra.mxu1 %v2243_v5  ;;  %1210 = vrot.lane.b32.xlu2 %v1109_v44, %s8618_s17  ;;  %1628 = vst.msk [vmem:[#allocation5 + $0x128] sm:$0xff] %vm678_vm2, %v1592_v0  ;;  %v1043_v50 = vld [vmem:[#allocation2 + $0x118] sm:$0xff] }
 0x10f   : > { %1006 = vst.msk [vmem:[#allocation2 + $0x123] sm:$0xff] %vm678_vm2, %v970_v1  ;;  %v951_v15 = vmul.f32 %v9094_v53, %v657_v45  ;;  %v9455_v21 = vld [vmem:[#allocation2 + $0x11a] sm:$0xff]  ;;  %2859 = vmatpush.msrb.mxu3 %v2448_v47 }
 0x110   : > { %v639_v54 = vpop.f32.mrf.mxu3  ;;  %1079 = vst.msk [vmem:[#allocation5 + $0x578] sm:$0xff] %vm678_vm2, %v1043_v50  ;;  %v9460_v61 = vld [vmem:[#allocation2 + $0x82] sm:$0xff] }
 0x111   : > { %987 = vst.msk [vmem:[#allocation2 + $0x8b] sm:$0xff] %vm678_vm2, %v951_v15  ;;  %v640_v58 = vadd.f32 %v9036_v25, %v639_v54  ;;  %v1024_v51 = vld [vmem:[#allocation2 + $0x80] sm:$0xff]  ;;  %2860 = vmatpush.msrb.mxu3 %v2447_v10 }
 0x112   : > { %v582_v53 = vpop.f32.mrf.mxu0  ;;  %1060 = vst.msk [vmem:[#allocation5 + $0x280] sm:$0xff] %vm678_vm2, %v1024_v51  ;;  %v1112_v47 = vld [vmem:[#allocation2 + $0x101] sm:$0xff] }
 0x113   : > { %v677_v63 = vmax.f32 %v640_v58, 0.0  ;;  %v583_v2 = vadd.f32 %v9036_v25, %v582_v53  ;;  %1368 = vst.msk [vmem:[#allocation5 + $0x580] sm:$0xff] %vm678_vm2, %v9455_v21  ;;  %v2445_v25 = vld [vmem:[%s13321_s4 + $0x100] sm:$0xff]  ;;  %2861 = vmatpush.msrb.mxu3 %v2446_v3  ;;  %v1442_v24 = vpop.permute.xlu0 %1441 }
 0x114   : > { %1349 = vst.msk [vmem:[#allocation5 + $0x288] sm:$0xff] %vm678_vm2, %v9460_v61  ;;  %v1598_v58 = vld [vmem:[#allocation2 + $0x7b] sm:$0xff]  ;;  %v1607_v53 = vld [vmem:[#allocation2 + $0xc3] sm:$0xff] }
 0x115   : > { %v971_v4 = vmul.f32 %v9370_v59, %v677_v63  ;;  %v658_v6 = vmax.f32 %v583_v2, 0.0  ;;  %1461 = vrot.lane.b32.xlu1 %v9322_v57, %s8618_s17  ;;  %1459 = vrot.lane.b32.xlu0 %v9301_v60, %s8618_s17  ;;  %1627 = vst.msk [vmem:[#allocation5 + $0x100] sm:$0xff] %vm678_vm2, %v1591_v62 }
 0x116   : > { %1457 = vrot.lane.b32.xlu2 %v9287_v49, %s8618_s17  ;;  %1629 = vst.msk [vmem:[#allocation5 + $0x150] sm:$0xff] %vm678_vm2, %v1593_v30  ;;  %2862 = vmatpush.msrb.mxu3 %v2445_v25  ;;  %v1594_v49 = vld [vmem:[#allocation2 + $0x5b] sm:$0xff]  ;;  %v1599_v30 = vld [vmem:[#allocation2 + $0x83] sm:$0xff]  ;;  %v1608_v25 = vld [vmem:[#allocation2 + $0xcb] sm:$0xff] }
 0x117   : > { %1007 = vst.msk [vmem:[#allocation2 + $0x12b] sm:$0xff] %vm678_vm2, %v971_v4  ;;  %v952_v57 = vmul.f32 %v9092_v52, %v658_v6  ;;  %v1093_v52 = vld [vmem:[#allocation2 + $0x69] sm:$0xff] }
 0x118   : > { %v9485_v59 = vld [vmem:[#allocation2 + $0x8a] sm:$0xff]  ;;  %2200 = vst.msk [vmem:[#allocation5 + $0x98] sm:$0xff] %vm678_vm2, %v2164_v12  ;;  %v1096_v12 = vld [vmem:[#allocation2 + $0x81] sm:$0xff] }
 0x119   : > { %988 = vst.msk [vmem:[#allocation2 + $0x93] sm:$0xff] %vm678_vm2, %v952_v57  ;;  %v1025_v60 = vld [vmem:[#allocation2 + $0x88] sm:$0xff]  ;;  %v1095_v57 = vld [vmem:[#allocation2 + $0x79] sm:$0xff] }
 0x11a   : > { %v585_v13 = vpop.f32.mrf.mxu0  ;;  %1061 = vst.msk [vmem:[#allocation5 + $0x2a8] sm:$0xff] %vm678_vm2, %v1025_v60  ;;  %v1610_v60 = vld [vmem:[#allocation2 + $0xdb] sm:$0xff] }
 0x11b   : > { %v586_v8 = vadd.f32 %v8603_v14, %v585_v13  ;;  %1350 = vst.msk [vmem:[#allocation5 + $0x2b0] sm:$0xff] %vm678_vm2, %v9485_v59  ;;  %v1444_v33 = vpop.permute.xlu1 %1443 }
 0x11c   : > { %1631 = vst.msk [vmem:[#allocation5 + $0x1a0] sm:$0xff] %vm678_vm2, %v1595_v56  ;;  %v1094_v56 = vld [vmem:[#allocation2 + $0x71] sm:$0xff] }
 0x11d   : > { %v659_v28 = vmax.f32 %v586_v8, 0.0  ;;  %1178 = vrot.lane.b32.xlu1 %v1093_v52, %s8618_s17  ;;  %1176 = vrot.lane.b32.xlu0 %v1092_v17, %s8618_s17  ;;  %1630 = vst.msk [vmem:[#allocation5 + $0x178] sm:$0xff] %vm678_vm2, %v1594_v49  ;;  %v1600_v8 = vld [vmem:[#allocation2 + $0x8b] sm:$0xff]  ;;  %v1609_v52 = vld [vmem:[#allocation2 + $0xd3] sm:$0xff]  ;;  %v1611_v17 = vld [vmem:[#allocation2 + $0xe3] sm:$0xff] }
 0x11e   : > { %1549 = vst.msk [vmem:[#allocation5 + $0x8] sm:$0xff] %vm1260_vm3, %v1442_v24  ;;  %1174 = vrot.lane.b32.xlu2 %v1091_v11, %s8618_s17  ;;  %v1159_v38 = vpop.permute.xlu0 %1158  ;;  %v1612_v11 = vld [vmem:[#allocation2 + $0xeb] sm:$0xff] }
 0x11f   : > { %v953_v16 = vmul.f32 %v9042_v26, %v659_v28  ;;  %2201 = vst.msk [vmem:[#allocation5 + $0xc0] sm:$0xff] %vm678_vm2, %v2165_v19  ;;  %v2167_v26 = vld [vmem:[#allocation2 + $0x56] sm:$0xff]  ;;  %v1874_v19 = vld [vmem:[#allocation2 + $0x2c] sm:$0xff]  ;;  %v1403_v28 = vld [vmem:[#allocation2 + $0x122] sm:$0xff] }
 0x120   : > { %1550 = vst.msk [vmem:[#allocation5 + $0x30] sm:$0xff] %vm1260_vm3, %v1444_v33  ;;  %v1199_v46 = vpop.permute.xlu2 %1198  ;;  %v9504_v29 = vld [vmem:[#allocation2 + $0x92] sm:$0xff] }
 0x121   : > { %989 = vst.msk [vmem:[#allocation2 + $0x9b] sm:$0xff] %vm678_vm2, %v953_v16  ;;  %v1026_v5 = vld [vmem:[#allocation2 + $0x90] sm:$0xff] }
 0x122   : > { %1284 = vst.msk [vmem:[#allocation5 + $0x398] sm:$0xff] %vm1260_vm3, %v1199_v46  ;;  %v588_v18 = vpop.f32.mrf.mxu0 }
 0x123   : > { %v589_v37 = vadd.f32 %v8603_v14, %v588_v18  ;;  %1351 = vst.msk [vmem:[#allocation5 + $0x2d8] sm:$0xff] %vm678_vm2, %v9504_v29  ;;  %v1875_v18 = vld [vmem:[#allocation2 + $0x34] sm:$0xff] }
 0x124   : > { %1632 = vst.msk [vmem:[#allocation5 + $0x1c8] sm:$0xff] %vm678_vm2, %v1596_v32  ;;  %v1601_v32 = vld [vmem:[#allocation2 + $0x93] sm:$0xff] }
 0x125   : > { %v660_v39 = vmax.f32 %v589_v37, 0.0  ;;  %1503 = vrot.lane.b32.xlu1 %v9395_v43, %s8618_s17  ;;  %1501 = vrot.lane.b32.xlu0 %v9355_v42, %s8618_s17  ;;  %2202 = vst.msk [vmem:[#allocation5 + $0xe8] sm:$0xff] %vm678_vm2, %v2166_v36  ;;  %v1597_v42 = vld [vmem:[#allocation2 + $0x73] sm:$0xff] }
 0x126   : > { %1264 = vst.msk [vmem:[#allocation5 + $0x78] sm:$0xff] %vm1260_vm3, %v1159_v38  ;;  %1499 = vrot.lane.b32.xlu2 %v9324_v23, %s8618_s17  ;;  %v1161_v40 = vpop.permute.xlu1 %1160  ;;  %v1605_v23 = vld [vmem:[#allocation2 + $0xb3] sm:$0xff]  ;;  %v1730_v1 = vpop.permute.xlu0 %1729 }
 0x127   : > { %v954_v27 = vmul.f32 %v9113_v9, %v660_v39  ;;  %2203 = vst.msk [vmem:[#allocation5 + $0x110] sm:$0xff] %vm678_vm2, %v2167_v26  ;;  %v1114_v9 = vld [vmem:[#allocation2 + $0x111] sm:$0xff]  ;;  %v1115_v37 = vld [vmem:[#allocation2 + $0x119] sm:$0xff] }
 0x128   : > { %1265 = vst.msk [vmem:[#allocation5 + $0xa0] sm:$0xff] %vm1260_vm3, %v1161_v40  ;;  %v1446_v0 = vpop.permute.xlu2 %1445  ;;  %v9522_v41 = vld [vmem:[#allocation2 + $0x9a] sm:$0xff] }
 0x129   : > { %990 = vst.msk [vmem:[#allocation2 + $0xa3] sm:$0xff] %vm678_vm2, %v954_v27  ;;  %v1027_v62 = vld [vmem:[#allocation2 + $0x98] sm:$0xff] }
 0x12a   : > { %1551 = vst.msk [vmem:[#allocation5 + $0x58] sm:$0xff] %vm1260_vm3, %v1446_v0  ;;  %v591_v43 = vpop.f32.mrf.mxu0  ;;  %v1661_v36 = vld [vmem:[#allocation2 + $0x34] sm:$0xff]  ;;  %v1876_v0 = vld [vmem:[#allocation2 + $0x3c] sm:$0xff] }
 0x12b   : > { %v592_v55 = vadd.f32 %v8603_v14, %v591_v43  ;;  %1352 = vst.msk [vmem:[#allocation5 + $0x300] sm:$0xff] %vm678_vm2, %v9522_v41  ;;  %v1613_v26 = vld [vmem:[#allocation2 + $0xf3] sm:$0xff]  ;;  %v1602_v40 = vld [vmem:[#allocation2 + $0x9b] sm:$0xff] }
 0x12c   : > { %1633 = vst.msk [vmem:[#allocation5 + $0x1f0] sm:$0xff] %vm678_vm2, %v1597_v42  ;;  %v1098_v42 = vld [vmem:[#allocation2 + $0x91] sm:$0xff] }
 0x12d   : > { %v2248_v45 = vld [vmem:[#allocation5 + $0x78] sm:$0xff]  ;;  %v661_v44 = vmax.f32 %v592_v55, 0.0  ;;  %1220 = vrot.lane.b32.xlu1 %v1114_v9, %s8618_s17  ;;  %1218 = vrot.lane.b32.xlu0 %v1113_v22, %s8618_s17  ;;  %1062 = vst.msk [vmem:[#allocation5 + $0x2d0] sm:$0xff] %vm678_vm2, %v1026_v5 }
 0x12e   : > { %1837 = vst.msk [vmem:[#allocation5 + $0x10] sm:$0xff] %vm1260_vm3, %v1730_v1  ;;  %2622 = vmatmul.f32.gmra.mxu1 %v2248_v45  ;;  %1216 = vrot.lane.b32.xlu2 %v1112_v47, %s8618_s17  ;;  %v1732_v50 = vpop.permute.xlu1 %1731  ;;  %v2168_v1 = vld [vmem:[#allocation2 + $0x5e] sm:$0xff]  ;;  %v1660_v47 = vld [vmem:[#allocation2 + $0x2c] sm:$0xff] }
 0x12f   : > { %v955_v15 = vmul.f32 %v9111_v7, %v661_v44  ;;  %1641 = vst.msk [vmem:[#allocation5 + $0x330] sm:$0xff] %vm678_vm2, %v1605_v23  ;;  %v2253_v51 = vld [vmem:[#allocation5 + $0xa0] sm:$0xff]  ;;  %v1878_v44 = vld [vmem:[#allocation2 + $0x4c] sm:$0xff] }
 0x130   : > { %1838 = vst.msk [vmem:[#allocation5 + $0x38] sm:$0xff] %vm1260_vm3, %v1732_v50  ;;  %v1163_v54 = vpop.permute.xlu2 %1162  ;;  %v9537_v10 = vld [vmem:[#allocation2 + $0xa2] sm:$0xff] }
 0x131   : > { %991 = vst.msk [vmem:[#allocation2 + $0xab] sm:$0xff] %vm678_vm2, %v955_v15  ;;  %v1606_v7 = vld [vmem:[#allocation2 + $0xbb] sm:$0xff]  ;;  %v1097_v15 = vld [vmem:[#allocation2 + $0x89] sm:$0xff] }
 0x132   : > { %1266 = vst.msk [vmem:[#allocation5 + $0xc8] sm:$0xff] %vm1260_vm3, %v1163_v54  ;;  %v1614_v45 = vld [vmem:[#allocation2 + $0xfb] sm:$0xff]  ;;  %v1615_v50 = vld [vmem:[#allocation2 + $0x103] sm:$0xff] }
 0x133   : > { %1353 = vst.msk [vmem:[#allocation5 + $0x328] sm:$0xff] %vm678_vm2, %v9537_v10 }
 0x134   : > { %1634 = vst.msk [vmem:[#allocation5 + $0x218] sm:$0xff] %vm678_vm2, %v1598_v58 }
 0x135   : > { %v2235_v63 = vld [vmem:[#allocation5 + $0x10] sm:$0xff]  ;;  %1467 = vrot.lane.b32.xlu1 %v9430_v20, %s8618_s17  ;;  %1465 = vrot.lane.b32.xlu0 %v9392_v34, %s8618_s17  ;;  %1063 = vst.msk [vmem:[#allocation5 + $0x2f8] sm:$0xff] %vm678_vm2, %v1027_v62 }
 0x136   : > { %2863 = vmatmul.f32.vlgmr.msrb.gmra.mxu3 %v2235_v63  ;;  %2625 = vmatmul.f32.gmra.mxu1 %v2253_v51  ;;  %1643 = vst.msk [vmem:[#allocation5 + $0x380] sm:$0xff] %vm678_vm2, %v1607_v53  ;;  %v1880_v63 = vld [vmem:[#allocation2 + $0x5c] sm:$0xff] }
 0x137   : > { %1463 = vrot.lane.b32.xlu2 %v9364_v31, %s8618_s17  ;;  %v1486_v2 = vpop.permute.xlu1 %1485  ;;  %v1484_v3 = vpop.permute.xlu0 %1483  ;;  %1642 = vst.msk [vmem:[#allocation5 + $0x358] sm:$0xff] %vm678_vm2, %v1606_v7  ;;  %v2240_v34 = vld [vmem:[#allocation5 + $0x38] sm:$0xff]  ;;  %v2169_v7 = vld [vmem:[#allocation2 + $0x66] sm:$0xff] }
 0x138   : > { %v9553_v4 = vld [vmem:[#allocation2 + $0xb2] sm:$0xff]  ;;  %v9555_v20 = vld [vmem:[#allocation2 + $0xaa] sm:$0xff]  ;;  %v1734_v6 = vpop.permute.xlu2 %1733  ;;  %1635 = vst.msk [vmem:[#allocation5 + $0x240] sm:$0xff] %vm678_vm2, %v1599_v30 }
 0x139   : > { %1355 = vst.msk [vmem:[#allocation5 + $0x378] sm:$0xff] %vm678_vm2, %v9553_v4  ;;  %v2258_v31 = vld [vmem:[#allocation5 + $0xc8] sm:$0xff]  ;;  %v1030_v43 = vld [vmem:[#allocation2 + $0xb0] sm:$0xff]  ;;  %v1029_v55 = vld [vmem:[#allocation2 + $0xa8] sm:$0xff] }
 0x13a   : > { %1571 = vst.msk [vmem:[#allocation5 + $0x378] sm:$0xff] %vm1260_vm3, %v1486_v2  ;;  %v1604_v62 = vld [vmem:[#allocation2 + $0xab] sm:$0xff]  ;;  %v1879_v2 = vld [vmem:[#allocation2 + $0x54] sm:$0xff] }
 0x13b   : > { %1354 = vst.msk [vmem:[#allocation5 + $0x350] sm:$0xff] %vm678_vm2, %v9555_v20  ;;  %v1404_v30 = vld [vmem:[#allocation2 + $0x12a] sm:$0xff] }
 0x13c   : > { %1570 = vst.msk [vmem:[#allocation5 + $0x350] sm:$0xff] %vm1260_vm3, %v1484_v3  ;;  %v1102_v3 = vld [vmem:[#allocation2 + $0xb1] sm:$0xff] }
 0x13d   : > { %1839 = vst.msk [vmem:[#allocation5 + $0x60] sm:$0xff] %vm1260_vm3, %v1734_v6  ;;  %1184 = vrot.lane.b32.xlu1 %v1096_v12, %s8618_s17  ;;  %1182 = vrot.lane.b32.xlu0 %v1095_v57, %s8618_s17  ;;  %v1616_v6 = vld [vmem:[#allocation2 + $0x10b] sm:$0xff] }
 0x13e   : > { %2866 = vmatmul.f32.gmra.mxu3 %v2240_v34  ;;  %2628 = vmatmul.f32.gmra.mxu1 %v2258_v31  ;;  %1644 = vst.msk [vmem:[#allocation5 + $0x3a8] sm:$0xff] %vm678_vm2, %v1608_v25  ;;  %v2170_v57 = vld [vmem:[#allocation2 + $0x6e] sm:$0xff] }
 0x13f   : > { %1180 = vrot.lane.b32.xlu2 %v1094_v56, %s8618_s17  ;;  %v1203_v13 = vpop.permute.xlu1 %1202  ;;  %v1201_v49 = vpop.permute.xlu0 %1200  ;;  %1646 = vst.msk [vmem:[#allocation5 + $0x3f8] sm:$0xff] %vm678_vm2, %v1610_v60  ;;  %v1881_v60 = vld [vmem:[#allocation2 + $0x64] sm:$0xff]  ;;  %v1892_v56 = vld [vmem:[#allocation2 + $0xbc] sm:$0xff] }
 0x140   : > { %1286 = vst.msk [vmem:[#allocation5 + $0x3e8] sm:$0xff] %vm1260_vm3, %v1203_v13  ;;  %v1488_v14 = vpop.permute.xlu2 %1487  ;;  %v1101_v13 = vld [vmem:[#allocation2 + $0xa9] sm:$0xff] }
 0x141   : > { %1285 = vst.msk [vmem:[#allocation5 + $0x3c0] sm:$0xff] %vm1260_vm3, %v1201_v49  ;;  %v1662_v49 = vld [vmem:[#allocation2 + $0x3c] sm:$0xff] }
 0x142   : > { %1572 = vst.msk [vmem:[#allocation5 + $0x3a0] sm:$0xff] %vm1260_vm3, %v1488_v14  ;;  %v1617_v14 = vld [vmem:[#allocation2 + $0x113] sm:$0xff] }
 0x143   : > { %1636 = vst.msk [vmem:[#allocation5 + $0x268] sm:$0xff] %vm678_vm2, %v1600_v8 }
 0x144   : > { %v2245_v24 = vld [vmem:[#allocation5 + $0x60] sm:$0xff]  ;;  %1645 = vst.msk [vmem:[#allocation5 + $0x3d0] sm:$0xff] %vm678_vm2, %v1609_v52 }
 0x145   : > { %1509 = vrot.lane.b32.xlu1 %v1403_v28, %s8618_s17  ;;  %1507 = vrot.lane.b32.xlu0 %v9455_v21, %s8618_s17  ;;  %1647 = vst.msk [vmem:[#allocation5 + $0x420] sm:$0xff] %vm678_vm2, %v1611_v17  ;;  %v1873_v21 = vld [vmem:[#allocation2 + $0x24] sm:$0xff] }
 0x146   : > { %2869 = vmatmul.f32.gmra.mxu3 %v2245_v24  ;;  %1910 = vst.msk [vmem:[#allocation5 + $0x40] sm:$0xff] %vm678_vm2, %v1874_v19  ;;  %v2171_v19 = vld [vmem:[#allocation2 + $0x76] sm:$0xff]  ;;  %v1882_v24 = vld [vmem:[#allocation2 + $0x6c] sm:$0xff]  ;;  %v1893_v28 = vld [vmem:[#allocation2 + $0xc4] sm:$0xff] }
 0x147   : > { %1505 = vrot.lane.b32.xlu2 %v9422_v35, %s8618_s17  ;;  %v1450_v16 = vpop.permute.xlu1 %1449  ;;  %v1448_v33 = vpop.permute.xlu0 %1447  ;;  %1648 = vst.msk [vmem:[#allocation5 + $0x448] sm:$0xff] %vm678_vm2, %v1612_v11  ;;  %v1028_v35 = vld [vmem:[#allocation2 + $0xa0] sm:$0xff]  ;;  %v1664_v11 = vld [vmem:[#allocation2 + $0x4c] sm:$0xff] }
 0x148   : > { %1553 = vst.msk [vmem:[#allocation5 + $0xa8] sm:$0xff] %vm1260_vm3, %v1450_v16  ;;  %v1205_v46 = vpop.permute.xlu2 %1204  ;;  %v1663_v16 = vld [vmem:[#allocation2 + $0x44] sm:$0xff] }
 0x149   : > { %1552 = vst.msk [vmem:[#allocation5 + $0x80] sm:$0xff] %vm1260_vm3, %v1448_v33  ;;  %v1618_v33 = vld [vmem:[#allocation2 + $0x11b] sm:$0xff] }
 0x14a   : > { %1287 = vst.msk [vmem:[#allocation5 + $0x410] sm:$0xff] %vm1260_vm3, %v1205_v46 }
 0x14b   : > { %1637 = vst.msk [vmem:[#allocation5 + $0x290] sm:$0xff] %vm678_vm2, %v1601_v32 }
 0x14c   : > { %1909 = vst.msk [vmem:[#allocation5 + $0x18] sm:$0xff] %vm678_vm2, %v1873_v21 }
 0x14d   : > { %1737 = vrot.lane.b32.xlu1 %v1661_v36, %s8618_s17  ;;  %1471 = vrot.lane.b32.xlu0 %v9485_v59, %s8618_s17  ;;  %1911 = vst.msk [vmem:[#allocation5 + $0x68] sm:$0xff] %vm678_vm2, %v1875_v18  ;;  %v1877_v59 = vld [vmem:[#allocation2 + $0x44] sm:$0xff] }
 0x14e   : > { %1064 = vst.msk [vmem:[#allocation5 + $0x320] sm:$0xff] %vm678_vm2, %v1028_v35  ;;  %v2172_v36 = vld [vmem:[#allocation2 + $0x7e] sm:$0xff] }
 0x14f   : > { %1222 = vrot.lane.b32.xlu2 %v1115_v37, %s8618_s17  ;;  %v1167_v38 = vpop.permute.xlu1 %1166  ;;  %v1165_v39 = vpop.permute.xlu0 %1164  ;;  %1649 = vst.msk [vmem:[#allocation5 + $0x470] sm:$0xff] %vm678_vm2, %v1613_v26  ;;  %v2180_v35 = vld [vmem:[#allocation2 + $0xbe] sm:$0xff]  ;;  %v1883_v37 = vld [vmem:[#allocation2 + $0x74] sm:$0xff] }
 0x150   : > { %1268 = vst.msk [vmem:[#allocation5 + $0x118] sm:$0xff] %vm1260_vm3, %v1167_v38  ;;  %v1452_v27 = vpop.permute.xlu2 %1451  ;;  %v1895_v26 = vld [vmem:[#allocation2 + $0xd4] sm:$0xff]  ;;  %v1666_v38 = vld [vmem:[#allocation2 + $0x5c] sm:$0xff] }
 0x151   : > { %1267 = vst.msk [vmem:[#allocation5 + $0xf0] sm:$0xff] %vm1260_vm3, %v1165_v39  ;;  %v1100_v39 = vld [vmem:[#allocation2 + $0xa1] sm:$0xff] }
 0x152   : > { %1554 = vst.msk [vmem:[#allocation5 + $0xd0] sm:$0xff] %vm1260_vm3, %v1452_v27  ;;  %v1619_v27 = vld [vmem:[#allocation2 + $0x123] sm:$0xff] }
 0x153   : > { %1638 = vst.msk [vmem:[#allocation5 + $0x2b8] sm:$0xff] %vm678_vm2, %v1602_v40 }
 0x154   : > { %1913 = vst.msk [vmem:[#allocation5 + $0xb8] sm:$0xff] %vm678_vm2, %v1877_v59 }
 0x155   : > { %1473 = vrot.lane.b32.xlu1 %v9504_v29, %s8618_s17  ;;  %1188 = vrot.lane.b32.xlu0 %v1098_v42, %s8618_s17  ;;  %1912 = vst.msk [vmem:[#allocation5 + $0x90] sm:$0xff] %vm678_vm2, %v1876_v0  ;;  %v1603_v29 = vld [vmem:[#allocation2 + $0xa3] sm:$0xff] }
 0x156   : > { %1066 = vst.msk [vmem:[#allocation5 + $0x370] sm:$0xff] %vm678_vm2, %v1030_v43  ;;  %v2173_v43 = vld [vmem:[#allocation2 + $0x86] sm:$0xff] }
 0x157   : > { %1469 = vrot.lane.b32.xlu2 %v9460_v61, %s8618_s17  ;;  %v1492_v23 = vpop.permute.xlu1 %1491  ;;  %v1490_v9 = vpop.permute.xlu0 %1489  ;;  %1065 = vst.msk [vmem:[#allocation5 + $0x348] sm:$0xff] %vm678_vm2, %v1029_v55  ;;  %v1099_v61 = vld [vmem:[#allocation2 + $0x99] sm:$0xff]  ;;  %v2268_v53 = vld [vmem:[#allocation5 + $0x118] sm:$0xff] }
 0x158   : > { %1574 = vst.msk [vmem:[#allocation5 + $0x3f0] sm:$0xff] %vm1260_vm3, %v1492_v23  ;;  %v1169_v22 = vpop.permute.xlu2 %1168  ;;  %v2263_v5 = vld [vmem:[#allocation5 + $0xf0] sm:$0xff]  ;;  %v1884_v23 = vld [vmem:[#allocation2 + $0x7c] sm:$0xff] }
 0x159   : > { %1573 = vst.msk [vmem:[#allocation5 + $0x3c8] sm:$0xff] %vm1260_vm3, %v1490_v9  ;;  %2631 = vmatmul.f32.gmra.mxu1 %v2263_v5  ;;  %v1894_v55 = vld [vmem:[#allocation2 + $0xcc] sm:$0xff]  ;;  %v1896_v9 = vld [vmem:[#allocation2 + $0xdc] sm:$0xff]  ;;  %v1669_v5 = vld [vmem:[#allocation2 + $0x74] sm:$0xff] }
 0x15a   : > { %1269 = vst.msk [vmem:[#allocation5 + $0x140] sm:$0xff] %vm1260_vm3, %v1169_v22  ;;  %v1670_v22 = vld [vmem:[#allocation2 + $0x7c] sm:$0xff] }
 0x15b   : > { %1639 = vst.msk [vmem:[#allocation5 + $0x2e0] sm:$0xff] %vm678_vm2, %v1603_v29  ;;  %v1620_v29 = vld [vmem:[#allocation2 + $0x12b] sm:$0xff] }
 0x15c   : > { %2204 = vst.msk [vmem:[#allocation5 + $0x138] sm:$0xff] %vm678_vm2, %v2168_v1 }
 0x15d   : > { %1190 = vrot.lane.b32.xlu1 %v1099_v61, %s8618_s17  ;;  %1735 = vrot.lane.b32.xlu0 %v1660_v47, %s8618_s17  ;;  %1650 = vst.msk [vmem:[#allocation5 + $0x498] sm:$0xff] %vm678_vm2, %v1614_v45  ;;  %v2181_v47 = vld [vmem:[#allocation2 + $0xc6] sm:$0xff] }
 0x15e   : > { %1914 = vst.msk [vmem:[#allocation5 + $0xe0] sm:$0xff] %vm678_vm2, %v1878_v44 }
 0x15f   : > { %1186 = vrot.lane.b32.xlu2 %v1097_v15, %s8618_s17  ;;  %v1209_v54 = vpop.permute.xlu1 %1208  ;;  %v1207_v58 = vpop.permute.xlu0 %1206  ;;  %1651 = vst.msk [vmem:[#allocation5 + $0x4c0] sm:$0xff] %vm678_vm2, %v1615_v50  ;;  %v1897_v15 = vld [vmem:[#allocation2 + $0xe4] sm:$0xff] }
 0x160   : > { %1289 = vst.msk [vmem:[#allocation5 + $0x460] sm:$0xff] %vm1260_vm3, %v1209_v54  ;;  %v1494_v51 = vpop.permute.xlu2 %1493  ;;  %v1885_v50 = vld [vmem:[#allocation2 + $0x84] sm:$0xff]  ;;  %v1673_v54 = vld [vmem:[#allocation2 + $0x94] sm:$0xff] }
 0x161   : > { %1288 = vst.msk [vmem:[#allocation5 + $0x438] sm:$0xff] %vm1260_vm3, %v1207_v58  ;;  %2634 = vmatmul.f32.gmra.mxu1 %v2268_v53  ;;  %v2273_v12 = vld [vmem:[#allocation5 + $0x140] sm:$0xff]  ;;  %v2182_v58 = vld [vmem:[#allocation2 + $0xce] sm:$0xff] }
 0x162   : > { %1575 = vst.msk [vmem:[#allocation5 + $0x418] sm:$0xff] %vm1260_vm3, %v1494_v51  ;;  %v1898_v51 = vld [vmem:[#allocation2 + $0xec] sm:$0xff]  ;;  %v1665_v53 = vld [vmem:[#allocation2 + $0x54] sm:$0xff] }
 0x163   : > { %1640 = vst.msk [vmem:[#allocation5 + $0x308] sm:$0xff] %vm678_vm2, %v1604_v62 }
 0x164   : > { %2205 = vst.msk [vmem:[#allocation5 + $0x160] sm:$0xff] %vm678_vm2, %v2169_v7 }
 0x165   : > { %1196 = vrot.lane.b32.xlu1 %v1102_v3, %s8618_s17  ;;  %1477 = vrot.lane.b32.xlu0 %v9537_v10, %s8618_s17  ;;  %1916 = vst.msk [vmem:[#allocation5 + $0x130] sm:$0xff] %vm678_vm2, %v1880_v63  ;;  %v2179_v10 = vld [vmem:[#allocation2 + $0xb6] sm:$0xff]  ;;  %v2174_v3 = vld [vmem:[#allocation2 + $0x8e] sm:$0xff] }
 0x166   : > { %1915 = vst.msk [vmem:[#allocation5 + $0x108] sm:$0xff] %vm678_vm2, %v1879_v2  ;;  %v2183_v63 = vld [vmem:[#allocation2 + $0xd6] sm:$0xff] }
 0x167   : > { %1511 = vrot.lane.b32.xlu2 %v1404_v30, %s8618_s17  ;;  %v1456_v34 = vpop.permute.xlu1 %1455  ;;  %v1454_v31 = vpop.permute.xlu0 %1453  ;;  %1652 = vst.msk [vmem:[#allocation5 + $0x4e8] sm:$0xff] %vm678_vm2, %v1616_v6  ;;  %v1886_v30 = vld [vmem:[#allocation2 + $0x8c] sm:$0xff] }
 0x168   : > { %1556 = vst.msk [vmem:[#allocation5 + $0x120] sm:$0xff] %vm1260_vm3, %v1456_v34  ;;  %v1211_v25 = vpop.permute.xlu2 %1210  ;;  %v1676_v6 = vld [vmem:[#allocation2 + $0xac] sm:$0xff]  ;;  %v1675_v34 = vld [vmem:[#allocation2 + $0xa4] sm:$0xff] }
 0x169   : > { %1555 = vst.msk [vmem:[#allocation5 + $0xf8] sm:$0xff] %vm1260_vm3, %v1454_v31  ;;  %2637 = vmatmul.f32.gmra.mxu1 %v2273_v12  ;;  %v2184_v31 = vld [vmem:[#allocation2 + $0xde] sm:$0xff]  ;;  %v1668_v12 = vld [vmem:[#allocation2 + $0x6c] sm:$0xff] }
 0x16a   : > { %1290 = vst.msk [vmem:[#allocation5 + $0x488] sm:$0xff] %vm1260_vm3, %v1211_v25  ;;  %v1899_v25 = vld [vmem:[#allocation2 + $0xf4] sm:$0xff] }
 0x16b   : > { %2206 = vst.msk [vmem:[#allocation5 + $0x188] sm:$0xff] %vm678_vm2, %v2170_v57 }
 0x16c   : > { %1917 = vst.msk [vmem:[#allocation5 + $0x158] sm:$0xff] %vm678_vm2, %v1881_v60 }
 0x16d   : > { %1479 = vrot.lane.b32.xlu1 %v9555_v20, %s8618_s17  ;;  %1194 = vrot.lane.b32.xlu0 %v1101_v13, %s8618_s17  ;;  %2215 = vst.msk [vmem:[#allocation5 + $0x2f0] sm:$0xff] %vm678_vm2, %v2179_v10  ;;  %v1891_v20 = vld [vmem:[#allocation2 + $0xb4] sm:$0xff] }
 0x16e   : > { %1928 = vst.msk [vmem:[#allocation5 + $0x310] sm:$0xff] %vm678_vm2, %v1892_v56  ;;  %v2185_v56 = vld [vmem:[#allocation2 + $0xe6] sm:$0xff] }
 0x16f   : > { %1739 = vrot.lane.b32.xlu2 %v1662_v49, %s8618_s17  ;;  %v1173_v8 = vpop.permute.xlu1 %1172  ;;  %v1171_v52 = vpop.permute.xlu0 %1170  ;;  %1653 = vst.msk [vmem:[#allocation5 + $0x510] sm:$0xff] %vm678_vm2, %v1617_v14  ;;  %v2175_v49 = vld [vmem:[#allocation2 + $0x96] sm:$0xff] }
 0x170   : > { %1271 = vst.msk [vmem:[#allocation5 + $0x190] sm:$0xff] %vm1260_vm3, %v1173_v8  ;;  %v1458_v17 = vpop.permute.xlu2 %1457  ;;  %v1887_v14 = vld [vmem:[#allocation2 + $0x94] sm:$0xff]  ;;  %v1679_v8 = vld [vmem:[#allocation2 + $0xc4] sm:$0xff] }
 0x171   : > { %1270 = vst.msk [vmem:[#allocation5 + $0x168] sm:$0xff] %vm1260_vm3, %v1171_v52  ;;  %v1678_v52 = vld [vmem:[#allocation2 + $0xbc] sm:$0xff] }
 0x172   : > { %1557 = vst.msk [vmem:[#allocation5 + $0x148] sm:$0xff] %vm1260_vm3, %v1458_v17  ;;  %v2186_v17 = vld [vmem:[#allocation2 + $0xee] sm:$0xff] }
 0x173   : > { %2207 = vst.msk [vmem:[#allocation5 + $0x1b0] sm:$0xff] %vm678_vm2, %v2171_v19  ;;  %v1900_v19 = vld [vmem:[#allocation2 + $0xfc] sm:$0xff] }
 0x174   : > { %1918 = vst.msk [vmem:[#allocation5 + $0x180] sm:$0xff] %vm678_vm2, %v1882_v24 }
 0x175   : > { %1743 = vrot.lane.b32.xlu1 %v1664_v11, %s8618_s17  ;;  %1741 = vrot.lane.b32.xlu0 %v1663_v16, %s8618_s17  ;;  %1927 = vst.msk [vmem:[#allocation5 + $0x2e8] sm:$0xff] %vm678_vm2, %v1891_v20  ;;  %v1671_v20 = vld [vmem:[#allocation2 + $0x84] sm:$0xff]  ;;  %v2187_v16 = vld [vmem:[#allocation2 + $0xf6] sm:$0xff] }
 0x176   : > { %1929 = vst.msk [vmem:[#allocation5 + $0x338] sm:$0xff] %vm678_vm2, %v1893_v28 }
 0x177   : > { %1475 = vrot.lane.b32.xlu2 %v9522_v41, %s8618_s17  ;;  %v1498_v46 = vpop.permute.xlu1 %1497  ;;  %v1496_v32 = vpop.permute.xlu0 %1495  ;;  %1654 = vst.msk [vmem:[#allocation5 + $0x538] sm:$0xff] %vm678_vm2, %v1618_v33  ;;  %v1667_v41 = vld [vmem:[#allocation2 + $0x64] sm:$0xff] }
 0x178   : > { %1577 = vst.msk [vmem:[#allocation5 + $0x468] sm:$0xff] %vm1260_vm3, %v1498_v46  ;;  %v1175_v21 = vpop.permute.xlu2 %1174  ;;  %v2278_v18 = vld [vmem:[#allocation5 + $0x168] sm:$0xff]  ;;  %v2283_v42 = vld [vmem:[#allocation5 + $0x190] sm:$0xff]  ;;  %v2484_v46 = vld [vmem:[%s13321_s4 + $0x238] sm:$0xff] }
 0x179   : > { %1576 = vst.msk [vmem:[#allocation5 + $0x440] sm:$0xff] %vm1260_vm3, %v1496_v32  ;;  %2640 = vmatmul.f32.gmra.mxu1 %v2278_v18  ;;  %v2176_v32 = vld [vmem:[#allocation2 + $0x9e] sm:$0xff] }
 0x17a   : > { %1272 = vst.msk [vmem:[#allocation5 + $0x1b8] sm:$0xff] %vm1260_vm3, %v1175_v21  ;;  %3105 = vmatpush.msrb.mxu1 %v2484_v46  ;;  %v1888_v21 = vld [vmem:[#allocation2 + $0x9c] sm:$0xff] }
 0x17b   : > { %2208 = vst.msk [vmem:[#allocation5 + $0x1d8] sm:$0xff] %vm678_vm2, %v2172_v36  ;;  %v1682_v18 = vld [vmem:[#allocation2 + $0xdc] sm:$0xff]  ;;  %v1681_v36 = vld [vmem:[#allocation2 + $0xd4] sm:$0xff] }
 0x17c   : > { %1919 = vst.msk [vmem:[#allocation5 + $0x1a8] sm:$0xff] %vm678_vm2, %v1883_v37  ;;  %v1901_v37 = vld [vmem:[#allocation2 + $0x104] sm:$0xff] }
 0x17d   : > { %1749 = vrot.lane.b32.xlu1 %v1667_v41, %s8618_s17  ;;  %1747 = vrot.lane.b32.xlu0 %v1666_v38, %s8618_s17  ;;  %2216 = vst.msk [vmem:[#allocation5 + $0x318] sm:$0xff] %vm678_vm2, %v2180_v35  ;;  %v2188_v35 = vld [vmem:[#allocation2 + $0xfe] sm:$0xff] }
 0x17e   : > { %1931 = vst.msk [vmem:[#allocation5 + $0x388] sm:$0xff] %vm678_vm2, %v1895_v26  ;;  %v1674_v26 = vld [vmem:[#allocation2 + $0x9c] sm:$0xff] }
 0x17f   : > { %1192 = vrot.lane.b32.xlu2 %v1100_v39, %s8618_s17  ;;  %v1215_v40 = vpop.permute.xlu1 %1214  ;;  %v1213_v59 = vpop.permute.xlu0 %1212  ;;  %1655 = vst.msk [vmem:[#allocation5 + $0x560] sm:$0xff] %vm678_vm2, %v1619_v27  ;;  %v2189_v27 = vld [vmem:[#allocation2 + $0x106] sm:$0xff] }
 0x180   : > { %1292 = vst.msk [vmem:[#allocation5 + $0x4d8] sm:$0xff] %vm1260_vm3, %v1215_v40  ;;  %v1500_v0 = vpop.permute.xlu2 %1499 }
 0x181   : > { %1291 = vst.msk [vmem:[#allocation5 + $0x4b0] sm:$0xff] %vm1260_vm3, %v1213_v59  ;;  %2643 = vmatmul.f32.gmra.mxu1 %v2283_v42  ;;  %v2288_v61 = vld [vmem:[#allocation5 + $0x1b8] sm:$0xff] }
 0x182   : > { %1578 = vst.msk [vmem:[#allocation5 + $0x490] sm:$0xff] %vm1260_vm3, %v1500_v0  ;;  %v2483_v59 = vld [vmem:[%s13321_s4 + $0x230] sm:$0xff]  ;;  %v2482_v0 = vld [vmem:[%s13321_s4 + $0x228] sm:$0xff] }
 0x183   : > { %2209 = vst.msk [vmem:[#allocation5 + $0x200] sm:$0xff] %vm678_vm2, %v2173_v43  ;;  %v1684_v42 = vld [vmem:[#allocation2 + $0xec] sm:$0xff]  ;;  %3106 = vmatpush.msrb.mxu1 %v2483_v59  ;;  %v2476_v43 = vld [vmem:[%s13321_s4 + $0x1f8] sm:$0xff] }
 0x184   : > { %1920 = vst.msk [vmem:[#allocation5 + $0x1d0] sm:$0xff] %vm678_vm2, %v1884_v23  ;;  %v2481_v23 = vld [vmem:[%s13321_s4 + $0x220] sm:$0xff]  ;;  %2972 = vmatpush.msrb.mxu0 %v2476_v43 }
 0x185   : > { %1755 = vrot.lane.b32.xlu1 %v1670_v22, %s8618_s17  ;;  %1753 = vrot.lane.b32.xlu0 %v1669_v5, %s8618_s17  ;;  %1930 = vst.msk [vmem:[#allocation5 + $0x360] sm:$0xff] %vm678_vm2, %v1894_v55  ;;  %v1685_v55 = vld [vmem:[#allocation2 + $0xf4] sm:$0xff]  ;;  %v1889_v5 = vld [vmem:[#allocation2 + $0xa4] sm:$0xff] }
 0x186   : > { %1932 = vst.msk [vmem:[#allocation5 + $0x3b0] sm:$0xff] %vm678_vm2, %v1896_v9  ;;  %v2177_v9 = vld [vmem:[#allocation2 + $0xa6] sm:$0xff]  ;;  %3107 = vmatpush.msrb.mxu1 %v2482_v0  ;;  %v2178_v22 = vld [vmem:[#allocation2 + $0xae] sm:$0xff]  ;;  %v2472_v0 = vld [vmem:[%s13321_s4 + $0x1d8] sm:$0xff] }
 0x187   : > { %1481 = vrot.lane.b32.xlu2 %v9553_v4, %s8618_s17  ;;  %v1462_v1 = vpop.permute.xlu1 %1461  ;;  %v1460_v45 = vpop.permute.xlu0 %1459  ;;  %1656 = vst.msk [vmem:[#allocation5 + $0x588] sm:$0xff] %vm678_vm2, %v1620_v29  ;;  %v1672_v4 = vld [vmem:[#allocation2 + $0x8c] sm:$0xff]  ;;  %v1952_v43 = vld [vmem:[#allocation2 + $0x5d] sm:$0xff] }
 0x188   : > { %1559 = vst.msk [vmem:[#allocation5 + $0x198] sm:$0xff] %vm1260_vm3, %v1462_v1  ;;  %v1217_v44 = vpop.permute.xlu2 %1216  ;;  %v1890_v29 = vld [vmem:[#allocation2 + $0xac] sm:$0xff]  ;;  %v2480_v1 = vld [vmem:[%s13321_s4 + $0x218] sm:$0xff]  ;;  %3108 = vmatpush.msrb.mxu1 %v2481_v23 }
 0x189   : > { %1558 = vst.msk [vmem:[#allocation5 + $0x170] sm:$0xff] %vm1260_vm3, %v1460_v45  ;;  %2646 = vmatmul.f32.gmra.mxu1 %v2288_v61  ;;  %v1677_v45 = vld [vmem:[#allocation2 + $0xb4] sm:$0xff]  ;;  %v1692_v23 = vld [vmem:[#allocation2 + $0x12c] sm:$0xff] }
 0x18a   : > { %1293 = vst.msk [vmem:[#allocation5 + $0x500] sm:$0xff] %vm1260_vm3, %v1217_v44  ;;  %3109 = vmatpush.msrb.mxu1 %v2480_v1 }
 0x18b   : > { %2217 = vst.msk [vmem:[#allocation5 + $0x340] sm:$0xff] %vm678_vm2, %v2181_v47  ;;  %v2479_v47 = vld [vmem:[%s13321_s4 + $0x210] sm:$0xff] }
 0x18c   : > { %1921 = vst.msk [vmem:[#allocation5 + $0x1f8] sm:$0xff] %vm678_vm2, %v1885_v50  ;;  %3110 = vmatpush.msrb.mxu1 %v2479_v47  ;;  %v2439_v47 = vld [vmem:[%s13321_s4 + $0xd0] sm:$0xff] }
 0x18d   : > { %1761 = vrot.lane.b32.xlu1 %v1673_v54, %s8618_s17  ;;  %1759 = vrot.lane.b32.xlu0 %v1672_v4, %s8618_s17  ;;  %1933 = vst.msk [vmem:[#allocation5 + $0x3d8] sm:$0xff] %vm678_vm2, %v1897_v15  ;;  %v1902_v15 = vld [vmem:[#allocation2 + $0x10c] sm:$0xff] }
 0x18e   : > { %1934 = vst.msk [vmem:[#allocation5 + $0x400] sm:$0xff] %vm678_vm2, %v1898_v51  ;;  %v2478_v54 = vld [vmem:[%s13321_s4 + $0x208] sm:$0xff]  ;;  %v2475_v51 = vld [vmem:[%s13321_s4 + $0x1f0] sm:$0xff] }
 0x18f   : > { %1745 = vrot.lane.b32.xlu2 %v1665_v53, %s8618_s17  ;;  %v1179_v62 = vpop.permute.xlu1 %1178  ;;  %v1177_v7 = vpop.permute.xlu0 %1176  ;;  %2218 = vst.msk [vmem:[#allocation5 + $0x368] sm:$0xff] %vm678_vm2, %v2182_v58  ;;  %v2190_v4 = vld [vmem:[#allocation2 + $0x10e] sm:$0xff]  ;;  %v2444_v58 = vld [vmem:[%s13321_s4 + $0xf8] sm:$0xff]  ;;  %v2477_v53 = vld [vmem:[%s13321_s4 + $0x200] sm:$0xff]  ;;  %2973 = vmatpush.msrb.mxu0 %v2475_v51 }
 0x190   : > { %1274 = vst.msk [vmem:[#allocation5 + $0x208] sm:$0xff] %vm1260_vm3, %v1179_v62  ;;  %2722 = vmatpush.msrb.mxu2 %v2444_v58  ;;  %v1688_v62 = vld [vmem:[#allocation2 + $0x10c] sm:$0xff]  ;;  %3111 = vmatpush.msrb.mxu1 %v2478_v54  ;;  %v1947_v54 = vld [vmem:[#allocation2 + $0x35] sm:$0xff] }
 0x191   : > { %1273 = vst.msk [vmem:[#allocation5 + $0x1e0] sm:$0xff] %vm1260_vm3, %v1177_v7  ;;  %v1464_v2 = vpop.permute.xlu2 %1463  ;;  %v1687_v7 = vld [vmem:[#allocation2 + $0x104] sm:$0xff] }
 0x192   : > { %1560 = vst.msk [vmem:[#allocation5 + $0x1c0] sm:$0xff] %vm1260_vm3, %v1464_v2  ;;  %v2191_v2 = vld [vmem:[#allocation2 + $0x116] sm:$0xff]  ;;  %3112 = vmatpush.msrb.mxu1 %v2477_v53 }
 0x193   : > { %2219 = vst.msk [vmem:[#allocation5 + $0x390] sm:$0xff] %vm678_vm2, %v2183_v63  ;;  %v1903_v63 = vld [vmem:[#allocation2 + $0x114] sm:$0xff] }
 0x194   : > { %2210 = vst.msk [vmem:[#allocation5 + $0x228] sm:$0xff] %vm678_vm2, %v2174_v3  ;;  %v1680_v3 = vld [vmem:[#allocation2 + $0xcc] sm:$0xff] }
 0x195   : > { %1767 = vrot.lane.b32.xlu1 %v1676_v6, %s8618_s17  ;;  %1765 = vrot.lane.b32.xlu0 %v1675_v34, %s8618_s17  ;;  %1922 = vst.msk [vmem:[#allocation5 + $0x220] sm:$0xff] %vm678_vm2, %v1886_v30 }
 0x196   : > { %1935 = vst.msk [vmem:[#allocation5 + $0x428] sm:$0xff] %vm678_vm2, %v1899_v25  ;;  %v2443_v25 = vld [vmem:[%s13321_s4 + $0xf0] sm:$0xff] }
 0x197   : > { %1751 = vrot.lane.b32.xlu2 %v1668_v12, %s8618_s17  ;;  %v1504_v57 = vpop.permute.xlu1 %1503  ;;  %v1502_v10 = vpop.permute.xlu0 %1501  ;;  %2220 = vst.msk [vmem:[#allocation5 + $0x3b8] sm:$0xff] %vm678_vm2, %v2184_v31  ;;  %v2298_v11 = vld [vmem:[#allocation5 + $0x208] sm:$0xff]  ;;  %2723 = vmatpush.msrb.mxu2 %v2443_v25  ;;  %v2470_v25 = vld [vmem:[%s13321_s4 + $0x1c8] sm:$0xff] }
 0x198   : > { %1580 = vst.msk [vmem:[#allocation5 + $0x4e0] sm:$0xff] %vm1260_vm3, %v1504_v57  ;;  %v2293_v60 = vld [vmem:[#allocation5 + $0x1e0] sm:$0xff]  ;;  %v1691_v12 = vld [vmem:[#allocation2 + $0x124] sm:$0xff] }
 0x199   : > { %1579 = vst.msk [vmem:[#allocation5 + $0x4b8] sm:$0xff] %vm1260_vm3, %v1502_v10  ;;  %v1181_v13 = vpop.permute.xlu2 %1180  ;;  %2649 = vmatmul.f32.gmra.mxu1 %v2293_v60  ;;  %v1690_v57 = vld [vmem:[#allocation2 + $0x11c] sm:$0xff] }
 0x19a   : > { %1275 = vst.msk [vmem:[#allocation5 + $0x230] sm:$0xff] %vm1260_vm3, %v1181_v13  ;;  %v1904_v10 = vld [vmem:[#allocation2 + $0x11c] sm:$0xff] }
 0x19b   : > { %2221 = vst.msk [vmem:[#allocation5 + $0x3e0] sm:$0xff] %vm678_vm2, %v2185_v56  ;;  %v2192_v60 = vld [vmem:[#allocation2 + $0x11e] sm:$0xff] }
 0x19c   : > { %2211 = vst.msk [vmem:[#allocation5 + $0x250] sm:$0xff] %vm678_vm2, %v2175_v49  ;;  %v1683_v56 = vld [vmem:[#allocation2 + $0xe4] sm:$0xff] }
 0x19d   : > { %1773 = vrot.lane.b32.xlu1 %v1679_v8, %s8618_s17  ;;  %1771 = vrot.lane.b32.xlu0 %v1678_v52, %s8618_s17  ;;  %1923 = vst.msk [vmem:[#allocation5 + $0x248] sm:$0xff] %vm678_vm2, %v1887_v14  ;;  %v2474_v14 = vld [vmem:[%s13321_s4 + $0x1e8] sm:$0xff] }
 0x19e   : > { %1936 = vst.msk [vmem:[#allocation5 + $0x450] sm:$0xff] %vm678_vm2, %v1900_v19  ;;  %2974 = vmatpush.msrb.mxu0 %v2474_v14  ;;  %v1946_v19 = vld [vmem:[#allocation2 + $0x2d] sm:$0xff]  ;;  %v1953_v14 = vld [vmem:[#allocation2 + $0x65] sm:$0xff] }
 0x19f   : > { %1757 = vrot.lane.b32.xlu2 %v1671_v20, %s8618_s17  ;;  %v1221_v24 = vpop.permute.xlu1 %1220  ;;  %v1219_v28 = vpop.permute.xlu0 %1218  ;;  %2222 = vst.msk [vmem:[#allocation5 + $0x408] sm:$0xff] %vm678_vm2, %v2186_v17  ;;  %v2442_v17 = vld [vmem:[%s13321_s4 + $0xe8] sm:$0xff] }
 0x1a0   : > { %1295 = vst.msk [vmem:[#allocation5 + $0x550] sm:$0xff] %vm1260_vm3, %v1221_v24  ;;  %2724 = vmatpush.msrb.mxu2 %v2442_v17  ;;  %v1945_v20 = vld [vmem:[#allocation2 + $0x25] sm:$0xff] }
 0x1a1   : > { %1294 = vst.msk [vmem:[#allocation5 + $0x528] sm:$0xff] %vm1260_vm3, %v1219_v28  ;;  %v1506_v33 = vpop.permute.xlu2 %1505  ;;  %2652 = vmatmul.f32.gmra.mxu1 %v2298_v11  ;;  %v2303_v39 = vld [vmem:[#allocation5 + $0x230] sm:$0xff]  ;;  %v1686_v11 = vld [vmem:[#allocation2 + $0xfc] sm:$0xff] }
 0x1a2   : > { %1581 = vst.msk [vmem:[#allocation5 + $0x508] sm:$0xff] %vm1260_vm3, %v1506_v33  ;;  %v1905_v24 = vld [vmem:[#allocation2 + $0x124] sm:$0xff]  ;;  %v1906_v28 = vld [vmem:[#allocation2 + $0x12c] sm:$0xff] }
 0x1a3   : > { %2223 = vst.msk [vmem:[#allocation5 + $0x430] sm:$0xff] %vm678_vm2, %v2187_v16  ;;  %v2437_v17 = vld [vmem:[%s13321_s4 + $0xc0] sm:$0xff] }
 0x1a4   : > { %2212 = vst.msk [vmem:[#allocation5 + $0x278] sm:$0xff] %vm678_vm2, %v2176_v32  ;;  %v2193_v32 = vld [vmem:[#allocation2 + $0x126] sm:$0xff] }
 0x1a5   : > { %1779 = vrot.lane.b32.xlu1 %v1682_v18, %s8618_s17  ;;  %1777 = vrot.lane.b32.xlu0 %v1681_v36, %s8618_s17  ;;  %1924 = vst.msk [vmem:[#allocation5 + $0x270] sm:$0xff] %vm678_vm2, %v1888_v21  ;;  %v2194_v18 = vld [vmem:[#allocation2 + $0x12e] sm:$0xff]  ;;  %v2473_v36 = vld [vmem:[%s13321_s4 + $0x1e0] sm:$0xff] }
 0x1a6   : > { %1937 = vst.msk [vmem:[#allocation5 + $0x478] sm:$0xff] %vm678_vm2, %v1901_v37  ;;  %2975 = vmatpush.msrb.mxu0 %v2473_v36  ;;  %v1949_v37 = vld [vmem:[#allocation2 + $0x45] sm:$0xff] }
 0x1a7   : > { %1763 = vrot.lane.b32.xlu2 %v1674_v26, %s8618_s17  ;;  %v1468_v41 = vpop.permute.xlu1 %1467  ;;  %v1466_v38 = vpop.permute.xlu0 %1465  ;;  %2224 = vst.msk [vmem:[#allocation5 + $0x458] sm:$0xff] %vm678_vm2, %v2188_v35  ;;  %v2441_v35 = vld [vmem:[%s13321_s4 + $0xe0] sm:$0xff] }
 0x1a8   : > { %1562 = vst.msk [vmem:[#allocation5 + $0x210] sm:$0xff] %vm1260_vm3, %v1468_v41  ;;  %2725 = vmatpush.msrb.mxu2 %v2441_v35  ;;  %v1948_v26 = vld [vmem:[#allocation2 + $0x3d] sm:$0xff]  ;;  %v1689_v41 = vld [vmem:[#allocation2 + $0x114] sm:$0xff]  ;;  %2976 = vmatpush.msrb.mxu0 %v2472_v0 }
 0x1a9   : > { %1561 = vst.msk [vmem:[#allocation5 + $0x1e8] sm:$0xff] %vm1260_vm3, %v1466_v38  ;;  %v1223_v40 = vpop.permute.xlu2 %1222  ;;  %2655 = vmatmul.f32.gmra.mxu1 %v2303_v39 }
 0x1aa   : > { %1296 = vst.msk [vmem:[#allocation5 + $0x578] sm:$0xff] %vm1260_vm3, %v1223_v40  ;;  %v2237_v40 = vld [vmem:[#allocation5 + $0x20] sm:$0xff] }
 0x1ab   : > { %2225 = vst.msk [vmem:[#allocation5 + $0x480] sm:$0xff] %vm678_vm2, %v2189_v27 }
 0x1ac   : > { %2213 = vst.msk [vmem:[#allocation5 + $0x2a0] sm:$0xff] %vm678_vm2, %v2177_v9 }
 0x1ad   : > { %1785 = vrot.lane.b32.xlu1 %v1685_v55, %s8618_s17  ;;  %1783 = vrot.lane.b32.xlu0 %v1684_v42, %s8618_s17  ;;  %2214 = vst.msk [vmem:[#allocation5 + $0x2c8] sm:$0xff] %vm678_vm2, %v2178_v22  ;;  %v2440_v42 = vld [vmem:[%s13321_s4 + $0xd8] sm:$0xff] }
 0x1ae   : > { %1925 = vst.msk [vmem:[#allocation5 + $0x298] sm:$0xff] %vm678_vm2, %v1889_v5  ;;  %2726 = vmatpush.msrb.mxu2 %v2440_v42  ;;  %v1951_v55 = vld [vmem:[#allocation2 + $0x55] sm:$0xff] }
 0x1af   : > { %1769 = vrot.lane.b32.xlu2 %v1677_v45, %s8618_s17  ;;  %v1185_v44 = vpop.permute.xlu1 %1184  ;;  %v1183_v61 = vpop.permute.xlu0 %1182  ;;  %1926 = vst.msk [vmem:[#allocation5 + $0x2c0] sm:$0xff] %vm678_vm2, %v1890_v29 }
 0x1b0   : > { %1277 = vst.msk [vmem:[#allocation5 + $0x280] sm:$0xff] %vm1260_vm3, %v1185_v44  ;;  %v9828_v29 = vpop.f32.mrf.mxu1  ;;  %v2242_v44 = vld [vmem:[#allocation5 + $0x48] sm:$0xff]  ;;  %2727 = vmatpush.msrb.mxu2 %v2439_v47 }
 0x1b1   : > { %1276 = vst.msk [vmem:[#allocation5 + $0x258] sm:$0xff] %vm1260_vm3, %v1183_v61  ;;  %v1470_v50 = vpop.permute.xlu2 %1469  ;;  %v2471_v61 = vld [vmem:[%s13321_s4 + $0x1d0] sm:$0xff] }
 0x1b2   : > { %1563 = vst.msk [vmem:[#allocation5 + $0x238] sm:$0xff] %vm1260_vm3, %v1470_v50  ;;  %2977 = vmatpush.msrb.mxu0 %v2471_v61  ;;  %v1954_v50 = vld [vmem:[#allocation2 + $0x6d] sm:$0xff] }
 0x1b3   : > { %1938 = vst.msk [vmem:[#allocation5 + $0x4a0] sm:$0xff] %vm678_vm2, %v1902_v15  ;;  %v1955_v15 = vld [vmem:[#allocation2 + $0x75] sm:$0xff]  ;;  %v1962_v61 = vld [vmem:[#allocation2 + $0xad] sm:$0xff] }
 0x1b4   : > { %2226 = vst.msk [vmem:[#allocation5 + $0x4a8] sm:$0xff] %vm678_vm2, %v2190_v4  ;;  %2978 = vmatpush.msrb.mxu0 %v2470_v25  ;;  %v2363_v25 = vld [vmem:[#allocation5 + $0x410] sm:$0xff] }
 0x1b5   : > { %1791 = vrot.lane.b32.xlu1 %v1688_v62, %s8618_s17  ;;  %1789 = vrot.lane.b32.xlu0 %v1687_v7, %s8618_s17  ;;  %1939 = vst.msk [vmem:[#allocation5 + $0x4c8] sm:$0xff] %vm678_vm2, %v1903_v63  ;;  %v2247_v7 = vld [vmem:[#allocation5 + $0x70] sm:$0xff] }
 0x1b6   : > { %2227 = vst.msk [vmem:[#allocation5 + $0x4d0] sm:$0xff] %vm678_vm2, %v2191_v2  ;;  %v1958_v2 = vld [vmem:[#allocation2 + $0x8d] sm:$0xff] }
 0x1b7   : > { %1775 = vrot.lane.b32.xlu2 %v1680_v3, %s8618_s17  ;;  %v1510_v30 = vpop.permute.xlu1 %1509  ;;  %v1508_v6 = vpop.permute.xlu0 %1507  ;;  %1940 = vst.msk [vmem:[#allocation5 + $0x4f0] sm:$0xff] %vm678_vm2, %v1904_v10  ;;  %v2313_v8 = vld [vmem:[#allocation5 + $0x280] sm:$0xff]  ;;  %v1957_v3 = vld [vmem:[#allocation2 + $0x85] sm:$0xff] }
 0x1b8   : > { %1583 = vst.msk [vmem:[#allocation5 + $0x558] sm:$0xff] %vm1260_vm3, %v1510_v30  ;;  %v2308_v34 = vld [vmem:[#allocation5 + $0x258] sm:$0xff]  ;;  %v9845_v63 = vpop.f32.mrf.mxu1 }
 0x1b9   : > { %1582 = vst.msk [vmem:[#allocation5 + $0x530] sm:$0xff] %vm1260_vm3, %v1508_v6  ;;  %v1187_v31 = vpop.permute.xlu2 %1186  ;;  %2658 = vmatmul.f32.gmra.mxu1 %v2308_v34  ;;  %v1950_v30 = vld [vmem:[#allocation2 + $0x4d] sm:$0xff] }
 0x1ba   : > { %1278 = vst.msk [vmem:[#allocation5 + $0x2a8] sm:$0xff] %vm1260_vm3, %v1187_v31  ;;  %v2438_v31 = vld [vmem:[%s13321_s4 + $0xc8] sm:$0xff] }
 0x1bb   : > { %2228 = vst.msk [vmem:[#allocation5 + $0x4f8] sm:$0xff] %vm678_vm2, %v2192_v60  ;;  %2728 = vmatpush.msrb.mxu2 %v2438_v31  ;;  %v2252_v60 = vld [vmem:[#allocation5 + $0x98] sm:$0xff] }
 0x1bc   : > { %1941 = vst.msk [vmem:[#allocation5 + $0x518] sm:$0xff] %vm678_vm2, %v1905_v24 }
 0x1bd   : > { %1797 = vrot.lane.b32.xlu1 %v1691_v12, %s8618_s17  ;;  %1795 = vrot.lane.b32.xlu0 %v1690_v57, %s8618_s17  ;;  %1942 = vst.msk [vmem:[#allocation5 + $0x540] sm:$0xff] %vm678_vm2, %v1906_v28  ;;  %v2257_v28 = vld [vmem:[#allocation5 + $0xc0] sm:$0xff] }
 0x1be   : > { %2229 = vst.msk [vmem:[#allocation5 + $0x520] sm:$0xff] %vm678_vm2, %v2193_v32  ;;  %2729 = vmatpush.msrb.mxu2 %v2437_v17  ;;  %v1956_v32 = vld [vmem:[#allocation2 + $0x7d] sm:$0xff] }
 0x1bf   : > { %1781 = vrot.lane.b32.xlu2 %v1683_v56, %s8618_s17  ;;  %v1738_v13 = vpop.permute.xlu1 %1737  ;;  %v1472_v49 = vpop.permute.xlu0 %1471  ;;  %2230 = vst.msk [vmem:[#allocation5 + $0x548] sm:$0xff] %vm678_vm2, %v2194_v18 }
 0x1c0   : > { %1841 = vst.msk [vmem:[#allocation5 + $0xb0] sm:$0xff] %vm1260_vm3, %v1738_v13  ;;  %v9862_v56 = vpop.f32.mrf.mxu1  ;;  %v1961_v13 = vld [vmem:[#allocation2 + $0xa5] sm:$0xff] }
 0x1c1   : > { %1564 = vst.msk [vmem:[#allocation5 + $0x260] sm:$0xff] %vm1260_vm3, %v1472_v49  ;;  %v1512_v52 = vpop.permute.xlu2 %1511  ;;  %2661 = vmatmul.f32.gmra.mxu1 %v2313_v8  ;;  %v2318_v46 = vld [vmem:[#allocation5 + $0x2a8] sm:$0xff] }
 0x1c2   : > { %1584 = vst.msk [vmem:[#allocation5 + $0x580] sm:$0xff] %vm1260_vm3, %v1512_v52  ;;  %v1960_v49 = vld [vmem:[#allocation2 + $0x9d] sm:$0xff] }
 0x1c5   : > { %2019 = vrot.lane.b32.xlu1 %v1946_v19, %s8618_s17  ;;  %2017 = vrot.lane.b32.xlu0 %v1945_v20, %s8618_s17 }
 0x1c7   : > { %1787 = vrot.lane.b32.xlu2 %v1686_v11, %s8618_s17  ;;  %v1474_v16 = vpop.permute.xlu1 %1473  ;;  %v1189_v33 = vpop.permute.xlu0 %1188  ;;  %v2255_v51 = vld [vmem:[#allocation5 + $0xb0] sm:$0xff]  ;;  %v2469_v11 = vld [vmem:[%s13321_s4 + $0x1c0] sm:$0xff] }
 0x1c8   : > { %1565 = vst.msk [vmem:[#allocation5 + $0x288] sm:$0xff] %vm1260_vm3, %v1474_v16  ;;  %2979 = vmatpush.msrb.mxu0 %v2469_v11  ;;  %v9877_v16 = vpop.f32.mrf.mxu1  ;;  %v2464_v11 = vld [vmem:[%s13321_s4 + $0x198] sm:$0xff] }
 0x1c9   : > { %1279 = vst.msk [vmem:[#allocation5 + $0x2d0] sm:$0xff] %vm1260_vm3, %v1189_v33  ;;  %v1740_v21 = vpop.permute.xlu2 %1739  ;;  %2664 = vmatmul.f32.gmra.mxu1 %v2318_v46  ;;  %v1964_v33 = vld [vmem:[#allocation2 + $0xbd] sm:$0xff]  ;;  %v1963_v46 = vld [vmem:[#allocation2 + $0xb5] sm:$0xff] }
 0x1ca   : > { %1842 = vst.msk [vmem:[#allocation5 + $0xd8] sm:$0xff] %vm1260_vm3, %v1740_v21 }
 0x1cd   : > { %2025 = vrot.lane.b32.xlu1 %v1949_v37, %s8618_s17  ;;  %2023 = vrot.lane.b32.xlu0 %v1948_v26, %s8618_s17  ;;  %v2348_v37 = vld [vmem:[#allocation5 + $0x398] sm:$0xff]  ;;  %v2262_v26 = vld [vmem:[#allocation5 + $0xe8] sm:$0xff] }
 0x1cf   : > { %1793 = vrot.lane.b32.xlu2 %v1689_v41, %s8618_s17  ;;  %v1191_v38 = vpop.permute.xlu1 %1190  ;;  %v1736_v39 = vpop.permute.xlu0 %1735  ;;  %v2436_v41 = vld [vmem:[%s13321_s4 + $0xb8] sm:$0xff] }
 0x1d0   : > { %1280 = vst.msk [vmem:[#allocation5 + $0x2f8] sm:$0xff] %vm1260_vm3, %v1191_v38  ;;  %v2323_v27 = vld [vmem:[#allocation5 + $0x2d0] sm:$0xff]  ;;  %v2468_v38 = vld [vmem:[%s13321_s4 + $0x1b8] sm:$0xff]  ;;  %2730 = vmatpush.msrb.mxu2 %v2436_v41 }
 0x1d1   : > { %1840 = vst.msk [vmem:[#allocation5 + $0x88] sm:$0xff] %vm1260_vm3, %v1736_v39  ;;  %v1476_v59 = vpop.permute.xlu2 %1475  ;;  %2667 = vmatmul.f32.vlgmr.msra.gmra.mxu2 %v2323_v27  ;;  %8448 = vmatmul.msk.f32.vlgmr.msrb.gmra.mxu1 %vm678_vm2, %v2237_v40  ;;  %v2260_v57 = vld [vmem:[#allocation5 + $0xd8] sm:$0xff]  ;;  %v9894_v40 = vpop.f32.mrf.mxu1 }
 0x1d2   : > { %1566 = vst.msk [vmem:[#allocation5 + $0x2b0] sm:$0xff] %vm1260_vm3, %v1476_v59  ;;  %2980 = vmatpush.msrb.mxu0 %v2468_v38  ;;  %v1967_v39 = vld [vmem:[#allocation2 + $0xd5] sm:$0xff]  ;;  %v1966_v27 = vld [vmem:[#allocation2 + $0xcd] sm:$0xff] }
 0x1d3   : > { %v1959_v59 = vld [vmem:[#allocation2 + $0x95] sm:$0xff] }
 0x1d4   : > { %v2373_v38 = vld [vmem:[#allocation5 + $0x460] sm:$0xff] }
 0x1d5   : > { %2031 = vrot.lane.b32.xlu1 %v1952_v43, %s8618_s17  ;;  %2029 = vrot.lane.b32.xlu0 %v1951_v55, %s8618_s17 }
 0x1d7   : > { %1799 = vrot.lane.b32.xlu2 %v1692_v23, %s8618_s17  ;;  %v1197_v9 = vpop.permute.xlu1 %1196  ;;  %v1478_v22 = vpop.permute.xlu0 %1477  ;;  %v2328_v5 = vld [vmem:[#allocation5 + $0x2f8] sm:$0xff]  ;;  %v2353_v23 = vld [vmem:[#allocation5 + $0x3c0] sm:$0xff] }
 0x1d8   : > { %1283 = vst.msk [vmem:[#allocation5 + $0x370] sm:$0xff] %vm1260_vm3, %v1197_v9  ;;  %v2250_v1 = vld [vmem:[#allocation5 + $0x88] sm:$0xff]  ;;  %v2267_v9 = vld [vmem:[#allocation5 + $0x110] sm:$0xff] }
 0x1d9   : > { %1567 = vst.msk [vmem:[#allocation5 + $0x2d8] sm:$0xff] %vm1260_vm3, %v1478_v22  ;;  %v1193_v45 = vpop.permute.xlu2 %1192  ;;  %2670 = vmatmul.f32.gmra.mxu2 %v2328_v5  ;;  %2872 = vmatmul.f32.gmra.mxu3 %v2250_v1  ;;  %v2435_v22 = vld [vmem:[%s13321_s4 + $0xb0] sm:$0xff] }
 0x1da   : > { %1281 = vst.msk [vmem:[#allocation5 + $0x320] sm:$0xff] %vm1260_vm3, %v1193_v45  ;;  %8449 = vmatmul.msk.f32.gmra.mxu1 %vm678_vm2, %v2242_v44  ;;  %v2467_v5 = vld [vmem:[%s13321_s4 + $0x1b0] sm:$0xff]  ;;  %2731 = vmatpush.msrb.mxu2 %v2435_v22  ;;  %v1969_v45 = vld [vmem:[#allocation2 + $0xe5] sm:$0xff]  ;;  %v9909_v44 = vpop.f32.mrf.mxu1 }
 0x1db   : > { %2981 = vmatpush.msrb.mxu0 %v2467_v5  ;;  %v1970_v1 = vld [vmem:[#allocation2 + $0xed] sm:$0xff]  ;;  %v2378_v5 = vld [vmem:[#allocation5 + $0x488] sm:$0xff] }
 0x1dd   : > { %2037 = vrot.lane.b32.xlu1 %v1955_v15, %s8618_s17  ;;  %2035 = vrot.lane.b32.xlu0 %v1954_v50, %s8618_s17 }
 0x1df   : > { %2021 = vrot.lane.b32.xlu2 %v1947_v54, %s8618_s17  ;;  %v1480_v4 = vpop.permute.xlu1 %1479  ;;  %v1195_v58 = vpop.permute.xlu0 %1194  ;;  %v2343_v24 = vld [vmem:[#allocation5 + $0x370] sm:$0xff] }
 0x1e0   : > { %1568 = vst.msk [vmem:[#allocation5 + $0x300] sm:$0xff] %vm1260_vm3, %v1480_v4  ;;  %v2358_v4 = vld [vmem:[#allocation5 + $0x3e8] sm:$0xff] }
 0x1e1   : > { %1282 = vst.msk [vmem:[#allocation5 + $0x348] sm:$0xff] %vm1260_vm3, %v1195_v58  ;;  %v1482_v53 = vpop.permute.xlu2 %1481  ;;  %v2333_v62 = vld [vmem:[#allocation5 + $0x320] sm:$0xff]  ;;  %2875 = vmatmul.f32.gmra.mxu3 %v2255_v51  ;;  %v2272_v58 = vld [vmem:[#allocation5 + $0x138] sm:$0xff]  ;;  %v2434_v51 = vld [vmem:[%s13321_s4 + $0xa8] sm:$0xff] }
 0x1e2   : > { %1569 = vst.msk [vmem:[#allocation5 + $0x328] sm:$0xff] %vm1260_vm3, %v1482_v53  ;;  %2673 = vmatmul.f32.gmra.mxu2 %v2333_v62  ;;  %8450 = vmatmul.msk.f32.gmra.mxu1 %vm678_vm2, %v2247_v7  ;;  %v1973_v53 = vld [vmem:[#allocation2 + $0x105] sm:$0xff]  ;;  %v1972_v62 = vld [vmem:[#allocation2 + $0xfd] sm:$0xff]  ;;  %v9921_v7 = vpop.f32.mrf.mxu1 }
 0x1e3   : > { %2732 = vmatpush.msrb.mxu2 %v2434_v51 }
 0x1e5   : > { %2043 = vrot.lane.b32.xlu1 %v1958_v2, %s8618_s17  ;;  %2041 = vrot.lane.b32.xlu0 %v1957_v3, %s8618_s17  ;;  %v1965_v2 = vld [vmem:[#allocation2 + $0xc5] sm:$0xff] }
 0x1e7   : > { %2027 = vrot.lane.b32.xlu2 %v1950_v30, %s8618_s17  ;;  %v1744_v6 = vpop.permute.xlu1 %1743  ;;  %v1742_v34 = vpop.permute.xlu0 %1741 }
 0x1e8   : > { %1844 = vst.msk [vmem:[#allocation5 + $0x128] sm:$0xff] %vm1260_vm3, %v1744_v6  ;;  %v2338_v12 = vld [vmem:[#allocation5 + $0x348] sm:$0xff]  ;;  %v2466_v6 = vld [vmem:[%s13321_s4 + $0x1a8] sm:$0xff] }
 0x1e9   : > { %1843 = vst.msk [vmem:[#allocation5 + $0x100] sm:$0xff] %vm1260_vm3, %v1742_v34  ;;  %v1746_v10 = vpop.permute.xlu2 %1745  ;;  %2878 = vmatmul.f32.gmra.mxu3 %v2260_v57  ;;  %2982 = vmatpush.msrb.mxu0 %v2466_v6  ;;  %v2433_v57 = vld [vmem:[%s13321_s4 + $0xa0] sm:$0xff] }
 0x1ea   : > { %1845 = vst.msk [vmem:[#allocation5 + $0x150] sm:$0xff] %vm1260_vm3, %v1746_v10  ;;  %2676 = vmatmul.f32.gmra.mxu2 %v2338_v12  ;;  %8451 = vmatmul.msk.f32.gmra.mxu1 %vm678_vm2, %v2252_v60  ;;  %v2277_v12 = vld [vmem:[#allocation5 + $0x160] sm:$0xff] }
 0x1eb   : > { %2733 = vmatpush.msrb.mxu2 %v2433_v57  ;;  %v1976_v10 = vld [vmem:[#allocation2 + $0x11d] sm:$0xff]  ;;  %v1975_v60 = vld [vmem:[#allocation2 + $0x115] sm:$0xff] }
 0x1ec   : > { %v1980_v6 = vld [vmem:[#allocation2 + $0x13d] sm:$0xff] }
 0x1ed   : > { %2049 = vrot.lane.b32.xlu1 %v1961_v13, %s8618_s17  ;;  %2047 = vrot.lane.b32.xlu0 %v1960_v49, %s8618_s17  ;;  %v1968_v13 = vld [vmem:[#allocation2 + $0xdd] sm:$0xff] }
 0x1ef   : > { %2033 = vrot.lane.b32.xlu2 %v1953_v14, %s8618_s17  ;;  %v1750_v8 = vpop.permute.xlu1 %1749  ;;  %v1748_v52 = vpop.permute.xlu0 %1747  ;;  %v2270_v36 = vld [vmem:[#allocation5 + $0x128] sm:$0xff] }
 0x1f0   : > { %1847 = vst.msk [vmem:[#allocation5 + $0x1a0] sm:$0xff] %vm1260_vm3, %v1750_v8  ;;  %v2265_v19 = vld [vmem:[#allocation5 + $0x100] sm:$0xff]  ;;  %v2465_v8 = vld [vmem:[%s13321_s4 + $0x1a0] sm:$0xff] }
 0x1f1   : > { %1846 = vst.msk [vmem:[#allocation5 + $0x178] sm:$0xff] %vm1260_vm3, %v1748_v52  ;;  %v1752_v20 = vpop.permute.xlu2 %1751  ;;  %2881 = vmatmul.f32.gmra.mxu3 %v2265_v19  ;;  %v2275_v43 = vld [vmem:[#allocation5 + $0x150] sm:$0xff]  ;;  %v9940_v52 = vpop.f32.mrf.mxu1  ;;  %2983 = vmatpush.msrb.mxu0 %v2465_v8 }
 0x1f2   : > { %1848 = vst.msk [vmem:[#allocation5 + $0x1c8] sm:$0xff] %vm1260_vm3, %v1752_v20  ;;  %2679 = vmatmul.f32.gmra.mxu2 %v2343_v24  ;;  %8452 = vmatmul.msk.f32.gmra.mxu1 %vm678_vm2, %v2257_v28  ;;  %v2368_v20 = vld [vmem:[#allocation5 + $0x438] sm:$0xff]  ;;  %v2282_v24 = vld [vmem:[#allocation5 + $0x188] sm:$0xff] }
 0x1f3   : > { %v1979_v28 = vld [vmem:[#allocation2 + $0x135] sm:$0xff]  ;;  %2984 = vmatpush.msrb.mxu0 %v2464_v11 }
 0x1f4   : > { %v2393_v11 = vld [vmem:[#allocation5 + $0x500] sm:$0xff] }
 0x1f5   : > { %2055 = vrot.lane.b32.xlu1 %v1964_v33, %s8618_s17  ;;  %2053 = vrot.lane.b32.xlu0 %v1963_v46, %s8618_s17  ;;  %v2463_v33 = vld [vmem:[%s13321_s4 + $0x190] sm:$0xff]  ;;  %v2432_v46 = vld [vmem:[%s13321_s4 + $0x98] sm:$0xff] }
 0x1f6   : > { %2734 = vmatpush.msrb.mxu2 %v2432_v46  ;;  %2985 = vmatpush.msrb.mxu0 %v2463_v33  ;;  %v2307_v33 = vld [vmem:[#allocation5 + $0x250] sm:$0xff] }
 0x1f7   : > { %2039 = vrot.lane.b32.xlu2 %v1956_v32, %s8618_s17  ;;  %v1756_v21 = vpop.permute.xlu1 %1755  ;;  %v1754_v18 = vpop.permute.xlu0 %1753  ;;  %v2285_v34 = vld [vmem:[#allocation5 + $0x1a0] sm:$0xff]  ;;  %v1978_v32 = vld [vmem:[#allocation2 + $0x12d] sm:$0xff] }
 0x1f8   : > { %1850 = vst.msk [vmem:[#allocation5 + $0x218] sm:$0xff] %vm1260_vm3, %v1756_v21  ;;  %v2280_v50 = vld [vmem:[#allocation5 + $0x178] sm:$0xff]  ;;  %v2462_v21 = vld [vmem:[%s13321_s4 + $0x188] sm:$0xff] }
 0x1f9   : > { %1849 = vst.msk [vmem:[#allocation5 + $0x1f0] sm:$0xff] %vm1260_vm3, %v1754_v18  ;;  %v1758_v35 = vpop.permute.xlu2 %1757  ;;  %2884 = vmatmul.f32.gmra.mxu3 %v2270_v36  ;;  %v2290_v17 = vld [vmem:[#allocation5 + $0x1c8] sm:$0xff]  ;;  %v1971_v18 = vld [vmem:[#allocation2 + $0xf5] sm:$0xff]  ;;  %2986 = vmatpush.msrb.mxu0 %v2462_v21  ;;  %v3312_v46 = vld [vmem:[%s13318_s1 + $0x68] sm:$0xff] }
 0x1fa   : > { %1851 = vst.msk [vmem:[#allocation5 + $0x240] sm:$0xff] %vm1260_vm3, %v1758_v35  ;;  %2682 = vmatmul.f32.gmra.mxu2 %v2348_v37  ;;  %8453 = vmatmul.msk.f32.gmra.mxu1 %vm678_vm2, %v2262_v26  ;;  %v2461_v26 = vld [vmem:[%s13321_s4 + $0x180] sm:$0xff]  ;;  %v10055_v21 = vld [vmem:[%s13318_s1 + $0x28] sm:$0xff] }
 0x1fb   : > { %2987 = vmatpush.msrb.mxu0 %v2461_v26 }
 0x1fd   : > { %2061 = vrot.lane.b32.xlu1 %v1967_v39, %s8618_s17  ;;  %2059 = vrot.lane.b32.xlu0 %v1966_v27, %s8618_s17  ;;  %v2287_v39 = vld [vmem:[#allocation5 + $0x1b0] sm:$0xff]  ;;  %v9966_v27 = vpop.f32.mrf.mxu1 }
 0x1ff   : > { %2045 = vrot.lane.b32.xlu2 %v1959_v59, %s8618_s17  ;;  %v1762_v0 = vpop.permute.xlu1 %1761  ;;  %v1760_v42 = vpop.permute.xlu0 %1759  ;;  %v9973_v59 = vld [vmem:[%s13318_s1 + $0x8] sm:$0xff] }
 0x200   : > { %1853 = vst.msk [vmem:[#allocation5 + $0x290] sm:$0xff] %vm1260_vm3, %v1762_v0  ;;  %v2295_v37 = vld [vmem:[#allocation5 + $0x1f0] sm:$0xff]  ;;  %v9978_v0 = vld [vmem:[%s13318_s1] sm:$0xff] }
 0x201   : > { %1852 = vst.msk [vmem:[#allocation5 + $0x268] sm:$0xff] %vm1260_vm3, %v1760_v42  ;;  %v1764_v55 = vpop.permute.xlu2 %1763  ;;  %2887 = vmatmul.f32.gmra.mxu3 %v2275_v43  ;;  %v2431_v42 = vld [vmem:[%s13321_s4 + $0x90] sm:$0xff] }
 0x202   : > { %1854 = vst.msk [vmem:[#allocation5 + $0x2b8] sm:$0xff] %vm1260_vm3, %v1764_v55  ;;  %2685 = vmatmul.f32.gmra.mxu2 %v2353_v23  ;;  %8454 = vmatmul.msk.f32.gmra.mxu1 %vm678_vm2, %v2267_v9  ;;  %v1974_v43 = vld [vmem:[#allocation2 + $0x10d] sm:$0xff] }
 0x203   : > { %2735 = vmatpush.msrb.mxu2 %v2431_v42  ;;  %v2300_v9 = vld [vmem:[#allocation5 + $0x218] sm:$0xff]  ;;  %v3315_v42 = vld [vmem:[%s13318_s1 + $0x80] sm:$0xff] }
 0x205   : > { %2067 = vrot.lane.b32.xlu1 %v1970_v1, %s8618_s17  ;;  %2065 = vrot.lane.b32.xlu0 %v1969_v45, %s8618_s17  ;;  %v2292_v1 = vld [vmem:[#allocation5 + $0x1d8] sm:$0xff]  ;;  %v9988_v45 = vpop.f32.mrf.mxu1 }
 0x207   : > { %2051 = vrot.lane.b32.xlu2 %v1962_v61, %s8618_s17  ;;  %v1768_v47 = vpop.permute.xlu1 %1767  ;;  %v1766_v15 = vpop.permute.xlu0 %1765  ;;  %v9995_v61 = vld [vmem:[%s13318_s1 + $0x20] sm:$0xff] }
 0x208   : > { %1856 = vst.msk [vmem:[#allocation5 + $0x308] sm:$0xff] %vm1260_vm3, %v1768_v47  ;;  %v10000_v47 = vld [vmem:[%s13318_s1 + $0x18] sm:$0xff] }
 0x209   : > { %1855 = vst.msk [vmem:[#allocation5 + $0x2e0] sm:$0xff] %vm1260_vm3, %v1766_v15  ;;  %v1770_v54 = vpop.permute.xlu2 %1769  ;;  %2890 = vmatmul.f32.gmra.mxu3 %v2280_v50  ;;  %v1977_v15 = vld [vmem:[#allocation2 + $0x125] sm:$0xff] }
 0x20a   : > { %1857 = vst.msk [vmem:[#allocation5 + $0x330] sm:$0xff] %vm1260_vm3, %v1770_v54  ;;  %2688 = vmatmul.f32.gmra.mxu2 %v2358_v4  ;;  %8455 = vmatmul.msk.f32.gmra.mxu1 %vm678_vm2, %v2272_v58  ;;  %v2430_v4 = vld [vmem:[%s13321_s4 + $0x88] sm:$0xff]  ;;  %v2305_v58 = vld [vmem:[#allocation5 + $0x240] sm:$0xff] }
 0x20b   : > { %2736 = vmatpush.msrb.mxu2 %v2430_v4  ;;  %v3318_v4 = vld [vmem:[%s13318_s1 + $0x98] sm:$0xff] }
 0x20d   : > { %2073 = vrot.lane.b32.xlu1 %v1973_v53, %s8618_s17  ;;  %2071 = vrot.lane.b32.xlu0 %v1972_v62, %s8618_s17  ;;  %v2383_v53 = vld [vmem:[#allocation5 + $0x4b0] sm:$0xff]  ;;  %v2297_v62 = vld [vmem:[#allocation5 + $0x200] sm:$0xff] }
 0x20f   : > { %2057 = vrot.lane.b32.xlu2 %v1965_v2, %s8618_s17  ;;  %v1774_v3 = vpop.permute.xlu1 %1773  ;;  %v1772_v30 = vpop.permute.xlu0 %1771  ;;  %v3306_v2 = vld [vmem:[%s13318_s1 + $0x38] sm:$0xff] }
 0x210   : > { %1859 = vst.msk [vmem:[#allocation5 + $0x380] sm:$0xff] %vm1260_vm3, %v1774_v3  ;;  %v3305_v3 = vld [vmem:[%s13318_s1 + $0x30] sm:$0xff] }
 0x211   : > { %1858 = vst.msk [vmem:[#allocation5 + $0x358] sm:$0xff] %vm1260_vm3, %v1772_v30  ;;  %v1776_v31 = vpop.permute.xlu2 %1775  ;;  %2893 = vmatmul.f32.gmra.mxu3 %v2285_v34  ;;  %v10018_v30 = vpop.f32.mrf.mxu1 }
 0x212   : > { %1860 = vst.msk [vmem:[#allocation5 + $0x3a8] sm:$0xff] %vm1260_vm3, %v1776_v31  ;;  %2691 = vmatmul.f32.gmra.mxu2 %v2363_v25  ;;  %8456 = vmatmul.msk.f32.gmra.mxu1 %vm678_vm2, %v2277_v12  ;;  %v2429_v25 = vld [vmem:[%s13321_s4 + $0x80] sm:$0xff] }
 0x213   : > { %v2310_v12 = vld [vmem:[#allocation5 + $0x268] sm:$0xff]  ;;  %2737 = vmatpush.msrb.mxu2 %v2429_v25 }
 0x214   : > { %v2322_v25 = vld [vmem:[#allocation5 + $0x2c8] sm:$0xff] }
 0x215   : > { %2079 = vrot.lane.b32.xlu1 %v1976_v10, %s8618_s17  ;;  %2077 = vrot.lane.b32.xlu0 %v1975_v60, %s8618_s17  ;;  %v2388_v10 = vld [vmem:[#allocation5 + $0x4d8] sm:$0xff]  ;;  %v2302_v60 = vld [vmem:[#allocation5 + $0x228] sm:$0xff] }
 0x217   : > { %2063 = vrot.lane.b32.xlu2 %v1968_v13, %s8618_s17  ;;  %v1780_v49 = vpop.permute.xlu1 %1779  ;;  %v1778_v14 = vpop.permute.xlu0 %1777  ;;  %v3309_v13 = vld [vmem:[%s13318_s1 + $0x50] sm:$0xff] }
 0x218   : > { %1862 = vst.msk [vmem:[#allocation5 + $0x3f8] sm:$0xff] %vm1260_vm3, %v1780_v49  ;;  %v3308_v49 = vld [vmem:[%s13318_s1 + $0x48] sm:$0xff] }
 0x219   : > { %1861 = vst.msk [vmem:[#allocation5 + $0x3d0] sm:$0xff] %vm1260_vm3, %v1778_v14  ;;  %v1782_v19 = vpop.permute.xlu2 %1781  ;;  %2896 = vmatmul.f32.gmra.mxu3 %v2290_v17  ;;  %v10037_v14 = vld [vmem:[%s13318_s1 + $0x10] sm:$0xff]  ;;  %v10039_v8 = vpop.f32.mrf.mxu1 }
 0x21a   : > { %1863 = vst.msk [vmem:[#allocation5 + $0x420] sm:$0xff] %vm1260_vm3, %v1782_v19  ;;  %2694 = vmatmul.f32.gmra.mxu2 %v2368_v20  ;;  %8457 = vmatmul.msk.f32.gmra.mxu1 %vm678_vm2, %v2282_v24  ;;  %v2315_v20 = vld [vmem:[#allocation5 + $0x290] sm:$0xff] }
 0x21d   : > { %2085 = vrot.lane.b32.xlu1 %v1979_v28, %s8618_s17  ;;  %2083 = vrot.lane.b32.xlu0 %v1978_v32, %s8618_s17  ;;  %v3311_v32 = vld [vmem:[%s13318_s1 + $0x60] sm:$0xff] }
 0x21f   : > { %2069 = vrot.lane.b32.xlu2 %v1971_v18, %s8618_s17  ;;  %v1786_v36 = vpop.permute.xlu1 %1785  ;;  %v1784_v35 = vpop.permute.xlu0 %1783 }
 0x220   : > { %1865 = vst.msk [vmem:[#allocation5 + $0x470] sm:$0xff] %vm1260_vm3, %v1786_v36 }
 0x221   : > { %1864 = vst.msk [vmem:[#allocation5 + $0x448] sm:$0xff] %vm1260_vm3, %v1784_v35  ;;  %v1788_v41 = vpop.permute.xlu2 %1787  ;;  %2899 = vmatmul.f32.gmra.mxu3 %v2295_v37  ;;  %v10057_v18 = vpop.f32.mrf.mxu1  ;;  %v2320_v37 = vld [vmem:[#allocation5 + $0x2b8] sm:$0xff] }
 0x222   : > { %1866 = vst.msk [vmem:[#allocation5 + $0x498] sm:$0xff] %vm1260_vm3, %v1788_v41  ;;  %2697 = vmatmul.f32.gmra.mxu2 %v2373_v38  ;;  %8458 = vmatmul.msk.f32.gmra.mxu1 %vm678_vm2, %v2287_v39  ;;  %v2398_v38 = vld [vmem:[#allocation5 + $0x528] sm:$0xff]  ;;  %v2312_v39 = vld [vmem:[#allocation5 + $0x278] sm:$0xff] }
 0x225   : > { %3342 = vperm.xlu1 %8597, %v9973_v59   ;;  %3337 = vperm.xlu0 %8596, %v9978_v0  }
 0x227   : > { %2075 = vrot.lane.b32.xlu2 %v1974_v43, %s8618_s17  ;;  %v1792_v55 = vpop.permute.xlu1 %1791  ;;  %v1790_v23 = vpop.permute.xlu0 %1789  ;;  %v3314_v43 = vld [vmem:[%s13318_s1 + $0x78] sm:$0xff] }
 0x228   : > { %1868 = vst.msk [vmem:[#allocation5 + $0x4e8] sm:$0xff] %vm1260_vm3, %v1792_v55  ;;  %v3307_v55 = vld [vmem:[%s13318_s1 + $0x40] sm:$0xff] }
 0x229   : > { %1867 = vst.msk [vmem:[#allocation5 + $0x4c0] sm:$0xff] %vm1260_vm3, %v1790_v23  ;;  %v1794_v22 = vpop.permute.xlu2 %1793  ;;  %2902 = vmatmul.f32.gmra.mxu3 %v2300_v9 }
 0x22a   : > { %1869 = vst.msk [vmem:[#allocation5 + $0x510] sm:$0xff] %vm1260_vm3, %v1794_v22  ;;  %2700 = vmatmul.f32.gmra.mxu2 %v2378_v5  ;;  %8459 = vmatmul.msk.f32.gmra.mxu1 %vm678_vm2, %v2292_v1  ;;  %v10073_v22 = vpop.f32.mrf.mxu1  ;;  %v2325_v5 = vld [vmem:[#allocation5 + $0x2e0] sm:$0xff] }
 0x22b   : > { %13330 = vst [vmem:[#allocation6_spill] sm:$0xff] %v10073_v22 }
 0x22d   : > { %3357 = vperm.xlu1 %8597, %v9995_v61   ;;  %3352 = vperm.xlu0 %8596, %v10000_v47  }
 0x22f   : > { %2081 = vrot.lane.b32.xlu2 %v1977_v15, %s8618_s17  ;;  %v1798_v50 = vpop.permute.xlu1 %1797  ;;  %v1796_v54 = vpop.permute.xlu0 %1795  ;;  %v2390_v48 = vld [vmem:[#allocation5 + $0x4e8] sm:$0xff] }
 0x230   : > { %1871 = vst.msk [vmem:[#allocation5 + $0x560] sm:$0xff] %vm1260_vm3, %v1798_v50  ;;  %v2403_v50 = vld [vmem:[#allocation5 + $0x550] sm:$0xff] }
 0x231   : > { %1870 = vst.msk [vmem:[#allocation5 + $0x538] sm:$0xff] %vm1260_vm3, %v1796_v54  ;;  %v1800_v51 = vpop.permute.xlu2 %1799  ;;  %2905 = vmatmul.f32.gmra.mxu3 %v2305_v58  ;;  %v2317_v54 = vld [vmem:[#allocation5 + $0x2a0] sm:$0xff]  ;;  %v3317_v58 = vld [vmem:[%s13318_s1 + $0x90] sm:$0xff] }
 0x232   : > { %1872 = vst.msk [vmem:[#allocation5 + $0x588] sm:$0xff] %vm1260_vm3, %v1800_v51  ;;  %2703 = vmatmul.f32.gmra.mxu2 %v2383_v53  ;;  %8460 = vmatmul.msk.f32.gmra.mxu1 %vm678_vm2, %v2297_v62  ;;  %v3310_v53 = vld [vmem:[%s13318_s1 + $0x58] sm:$0xff] }
 0x235   : > { %3372 = vperm.xlu1 %8597, %v3306_v2   ;;  %3367 = vperm.xlu0 %8596, %v3305_v3   ;;  %v2330_v3 = vld [vmem:[#allocation5 + $0x308] sm:$0xff] }
 0x237   : > { %2087 = vrot.lane.b32.xlu2 %v1980_v6, %s8618_s17  ;;  %v2020_v34 = vpop.permute.xlu1 %2019  ;;  %v2018_v31 = vpop.permute.xlu0 %2017 }
 0x238   : > { %2126 = vst.msk [vmem:[#allocation5 + $0x40] sm:$0xff] %vm1260_vm3, %v2020_v34 }
 0x239   : > { %2125 = vst.msk [vmem:[#allocation5 + $0x18] sm:$0xff] %vm1260_vm3, %v2018_v31  ;;  %v2022_v57 = vpop.permute.xlu2 %2021  ;;  %2908 = vmatmul.f32.gmra.mxu3 %v2310_v12  ;;  %v2408_v31 = vld [vmem:[#allocation5 + $0x578] sm:$0xff]  ;;  %v10092_v12 = vpop.f32.mrf.mxu1 }
 0x23a   : > { %2127 = vst.msk [vmem:[#allocation5 + $0x68] sm:$0xff] %vm1260_vm3, %v2022_v57  ;;  %2706 = vmatmul.f32.gmra.mxu2 %v2388_v10  ;;  %8461 = vmatmul.msk.f32.gmra.mxu1 %vm678_vm2, %v2302_v60  ;;  %v3321_v57 = vld [vmem:[%s13318_s1 + $0xb0] sm:$0xff]  ;;  %v3320_v10 = vld [vmem:[%s13318_s1 + $0xa8] sm:$0xff] }
 0x23b   : > { %13332 = vst [vmem:[#allocation8_spill] sm:$0xff] %v10092_v12 }
 0x23d   : > { %3387 = vperm.xlu1 %8597, %v3309_v13   ;;  %3382 = vperm.xlu0 %8596, %v3308_v49   ;;  %v3313_v13 = vld [vmem:[%s13318_s1 + $0x70] sm:$0xff] }
 0x23f   : > { %3347 = vperm.xlu2 %8598, %v10037_v14   ;;  %v2026_v17 = vpop.permute.xlu1 %2025  ;;  %v2024_v19 = vpop.permute.xlu0 %2023  ;;  %v2241_v26 = vld [vmem:[#allocation5 + $0x40] sm:$0xff] }
 0x240   : > { %2129 = vst.msk [vmem:[#allocation5 + $0xb8] sm:$0xff] %vm1260_vm3, %v2026_v17  ;;  %v2236_v24 = vld [vmem:[#allocation5 + $0x18] sm:$0xff] }
 0x241   : > { %2128 = vst.msk [vmem:[#allocation5 + $0x90] sm:$0xff] %vm1260_vm3, %v2024_v19  ;;  %v2028_v28 = vpop.permute.xlu2 %2027  ;;  %2911 = vmatmul.f32.gmra.mxu3 %v2315_v20  ;;  %2988 = vmatmul.f32.vlgmr.msrb.gmra.mxu0 %v2236_v24  ;;  %v2246_v1 = vld [vmem:[#allocation5 + $0x68] sm:$0xff]  ;;  %v2335_v19 = vld [vmem:[#allocation5 + $0x330] sm:$0xff] }
 0x242   : > { %2130 = vst.msk [vmem:[#allocation5 + $0xe0] sm:$0xff] %vm1260_vm3, %v2028_v28  ;;  %2709 = vmatmul.f32.gmra.mxu2 %v2393_v11  ;;  %8462 = vmatmul.msk.f32.gmra.mxu1 %vm678_vm2, %v2307_v33  ;;  %v2234_v28 = vld [vmem:[#allocation5 + $0x8] sm:$0xff]  ;;  %v2327_v11 = vld [vmem:[#allocation5 + $0x2f0] sm:$0xff]  ;;  %v10109_v33 = vpop.f32.mrf.mxu1 }
 0x243   : > { %13334 = vst [vmem:[#allocation10_spill] sm:$0xff] %v10109_v33 }
 0x245   : > { %3402 = vperm.xlu1 %8597, %v3312_v46   ;;  %3397 = vperm.xlu0 %8596, %v3311_v32   ;;  %v3324_v46 = vld [vmem:[%s13318_s1 + $0xc8] sm:$0xff]  ;;  %v3323_v32 = vld [vmem:[%s13318_s1 + $0xc0] sm:$0xff] }
 0x247   : > { %3362 = vperm.xlu2 %8598, %v10055_v21   ;;  %v2032_v36 = vpop.permute.xlu1 %2031  ;;  %v2030_v35 = vpop.permute.xlu0 %2029  ;;  %v2256_v20 = vld [vmem:[#allocation5 + $0xb8] sm:$0xff] }
 0x248   : > { %2132 = vst.msk [vmem:[#allocation5 + $0x130] sm:$0xff] %vm1260_vm3, %v2032_v36  ;;  %v2251_v6 = vld [vmem:[#allocation5 + $0x90] sm:$0xff] }
 0x249   : > { %2131 = vst.msk [vmem:[#allocation5 + $0x108] sm:$0xff] %vm1260_vm3, %v2030_v35  ;;  %v2034_v41 = vpop.permute.xlu2 %2033  ;;  %2914 = vmatmul.f32.gmra.mxu3 %v2320_v37  ;;  %2991 = vmatmul.f32.gmra.mxu0 %v2241_v26  ;;  %v3316_v36 = vld [vmem:[%s13318_s1 + $0x88] sm:$0xff] }
 0x24a   : > { %2133 = vst.msk [vmem:[#allocation5 + $0x158] sm:$0xff] %vm1260_vm3, %v2034_v41  ;;  %2712 = vmatmul.f32.gmra.mxu2 %v2398_v38  ;;  %8463 = vmatmul.msk.f32.gmra.mxu1 %vm678_vm2, %v2312_v39  ;;  %v2340_v41 = vld [vmem:[#allocation5 + $0x358] sm:$0xff]  ;;  %v2261_v38 = vld [vmem:[#allocation5 + $0xe0] sm:$0xff] }
 0x24d   : > { %3417 = vperm.xlu1 %8597, %v3315_v42   ;;  %3412 = vperm.xlu0 %8596, %v3314_v43   ;;  %v2239_v42 = vld [vmem:[#allocation5 + $0x30] sm:$0xff]  ;;  %v2332_v43 = vld [vmem:[#allocation5 + $0x318] sm:$0xff] }
 0x24f   : > { %3377 = vperm.xlu2 %8598, %v3307_v55   ;;  %v2038_v23 = vpop.permute.xlu1 %2037  ;;  %v2036_v9 = vpop.permute.xlu0 %2035  ;;  %v3327_v55 = vld [vmem:[%s13318_s1 + $0xe0] sm:$0xff] }
 0x250   : > { %2135 = vst.msk [vmem:[#allocation5 + $0x1a8] sm:$0xff] %vm1260_vm3, %v2038_v23  ;;  %v3326_v23 = vld [vmem:[%s13318_s1 + $0xd8] sm:$0xff] }
 0x251   : > { %2134 = vst.msk [vmem:[#allocation5 + $0x180] sm:$0xff] %vm1260_vm3, %v2036_v9  ;;  %v2040_v15 = vpop.permute.xlu2 %2039  ;;  %2917 = vmatmul.f32.gmra.mxu3 %v2325_v5  ;;  %2994 = vmatmul.f32.gmra.mxu0 %v2246_v1  ;;  %v10134_v9 = vpop.f32.mrf.mxu1  ;;  %v3319_v5 = vld [vmem:[%s13318_s1 + $0xa0] sm:$0xff] }
 0x252   : > { %2136 = vst.msk [vmem:[#allocation5 + $0x1d0] sm:$0xff] %vm1260_vm3, %v2040_v15  ;;  %2715 = vmatmul.f32.gmra.mxu2 %v2403_v50  ;;  %8464 = vmatmul.msk.f32.gmra.mxu1 %vm678_vm2, %v2317_v54  ;;  %v10141_v15 = vpop.f32.mrf.mxu3 }
 0x253   : > { %13336 = vst [vmem:[#allocation12_spill] sm:$0xff] %v10134_v9 }
 0x254   : > { %v10085_v51 = vpop.f32.mrf.mxu2 }
 0x255   : > { %13331 = vst [vmem:[#allocation7_spill] sm:$0xff] %v10085_v51  ;;  %3432 = vperm.xlu1 %8597, %v3318_v4   ;;  %3427 = vperm.xlu0 %8596, %v3317_v58   ;;  %v2345_v4 = vld [vmem:[#allocation5 + $0x380] sm:$0xff]  ;;  %v2266_v58 = vld [vmem:[#allocation5 + $0x108] sm:$0xff] }
 0x257   : > { %3392 = vperm.xlu2 %8598, %v3310_v53   ;;  %v2044_v62 = vpop.permute.xlu1 %2043  ;;  %v2042_v2 = vpop.permute.xlu0 %2041  ;;  %v1907_v53 = vld [vmem:[#allocation2 + $0x134] sm:$0xff] }
 0x258   : > { %2138 = vst.msk [vmem:[#allocation5 + $0x220] sm:$0xff] %vm1260_vm3, %v2044_v62 }
 0x259   : > { %2137 = vst.msk [vmem:[#allocation5 + $0x1f8] sm:$0xff] %vm1260_vm3, %v2042_v2  ;;  %v2046_v34 = vpop.permute.xlu2 %2045  ;;  %2920 = vmatmul.f32.gmra.mxu3 %v2330_v3  ;;  %2997 = vmatmul.f32.gmra.mxu0 %v2251_v6  ;;  %v2244_v2 = vld [vmem:[#allocation5 + $0x58] sm:$0xff]  ;;  %v2337_v3 = vld [vmem:[#allocation5 + $0x340] sm:$0xff] }
 0x25a   : > { %2139 = vst.msk [vmem:[#allocation5 + $0x248] sm:$0xff] %vm1260_vm3, %v2046_v34  ;;  %2718 = vmatmul.f32.gmra.mxu2 %v2408_v31  ;;  %8465 = vmatmul.msk.f32.gmra.mxu1 %vm678_vm2, %v2322_v25  ;;  %v1908_v6 = vld [vmem:[#allocation2 + $0x13c] sm:$0xff]  ;;  %v3329_v31 = vld [vmem:[%s13318_s1 + $0xf0] sm:$0xff] }
 0x25b   : > { %v3330_v34 = vld [vmem:[%s13318_s1 + $0xf8] sm:$0xff]  ;;  %1943 = vst.msk [vmem:[#allocation5 + $0x568] sm:$0xff] %vm678_vm2, %v1907_v53 }
 0x25c   : > { %v10102_v60 = vpop.f32.mrf.mxu2  ;;  %v3322_v25 = vld [vmem:[%s13318_s1 + $0xb8] sm:$0xff]  ;;  %1944 = vst.msk [vmem:[#allocation5 + $0x590] sm:$0xff] %vm678_vm2, %v1908_v6  ;;  %v2360_v6 = vld [vmem:[#allocation5 + $0x3f8] sm:$0xff] }
 0x25d   : > { %13333 = vst [vmem:[#allocation9_spill] sm:$0xff] %v10102_v60  ;;  %3447 = vperm.xlu1 %8597, %v3321_v57   ;;  %3442 = vperm.xlu0 %8596, %v3320_v10   ;;  %v10160_v10 = vpop.f32.mrf.mxu1 }
 0x25e   : > { %13339 = vst [vmem:[#allocation15_spill] sm:$0xff] %v10160_v10 }
 0x25f   : > { %3407 = vperm.xlu2 %8598, %v3313_v13   ;;  %v2050_v49 = vpop.permute.xlu1 %2049  ;;  %v2048_v17 = vpop.permute.xlu0 %2047  ;;  %v5006_v13 = vld [vmem:[%s13323_s6 + $0x78] sm:$0xff] }
 0x260   : > { %2141 = vst.msk [vmem:[#allocation5 + $0x298] sm:$0xff] %vm1260_vm3, %v2050_v49  ;;  %5175 = vmatpush.msra.mxu2 %v5006_v13  ;;  %v2259_v13 = vld [vmem:[#allocation5 + $0xd0] sm:$0xff] }
 0x261   : > { %2140 = vst.msk [vmem:[#allocation5 + $0x270] sm:$0xff] %vm1260_vm3, %v2048_v17  ;;  %v2052_v24 = vpop.permute.xlu2 %2051  ;;  %2923 = vmatmul.f32.gmra.mxu3 %v2335_v19  ;;  %3000 = vmatmul.f32.gmra.mxu0 %v2256_v20  ;;  %v2350_v19 = vld [vmem:[#allocation5 + $0x3a8] sm:$0xff]  ;;  %v2271_v20 = vld [vmem:[#allocation5 + $0x130] sm:$0xff] }
 0x262   : > { %2142 = vst.msk [vmem:[#allocation5 + $0x2c0] sm:$0xff] %vm1260_vm3, %v2052_v24  ;;  %2738 = vmatmul.f32.vlgmr.msrb.gmra.mxu2 %v2234_v28  ;;  %8466 = vmatmul.msk.f32.gmra.mxu1 %vm678_vm2, %v2327_v11  ;;  %v10166_v24 = vpop.f32.mrf.mxu3  ;;  %v2249_v11 = vld [vmem:[#allocation5 + $0x80] sm:$0xff] }
 0x265   : > { %v10122_v35 = vpop.f32.mrf.mxu2  ;;  %3462 = vperm.xlu1 %8597, %v3324_v46   ;;  %3457 = vperm.xlu0 %8596, %v3323_v32   ;;  %v2342_v46 = vld [vmem:[#allocation5 + $0x368] sm:$0xff]  ;;  %v3333_v32 = vld [vmem:[%s13318_s1 + $0x110] sm:$0xff] }
 0x266   : > { %13335 = vst [vmem:[#allocation11_spill] sm:$0xff] %v10122_v35 }
 0x267   : > { %3422 = vperm.xlu2 %8598, %v3316_v36   ;;  %v2056_v37 = vpop.permute.xlu1 %2055  ;;  %v2054_v26 = vpop.permute.xlu0 %2053  ;;  %v3332_v36 = vld [vmem:[%s13318_s1 + $0x108] sm:$0xff] }
 0x268   : > { %2144 = vst.msk [vmem:[#allocation5 + $0x310] sm:$0xff] %vm1260_vm3, %v2056_v37  ;;  %v3325_v37 = vld [vmem:[%s13318_s1 + $0xd0] sm:$0xff] }
 0x269   : > { %2143 = vst.msk [vmem:[#allocation5 + $0x2e8] sm:$0xff] %vm1260_vm3, %v2054_v26  ;;  %v2058_v39 = vpop.permute.xlu2 %2057  ;;  %2926 = vmatmul.f32.gmra.mxu3 %v2340_v41  ;;  %3003 = vmatmul.f32.gmra.mxu0 %v2261_v38  ;;  %v10182_v38 = vpop.f32.mrf.mxu1  ;;  %v2321_v51 = vld [vmem:[#allocation5 + $0x2c0] sm:$0xff] }
 0x26a   : > { %2145 = vst.msk [vmem:[#allocation5 + $0x338] sm:$0xff] %vm1260_vm3, %v2058_v39  ;;  %2741 = vmatmul.f32.gmra.mxu2 %v2239_v42  ;;  %8467 = vmatmul.msk.f32.gmra.mxu1 %vm678_vm2, %v2332_v43  ;;  %v2355_v42 = vld [vmem:[#allocation5 + $0x3d0] sm:$0xff]  ;;  %v2276_v43 = vld [vmem:[#allocation5 + $0x158] sm:$0xff] }
 0x26d   : > { %v10139_v1 = vpop.f32.mrf.mxu2  ;;  %3477 = vperm.xlu1 %8597, %v3327_v55   ;;  %3472 = vperm.xlu0 %8596, %v3326_v23   ;;  %v10185_v55 = vpop.f32.mrf.mxu3 }
 0x26e   : > { %13337 = vst [vmem:[#allocation13_spill] sm:$0xff] %v10139_v1 }
 0x26f   : > { %3437 = vperm.xlu2 %8598, %v3319_v5   ;;  %v2062_v50 = vpop.permute.xlu1 %2061  ;;  %v2060_v54 = vpop.permute.xlu0 %2059  ;;  %v2254_v5 = vld [vmem:[#allocation5 + $0xa8] sm:$0xff] }
 0x270   : > { %2147 = vst.msk [vmem:[#allocation5 + $0x388] sm:$0xff] %vm1260_vm3, %v2062_v50  ;;  %v2347_v50 = vld [vmem:[#allocation5 + $0x390] sm:$0xff] }
 0x271   : > { %2146 = vst.msk [vmem:[#allocation5 + $0x360] sm:$0xff] %vm1260_vm3, %v2060_v54  ;;  %v2064_v62 = vpop.permute.xlu2 %2063  ;;  %2929 = vmatmul.f32.gmra.mxu3 %v2345_v4  ;;  %3006 = vmatmul.f32.gmra.mxu0 %v2266_v58  ;;  %v3660_v54 = vld [vmem:[#allocation3 + $0x9] sm:$0xff]  ;;  %v3659_v4 = vld [vmem:[#allocation3 + $0x1] sm:$0xff] }
 0x272   : > { %2148 = vst.msk [vmem:[#allocation5 + $0x3b0] sm:$0xff] %vm1260_vm3, %v2064_v62  ;;  %2744 = vmatmul.f32.gmra.mxu2 %v2244_v2  ;;  %8468 = vmatmul.msk.f32.gmra.mxu1 %vm678_vm2, %v2337_v3  ;;  %v3328_v58 = vld [vmem:[%s13318_s1 + $0xe8] sm:$0xff]  ;;  %v5005_v62 = vld [vmem:[%s13323_s6 + $0x70] sm:$0xff] }
 0x273   : > { %5176 = vmatpush.msra.mxu2 %v5005_v62 }
 0x275   : > { %v10158_v57 = vpop.f32.mrf.mxu2  ;;  %3492 = vperm.xlu1 %8597, %v3330_v34   ;;  %3487 = vperm.xlu0 %8596, %v3329_v31   ;;  %v2281_v34 = vld [vmem:[#allocation5 + $0x180] sm:$0xff]  ;;  %v10201_v31 = vpop.f32.mrf.mxu3 }
 0x276   : > { %13338 = vst [vmem:[#allocation14_spill] sm:$0xff] %v10158_v57 }
 0x277   : > { %3452 = vperm.xlu2 %8598, %v3322_v25   ;;  %v2068_v49 = vpop.permute.xlu1 %2067  ;;  %v2066_v17 = vpop.permute.xlu0 %2065 }
 0x278   : > { %2150 = vst.msk [vmem:[#allocation5 + $0x400] sm:$0xff] %vm1260_vm3, %v2068_v49  ;;  %v2352_v49 = vld [vmem:[#allocation5 + $0x3b8] sm:$0xff] }
 0x279   : > { %2149 = vst.msk [vmem:[#allocation5 + $0x3d8] sm:$0xff] %vm1260_vm3, %v2066_v17  ;;  %v2070_v28 = vpop.permute.xlu2 %2069  ;;  %2932 = vmatmul.f32.gmra.mxu3 %v2350_v19  ;;  %3009 = vmatmul.f32.gmra.mxu0 %v2271_v20  ;;  %v10204_v17 = vpop.f32.mrf.mxu1  ;;  %v4557_v19 = vld [vmem:[#allocation3 + $0x135] sm:$0xff] }
 0x27a   : > { %2151 = vst.msk [vmem:[#allocation5 + $0x428] sm:$0xff] %vm1260_vm3, %v2070_v28  ;;  %2747 = vmatmul.f32.gmra.mxu2 %v2249_v11  ;;  %8469 = vmatmul.msk.f32.gmra.mxu1 %vm678_vm2, %v2342_v46  ;;  %v3331_v20 = vld [vmem:[%s13318_s1 + $0x100] sm:$0xff] }
 0x27d   : > { %v10180_v26 = vpop.f32.mrf.mxu2  ;;  %3507 = vperm.xlu1 %8597, %v3333_v32   ;;  %3502 = vperm.xlu0 %8596, %v3332_v36   ;;  %v2365_v32 = vld [vmem:[#allocation5 + $0x420] sm:$0xff]  ;;  %v2286_v36 = vld [vmem:[#allocation5 + $0x1a8] sm:$0xff] }
 0x27e   : > { %13340 = vst [vmem:[#allocation16_spill] sm:$0xff] %v10180_v26  ;;  %v2387_v26 = vld [vmem:[#allocation5 + $0x4d0] sm:$0xff] }
 0x27f   : > { %3467 = vperm.xlu2 %8598, %v3325_v37   ;;  %v2074_v41 = vpop.permute.xlu1 %2073  ;;  %v2072_v39 = vpop.permute.xlu0 %2071 }
 0x280   : > { %2153 = vst.msk [vmem:[#allocation5 + $0x478] sm:$0xff] %vm1260_vm3, %v2074_v41  ;;  %v2264_v41 = vld [vmem:[#allocation5 + $0xf8] sm:$0xff] }
 0x281   : > { %2152 = vst.msk [vmem:[#allocation5 + $0x450] sm:$0xff] %vm1260_vm3, %v2072_v39  ;;  %v2076_v23 = vpop.permute.xlu2 %2075  ;;  %2935 = vmatmul.f32.gmra.mxu3 %v2355_v42  ;;  %3012 = vmatmul.f32.gmra.mxu0 %v2276_v43  ;;  %v2357_v39 = vld [vmem:[#allocation5 + $0x3e0] sm:$0xff]  ;;  %v10221_v42 = vpop.f32.mrf.mxu1 }
 0x282   : > { %2154 = vst.msk [vmem:[#allocation5 + $0x4a0] sm:$0xff] %vm1260_vm3, %v2076_v23  ;;  %2750 = vmatmul.f32.gmra.mxu2 %v2254_v5  ;;  %8470 = vmatmul.msk.f32.gmra.mxu1 %vm678_vm2, %v2347_v50  ;;  %v3334_v43 = vld [vmem:[%s13318_s1 + $0x118] sm:$0xff]  ;;  %v5004_v50 = vld [vmem:[%s13323_s6 + $0x68] sm:$0xff] }
 0x283   : > { %5177 = vmatpush.msra.mxu2 %v5004_v50 }
 0x285   : > { %v10193_v53 = vpop.f32.mrf.mxu2  ;;  %3733 = vrot.lane.b32.xlu1 %v3660_v54, %s8618_s17  ;;  %3731 = vrot.lane.b32.xlu0 %v3659_v4, %s8618_s17  ;;  %v2370_v4 = vld [vmem:[#allocation5 + $0x448] sm:$0xff] }
 0x286   : > { %13341 = vst [vmem:[#allocation17_spill] sm:$0xff] %v10193_v53  ;;  %v2294_v53 = vld [vmem:[#allocation5 + $0x1e8] sm:$0xff] }
 0x287   : > { %3482 = vperm.xlu2 %8598, %v3328_v58   ;;  %v2080_v2 = vpop.permute.xlu1 %2079  ;;  %v2078_v3 = vpop.permute.xlu0 %2077  ;;  %v2291_v58 = vld [vmem:[#allocation5 + $0x1d0] sm:$0xff] }
 0x288   : > { %2156 = vst.msk [vmem:[#allocation5 + $0x4f0] sm:$0xff] %vm1260_vm3, %v2080_v2  ;;  %v2269_v2 = vld [vmem:[#allocation5 + $0x120] sm:$0xff] }
 0x289   : > { %2155 = vst.msk [vmem:[#allocation5 + $0x4c8] sm:$0xff] %vm1260_vm3, %v2078_v3  ;;  %v2082_v25 = vpop.permute.xlu2 %2081  ;;  %2938 = vmatmul.f32.gmra.mxu3 %v2360_v6  ;;  %3015 = vmatmul.f32.gmra.mxu0 %v2281_v34  ;;  %v10245_v34 = vpop.f32.mrf.mxu1 }
 0x28a   : > { %2157 = vst.msk [vmem:[#allocation5 + $0x518] sm:$0xff] %vm1260_vm3, %v2082_v25  ;;  %2753 = vmatmul.f32.gmra.mxu2 %v2259_v13  ;;  %8471 = vmatmul.msk.f32.gmra.mxu1 %vm678_vm2, %v2352_v49  ;;  %v2375_v49 = vld [vmem:[#allocation5 + $0x470] sm:$0xff] }
 0x28d   : > { %v10211_v28 = vpop.f32.mrf.mxu2  ;;  %4663 = vrot.lane.b32.xlu1 %v4557_v19, %s8618_s17  ;;  %5916 = vperm.xlu0 %8596, %v9978_v0   ;;  %v10219_v0 = vpop.f32.mrf.mxu3  ;;  %v2296_v19 = vld [vmem:[#allocation5 + $0x1f8] sm:$0xff] }
 0x28e   : > { %13342 = vst [vmem:[#allocation18_spill] sm:$0xff] %v10211_v28 }
 0x28f   : > { %3497 = vperm.xlu2 %8598, %v3331_v20   ;;  %v2086_v11 = vpop.permute.xlu1 %2085  ;;  %v2084_v46 = vpop.permute.xlu0 %2083 }
 0x290   : > { %2159 = vst.msk [vmem:[#allocation5 + $0x568] sm:$0xff] %vm1260_vm3, %v2086_v11  ;;  %v2274_v11 = vld [vmem:[#allocation5 + $0x148] sm:$0xff] }
 0x291   : > { %2158 = vst.msk [vmem:[#allocation5 + $0x540] sm:$0xff] %vm1260_vm3, %v2084_v46  ;;  %v2088_v37 = vpop.permute.xlu2 %2087  ;;  %2941 = vmatmul.f32.gmra.mxu3 %v2365_v32  ;;  %3018 = vmatmul.f32.gmra.mxu0 %v2286_v36  ;;  %v2367_v46 = vld [vmem:[#allocation5 + $0x430] sm:$0xff] }
 0x292   : > { %2160 = vst.msk [vmem:[#allocation5 + $0x590] sm:$0xff] %vm1260_vm3, %v2088_v37  ;;  %2756 = vmatmul.f32.gmra.mxu2 %v2264_v41  ;;  %8472 = vmatmul.msk.f32.gmra.mxu1 %vm678_vm2, %v2357_v39  ;;  %v10262_v37 = vpop.f32.mrf.mxu1  ;;  %v2380_v39 = vld [vmem:[#allocation5 + $0x498] sm:$0xff] }
 0x295   : > { %v10226_v23 = vpop.f32.mrf.mxu2  ;;  %5921 = vperm.xlu1 %8597, %v9973_v59   ;;  %5931 = vperm.xlu0 %8596, %v10000_v47   ;;  %v2362_v59 = vld [vmem:[#allocation5 + $0x408] sm:$0xff]  ;;  %v10240_v3 = vpop.f32.mrf.mxu3 }
 0x296   : > { %13343 = vst [vmem:[#allocation19_spill] sm:$0xff] %v10226_v23  ;;  %v4558_v47 = vld [vmem:[#allocation3 + $0x13d] sm:$0xff]  ;;  %v5002_v23 = vld [vmem:[%s13323_s6 + $0x58] sm:$0xff] }
 0x297   : > { %3512 = vperm.xlu2 %8598, %v3334_v43   ;;  %v10230_v5 = vpop.permute.xlu1 %3342  ;;  %v10235_v54 = vpop.permute.xlu0 %3337  ;;  %v2301_v43 = vld [vmem:[#allocation5 + $0x220] sm:$0xff] }
 0x299   : > { %v10237_v62 = vpop.permute.xlu2 %3347  ;;  %2944 = vmatmul.f32.gmra.mxu3 %v2370_v4  ;;  %3021 = vmatmul.f32.gmra.mxu0 %v2291_v58  ;;  %v2279_v4 = vld [vmem:[#allocation5 + $0x170] sm:$0xff]  ;;  %v2372_v58 = vld [vmem:[#allocation5 + $0x458] sm:$0xff] }
 0x29a   : > { %2759 = vmatmul.f32.gmra.mxu2 %v2269_v2  ;;  %8473 = vmatmul.msk.f32.gmra.mxu1 %vm678_vm2, %v2362_v59 }
 0x29d   : > { %v10242_v6 = vpop.f32.mrf.mxu2  ;;  %5936 = vperm.xlu1 %8597, %v9995_v61   ;;  %v10257_v32 = vpop.f32.mrf.mxu3 }
 0x29e   : > { %13344 = vst [vmem:[#allocation20_spill] sm:$0xff] %v10242_v6  ;;  %v2289_v6 = vld [vmem:[#allocation5 + $0x1c0] sm:$0xff] }
 0x29f   : > { %4665 = vrot.lane.b32.xlu2 %v4558_v47, %s8618_s17  ;;  %v10248_v25 = vpop.permute.xlu1 %3357  ;;  %v10250_v13 = vpop.permute.xlu0 %3352 }
 0x2a1   : > { %v10252_v20 = vpop.permute.xlu2 %3362  ;;  %2947 = vmatmul.f32.gmra.mxu3 %v2375_v49  ;;  %3024 = vmatmul.f32.gmra.mxu0 %v2296_v19  ;;  %v2385_v49 = vld [vmem:[#allocation5 + $0x4c0] sm:$0xff]  ;;  %v2306_v19 = vld [vmem:[#allocation5 + $0x248] sm:$0xff] }
 0x2a2   : > { %2762 = vmatmul.f32.gmra.mxu2 %v2274_v11  ;;  %8474 = vmatmul.msk.f32.gmra.mxu1 %vm678_vm2, %v2367_v46 }
 0x2a5   : > { %v10255_v61 = vpop.f32.mrf.mxu2  ;;  %v10279_v11 = vpop.f32.mrf.mxu3 }
 0x2a6   : > { %13345 = vst [vmem:[#allocation21_spill] sm:$0xff] %v10255_v61 }
 0x2a7   : > { %5926 = vperm.xlu2 %8598, %v10037_v14   ;;  %v10260_v36 = vpop.permute.xlu1 %3372  ;;  %v10264_v41 = vpop.permute.xlu0 %3367  ;;  %v5003_v14 = vld [vmem:[%s13323_s6 + $0x60] sm:$0xff] }
 0x2a8   : > { %5178 = vmatpush.msra.mxu2 %v5003_v14 }
 0x2a9   : > { %v10266_v50 = vpop.permute.xlu2 %3377  ;;  %2950 = vmatmul.f32.gmra.mxu3 %v2380_v39  ;;  %3027 = vmatmul.f32.gmra.mxu0 %v2301_v43  ;;  %v2284_v39 = vld [vmem:[#allocation5 + $0x198] sm:$0xff]  ;;  %v2377_v43 = vld [vmem:[#allocation5 + $0x480] sm:$0xff] }
 0x2aa   : > { %2765 = vmatmul.f32.gmra.mxu2 %v2279_v4  ;;  %8475 = vmatmul.msk.f32.gmra.mxu1 %vm678_vm2, %v2372_v58  ;;  %v10283_v4 = vpop.f32.mrf.mxu1 }
 0x2ab   : > { %5179 = vmatpush.msra.mxu2 %v5002_v23 }
 0x2ad   : > { %v10272_v2 = vpop.f32.mrf.mxu2 }
 0x2ae   : > { %13346 = vst [vmem:[#allocation22_spill] sm:$0xff] %v10272_v2  ;;  %v2311_v2 = vld [vmem:[#allocation5 + $0x270] sm:$0xff] }
 0x2af   : > { %5941 = vperm.xlu2 %8598, %v10055_v21   ;;  %v10275_v59 = vpop.permute.xlu1 %3387  ;;  %v10277_v47 = vpop.permute.xlu0 %3382 }
 0x2b1   : > { %v10281_v46 = vpop.permute.xlu2 %3392  ;;  %2953 = vmatmul.f32.gmra.mxu3 %v2385_v49  ;;  %3030 = vmatmul.f32.gmra.mxu0 %v2306_v19  ;;  %v2382_v49 = vld [vmem:[#allocation5 + $0x4a8] sm:$0xff]  ;;  %v10295_v19 = vpop.f32.mrf.mxu3 }
 0x2b2   : > { %13347 = vst [vmem:[#allocation23_spill] sm:$0xff] %v10281_v46  ;;  %2768 = vmatmul.f32.gmra.mxu2 %v2284_v39  ;;  %8476 = vmatmul.msk.f32.gmra.mxu1 %vm678_vm2, %v2377_v43  ;;  %v10297_v39 = vpop.f32.mrf.mxu1 }
 0x2b5   : > { %v10286_v21 = vpop.f32.mrf.mxu2 }
 0x2b6   : > { %13348 = vst [vmem:[#allocation24_spill] sm:$0xff] %v10286_v21 }
 0x2b7   : > { %v10288_v58 = vpop.permute.xlu1 %3402  ;;  %v10290_v14 = vpop.permute.xlu0 %3397 }
 0x2b8   : > { %13349 = vst [vmem:[#allocation25_spill] sm:$0xff] %v10288_v58  ;;  %v2314_v58 = vld [vmem:[#allocation5 + $0x288] sm:$0xff] }
 0x2b9   : > { %13350 = vst [vmem:[#allocation26_spill] sm:$0xff] %v10290_v14  ;;  %v10292_v61 = vpop.permute.xlu2 %3407  ;;  %2956 = vmatmul.f32.gmra.mxu3 %v2390_v48  ;;  %3033 = vmatmul.f32.gmra.mxu0 %v2311_v2  ;;  %v2316_v2 = vld [vmem:[#allocation5 + $0x298] sm:$0xff] }
 0x2ba   : > { %13351 = vst [vmem:[#allocation27_spill] sm:$0xff] %v10292_v61  ;;  %2771 = vmatmul.f32.gmra.mxu2 %v2289_v6  ;;  %8477 = vmatmul.msk.f32.gmra.mxu1 %vm678_vm2, %v2382_v49  ;;  %v2395_v6 = vld [vmem:[#allocation5 + $0x510] sm:$0xff]  ;;  %v10317_v1 = vpop.f32.mrf.mxu1 }
 0x2bb   : > { %v2331_v61 = vld [vmem:[#allocation5 + $0x310] sm:$0xff] }
 0x2bd   : > { %v10299_v43 = vpop.f32.mrf.mxu2 }
 0x2be   : > { %13352 = vst [vmem:[#allocation28_spill] sm:$0xff] %v10299_v43  ;;  %v10301_v21 = vpop.f32.mrf.mxu0  ;;  %v10313_v43 = vpop.f32.mrf.mxu3 }
 0x2bf   : > { %v10306_v28 = vpop.permute.xlu1 %3417  ;;  %v10308_v48 = vpop.permute.xlu0 %3412 }
 0x2c0   : > { %13353 = vst [vmem:[#allocation29_spill] sm:$0xff] %v10306_v28 }
 0x2c1   : > { %13354 = vst [vmem:[#allocation30_spill] sm:$0xff] %v10308_v48  ;;  %v10310_v49 = vpop.permute.xlu2 %3422  ;;  %2959 = vmatmul.f32.gmra.mxu3 %v2395_v6  ;;  %3036 = vmatmul.f32.gmra.mxu0 %v2316_v2  ;;  %v2299_v2 = vld [vmem:[#allocation5 + $0x210] sm:$0xff]  ;;  %v2326_v48 = vld [vmem:[#allocation5 + $0x2e8] sm:$0xff] }
 0x2c2   : > { %13355 = vst [vmem:[#allocation31_spill] sm:$0xff] %v10310_v49  ;;  %2774 = vmatmul.f32.gmra.mxu2 %v2294_v53  ;;  %8478 = vmatmul.msk.f32.gmra.mxu1 %vm678_vm2, %v2387_v26  ;;  %v2400_v49 = vld [vmem:[#allocation5 + $0x538] sm:$0xff] }
 0x2c3   : > { %v2392_v26 = vld [vmem:[#allocation5 + $0x4f8] sm:$0xff] }
 0x2c5   : > { %v10315_v57 = vpop.f32.mrf.mxu2 }
 0x2c6   : > { %13356 = vst [vmem:[#allocation32_spill] sm:$0xff] %v10315_v57  ;;  %v10319_v23 = vpop.f32.mrf.mxu0  ;;  %v10332_v28 = vpop.f32.mrf.mxu3 }
 0x2c7   : > { %v10321_v35 = vpop.permute.xlu1 %3432  ;;  %v10323_v60 = vpop.permute.xlu0 %3427 }
 0x2c8   : > { %13357 = vst [vmem:[#allocation33_spill] sm:$0xff] %v10321_v35 }
 0x2c9   : > { %13358 = vst [vmem:[#allocation34_spill] sm:$0xff] %v10323_v60  ;;  %v10325_v6 = vpop.permute.xlu2 %3437  ;;  %2962 = vmatmul.f32.gmra.mxu3 %v2400_v49  ;;  %3039 = vmatmul.f32.gmra.mxu0 %v2321_v51  ;;  %v10336_v60 = vpop.f32.mrf.mxu1  ;;  %v2304_v51 = vld [vmem:[#allocation5 + $0x238] sm:$0xff] }
 0x2ca   : > { %13359 = vst [vmem:[#allocation35_spill] sm:$0xff] %v10325_v6  ;;  %2777 = vmatmul.f32.gmra.mxu2 %v2299_v2  ;;  %8479 = vmatmul.msk.f32.gmra.mxu1 %vm678_vm2, %v2392_v26  ;;  %v2405_v6 = vld [vmem:[#allocation5 + $0x560] sm:$0xff] }
 0x2cb   : > { %v2397_v2 = vld [vmem:[#allocation5 + $0x520] sm:$0xff] }
 0x2cd   : > { %v10328_v53 = vpop.f32.mrf.mxu2 }
 0x2ce   : > { %13360 = vst [vmem:[#allocation36_spill] sm:$0xff] %v10328_v53  ;;  %v10330_v57 = vpop.f32.mrf.mxu0  ;;  %v10351_v33 = vpop.f32.mrf.mxu3 }
 0x2cf   : > { %v10334_v35 = vpop.permute.xlu1 %3447  ;;  %v10338_v10 = vpop.permute.xlu0 %3442 }
 0x2d0   : > { %13361 = vst [vmem:[#allocation37_spill] sm:$0xff] %v10334_v35 }
 0x2d1   : > { %13362 = vst [vmem:[#allocation38_spill] sm:$0xff] %v10338_v10  ;;  %v10340_v49 = vpop.permute.xlu2 %3452  ;;  %2965 = vmatmul.f32.gmra.mxu3 %v2405_v6  ;;  %3042 = vmatmul.f32.gmra.mxu0 %v2326_v48  ;;  %v2410_v10 = vld [vmem:[#allocation5 + $0x588] sm:$0xff]  ;;  %v2309_v6 = vld [vmem:[#allocation5 + $0x260] sm:$0xff] }
 0x2d2   : > { %13363 = vst [vmem:[#allocation39_spill] sm:$0xff] %v10340_v49  ;;  %2780 = vmatmul.f32.gmra.mxu2 %v2304_v51  ;;  %8480 = vmatmul.msk.f32.gmra.mxu1 %vm678_vm2, %v2397_v2  ;;  %v2402_v48 = vld [vmem:[#allocation5 + $0x548] sm:$0xff]  ;;  %v10355_v51 = vpop.f32.mrf.mxu1  ;;  %v5001_v2 = vld [vmem:[%s13323_s6 + $0x50] sm:$0xff] }
 0x2d3   : > { %5180 = vmatpush.msra.mxu2 %v5001_v2  ;;  %v3587_v2 = vld [vmem:[#allocation3] sm:$0xff] }
 0x2d4   : > { %3623 = vst.msk [vmem:[#allocation5] sm:$0xff] %vm678_vm2, %v3587_v2 }
 0x2d5   : > { %v10343_v26 = vpop.f32.mrf.mxu2 }
 0x2d6   : > { %13364 = vst [vmem:[#allocation40_spill] sm:$0xff] %v10343_v26  ;;  %v10345_v53 = vpop.f32.mrf.mxu0 }
 0x2d7   : > { %v10347_v35 = vpop.permute.xlu1 %3462  ;;  %v10349_v9 = vpop.permute.xlu0 %3457 }
 0x2d8   : > { %13365 = vst [vmem:[#allocation41_spill] sm:$0xff] %v10347_v35 }
 0x2d9   : > { %13366 = vst [vmem:[#allocation42_spill] sm:$0xff] %v10349_v9  ;;  %v10353_v49 = vpop.permute.xlu2 %3467  ;;  %2968 = vmatmul.f32.gmra.mxu3 %v2410_v10  ;;  %3045 = vmatmul.f32.gmra.mxu0 %v2331_v61  ;;  %v2336_v10 = vld [vmem:[#allocation5 + $0x338] sm:$0xff] }
 0x2da   : > { %13367 = vst [vmem:[#allocation43_spill] sm:$0xff] %v10353_v49  ;;  %2783 = vmatmul.f32.gmra.mxu2 %v2309_v6  ;;  %8481 = vmatmul.msk.f32.gmra.mxu1 %vm678_vm2, %v2402_v48  ;;  %v10374_v6 = vld [vmem:[%s13322_s5] ss:$0 sm:$0xff]  ;;  %v3588_v48 = vld [vmem:[#allocation3 + $0x8] sm:$0xff] }
 0x2db   : > { %3624 = vst.msk [vmem:[#allocation5 + $0x28] sm:$0xff] %vm678_vm2, %v3588_v48  ;;  %v2341_v48 = vld [vmem:[#allocation5 + $0x360] sm:$0xff] }
 0x2dd   : > { %v10361_v26 = vpop.f32.mrf.mxu2 }
 0x2de   : > { %13368 = vst [vmem:[#allocation44_spill] sm:$0xff] %v10361_v26  ;;  %v10363_v35 = vpop.f32.mrf.mxu0  ;;  %v4486_v26 = vld [vmem:[#allocation3 + $0x13c] sm:$0xff] }
 0x2df   : > { %v10365_v9 = vpop.permute.xlu1 %3477  ;;  %v10367_v49 = vpop.permute.xlu0 %3472 }
 0x2e0   : > { %13369 = vst [vmem:[#allocation45_spill] sm:$0xff] %v10365_v9  ;;  %v2615_v9 = vadd.f32 %v10374_v6, %v9828_v29  ;;  %v2319_v29 = vld [vmem:[#allocation5 + $0x2b0] sm:$0xff] }
 0x2e1   : > { %13370 = vst [vmem:[#allocation46_spill] sm:$0xff] %v10367_v49  ;;  %v10369_v61 = vpop.permute.xlu2 %3482  ;;  %3048 = vmatmul.f32.gmra.mxu0 %v2336_v10  ;;  %v10380_v49 = vld [vmem:[#allocation5 + $0x590] sm:$0xff] }
 0x2e2   : > { %13371 = vst [vmem:[#allocation47_spill] sm:$0xff] %v10369_v61  ;;  %2786 = vmatmul.f32.gmra.mxu2 %v2314_v58 }
 0x2e3   : > { %13372 = vst [vmem:[#allocation48_spill] sm:$0xff] %v10380_v49  ;;  %v10393_v49 = vld [vmem:[#allocation5 + $0x568] sm:$0xff] }
 0x2e4   : > { %4522 = vst.msk [vmem:[#allocation5 + $0x590] sm:$0xff] %vm678_vm2, %v4486_v26  ;;  %v4485_v26 = vld [vmem:[#allocation3 + $0x134] sm:$0xff] }
 0x2e5   : > { %v2739_v61 = vpop.f32.mrf.mxu2  ;;  %13376 = vst [vmem:[#allocation52_spill] sm:$0xff] %v10393_v49  ;;  %v2324_v49 = vld [vmem:[#allocation5 + $0x2d8] sm:$0xff] }
 0x2e6   : > { %v2740_v10 = vadd.f32 %v2739_v61, %v2615_v9  ;;  %v10383_v12 = vpop.f32.mrf.mxu0  ;;  %v5000_v9 = vld [vmem:[%s13323_s6 + $0x48] sm:$0xff]  ;;  %4521 = vst.msk [vmem:[#allocation5 + $0x568] sm:$0xff] %vm678_vm2, %v4485_v26  ;;  %v2346_v26 = vld [vmem:[#allocation5 + $0x388] sm:$0xff] }
 0x2e7   : > { %v10385_v14 = vpop.permute.xlu1 %3492  ;;  %v10388_v22 = vpop.permute.xlu0 %3487  ;;  %5181 = vmatpush.msra.mxu2 %v5000_v9 }
 0x2e8   : > { %13373 = vst [vmem:[#allocation49_spill] sm:$0xff] %v10385_v14  ;;  %v2865_v58 = vadd.f32 %v10141_v15, %v2740_v10  ;;  %v2618_v15 = vadd.f32 %v10374_v6, %v9845_v63 }
 0x2e9   : > { %13374 = vst [vmem:[#allocation50_spill] sm:$0xff] %v10388_v22  ;;  %v10390_v46 = vpop.permute.xlu2 %3497  ;;  %3051 = vmatmul.f32.gmra.mxu0 %v2341_v48 }
 0x2ea   : > { %13375 = vst [vmem:[#allocation51_spill] sm:$0xff] %v10390_v46  ;;  %v2990_v2 = vadd.f32 %v10301_v21, %v2865_v58  ;;  %2789 = vmatmul.f32.gmra.mxu2 %v2319_v29 }
 0x2ec   : > { %v3115_v61 = vadd.f32 %v10182_v38, %v2990_v2  ;;  %v2621_v38 = vadd.f32 %v10374_v6, %v9862_v56 }
 0x2ed   : > { %v2742_v10 = vpop.f32.mrf.mxu2 }
 0x2ee   : > { %v3222_v48 = vmax.f32 %v3115_v61, 0.0  ;;  %v2743_v46 = vadd.f32 %v2742_v10, %v2618_v15  ;;  %v10402_v21 = vpop.f32.mrf.mxu0 }
 0x2ef   : > { %v10404_v58 = vpop.permute.xlu1 %3507  ;;  %v10408_v22 = vpop.permute.xlu0 %3502 }
 0x2f0   : > { %v3515_v29 = vmul.f32 %v10235_v54, %v3222_v48  ;;  %v2868_v14 = vadd.f32 %v10166_v24, %v2743_v46 }
 0x2f1   : > { %v10410_v9 = vpop.permute.xlu2 %3512  ;;  %3054 = vmatmul.f32.gmra.mxu0 %v2346_v26 }
 0x2f2   : > { %3551 = vst.msk [vmem:[#allocation3 + $0x13] sm:$0xff] %vm678_vm2, %v3515_v29  ;;  %v2993_v63 = vadd.f32 %v10319_v23, %v2868_v14  ;;  %2792 = vmatmul.f32.gmra.mxu2 %v2324_v49  ;;  %v2351_v14 = vld [vmem:[#allocation5 + $0x3b0] sm:$0xff]  ;;  %v2329_v23 = vld [vmem:[#allocation5 + $0x300] sm:$0xff] }
 0x2f4   : > { %v3118_v2 = vadd.f32 %v10204_v17, %v2993_v63 }
 0x2f5   : > { %v2745_v54 = vpop.f32.mrf.mxu2 }
 0x2f6   : > { %v3223_v15 = vmax.f32 %v3118_v2, 0.0  ;;  %v2746_v24 = vadd.f32 %v2745_v54, %v2621_v38  ;;  %v10417_v46 = vpop.f32.mrf.mxu0 }
 0x2f7   : > { %v3734_v61 = vpop.permute.xlu1 %3733  ;;  %v3732_v29 = vpop.permute.xlu0 %3731 }
 0x2f8   : > { %v3516_v10 = vmul.f32 %v10230_v5, %v3223_v15  ;;  %v2871_v48 = vadd.f32 %v10185_v55, %v2746_v24  ;;  %3840 = vst.msk [vmem:[#allocation5 + $0x28] sm:$0xff] %vm1260_vm3, %v3734_v61  ;;  %v4999_v55 = vld [vmem:[%s13323_s6 + $0x40] sm:$0xff]  ;;  %v2624_v5 = vadd.f32 %v10374_v6, %v9877_v16 }
 0x2f9   : > { %3839 = vst.msk [vmem:[#allocation5] sm:$0xff] %vm1260_vm3, %v3732_v29  ;;  %3057 = vmatmul.f32.gmra.mxu0 %v2351_v14  ;;  %v3947_v56 = vld [vmem:[#allocation3 + $0x12] sm:$0xff]  ;;  %v4666_v26 = vpop.permute.xlu2 %4665  ;;  %5182 = vmatpush.msra.mxu2 %v4999_v55  ;;  %v10452_v55 = vpop.f32.mrf.mxu1 }
 0x2fa   : > { %v3661_v17 = vld [vmem:[#allocation3 + $0x11] sm:$0xff]  ;;  %3552 = vst.msk [vmem:[#allocation3 + $0x1b] sm:$0xff] %vm678_vm2, %v3516_v10  ;;  %v2996_v49 = vadd.f32 %v10330_v57, %v2871_v48  ;;  %2795 = vmatmul.f32.gmra.mxu2 %v2329_v23  ;;  %4019 = vrot.lane.b32.xlu0 %v3947_v56, %s8618_s17  ;;  %v2356_v10 = vld [vmem:[#allocation5 + $0x3d8] sm:$0xff] }
 0x2fb   : > { %4738 = vst.msk [vmem:[#allocation5 + $0x590] sm:$0xff] %vm1260_vm3, %v4666_v26  ;;  %3735 = vrot.lane.b32.xlu2 %v3661_v17, %s8618_s17  ;;  %v2334_v48 = vld [vmem:[#allocation5 + $0x328] sm:$0xff]  ;;  %v2361_v26 = vld [vmem:[#allocation5 + $0x400] sm:$0xff] }
 0x2fc   : > { %v3121_v63 = vadd.f32 %v10221_v42, %v2996_v49  ;;  %3913 = vst.msk [vmem:[#allocation5 + $0x58] sm:$0xff] %vm678_vm2, %v3947_v56 }
 0x2fd   : > { %v2748_v57 = vpop.f32.mrf.mxu2 }
 0x2fe   : > { %v3224_v38 = vmax.f32 %v3121_v63, 0.0  ;;  %v2749_v2 = vadd.f32 %v2748_v57, %v2624_v5  ;;  %v10435_v54 = vpop.f32.mrf.mxu0  ;;  %v2339_v5 = vld [vmem:[#allocation5 + $0x350] sm:$0xff] }
 0x2ff   : > { %v4664_v15 = vpop.permute.xlu1 %4663 }
 0x300   : > { %v3517_v24 = vmul.f32 %v10237_v62, %v3224_v38  ;;  %v2874_v61 = vadd.f32 %v10201_v31, %v2749_v2  ;;  %4737 = vst.msk [vmem:[#allocation5 + $0x568] sm:$0xff] %vm1260_vm3, %v4664_v15  ;;  %v2627_v31 = vadd.f32 %v10374_v6, %v9894_v40 }
 0x301   : > { %3060 = vmatmul.f32.gmra.mxu0 %v2356_v10  ;;  %v3948_v16 = vld [vmem:[#allocation3 + $0x1a] sm:$0xff] }
 0x302   : > { %v3662_v29 = vld [vmem:[#allocation3 + $0x19] sm:$0xff]  ;;  %3553 = vst.msk [vmem:[#allocation3 + $0x23] sm:$0xff] %vm678_vm2, %v3517_v24  ;;  %v2999_v42 = vadd.f32 %v10345_v53, %v2874_v61  ;;  %2798 = vmatmul.f32.gmra.mxu2 %v2334_v48  ;;  %4021 = vrot.lane.b32.xlu1 %v3948_v16, %s8618_s17  ;;  %v2344_v48 = vld [vmem:[#allocation5 + $0x378] sm:$0xff] }
 0x303   : > { %3737 = vrot.lane.b32.xlu0 %v3662_v29, %s8618_s17  ;;  %3914 = vst.msk [vmem:[#allocation5 + $0x80] sm:$0xff] %vm678_vm2, %v3948_v16  ;;  %v2366_v10 = vld [vmem:[#allocation5 + $0x428] sm:$0xff] }
 0x304   : > { %v3124_v62 = vadd.f32 %v10245_v34, %v2999_v42  ;;  %v4235_v34 = vld [vmem:[#allocation3 + $0x14] sm:$0xff] }
 0x305   : > { %v2751_v14 = vpop.f32.mrf.mxu2 }
 0x306   : > { %v3225_v23 = vmax.f32 %v3124_v62, 0.0  ;;  %v2752_v56 = vadd.f32 %v2751_v14, %v2627_v31  ;;  %v10448_v17 = vpop.f32.mrf.mxu0  ;;  %v10473_v31 = vpop.f32.mrf.mxu1 }
 0x308   : > { %v3518_v49 = vmul.f32 %v10250_v13, %v3225_v23  ;;  %v2877_v53 = vadd.f32 %v10219_v0, %v2752_v56  ;;  %v2630_v0 = vadd.f32 %v10374_v6, %v9909_v44 }
 0x309   : > { %3063 = vmatmul.f32.gmra.mxu0 %v2361_v26  ;;  %v3949_v63 = vld [vmem:[#allocation3 + $0x22] sm:$0xff] }
 0x30a   : > { %v3663_v57 = vld [vmem:[#allocation3 + $0x21] sm:$0xff]  ;;  %3554 = vst.msk [vmem:[#allocation3 + $0x2b] sm:$0xff] %vm678_vm2, %v3518_v49  ;;  %v3002_v40 = vadd.f32 %v10363_v35, %v2877_v53  ;;  %2801 = vmatmul.f32.gmra.mxu2 %v2339_v5  ;;  %4023 = vrot.lane.b32.xlu2 %v3949_v63, %s8618_s17  ;;  %v10484_v49 = vpop.f32.mrf.mxu3 }
 0x30b   : > { %4307 = vrot.lane.b32.xlu0 %v4235_v34, %s8618_s17  ;;  %3739 = vrot.lane.b32.xlu1 %v3663_v57, %s8618_s17  ;;  %3915 = vst.msk [vmem:[#allocation5 + $0xa8] sm:$0xff] %vm678_vm2, %v3949_v63  ;;  %v2371_v5 = vld [vmem:[#allocation5 + $0x450] sm:$0xff]  ;;  %v2349_v63 = vld [vmem:[#allocation5 + $0x3a0] sm:$0xff] }
 0x30c   : > { %v3127_v13 = vadd.f32 %v10262_v37, %v3002_v40  ;;  %v4236_v37 = vld [vmem:[#allocation3 + $0x1c] sm:$0xff] }
 0x30d   : > { %v2754_v38 = vpop.f32.mrf.mxu2 }
 0x30e   : > { %v3226_v2 = vmax.f32 %v3127_v13, 0.0  ;;  %v2755_v15 = vadd.f32 %v2754_v38, %v2630_v0  ;;  %v10463_v24 = vpop.f32.mrf.mxu0  ;;  %v10497_v34 = vpop.f32.mrf.mxu1 }
 0x310   : > { %v3519_v35 = vmul.f32 %v10248_v25, %v3226_v2  ;;  %v2880_v61 = vadd.f32 %v10240_v3, %v2755_v15  ;;  %v4998_v25 = vld [vmem:[%s13323_s6 + $0x38] sm:$0xff] }
 0x311   : > { %3066 = vmatmul.f32.gmra.mxu0 %v2366_v10  ;;  %v3950_v16 = vld [vmem:[#allocation3 + $0x2a] sm:$0xff]  ;;  %5183 = vmatpush.msra.mxu2 %v4998_v25 }
 0x312   : > { %v3664_v29 = vld [vmem:[#allocation3 + $0x29] sm:$0xff]  ;;  %3555 = vst.msk [vmem:[#allocation3 + $0x33] sm:$0xff] %vm678_vm2, %v3519_v35  ;;  %v3005_v44 = vadd.f32 %v10383_v12, %v2880_v61  ;;  %2804 = vmatmul.f32.gmra.mxu2 %v2344_v48  ;;  %v2633_v12 = vadd.f32 %v10374_v6, %v9921_v7  ;;  %v2354_v61 = vld [vmem:[#allocation5 + $0x3c8] sm:$0xff] }
 0x313   : > { %3741 = vrot.lane.b32.xlu2 %v3664_v29, %s8618_s17  ;;  %v4237_v42 = vld [vmem:[#allocation3 + $0x24] sm:$0xff]  ;;  %4025 = vrot.lane.b32.xlu0 %v3950_v16, %s8618_s17  ;;  %3916 = vst.msk [vmem:[#allocation5 + $0xd0] sm:$0xff] %vm678_vm2, %v3950_v16  ;;  %v10503_v16 = vpop.f32.mrf.mxu3 }
 0x314   : > { %4309 = vrot.lane.b32.xlu1 %v4236_v37, %s8618_s17  ;;  %v3130_v3 = vadd.f32 %v10283_v4, %v3005_v44  ;;  %4487 = vst.msk [vmem:[#allocation5 + $0x18] sm:$0xff] %vm678_vm2, %v4237_v42  ;;  %v4523_v57 = vld [vmem:[#allocation3 + $0x25] sm:$0xff] }
 0x315   : > { %v2757_v62 = vpop.f32.mrf.mxu2  ;;  %v2376_v35 = vld [vmem:[#allocation5 + $0x478] sm:$0xff] }
 0x316   : > { %v3227_v14 = vmax.f32 %v3130_v3, 0.0  ;;  %v2758_v23 = vadd.f32 %v2757_v62, %v2633_v12  ;;  %v10482_v56 = vpop.f32.mrf.mxu0  ;;  %v10519_v12 = vpop.f32.mrf.mxu1 }
 0x318   : > { %v3520_v53 = vmul.f32 %v10252_v20, %v3227_v14  ;;  %v2883_v26 = vadd.f32 %v10257_v32, %v2758_v23  ;;  %v2636_v20 = vadd.f32 %v10374_v6, %v9940_v52  ;;  %v2381_v14 = vld [vmem:[#allocation5 + $0x4a0] sm:$0xff]  ;;  %v2359_v23 = vld [vmem:[#allocation5 + $0x3f0] sm:$0xff] }
 0x319   : > { %3069 = vmatmul.f32.gmra.mxu0 %v2371_v5  ;;  %v3951_v7 = vld [vmem:[#allocation3 + $0x32] sm:$0xff] }
 0x31a   : > { %3556 = vst.msk [vmem:[#allocation3 + $0x3b] sm:$0xff] %vm678_vm2, %v3520_v53  ;;  %v3008_v4 = vadd.f32 %v10402_v21, %v2883_v26  ;;  %2807 = vmatmul.f32.gmra.mxu2 %v2349_v63  ;;  %v4238_v40 = vld [vmem:[#allocation3 + $0x2c] sm:$0xff] }
 0x31b   : > { %4311 = vrot.lane.b32.xlu2 %v4237_v42, %s8618_s17  ;;  %4595 = vrot.lane.b32.xlu0 %v4523_v57, %s8618_s17  ;;  %4488 = vst.msk [vmem:[#allocation5 + $0x40] sm:$0xff] %vm678_vm2, %v4238_v40  ;;  %v3665_v10 = vld [vmem:[#allocation3 + $0x31] sm:$0xff] }
 0x31c   : > { %4027 = vrot.lane.b32.xlu1 %v3951_v7, %s8618_s17  ;;  %v3133_v32 = vadd.f32 %v10297_v39, %v3008_v4  ;;  %v4524_v39 = vld [vmem:[#allocation3 + $0x2d] sm:$0xff] }
 0x31d   : > { %v2760_v0 = vpop.f32.mrf.mxu2 }
 0x31e   : > { %v3228_v21 = vmax.f32 %v3133_v32, 0.0  ;;  %v2761_v13 = vadd.f32 %v2760_v0, %v2636_v20  ;;  %v10499_v38 = vpop.f32.mrf.mxu0  ;;  %v2386_v32 = vld [vmem:[#allocation5 + $0x4c8] sm:$0xff]  ;;  %v10539_v0 = vpop.f32.mrf.mxu1 }
 0x320   : > { %v3521_v2 = vmul.f32 %v10264_v41, %v3228_v21  ;;  %v2886_v15 = vadd.f32 %v10279_v11, %v2761_v13  ;;  %v4997_v41 = vld [vmem:[%s13323_s6 + $0x30] sm:$0xff]  ;;  %v2639_v11 = vadd.f32 %v10374_v6, %v9966_v27  ;;  %v4996_v13 = vld [vmem:[%s13323_s6 + $0x28] sm:$0xff] }
 0x321   : > { %3072 = vmatmul.f32.gmra.mxu0 %v2376_v35  ;;  %v3952_v48 = vld [vmem:[#allocation3 + $0x3a] sm:$0xff]  ;;  %5184 = vmatpush.msra.mxu2 %v4997_v41  ;;  %v2364_v21 = vld [vmem:[#allocation5 + $0x418] sm:$0xff] }
 0x322   : > { %3557 = vst.msk [vmem:[#allocation3 + $0x43] sm:$0xff] %vm678_vm2, %v3521_v2  ;;  %v3011_v52 = vadd.f32 %v10417_v46, %v2886_v15  ;;  %2810 = vmatmul.f32.gmra.mxu2 %v2354_v61  ;;  %v4239_v29 = vld [vmem:[#allocation3 + $0x34] sm:$0xff] }
 0x323   : > { %4029 = vrot.lane.b32.xlu2 %v3952_v48, %s8618_s17  ;;  %3743 = vrot.lane.b32.xlu0 %v3665_v10, %s8618_s17  ;;  %4489 = vst.msk [vmem:[#allocation5 + $0x68] sm:$0xff] %vm678_vm2, %v4239_v29  ;;  %v4525_v53 = vld [vmem:[#allocation3 + $0x35] sm:$0xff] }
 0x324   : > { %4597 = vrot.lane.b32.xlu1 %v4524_v39, %s8618_s17  ;;  %v3136_v46 = vadd.f32 %v10317_v1, %v3011_v52  ;;  %v3666_v1 = vld [vmem:[#allocation3 + $0x39] sm:$0xff]  ;;  %5185 = vmatpush.msra.mxu2 %v4996_v13 }
 0x325   : > { %v2763_v44 = vpop.f32.mrf.mxu2  ;;  %v2391_v52 = vld [vmem:[#allocation5 + $0x4f0] sm:$0xff]  ;;  %v5019_v13 = vld [vmem:[%s13323_s6 + $0xe0] sm:$0xff] }
 0x326   : > { %v3229_v37 = vmax.f32 %v3136_v46, 0.0  ;;  %v2764_v42 = vadd.f32 %v2763_v44, %v2639_v11  ;;  %v10517_v25 = vpop.f32.mrf.mxu0  ;;  %v3589_v46 = vld [vmem:[#allocation3 + $0x10] sm:$0xff] }
 0x327   : > { %3625 = vst.msk [vmem:[#allocation5 + $0x50] sm:$0xff] %vm678_vm2, %v3589_v46 }
 0x328   : > { %v3522_v3 = vmul.f32 %v10260_v36, %v3229_v37  ;;  %v2889_v62 = vadd.f32 %v10295_v19, %v2764_v42  ;;  %v2642_v36 = vadd.f32 %v10374_v6, %v9988_v45  ;;  %v10531_v19 = vpop.f32.mrf.mxu3 }
 0x329   : > { %3075 = vmatmul.f32.gmra.mxu0 %v2381_v14  ;;  %v3953_v26 = vld [vmem:[#allocation3 + $0x42] sm:$0xff] }
 0x32a   : > { %3558 = vst.msk [vmem:[#allocation3 + $0x4b] sm:$0xff] %vm678_vm2, %v3522_v3  ;;  %v3014_v27 = vadd.f32 %v10435_v54, %v2889_v62  ;;  %2813 = vmatmul.f32.gmra.mxu2 %v2359_v23  ;;  %v4240_v5 = vld [vmem:[#allocation3 + $0x3c] sm:$0xff]  ;;  %v2396_v23 = vld [vmem:[#allocation5 + $0x518] sm:$0xff] }
 0x32b   : > { %4599 = vrot.lane.b32.xlu2 %v4525_v53, %s8618_s17  ;;  %4313 = vrot.lane.b32.xlu0 %v4238_v40, %s8618_s17  ;;  %3919 = vst.msk [vmem:[#allocation5 + $0x148] sm:$0xff] %vm678_vm2, %v3953_v26  ;;  %v3667_v45 = vld [vmem:[#allocation3 + $0x41] sm:$0xff]  ;;  %v2374_v53 = vld [vmem:[#allocation5 + $0x468] sm:$0xff] }
 0x32c   : > { %3745 = vrot.lane.b32.xlu1 %v3666_v1, %s8618_s17  ;;  %v3139_v63 = vadd.f32 %v10336_v60, %v3014_v27  ;;  %4490 = vst.msk [vmem:[#allocation5 + $0x90] sm:$0xff] %vm678_vm2, %v4240_v5  ;;  %v4526_v41 = vld [vmem:[#allocation3 + $0x3d] sm:$0xff]  ;;  %v10581_v27 = vpop.permute.xlu2 %5926 }
 0x32d   : > { %v2766_v54 = vpop.f32.mrf.mxu2 }
 0x32e   : > { %v3230_v7 = vmax.f32 %v3139_v63, 0.0  ;;  %v2767_v4 = vadd.f32 %v2766_v54, %v2642_v36  ;;  %v10535_v57 = vpop.f32.mrf.mxu0  ;;  %v2651_v36 = vadd.f32 %v10374_v6, %v10057_v18  ;;  %v2379_v18 = vld [vmem:[#allocation5 + $0x490] sm:$0xff] }
 0x330   : > { %v3523_v40 = vmul.f32 %v10266_v50, %v3230_v7  ;;  %v2892_v20 = vadd.f32 %v10313_v43, %v2767_v4  ;;  %v2645_v43 = vadd.f32 %v10374_v6, %v10018_v30  ;;  %v10556_v15 = vpop.f32.mrf.mxu3  ;;  %v5020_v4 = vld [vmem:[%s13323_s6 + $0xe8] sm:$0xff] }
 0x331   : > { %3078 = vmatmul.f32.gmra.mxu0 %v2386_v32  ;;  %v10547_v50 = vld [vmem:[#allocation3 + $0x44] sm:$0xff]  ;;  %v13377_v32 = vld [vmem:[#allocation23_spill] sm:$0xff] }
 0x332   : > { %3559 = vst.msk [vmem:[#allocation3 + $0x53] sm:$0xff] %vm678_vm2, %v3523_v40  ;;  %v3017_v60 = vadd.f32 %v10448_v17, %v2892_v20  ;;  %2816 = vmatmul.f32.gmra.mxu2 %v2364_v21  ;;  %v4527_v1 = vld [vmem:[#allocation3 + $0x45] sm:$0xff] }
 0x333   : > { %3747 = vrot.lane.b32.xlu2 %v3667_v45, %s8618_s17  ;;  %4031 = vrot.lane.b32.xlu0 %v3953_v26, %s8618_s17  ;;  %4491 = vst.msk [vmem:[#allocation5 + $0xb8] sm:$0xff] %vm678_vm2, %v10547_v50 }
 0x334   : > { %4315 = vrot.lane.b32.xlu1 %v4239_v29, %s8618_s17  ;;  %v3142_v17 = vadd.f32 %v10355_v51, %v3017_v60  ;;  %v2369_v29 = vld [vmem:[#allocation5 + $0x440] sm:$0xff] }
 0x335   : > { %v2769_v2 = vpop.f32.mrf.mxu2  ;;  %v3954_v51 = vld [vmem:[#allocation3 + $0x4a] sm:$0xff] }
 0x336   : > { %v3231_v35 = vmax.f32 %v3142_v17, 0.0  ;;  %v2770_v61 = vadd.f32 %v2769_v2, %v2645_v43  ;;  %v10560_v39 = vpop.f32.mrf.mxu0  ;;  %v2401_v60 = vld [vmem:[#allocation5 + $0x540] sm:$0xff] }
 0x338   : > { %v3524_v10 = vmul.f32 %v10277_v47, %v3231_v35  ;;  %v2895_v48 = vadd.f32 %v10332_v28, %v2770_v61  ;;  %v10567_v47 = vpop.f32.mrf.mxu1  ;;  %v2648_v28 = vadd.f32 %v10374_v6, %v10039_v8  ;;  %v10577_v3 = vpop.f32.mrf.mxu3  ;;  %v13378_v35 = vld [vmem:[#allocation6_spill] sm:$0xff] }
 0x339   : > { %3081 = vmatmul.f32.gmra.mxu0 %v2391_v52  ;;  %v10565_v11 = vld [vmem:[#allocation3 + $0x4c] sm:$0xff]  ;;  %v2654_v61 = vadd.f32 %v10374_v6, %v13378_v35 }
 0x33a   : > { %3560 = vst.msk [vmem:[#allocation3 + $0x5b] sm:$0xff] %vm678_vm2, %v3524_v10  ;;  %v3020_v30 = vadd.f32 %v10463_v24, %v2895_v48  ;;  %2819 = vmatmul.f32.gmra.mxu2 %v2369_v29  ;;  %v3955_v26 = vld [vmem:[#allocation3 + $0x52] sm:$0xff]  ;;  %v10625_v10 = vpop.permute.xlu2 %5941 }
 0x33b   : > { %4317 = vrot.lane.b32.xlu2 %v4240_v5, %s8618_s17  ;;  %4601 = vrot.lane.b32.xlu0 %v4526_v41, %s8618_s17  ;;  %4492 = vst.msk [vmem:[#allocation5 + $0xe0] sm:$0xff] %vm678_vm2, %v10565_v11  ;;  %v5021_v5 = vld [vmem:[%s13323_s6 + $0xf0] sm:$0xff]  ;;  %v3669_v2 = vld [vmem:[#allocation3 + $0x51] sm:$0xff] }
 0x33c   : > { %4033 = vrot.lane.b32.xlu1 %v3954_v51, %s8618_s17  ;;  %v3145_v24 = vadd.f32 %v10452_v55, %v3020_v30  ;;  %v3668_v55 = vld [vmem:[#allocation3 + $0x49] sm:$0xff] }
 0x33d   : > { %v2772_v44 = vpop.f32.mrf.mxu2  ;;  %v13379_v51 = vld [vmem:[#allocation26_spill] sm:$0xff] }
 0x33e   : > { %v3232_v37 = vmax.f32 %v3145_v24, 0.0  ;;  %v2773_v42 = vadd.f32 %v2772_v44, %v2648_v28  ;;  %v2384_v24 = vld [vmem:[#allocation5 + $0x4b8] sm:$0xff]  ;;  %v13384_v35 = vld [vmem:[#allocation10_spill] sm:$0xff] }
 0x340   : > { %v3525_v62 = vmul.f32 %v10275_v59, %v3232_v37  ;;  %v2898_v14 = vadd.f32 %v10351_v33, %v2773_v42  ;;  %v5022_v59 = vld [vmem:[%s13323_s6 + $0xf8] sm:$0xff]  ;;  %v10589_v33 = vpop.f32.mrf.mxu0  ;;  %v10602_v54 = vpop.f32.mrf.mxu1  ;;  %v5016_v37 = vld [vmem:[%s13323_s6 + $0xc8] sm:$0xff] }
 0x341   : > { %3084 = vmatmul.f32.gmra.mxu0 %v2396_v23  ;;  %5300 = vmatpush.msra.mxu3 %v5022_v59  ;;  %v10612_v43 = vpop.f32.mrf.mxu3  ;;  %v3670_v44 = vld [vmem:[#allocation3 + $0x59] sm:$0xff] }
 0x342   : > { %3561 = vst.msk [vmem:[#allocation3 + $0x63] sm:$0xff] %vm678_vm2, %v3525_v62  ;;  %v3023_v8 = vadd.f32 %v10482_v56, %v2898_v14  ;;  %2822 = vmatmul.f32.gmra.mxu2 %v2374_v53  ;;  %v4995_v56 = vld [vmem:[%s13323_s6 + $0x20] sm:$0xff]  ;;  %v13381_v23 = vld [vmem:[#allocation8_spill] sm:$0xff] }
 0x343   : > { %4035 = vrot.lane.b32.xlu2 %v3955_v26, %s8618_s17  ;;  %3749 = vrot.lane.b32.xlu0 %v3668_v55, %s8618_s17  ;;  %v3956_v62 = vld [vmem:[#allocation3 + $0x5a] sm:$0xff]  ;;  %v2657_v53 = vadd.f32 %v10374_v6, %v13381_v23  ;;  %v5010_v23 = vld [vmem:[%s13323_s6 + $0x98] sm:$0xff] }
 0x344   : > { %4603 = vrot.lane.b32.xlu1 %v4527_v1, %s8618_s17  ;;  %v3148_v63 = vadd.f32 %v10473_v31, %v3023_v8  ;;  %5186 = vmatpush.msra.mxu2 %v4995_v56  ;;  %v4528_v31 = vld [vmem:[#allocation3 + $0x4d] sm:$0xff]  ;;  %v5015_v14 = vld [vmem:[%s13323_s6 + $0xc0] sm:$0xff]  ;;  %v5036_v59 = vld [vmem:[%s13323_s6 + $0x168] sm:$0xff] }
 0x345   : > { %v2775_v7 = vpop.f32.mrf.mxu2  ;;  %5301 = vmatpush.msra.mxu3 %v5021_v5  ;;  %v3875_v5 = vld [vmem:[#allocation3 + $0x2] sm:$0xff] }
 0x346   : > { %v3233_v40 = vmax.f32 %v3148_v63, 0.0  ;;  %v2776_v20 = vadd.f32 %v2775_v7, %v2651_v36  ;;  %3911 = vst.msk [vmem:[#allocation5 + $0x8] sm:$0xff] %vm678_vm2, %v3875_v5  ;;  %v13382_v7 = vld [vmem:[#allocation25_spill] sm:$0xff]  ;;  %v13386_v5 = vld [vmem:[#allocation12_spill] sm:$0xff] }
 0x347   : > { %5302 = vmatpush.msra.mxu3 %v5020_v4 }
 0x348   : > { %v3526_v21 = vmul.f32 %v13377_v32, %v3233_v40  ;;  %v2901_v45 = vadd.f32 %v10484_v49, %v2776_v20  ;;  %v5018_v49 = vld [vmem:[%s13323_s6 + $0xd8] sm:$0xff]  ;;  %v10628_v48 = vpop.f32.mrf.mxu0  ;;  %v10633_v30 = vpop.f32.mrf.mxu1 }
 0x349   : > { %3087 = vmatmul.f32.gmra.mxu0 %v2401_v60  ;;  %5303 = vmatpush.msra.mxu3 %v5019_v13  ;;  %v10658_v26 = vpop.f32.mrf.mxu3  ;;  %v2389_v20 = vld [vmem:[#allocation5 + $0x4e0] sm:$0xff]  ;;  %v5013_v60 = vld [vmem:[%s13323_s6 + $0xb0] sm:$0xff] }
 0x34a   : > { %3562 = vst.msk [vmem:[#allocation3 + $0x6b] sm:$0xff] %vm678_vm2, %v3526_v21  ;;  %v3026_v17 = vadd.f32 %v10499_v38, %v2901_v45  ;;  %2825 = vmatmul.f32.gmra.mxu2 %v2379_v18  ;;  %v13383_v21 = vld [vmem:[#allocation48_spill] sm:$0xff]  ;;  %v4243_v45 = vld [vmem:[#allocation3 + $0x54] sm:$0xff] }
 0x34b   : > { %4605 = vrot.lane.b32.xlu2 %v4528_v31, %s8618_s17  ;;  %4319 = vrot.lane.b32.xlu0 %v10547_v50, %s8618_s17  ;;  %v5017_v50 = vld [vmem:[%s13323_s6 + $0xd0] sm:$0xff]  ;;  %v5035_v18 = vld [vmem:[%s13323_s6 + $0x160] sm:$0xff]  ;;  %v10683_v31 = vpop.permute.xlu0 %5916 }
 0x34c   : > { %3751 = vrot.lane.b32.xlu1 %v3669_v2, %s8618_s17  ;;  %v3151_v38 = vadd.f32 %v10497_v34, %v3026_v17  ;;  %5304 = vmatpush.msra.mxu3 %v5018_v49  ;;  %v13380_v34 = vld [vmem:[#allocation52_spill] sm:$0xff]  ;;  %v4529_v13 = vld [vmem:[#allocation3 + $0x55] sm:$0xff] }
 0x34d   : > { %v2778_v52 = vpop.f32.mrf.mxu2  ;;  %v3957_v17 = vld [vmem:[#allocation3 + $0x62] sm:$0xff]  ;;  %v4994_v2 = vld [vmem:[%s13323_s6 + $0x18] sm:$0xff] }
 0x34e   : > { %v3234_v29 = vmax.f32 %v3151_v38, 0.0  ;;  %v2779_v41 = vadd.f32 %v2778_v52, %v2654_v61  ;;  %5305 = vmatpush.msra.mxu3 %v5017_v50  ;;  %v5012_v49 = vld [vmem:[%s13323_s6 + $0xa8] sm:$0xff]  ;;  %v2660_v61 = vadd.f32 %v10374_v6, %v13384_v35  ;;  %v5011_v50 = vld [vmem:[%s13323_s6 + $0xa0] sm:$0xff]  ;;  %5187 = vmatpush.msra.mxu2 %v4994_v2 }
 0x350   : > { %v3527_v46 = vmul.f32 %v13379_v51, %v3234_v29  ;;  %v2904_v28 = vadd.f32 %v10503_v16, %v2779_v41  ;;  %v5038_v16 = vld [vmem:[%s13323_s6 + $0x178] sm:$0xff]  ;;  %5306 = vmatpush.msra.mxu3 %v5016_v37  ;;  %v10668_v63 = vpop.f32.mrf.mxu0  ;;  %v10674_v32 = vpop.f32.mrf.mxu1  ;;  %v5033_v29 = vld [vmem:[%s13323_s6 + $0x150] sm:$0xff] }
 0x351   : > { %3090 = vmatmul.f32.gmra.mxu0 %v13380_v34  ;;  %v10708_v41 = vld [vmem:[#allocation3 + $0x64] sm:$0xff]  ;;  %v10712_v34 = vpop.f32.mrf.mxu3 }
 0x352   : > { %3563 = vst.msk [vmem:[#allocation3 + $0x73] sm:$0xff] %vm678_vm2, %v3527_v46  ;;  %v3029_v42 = vadd.f32 %v10517_v25, %v2904_v28  ;;  %2828 = vmatmul.f32.gmra.mxu2 %v2384_v24  ;;  %v5037_v25 = vld [vmem:[%s13323_s6 + $0x170] sm:$0xff]  ;;  %5425 = vmatpush.msra.mxu0 %v5038_v16  ;;  %v10718_v16 = vpop.permute.xlu1 %5921 }
 0x353   : > { %3753 = vrot.lane.b32.xlu2 %v3670_v44, %s8618_s17  ;;  %4037 = vrot.lane.b32.xlu0 %v3956_v62, %s8618_s17  ;;  %v3876_v28 = vld [vmem:[#allocation3 + $0xa] sm:$0xff]  ;;  %4495 = vst.msk [vmem:[#allocation5 + $0x158] sm:$0xff] %vm678_vm2, %v10708_v41  ;;  %v13385_v44 = vld [vmem:[#allocation27_spill] sm:$0xff] }
 0x354   : > { %4321 = vrot.lane.b32.xlu1 %v10565_v11, %s8618_s17  ;;  %v3154_v8 = vadd.f32 %v10519_v12, %v3029_v42  ;;  %v5014_v11 = vld [vmem:[%s13323_s6 + $0xb8] sm:$0xff]  ;;  %5307 = vmatpush.msra.mxu3 %v5015_v14  ;;  %v3592_v12 = vld [vmem:[#allocation3 + $0x28] sm:$0xff]  ;;  %3912 = vst.msk [vmem:[#allocation5 + $0x30] sm:$0xff] %vm678_vm2, %v3876_v28  ;;  %v2394_v62 = vld [vmem:[#allocation5 + $0x508] sm:$0xff] }
 0x355   : > { %v3736_v55 = vpop.permute.xlu2 %3735  ;;  %v2781_v1 = vpop.f32.mrf.mxu2  ;;  %5426 = vmatpush.msra.mxu0 %v5037_v25  ;;  %3628 = vst.msk [vmem:[#allocation5 + $0xc8] sm:$0xff] %vm678_vm2, %v3592_v12  ;;  %v4165_v24 = vld [vmem:[#allocation3 + $0x23] sm:$0xff] }
 0x356   : > { %v3235_v56 = vmax.f32 %v3154_v8, 0.0  ;;  %3841 = vst.msk [vmem:[#allocation5 + $0x50] sm:$0xff] %vm1260_vm3, %v3736_v55  ;;  %v2782_v36 = vadd.f32 %v2781_v1, %v2657_v53  ;;  %5308 = vmatpush.msra.mxu3 %v5014_v11  ;;  %v3958_v25 = vld [vmem:[#allocation3 + $0x6a] sm:$0xff]  ;;  %v5032_v53 = vld [vmem:[%s13323_s6 + $0x148] sm:$0xff] }
 0x357   : > { %5427 = vmatpush.msra.mxu0 %v5036_v59  ;;  %4201 = vst.msk [vmem:[#allocation5 + $0x60] sm:$0xff] %vm678_vm2, %v4165_v24  ;;  %v3671_v8 = vld [vmem:[#allocation3 + $0x61] sm:$0xff]  ;;  %v5054_v1 = vld [vmem:[%s13323_s6 + $0x1f8] sm:$0xff]  ;;  %v13388_v24 = vld [vmem:[#allocation15_spill] sm:$0xff] }
 0x358   : > { %v3528_v4 = vmul.f32 %v13382_v7, %v3235_v56  ;;  %v2907_v40 = vadd.f32 %v10531_v19, %v2782_v36  ;;  %5309 = vmatpush.msra.mxu3 %v5013_v60  ;;  %v10720_v14 = vpop.f32.mrf.mxu0  ;;  %v4530_v55 = vld [vmem:[#allocation3 + $0x5d] sm:$0xff]  ;;  %v10735_v11 = vpop.f32.mrf.mxu1  ;;  %v5009_v59 = vld [vmem:[%s13323_s6 + $0x90] sm:$0xff]  ;;  %v2663_v56 = vadd.f32 %v10374_v6, %v13386_v5  ;;  %5550 = vmatpush.msra.mxu1 %v5054_v1 }
 0x359   : > { %3093 = vmatmul.f32.gmra.mxu0 %v13383_v21  ;;  %v10747_v36 = vpop.permute.xlu0 %5931  ;;  %v5030_v21 = vld [vmem:[%s13323_s6 + $0x138] sm:$0xff]  ;;  %v4531_v35 = vld [vmem:[#allocation3 + $0x65] sm:$0xff]  ;;  %v4991_v1 = vld [vmem:[%s13323_s6] sm:$0xff] }
 0x35a   : > { %3564 = vst.msk [vmem:[#allocation3 + $0x7b] sm:$0xff] %vm678_vm2, %v3528_v4  ;;  %v3032_v19 = vadd.f32 %v10535_v57, %v2907_v40  ;;  %2831 = vmatmul.f32.gmra.mxu2 %v2389_v20  ;;  %v5034_v57 = vld [vmem:[%s13323_s6 + $0x158] sm:$0xff]  ;;  %5428 = vmatpush.msra.mxu0 %v5035_v18  ;;  %v5053_v4 = vld [vmem:[%s13323_s6 + $0x1f0] sm:$0xff]  ;;  %v5008_v20 = vld [vmem:[%s13323_s6 + $0x88] sm:$0xff] }
 0x35b   : > { %4323 = vrot.lane.b32.xlu2 %v4243_v45, %s8618_s17  ;;  %4607 = vrot.lane.b32.xlu0 %v4529_v13, %s8618_s17  ;;  %v5052_v18 = vld [vmem:[%s13323_s6 + $0x1e8] sm:$0xff]  ;;  %v13387_v13 = vld [vmem:[#allocation30_spill] sm:$0xff]  ;;  %v4993_v28 = vld [vmem:[%s13323_s6 + $0x10] sm:$0xff] }
 0x35c   : > { %4039 = vrot.lane.b32.xlu1 %v3957_v17, %s8618_s17  ;;  %v3157_v38 = vadd.f32 %v10539_v0, %v3032_v19  ;;  %5310 = vmatpush.msra.mxu3 %v5012_v49  ;;  %v3590_v0 = vld [vmem:[#allocation3 + $0x18] sm:$0xff]  ;;  %v3591_v19 = vld [vmem:[#allocation3 + $0x20] sm:$0xff] }
 0x35d   : > { %v2784_v52 = vpop.f32.mrf.mxu2  ;;  %5429 = vmatpush.msra.mxu0 %v5034_v57  ;;  %3626 = vst.msk [vmem:[#allocation5 + $0x78] sm:$0xff] %vm678_vm2, %v3590_v0  ;;  %5551 = vmatpush.msra.mxu1 %v5053_v4  ;;  %v2399_v49 = vld [vmem:[#allocation5 + $0x530] sm:$0xff]  ;;  %v10767_v57 = vpop.f32.mrf.mxu3  ;;  %v2195_v0 = vld [vmem:[#allocation2 + $0x136] sm:$0xff]  ;;  %v4773_v4 = vld [vmem:[#allocation3 + $0x136] sm:$0xff] }
 0x35e   : > { %v3236_v51 = vmax.f32 %v3157_v38, 0.0  ;;  %v2785_v46 = vadd.f32 %v2784_v52, %v2660_v61  ;;  %5311 = vmatpush.msra.mxu3 %v5011_v50  ;;  %3627 = vst.msk [vmem:[#allocation5 + $0xa0] sm:$0xff] %vm678_vm2, %v3591_v19  ;;  %v5007_v61 = vld [vmem:[%s13323_s6 + $0x80] sm:$0xff]  ;;  %v5029_v38 = vld [vmem:[%s13323_s6 + $0x130] sm:$0xff]  ;;  %5188 = vmatpush.msra.mxu2 %v4993_v28 }
 0x35f   : > { %5430 = vmatpush.msra.mxu0 %v5033_v29  ;;  %5552 = vmatpush.msra.mxu1 %v5052_v18  ;;  %v3672_v50 = vld [vmem:[#allocation3 + $0x69] sm:$0xff]  ;;  %v5051_v29 = vld [vmem:[%s13323_s6 + $0x1e0] sm:$0xff]  ;;  %2231 = vst.msk [vmem:[#allocation5 + $0x570] sm:$0xff] %vm678_vm2, %v2195_v0 }
 0x360   : > { %v3529_v37 = vmul.f32 %v13385_v44, %v3236_v51  ;;  %v2910_v42 = vadd.f32 %v10556_v15, %v2785_v46  ;;  %5312 = vmatpush.msra.mxu3 %v5010_v23  ;;  %v10781_v51 = vpop.permute.xlu1 %5936  ;;  %v10783_v46 = vpop.f32.mrf.mxu0  ;;  %v2666_v44 = vadd.f32 %v10374_v6, %v13388_v24  ;;  %v4992_v23 = vld [vmem:[%s13323_s6 + $0x8] sm:$0xff]  ;;  %v5027_v6 = vld [vmem:[%s13323_s6 + $0x120] sm:$0xff] }
 0x361   : > { %5431 = vmatpush.msra.mxu0 %v5032_v53  ;;  %5553 = vmatpush.msra.mxu1 %v5051_v29  ;;  %v13390_v18 = vld [vmem:[#allocation7_spill] sm:$0xff]  ;;  %v5046_v29 = vld [vmem:[%s13323_s6 + $0x1b8] sm:$0xff] }
 0x362   : > { %3565 = vst.msk [vmem:[#allocation3 + $0x83] sm:$0xff] %vm678_vm2, %v3529_v37  ;;  %v3035_v15 = vadd.f32 %v10560_v39, %v2910_v42  ;;  %2834 = vmatmul.f32.gmra.mxu2 %v2394_v62  ;;  %v5031_v39 = vld [vmem:[%s13323_s6 + $0x140] sm:$0xff]  ;;  %5313 = vmatpush.msra.mxu3 %v5009_v59  ;;  %v13389_v59 = vld [vmem:[#allocation29_spill] sm:$0xff] }
 0x363   : > { %4041 = vrot.lane.b32.xlu2 %v3958_v25, %s8618_s17  ;;  %3755 = vrot.lane.b32.xlu0 %v3671_v8, %s8618_s17  ;;  %v5050_v25 = vld [vmem:[%s13323_s6 + $0x1d8] sm:$0xff]  ;;  %v13391_v0 = vld [vmem:[#allocation31_spill] sm:$0xff] }
 0x364   : > { %4609 = vrot.lane.b32.xlu1 %v4530_v55, %s8618_s17  ;;  %v3160_v12 = vadd.f32 %v10567_v47, %v3035_v15  ;;  %v4024_v7 = vpop.permute.xlu2 %4023  ;;  %v4163_v47 = vld [vmem:[#allocation3 + $0x13] sm:$0xff]  ;;  %5432 = vmatpush.msra.mxu0 %v5031_v39  ;;  %v5049_v55 = vld [vmem:[%s13323_s6 + $0x1d0] sm:$0xff] }
 0x365   : > { %4129 = vst.msk [vmem:[#allocation5 + $0x58] sm:$0xff] %vm1260_vm3, %v4024_v7  ;;  %v2787_v40 = vpop.f32.mrf.mxu2  ;;  %5314 = vmatpush.msra.mxu3 %v5008_v20  ;;  %5554 = vmatpush.msra.mxu1 %v5050_v25  ;;  %v3673_v7 = vld [vmem:[#allocation3 + $0x71] sm:$0xff] }
 0x366   : > { %v3237_v45 = vmax.f32 %v3160_v12, 0.0  ;;  %v2788_v60 = vadd.f32 %v2787_v40, %v2663_v56  ;;  %4199 = vst.msk [vmem:[#allocation5 + $0x10] sm:$0xff] %vm678_vm2, %v4163_v47  ;;  %5433 = vmatpush.msra.mxu0 %v5030_v21  ;;  %5189 = vmatpush.msra.mxu2 %v4992_v23  ;;  %v2404_v56 = vld [vmem:[#allocation5 + $0x558] sm:$0xff]  ;;  %v4164_v12 = vld [vmem:[#allocation3 + $0x1b] sm:$0xff]  ;;  %v5026_v40 = vld [vmem:[%s13323_s6 + $0x118] sm:$0xff]  ;;  %v10828_v47 = vpop.f32.mrf.mxu3 }
 0x367   : > { %5315 = vmatpush.msra.mxu3 %v5007_v61  ;;  %5555 = vmatpush.msra.mxu1 %v5049_v55  ;;  %4200 = vst.msk [vmem:[#allocation5 + $0x38] sm:$0xff] %vm678_vm2, %v4164_v12  ;;  %v3959_v21 = vld [vmem:[#allocation3 + $0x72] sm:$0xff]  ;;  %v5045_v23 = vld [vmem:[%s13323_s6 + $0x1b0] sm:$0xff] }
 0x368   : > { %v3530_v17 = vmul.f32 %v13387_v13, %v3237_v45  ;;  %v2913_v2 = vadd.f32 %v10577_v3, %v2788_v60  ;;  %v4244_v3 = vld [vmem:[#allocation3 + $0x5c] sm:$0xff]  ;;  %5434 = vmatpush.msra.mxu0 %v5029_v38  ;;  %5190 = vmatpush.msra.mxu2 %v4991_v1  ;;  %v10839_v60 = vld [vmem:[%s13322_s5] ss:$0 sm:$0xff]  ;;  %v13392_v1 = vld [vmem:[#allocation9_spill] sm:$0xff] }
 0x369   : > { %v2407_v45 = vld [vmem:[#allocation5 + $0x570] sm:$0xff]  ;;  %v2669_v19 = vadd.f32 %v10839_v60, %v13390_v18  ;;  %v2196_v38 = vld [vmem:[#allocation2 + $0x13e] sm:$0xff] }
 0x36a   : > { %3566 = vst.msk [vmem:[#allocation3 + $0x8b] sm:$0xff] %vm678_vm2, %v3530_v17  ;;  %v3038_v52 = vadd.f32 %v10589_v33, %v2913_v2  ;;  %2837 = vmatmul.f32.gmra.mxu2 %v2399_v49  ;;  %v5028_v33 = vld [vmem:[%s13323_s6 + $0x128] sm:$0xff]  ;;  %8482 = vmatmul.msk.f32.gmra.mxu1 %vm678_vm2, %v2407_v45  ;;  %v5023_v25 = vld [vmem:[%s13323_s6 + $0x100] sm:$0xff]  ;;  %v13393_v45 = vld [vmem:[#allocation34_spill] sm:$0xff] }
 0x36b   : > { %4611 = vrot.lane.b32.xlu2 %v4531_v35, %s8618_s17  ;;  %4325 = vrot.lane.b32.xlu0 %v4244_v3, %s8618_s17  ;;  %4809 = vst.msk [vmem:[#allocation5 + $0x570] sm:$0xff] %vm678_vm2, %v4773_v4  ;;  %v4811_v18 = vld [vmem:[#allocation5] sm:$0xff] }
 0x36c   : > { %3757 = vrot.lane.b32.xlu1 %v3672_v50, %s8618_s17  ;;  %v3163_v37 = vadd.f32 %v10602_v54, %v3038_v52  ;;  %v4020_v42 = vpop.permute.xlu0 %4019  ;;  %v10807_v54 = vpop.f32.mrf.mxu1  ;;  %5435 = vmatpush.msra.mxu0 %v5028_v33  ;;  %v3595_v33 = vld [vmem:[#allocation3 + $0x40] sm:$0xff]  ;;  %2232 = vst.msk [vmem:[#allocation5 + $0x598] sm:$0xff] %vm678_vm2, %v2196_v38 }
 0x36d   : > { %v3742_v62 = vpop.permute.xlu2 %3741  ;;  %4127 = vst.msk [vmem:[#allocation5 + $0x8] sm:$0xff] %vm1260_vm3, %v4020_v42  ;;  %v2790_v53 = vpop.f32.mrf.mxu2  ;;  %v10865_v42 = vld [vmem:[#allocation3 + $0x74] sm:$0xff] }
 0x36e   : > { %v3238_v15 = vmax.f32 %v3163_v37, 0.0  ;;  %3844 = vst.msk [vmem:[#allocation5 + $0xc8] sm:$0xff] %vm1260_vm3, %v3742_v62  ;;  %v2791_v8 = vadd.f32 %v2790_v53, %v2666_v44  ;;  %5436 = vmatpush.msra.mxu0 %v5027_v6  ;;  %v10853_v52 = vpop.f32.mrf.mxu0  ;;  %v2409_v37 = vld [vmem:[#allocation5 + $0x580] sm:$0xff]  ;;  %v3960_v6 = vld [vmem:[#allocation3 + $0x7a] sm:$0xff]  ;;  %v10888_v12 = vpop.f32.mrf.mxu3 }
 0x36f   : > { %v4246_v62 = vld [vmem:[#allocation3 + $0x6c] sm:$0xff]  ;;  %3631 = vst.msk [vmem:[#allocation5 + $0x140] sm:$0xff] %vm678_vm2, %v3595_v33 }
 0x370   : > { %v3531_v39 = vmul.f32 %v13389_v59, %v3238_v15  ;;  %v2916_v5 = vadd.f32 %v10612_v43, %v2791_v8  ;;  %v5048_v43 = vld [vmem:[%s13323_s6 + $0x1c8] sm:$0xff]  ;;  %5437 = vmatpush.msra.mxu0 %v5026_v40  ;;  %v4532_v53 = vld [vmem:[#allocation3 + $0x6d] sm:$0xff]  ;;  %4497 = vst.msk [vmem:[#allocation5 + $0x1a8] sm:$0xff] %vm678_vm2, %v10865_v42  ;;  %v2672_v59 = vadd.f32 %v10839_v60, %v13392_v1  ;;  %v5039_v1 = vld [vmem:[%s13323_s6 + $0x180] sm:$0xff] }
 0x371   : > { %5556 = vmatpush.msra.mxu1 %v5048_v43  ;;  %v5044_v15 = vld [vmem:[%s13323_s6 + $0x1a8] sm:$0xff]  ;;  %v3593_v40 = vld [vmem:[#allocation3 + $0x30] sm:$0xff] }
 0x372   : > { %3567 = vst.msk [vmem:[#allocation3 + $0x93] sm:$0xff] %vm678_vm2, %v3531_v39  ;;  %v3041_v20 = vadd.f32 %v10628_v48, %v2916_v5  ;;  %2840 = vmatmul.f32.gmra.mxu2 %v2404_v56  ;;  %v5025_v48 = vld [vmem:[%s13323_s6 + $0x110] sm:$0xff]  ;;  %v4774_v56 = vld [vmem:[#allocation3 + $0x13e] sm:$0xff] }
 0x373   : > { %3759 = vrot.lane.b32.xlu2 %v3673_v7, %s8618_s17  ;;  %4043 = vrot.lane.b32.xlu0 %v3959_v21, %s8618_s17  ;;  %v2412_v21 = vld [vmem:[#allocation5 + $0x598] sm:$0xff]  ;;  %3629 = vst.msk [vmem:[#allocation5 + $0xf0] sm:$0xff] %vm678_vm2, %v3593_v40 }
 0x374   : > { %4327 = vrot.lane.b32.xlu1 %v10708_v41, %s8618_s17  ;;  %v3166_v13 = vadd.f32 %v10633_v30, %v3041_v20  ;;  %v4022_v17 = vpop.permute.xlu1 %4021  ;;  %v4812_v49 = vld [vmem:[#allocation5 + $0x8] sm:$0xff]  ;;  %v5024_v30 = vld [vmem:[%s13323_s6 + $0x108] sm:$0xff]  ;;  %5438 = vmatpush.msra.mxu0 %v5025_v48  ;;  %v10860_v28 = vpop.f32.mrf.mxu1  ;;  %4810 = vst.msk [vmem:[#allocation5 + $0x598] sm:$0xff] %vm678_vm2, %v4774_v56 }
 0x375   : > { %v4312_v2 = vpop.permute.xlu2 %4311  ;;  %v5047_v41 = vld [vmem:[%s13323_s6 + $0x1c0] sm:$0xff]  ;;  %4128 = vst.msk [vmem:[#allocation5 + $0x30] sm:$0xff] %vm1260_vm3, %v4022_v17  ;;  %v3738_v35 = vpop.permute.xlu0 %3737  ;;  %5316 = vmatmul.f32.vlgmr.msra.gmra.mxu3 %v4812_v49  ;;  %8483 = vmatmul.msk.f32.gmra.mxu1 %vm678_vm2, %v2412_v21  ;;  %v3961_v17 = vld [vmem:[#allocation3 + $0x82] sm:$0xff] }
 0x376   : > { %v2793_v61 = vpop.f32.mrf.mxu2  ;;  %v3239_v3 = vmax.f32 %v3166_v13, 0.0  ;;  %3842 = vst.msk [vmem:[#allocation5 + $0x78] sm:$0xff] %vm1260_vm3, %v3738_v35  ;;  %5557 = vmatpush.msra.mxu1 %v5047_v41  ;;  %5439 = vmatpush.msra.mxu0 %v5024_v30  ;;  %v10895_v43 = vpop.f32.mrf.mxu0  ;;  %v10904_v49 = vld [vmem:[#allocation3 + $0x7c] sm:$0xff]  ;;  %v5041_v30 = vld [vmem:[%s13323_s6 + $0x190] sm:$0xff] }
 0x377   : > { %v2794_v50 = vadd.f32 %v2793_v61, %v2669_v19  ;;  %4417 = vst.msk [vmem:[#allocation5 + $0x60] sm:$0xff] %vm1260_vm3, %v4312_v2  ;;  %v4168_v19 = vld [vmem:[#allocation3 + $0x3b] sm:$0xff]  ;;  %v5042_v2 = vld [vmem:[%s13323_s6 + $0x198] sm:$0xff] }
 0x378   : > { %v3532_v24 = vmul.f32 %v13391_v0, %v3239_v3  ;;  %5558 = vmatpush.msra.mxu1 %v5046_v29  ;;  %5440 = vmatpush.msra.mxu0 %v5023_v25  ;;  %v3674_v35 = vld [vmem:[#allocation3 + $0x79] sm:$0xff]  ;;  %4204 = vst.msk [vmem:[#allocation5 + $0xd8] sm:$0xff] %vm678_vm2, %v4168_v19  ;;  %v4822_v3 = vld [vmem:[#allocation5 + $0x58] sm:$0xff] }
 0x379   : > { %v2919_v44 = vadd.f32 %v10658_v26, %v2794_v50  ;;  %v4533_v61 = vld [vmem:[#allocation3 + $0x75] sm:$0xff]  ;;  %4498 = vst.msk [vmem:[#allocation5 + $0x1d0] sm:$0xff] %vm678_vm2, %v10904_v49 }
 0x37a   : > { %3568 = vst.msk [vmem:[#allocation3 + $0x9b] sm:$0xff] %vm678_vm2, %v3532_v24  ;;  %2843 = vmatmul.f32.gmra.mxu2 %v2409_v37  ;;  %5559 = vmatpush.msra.mxu1 %v5045_v23  ;;  %v13394_v50 = vld [vmem:[#allocation11_spill] sm:$0xff]  ;;  %v4166_v37 = vld [vmem:[#allocation3 + $0x2b] sm:$0xff] }
 0x37b   : > { %v3044_v26 = vadd.f32 %v10668_v63, %v2919_v44  ;;  %4329 = vrot.lane.b32.xlu2 %v4246_v62, %s8618_s17  ;;  %4613 = vrot.lane.b32.xlu0 %v4532_v53, %s8618_s17  ;;  %v2675_v29 = vadd.f32 %v10839_v60, %v13394_v50  ;;  %v5040_v44 = vld [vmem:[%s13323_s6 + $0x188] sm:$0xff]  ;;  %v3594_v25 = vld [vmem:[#allocation3 + $0x38] sm:$0xff]  ;;  %v10929_v53 = vpop.f32.mrf.mxu3  ;;  %4202 = vst.msk [vmem:[#allocation5 + $0x88] sm:$0xff] %vm678_vm2, %v4166_v37  ;;  %v13398_v50 = vld [vmem:[#allocation14_spill] sm:$0xff] }
 0x37c   : > { %4045 = vrot.lane.b32.xlu1 %v3960_v6, %s8618_s17  ;;  %v4817_v63 = vld [vmem:[#allocation5 + $0x30] sm:$0xff]  ;;  %5560 = vmatpush.msra.mxu1 %v5044_v15  ;;  %v10907_v41 = vpop.f32.mrf.mxu1  ;;  %v4816_v6 = vld [vmem:[#allocation5 + $0x28] sm:$0xff]  ;;  %v13395_v15 = vld [vmem:[#allocation33_spill] sm:$0xff]  ;;  %3630 = vst.msk [vmem:[#allocation5 + $0x118] sm:$0xff] %vm678_vm2, %v3594_v25 }
 0x37d   : > { %v3169_v8 = vadd.f32 %v10674_v32, %v3044_v26  ;;  %v4030_v55 = vpop.permute.xlu2 %4029  ;;  %v4308_v39 = vpop.permute.xlu0 %4307  ;;  %5319 = vmatmul.f32.gmra.mxu3 %v4817_v63  ;;  %v5043_v32 = vld [vmem:[%s13323_s6 + $0x1a0] sm:$0xff]  ;;  %v3962_v26 = vld [vmem:[#allocation3 + $0x8a] sm:$0xff] }
 0x37e   : > { %4132 = vst.msk [vmem:[#allocation5 + $0xd0] sm:$0xff] %vm1260_vm3, %v4030_v55  ;;  %v3740_v5 = vpop.permute.xlu1 %3739  ;;  %v2796_v4 = vpop.f32.mrf.mxu2  ;;  %5561 = vmatpush.msra.mxu1 %v5043_v32  ;;  %v4534_v63 = vld [vmem:[#allocation3 + $0x7d] sm:$0xff] }
 0x37f   : > { %v3240_v7 = vmax.f32 %v3169_v8, 0.0  ;;  %4415 = vst.msk [vmem:[#allocation5 + $0x10] sm:$0xff] %vm1260_vm3, %v4308_v39  ;;  %v2797_v20 = vadd.f32 %v2796_v4, %v2672_v59  ;;  %v10937_v59 = vld [vmem:[#allocation3 + $0x84] sm:$0xff]  ;;  %v10940_v39 = vpop.f32.mrf.mxu0  ;;  %v3882_v25 = vld [vmem:[#allocation3 + $0x3a] sm:$0xff] }
 0x380   : > { %3843 = vst.msk [vmem:[#allocation5 + $0xa0] sm:$0xff] %vm1260_vm3, %v3740_v5  ;;  %5562 = vmatpush.msra.mxu1 %v5042_v2  ;;  %v3675_v5 = vld [vmem:[#allocation3 + $0x81] sm:$0xff] }
 0x381   : > { %v3533_v48 = vmul.f32 %v13393_v45, %v3240_v7  ;;  %v2922_v13 = vadd.f32 %v10712_v34, %v2797_v20  ;;  %3928 = vst.msk [vmem:[#allocation5 + $0x2b0] sm:$0xff] %vm678_vm2, %v3962_v26  ;;  %v13396_v4 = vld [vmem:[#allocation13_spill] sm:$0xff] }
 0x382   : > { %5191 = vmatmul.f32.vlgmr.msra.gmra.mxu2 %v4811_v18  ;;  %5563 = vmatpush.msra.mxu1 %v5041_v30  ;;  %4499 = vst.msk [vmem:[#allocation5 + $0x1f8] sm:$0xff] %vm678_vm2, %v10937_v59  ;;  %v2678_v32 = vadd.f32 %v10839_v60, %v13396_v4  ;;  %v4167_v18 = vld [vmem:[#allocation3 + $0x33] sm:$0xff] }
 0x383   : > { %3569 = vst.msk [vmem:[#allocation3 + $0xa3] sm:$0xff] %vm678_vm2, %v3533_v48  ;;  %4047 = vrot.lane.b32.xlu2 %v3961_v17, %s8618_s17  ;;  %v3047_v34 = vadd.f32 %v10720_v14, %v2922_v13  ;;  %3761 = vrot.lane.b32.xlu0 %v3674_v35, %s8618_s17  ;;  %v4821_v35 = vld [vmem:[#allocation5 + $0x50] sm:$0xff] }
 0x384   : > { %4615 = vrot.lane.b32.xlu1 %v4533_v61, %s8618_s17  ;;  %5564 = vmatpush.msra.mxu1 %v5040_v44  ;;  %v10949_v56 = vpop.f32.mrf.mxu1  ;;  %v3676_v61 = vld [vmem:[#allocation3 + $0x89] sm:$0xff]  ;;  %4203 = vst.msk [vmem:[#allocation5 + $0xb0] sm:$0xff] %vm678_vm2, %v4167_v18 }
 0x385   : > { %v4600_v38 = vpop.permute.xlu2 %4599  ;;  %v3172_v14 = vadd.f32 %v10735_v11, %v3047_v34  ;;  %v4026_v33 = vpop.permute.xlu0 %4025  ;;  %5322 = vmatmul.f32.gmra.mxu3 %v4822_v3  ;;  %3918 = vst.msk [vmem:[#allocation5 + $0x120] sm:$0xff] %vm678_vm2, %v3882_v25 }
 0x386   : > { %4705 = vst.msk [vmem:[#allocation5 + $0x68] sm:$0xff] %vm1260_vm3, %v4600_v38  ;;  %v4310_v0 = vpop.permute.xlu1 %4309  ;;  %v4813_v24 = vld [vmem:[#allocation5 + $0x10] sm:$0xff]  ;;  %v2799_v62 = vpop.f32.mrf.mxu2  ;;  %5565 = vmatpush.msra.mxu1 %v5039_v1  ;;  %v10971_v38 = vld [vmem:[#allocation3 + $0x8c] sm:$0xff]  ;;  %v10995_v1 = vld [vmem:[#allocation3 + $0x94] sm:$0xff] }
 0x387   : > { %4130 = vst.msk [vmem:[#allocation5 + $0x80] sm:$0xff] %vm1260_vm3, %v4026_v33  ;;  %5441 = vmatmul.f32.vlgmr.msra.gmra.mxu0 %v4813_v24  ;;  %v3241_v23 = vmax.f32 %v3172_v14, 0.0  ;;  %v2800_v11 = vadd.f32 %v2799_v62, %v2675_v29  ;;  %v10963_v34 = vpop.f32.mrf.mxu3  ;;  %v2681_v29 = vadd.f32 %v10839_v60, %v13398_v50  ;;  %v3598_v24 = vld [vmem:[#allocation3 + $0x58] sm:$0xff]  ;;  %v4823_v62 = vld [vmem:[#allocation5 + $0x60] sm:$0xff]  ;;  %v13402_v50 = vld [vmem:[#allocation17_spill] sm:$0xff] }
 0x388   : > { %4416 = vst.msk [vmem:[#allocation5 + $0x38] sm:$0xff] %vm1260_vm3, %v4310_v0 }
 0x389   : > { %v3534_v8 = vmul.f32 %v13395_v15, %v3241_v23  ;;  %v2925_v55 = vadd.f32 %v10767_v57, %v2800_v11  ;;  %4500 = vst.msk [vmem:[#allocation5 + $0x220] sm:$0xff] %vm678_vm2, %v10971_v38  ;;  %v4826_v15 = vld [vmem:[#allocation5 + $0x78] sm:$0xff] }
 0x38a   : > { %5194 = vmatmul.f32.gmra.mxu2 %v4816_v6  ;;  %3634 = vst.msk [vmem:[#allocation5 + $0x1b8] sm:$0xff] %vm678_vm2, %v3598_v24 }
 0x38b   : > { %4617 = vrot.lane.b32.xlu2 %v4534_v63, %s8618_s17  ;;  %3570 = vst.msk [vmem:[#allocation3 + $0xab] sm:$0xff] %vm678_vm2, %v3534_v8  ;;  %v3050_v57 = vadd.f32 %v10783_v46, %v2925_v55  ;;  %4331 = vrot.lane.b32.xlu0 %v10865_v42, %s8618_s17  ;;  %v3881_v42 = vld [vmem:[#allocation3 + $0x32] sm:$0xff]  ;;  %v4535_v8 = vld [vmem:[#allocation3 + $0x85] sm:$0xff] }
 0x38c   : > { %3763 = vrot.lane.b32.xlu1 %v3675_v5, %s8618_s17  ;;  %3917 = vst.msk [vmem:[#allocation5 + $0xf8] sm:$0xff] %vm678_vm2, %v3881_v42  ;;  %v3963_v55 = vld [vmem:[#allocation3 + $0x92] sm:$0xff] }
 0x38d   : > { %v3748_v7 = vpop.permute.xlu2 %3747  ;;  %v3175_v40 = vadd.f32 %v10807_v54, %v3050_v57  ;;  %v4596_v20 = vpop.permute.xlu0 %4595  ;;  %v13397_v54 = vld [vmem:[#allocation35_spill] sm:$0xff]  ;;  %4501 = vst.msk [vmem:[#allocation5 + $0x248] sm:$0xff] %vm678_vm2, %v10995_v1  ;;  %v13400_v57 = vld [vmem:[#allocation16_spill] sm:$0xff] }
 0x38e   : > { %3847 = vst.msk [vmem:[#allocation5 + $0x140] sm:$0xff] %vm1260_vm3, %v3748_v7  ;;  %v4028_v46 = vpop.permute.xlu1 %4027  ;;  %v4827_v21 = vld [vmem:[#allocation5 + $0x80] sm:$0xff]  ;;  %v2802_v45 = vpop.f32.mrf.mxu2 }
 0x38f   : > { %4703 = vst.msk [vmem:[#allocation5 + $0x18] sm:$0xff] %vm1260_vm3, %v4596_v20  ;;  %5325 = vmatmul.f32.gmra.mxu3 %v4827_v21  ;;  %v4818_v48 = vld [vmem:[#allocation5 + $0x38] sm:$0xff]  ;;  %v3242_v19 = vmax.f32 %v3175_v40, 0.0  ;;  %v2803_v13 = vadd.f32 %v2802_v45, %v2678_v32  ;;  %v4171_v42 = vld [vmem:[#allocation3 + $0x53] sm:$0xff] }
 0x390   : > { %4131 = vst.msk [vmem:[#allocation5 + $0xa8] sm:$0xff] %vm1260_vm3, %v4028_v46  ;;  %5444 = vmatmul.f32.gmra.mxu0 %v4818_v48  ;;  %v3596_v32 = vld [vmem:[#allocation3 + $0x48] sm:$0xff]  ;;  %v4837_v46 = vld [vmem:[#allocation5 + $0xd0] sm:$0xff] }
 0x391   : > { %v3535_v17 = vmul.f32 %v13397_v54, %v3242_v19  ;;  %v2928_v2 = vadd.f32 %v10828_v47, %v2803_v13  ;;  %v10973_v47 = vpop.f32.mrf.mxu0  ;;  %3632 = vst.msk [vmem:[#allocation5 + $0x168] sm:$0xff] %vm678_vm2, %v3596_v32  ;;  %v13401_v19 = vld [vmem:[#allocation37_spill] sm:$0xff] }
 0x392   : > { %5197 = vmatmul.f32.gmra.mxu2 %v4821_v35  ;;  %4207 = vst.msk [vmem:[#allocation5 + $0x150] sm:$0xff] %vm678_vm2, %v4171_v42  ;;  %v3677_v35 = vld [vmem:[#allocation3 + $0x91] sm:$0xff] }
 0x393   : > { %3765 = vrot.lane.b32.xlu2 %v3676_v61, %s8618_s17  ;;  %3571 = vst.msk [vmem:[#allocation3 + $0xb3] sm:$0xff] %vm678_vm2, %v3535_v17  ;;  %v3053_v30 = vadd.f32 %v10853_v52, %v2928_v2  ;;  %4049 = vrot.lane.b32.xlu0 %v3962_v26, %s8618_s17  ;;  %v3964_v17 = vld [vmem:[#allocation3 + $0x9a] sm:$0xff]  ;;  %v4831_v2 = vld [vmem:[#allocation5 + $0xa0] sm:$0xff] }
 0x394   : > { %4333 = vrot.lane.b32.xlu1 %v10904_v49, %s8618_s17  ;;  %v10981_v49 = vpop.f32.mrf.mxu1  ;;  %v4536_v61 = vld [vmem:[#allocation3 + $0x8d] sm:$0xff] }
 0x395   : > { %v4318_v3 = vpop.permute.xlu2 %4317  ;;  %v3178_v14 = vadd.f32 %v10860_v28, %v3053_v30  ;;  %v3744_v33 = vpop.permute.xlu0 %3743  ;;  %v13399_v28 = vld [vmem:[#allocation38_spill] sm:$0xff] }
 0x396   : > { %4420 = vst.msk [vmem:[#allocation5 + $0xd8] sm:$0xff] %vm1260_vm3, %v4318_v3  ;;  %v4598_v52 = vpop.permute.xlu1 %4597  ;;  %v4814_v0 = vld [vmem:[#allocation5 + $0x18] sm:$0xff]  ;;  %v2805_v44 = vpop.f32.mrf.mxu2 }
 0x397   : > { %3845 = vst.msk [vmem:[#allocation5 + $0xf0] sm:$0xff] %vm1260_vm3, %v3744_v33  ;;  %v4832_v37 = vld [vmem:[#allocation5 + $0xa8] sm:$0xff]  ;;  %5566 = vmatmul.f32.vlgmr.msra.gmra.mxu1 %v4814_v0  ;;  %v3243_v23 = vmax.f32 %v3178_v14, 0.0  ;;  %v2806_v11 = vadd.f32 %v2805_v44, %v2681_v29  ;;  %v2687_v29 = vadd.f32 %v10839_v60, %v13402_v50  ;;  %v4169_v0 = vld [vmem:[#allocation3 + $0x43] sm:$0xff] }
 0x398   : > { %4704 = vst.msk [vmem:[#allocation5 + $0x40] sm:$0xff] %vm1260_vm3, %v4598_v52  ;;  %5328 = vmatmul.f32.gmra.mxu3 %v4832_v37  ;;  %5447 = vmatmul.f32.gmra.mxu0 %v4823_v62  ;;  %v4824_v37 = vld [vmem:[#allocation5 + $0x68] sm:$0xff] }
 0x399   : > { %v3536_v26 = vmul.f32 %v13399_v28, %v3243_v23  ;;  %v2931_v6 = vadd.f32 %v10888_v12, %v2806_v11  ;;  %v10997_v12 = vpop.f32.mrf.mxu3  ;;  %v11005_v40 = vpop.f32.mrf.mxu0  ;;  %v3886_v62 = vld [vmem:[#allocation3 + $0x5a] sm:$0xff]  ;;  %4205 = vst.msk [vmem:[#allocation5 + $0x100] sm:$0xff] %vm678_vm2, %v4169_v0 }
 0x39a   : > { %5200 = vmatmul.f32.gmra.mxu2 %v4826_v15  ;;  %v13403_v28 = vld [vmem:[#allocation39_spill] sm:$0xff]  ;;  %3922 = vst.msk [vmem:[#allocation5 + $0x1c0] sm:$0xff] %vm678_vm2, %v3886_v62 }
 0x39b   : > { %4335 = vrot.lane.b32.xlu2 %v10937_v59, %s8618_s17  ;;  %3572 = vst.msk [vmem:[#allocation3 + $0xbb] sm:$0xff] %vm678_vm2, %v3536_v26  ;;  %v3056_v63 = vadd.f32 %v10895_v43, %v2931_v6  ;;  %4619 = vrot.lane.b32.xlu0 %v4535_v8, %s8618_s17  ;;  %v2684_v59 = vadd.f32 %v10839_v60, %v13400_v57  ;;  %v4537_v15 = vld [vmem:[#allocation3 + $0x95] sm:$0xff] }
 0x39c   : > { %4051 = vrot.lane.b32.xlu1 %v3963_v55, %s8618_s17  ;;  %v11011_v18 = vpop.f32.mrf.mxu1  ;;  %v4836_v8 = vld [vmem:[#allocation5 + $0xc8] sm:$0xff] }
 0x39d   : > { %v4036_v5 = vpop.permute.xlu2 %4035  ;;  %v3181_v7 = vadd.f32 %v10907_v41, %v3056_v63  ;;  %v4314_v4 = vpop.permute.xlu0 %4313  ;;  %v11009_v41 = vld [vmem:[#allocation3 + $0xa2] sm:$0xff] }
 0x39e   : > { %4135 = vst.msk [vmem:[#allocation5 + $0x148] sm:$0xff] %vm1260_vm3, %v4036_v5  ;;  %v3746_v43 = vpop.permute.xlu1 %3745  ;;  %v2808_v20 = vpop.f32.mrf.mxu2  ;;  %v11040_v55 = vld [vmem:[#allocation3 + $0x9c] sm:$0xff] }
 0x39f   : > { %4418 = vst.msk [vmem:[#allocation5 + $0x88] sm:$0xff] %vm1260_vm3, %v4314_v4  ;;  %v4819_v21 = vld [vmem:[#allocation5 + $0x40] sm:$0xff]  ;;  %v3244_v45 = vmax.f32 %v3181_v7, 0.0  ;;  %v2809_v48 = vadd.f32 %v2808_v20, %v2684_v59  ;;  %v3678_v5 = vld [vmem:[#allocation3 + $0x99] sm:$0xff] }
 0x3a0   : > { %3846 = vst.msk [vmem:[#allocation5 + $0x118] sm:$0xff] %vm1260_vm3, %v3746_v43  ;;  %5331 = vmatmul.f32.gmra.mxu3 %v4837_v46  ;;  %5569 = vmatmul.f32.gmra.mxu1 %v4819_v21  ;;  %v13404_v59 = vld [vmem:[#allocation18_spill] sm:$0xff] }
 0x3a1   : > { %v3537_v13 = vmul.f32 %v13401_v19, %v3244_v45  ;;  %v2934_v54 = vadd.f32 %v10929_v53, %v2809_v48  ;;  %3931 = vst.msk [vmem:[#allocation5 + $0x328] sm:$0xff] %vm678_vm2, %v11009_v41  ;;  %v5062_v53 = vld [vmem:[%s13323_s6 + $0x238] sm:$0xff]  ;;  %v11031_v24 = vpop.f32.mrf.mxu3  ;;  %v11035_v11 = vpop.f32.mrf.mxu0  ;;  %v2690_v7 = vadd.f32 %v10839_v60, %v13404_v59  ;;  %v3599_v59 = vld [vmem:[#allocation3 + $0x60] sm:$0xff] }
 0x3a2   : > { %5203 = vmatmul.f32.gmra.mxu2 %v4831_v2  ;;  %4502 = vst.msk [vmem:[#allocation5 + $0x270] sm:$0xff] %vm678_vm2, %v11040_v55  ;;  %v4170_v21 = vld [vmem:[#allocation3 + $0x4b] sm:$0xff] }
 0x3a3   : > { %4053 = vrot.lane.b32.xlu2 %v3964_v17, %s8618_s17  ;;  %3573 = vst.msk [vmem:[#allocation3 + $0xc3] sm:$0xff] %vm678_vm2, %v3537_v13  ;;  %v3059_v30 = vadd.f32 %v10940_v39, %v2934_v54  ;;  %3767 = vrot.lane.b32.xlu0 %v3677_v35, %s8618_s17  ;;  %v3679_v54 = vld [vmem:[#allocation3 + $0xa1] sm:$0xff] }
 0x3a4   : > { %4621 = vrot.lane.b32.xlu1 %v4536_v61, %s8618_s17  ;;  %5683 = vmatpush.msrb.mxu2 %v5062_v53  ;;  %v11043_v63 = vpop.f32.mrf.mxu1  ;;  %v4841_v17 = vld [vmem:[#allocation5 + $0xf0] sm:$0xff]  ;;  %4206 = vst.msk [vmem:[#allocation5 + $0x128] sm:$0xff] %vm678_vm2, %v4170_v21  ;;  %v13406_v53 = vld [vmem:[#allocation19_spill] sm:$0xff] }
 0x3a5   : > { %v4606_v3 = vpop.permute.xlu2 %4605  ;;  %v3184_v14 = vadd.f32 %v10949_v56, %v3059_v30  ;;  %v4032_v33 = vpop.permute.xlu0 %4031  ;;  %v3597_v56 = vld [vmem:[#allocation3 + $0x50] sm:$0xff]  ;;  %3635 = vst.msk [vmem:[#allocation5 + $0x1e0] sm:$0xff] %vm678_vm2, %v3599_v59 }
 0x3a6   : > { %4708 = vst.msk [vmem:[#allocation5 + $0xe0] sm:$0xff] %vm1260_vm3, %v4606_v3  ;;  %v4316_v52 = vpop.permute.xlu1 %4315  ;;  %v4828_v39 = vld [vmem:[#allocation5 + $0x88] sm:$0xff]  ;;  %v2811_v44 = vpop.f32.mrf.mxu2  ;;  %v2693_v3 = vadd.f32 %v10839_v60, %v13406_v53  ;;  %v13410_v53 = vld [vmem:[#allocation21_spill] sm:$0xff] }
 0x3a7   : > { %4133 = vst.msk [vmem:[#allocation5 + $0xf8] sm:$0xff] %vm1260_vm3, %v4032_v33  ;;  %5450 = vmatmul.f32.gmra.mxu0 %v4828_v39  ;;  %v3245_v25 = vmax.f32 %v3184_v14, 0.0  ;;  %v2812_v23 = vadd.f32 %v2811_v44, %v2687_v29  ;;  %v4457_v14 = vld [vmem:[#allocation3 + $0x54] sm:$0xff] }
 0x3a8   : > { %4419 = vst.msk [vmem:[#allocation5 + $0xb0] sm:$0xff] %vm1260_vm3, %v4316_v52  ;;  %5572 = vmatmul.f32.gmra.mxu1 %v4824_v37  ;;  %v4838_v52 = vld [vmem:[#allocation5 + $0xd8] sm:$0xff]  ;;  %v3601_v39 = vld [vmem:[#allocation3 + $0x70] sm:$0xff] }
 0x3a9   : > { %v3538_v26 = vmul.f32 %v13403_v28, %v3245_v25  ;;  %v2937_v6 = vadd.f32 %v10963_v34, %v2812_v23  ;;  %3633 = vst.msk [vmem:[#allocation5 + $0x190] sm:$0xff] %vm678_vm2, %v3597_v56  ;;  %v11060_v48 = vpop.f32.mrf.mxu3  ;;  %v11066_v2 = vpop.f32.mrf.mxu0  ;;  %v13407_v37 = vld [vmem:[#allocation41_spill] sm:$0xff]  ;;  %v4538_v28 = vld [vmem:[#allocation3 + $0x9d] sm:$0xff] }
 0x3aa   : > { %5206 = vmatmul.f32.gmra.mxu2 %v4836_v8  ;;  %4493 = vst.msk [vmem:[#allocation5 + $0x108] sm:$0xff] %vm678_vm2, %v4457_v14  ;;  %v4846_v23 = vld [vmem:[#allocation5 + $0x118] sm:$0xff] }
 0x3ab   : > { %4623 = vrot.lane.b32.xlu2 %v4537_v15, %s8618_s17  ;;  %3574 = vst.msk [vmem:[#allocation3 + $0xcb] sm:$0xff] %vm678_vm2, %v3538_v26  ;;  %v3062_v57 = vadd.f32 %v10973_v47, %v2937_v6  ;;  %4337 = vrot.lane.b32.xlu0 %v10971_v38, %s8618_s17  ;;  %v3884_v47 = vld [vmem:[#allocation3 + $0x4a] sm:$0xff] }
 0x3ac   : > { %3769 = vrot.lane.b32.xlu1 %v3678_v5, %s8618_s17  ;;  %3920 = vst.msk [vmem:[#allocation5 + $0x170] sm:$0xff] %vm678_vm2, %v3884_v47  ;;  %v11077_v61 = vpop.f32.mrf.mxu1  ;;  %v3966_v26 = vld [vmem:[#allocation3 + $0xaa] sm:$0xff] }
 0x3ad   : > { %v3754_v34 = vpop.permute.xlu2 %3753  ;;  %v3187_v4 = vadd.f32 %v10981_v49, %v3062_v57  ;;  %v4602_v43 = vpop.permute.xlu0 %4601  ;;  %v13405_v49 = vld [vmem:[#allocation42_spill] sm:$0xff]  ;;  %3637 = vst.msk [vmem:[#allocation5 + $0x230] sm:$0xff] %vm678_vm2, %v3601_v39 }
 0x3ae   : > { %3850 = vst.msk [vmem:[#allocation5 + $0x1b8] sm:$0xff] %vm1260_vm3, %v3754_v34  ;;  %v4034_v32 = vpop.permute.xlu1 %4033  ;;  %v4842_v20 = vld [vmem:[#allocation5 + $0xf8] sm:$0xff]  ;;  %v2814_v38 = vpop.f32.mrf.mxu2 }
 0x3af   : > { %4706 = vst.msk [vmem:[#allocation5 + $0x90] sm:$0xff] %vm1260_vm3, %v4602_v43  ;;  %5334 = vmatmul.f32.gmra.mxu3 %v4842_v20  ;;  %v4833_v46 = vld [vmem:[#allocation5 + $0xb0] sm:$0xff]  ;;  %v3246_v42 = vmax.f32 %v3187_v4, 0.0  ;;  %v2815_v45 = vadd.f32 %v2814_v38, %v2690_v7  ;;  %v4852_v43 = vld [vmem:[#allocation5 + $0x148] sm:$0xff]  ;;  %v4174_v20 = vld [vmem:[#allocation3 + $0x6b] sm:$0xff] }
 0x3b0   : > { %4134 = vst.msk [vmem:[#allocation5 + $0x120] sm:$0xff] %vm1260_vm3, %v4034_v32  ;;  %5453 = vmatmul.f32.gmra.mxu0 %v4833_v46  ;;  %v13409_v46 = vld [vmem:[#allocation43_spill] sm:$0xff] }
 0x3b1   : > { %v3539_v19 = vmul.f32 %v13405_v49, %v3246_v42  ;;  %v2940_v13 = vadd.f32 %v10997_v12, %v2815_v45  ;;  %v11075_v12 = vld [vmem:[#allocation3 + $0xa4] sm:$0xff]  ;;  %v11091_v56 = vpop.f32.mrf.mxu3  ;;  %v11102_v15 = vpop.f32.mrf.mxu0  ;;  %v3967_v45 = vld [vmem:[#allocation3 + $0xb2] sm:$0xff]  ;;  %4210 = vst.msk [vmem:[#allocation5 + $0x1c8] sm:$0xff] %vm678_vm2, %v4174_v20 }
 0x3b2   : > { %5209 = vmatmul.f32.gmra.mxu2 %v4841_v17  ;;  %4503 = vst.msk [vmem:[#allocation5 + $0x298] sm:$0xff] %vm678_vm2, %v11075_v12  ;;  %v4851_v49 = vld [vmem:[#allocation5 + $0x140] sm:$0xff] }
 0x3b3   : > { %3771 = vrot.lane.b32.xlu2 %v3679_v54, %s8618_s17  ;;  %3575 = vst.msk [vmem:[#allocation3 + $0xd3] sm:$0xff] %vm678_vm2, %v3539_v19  ;;  %v3065_v35 = vadd.f32 %v11005_v40, %v2940_v13  ;;  %4055 = vrot.lane.b32.xlu0 %v11009_v41, %s8618_s17  ;;  %v11117_v19 = vld [vmem:[#allocation3 + $0xba] sm:$0xff]  ;;  %v3680_v13 = vld [vmem:[#allocation3 + $0xa9] sm:$0xff] }
 0x3b4   : > { %4339 = vrot.lane.b32.xlu1 %v10995_v1, %s8618_s17  ;;  %v11110_v7 = vpop.f32.mrf.mxu1  ;;  %v4539_v54 = vld [vmem:[#allocation3 + $0xa5] sm:$0xff]  ;;  %3934 = vst.msk [vmem:[#allocation5 + $0x3a0] sm:$0xff] %vm678_vm2, %v11117_v19 }
 0x3b5   : > { %v4324_v30 = vpop.permute.xlu2 %4323  ;;  %v3190_v50 = vadd.f32 %v11011_v18, %v3065_v35  ;;  %v3750_v40 = vpop.permute.xlu0 %3749  ;;  %v3885_v18 = vld [vmem:[#allocation3 + $0x52] sm:$0xff] }
 0x3b6   : > { %4423 = vst.msk [vmem:[#allocation5 + $0x150] sm:$0xff] %vm1260_vm3, %v4324_v30  ;;  %v4604_v41 = vpop.permute.xlu1 %4603  ;;  %v4829_v29 = vld [vmem:[#allocation5 + $0x90] sm:$0xff]  ;;  %v2817_v1 = vpop.f32.mrf.mxu2 }
 0x3b7   : > { %3848 = vst.msk [vmem:[#allocation5 + $0x168] sm:$0xff] %vm1260_vm3, %v3750_v40  ;;  %v4847_v33 = vld [vmem:[#allocation5 + $0x120] sm:$0xff]  ;;  %5575 = vmatmul.f32.gmra.mxu1 %v4829_v29  ;;  %v3247_v0 = vmax.f32 %v3190_v50, 0.0  ;;  %v2818_v44 = vadd.f32 %v2817_v1, %v2693_v3  ;;  %v2699_v3 = vadd.f32 %v10839_v60, %v13410_v53  ;;  %v4172_v29 = vld [vmem:[#allocation3 + $0x5b] sm:$0xff] }
 0x3b8   : > { %4707 = vst.msk [vmem:[#allocation5 + $0xb8] sm:$0xff] %vm1260_vm3, %v4604_v41  ;;  %5337 = vmatmul.f32.gmra.mxu3 %v4847_v33  ;;  %5456 = vmatmul.f32.gmra.mxu0 %v4838_v52  ;;  %v4839_v33 = vld [vmem:[#allocation5 + $0xe0] sm:$0xff] }
 0x3b9   : > { %v3540_v62 = vmul.f32 %v13407_v37, %v3247_v0  ;;  %v2943_v25 = vadd.f32 %v11031_v24, %v2818_v44  ;;  %3921 = vst.msk [vmem:[#allocation5 + $0x198] sm:$0xff] %vm678_vm2, %v3885_v18  ;;  %v11100_v24 = vld [vmem:[#allocation3 + $0xac] sm:$0xff]  ;;  %v2951_v35 = vpop.f32.mrf.mxu3  ;;  %v3076_v14 = vpop.f32.mrf.mxu0 }
 0x3ba   : > { %5212 = vmatmul.f32.gmra.mxu2 %v4846_v23  ;;  %4504 = vst.msk [vmem:[#allocation5 + $0x2c0] sm:$0xff] %vm678_vm2, %v11100_v24  ;;  %v3889_v52 = vld [vmem:[#allocation3 + $0x72] sm:$0xff]  ;;  %v3600_v44 = vld [vmem:[#allocation3 + $0x68] sm:$0xff] }
 0x3bb   : > { %4341 = vrot.lane.b32.xlu2 %v11040_v55, %s8618_s17  ;;  %3576 = vst.msk [vmem:[#allocation3 + $0xdb] sm:$0xff] %vm678_vm2, %v3540_v62  ;;  %v3068_v6 = vadd.f32 %v11035_v11, %v2943_v25  ;;  %4625 = vrot.lane.b32.xlu0 %v4538_v28, %s8618_s17  ;;  %v13408_v55 = vld [vmem:[#allocation20_spill] sm:$0xff]  ;;  %v13411_v18 = vld [vmem:[#allocation46_spill] sm:$0xff] }
 0x3bc   : > { %4057 = vrot.lane.b32.xlu1 %v3966_v26, %s8618_s17  ;;  %v2696_v5 = vadd.f32 %v10839_v60, %v13408_v55  ;;  %4208 = vst.msk [vmem:[#allocation5 + $0x178] sm:$0xff] %vm678_vm2, %v4172_v29  ;;  %v4540_v25 = vld [vmem:[#allocation3 + $0xad] sm:$0xff] }
 0x3bd   : > { %v4042_v8 = vpop.permute.xlu2 %4041  ;;  %v3193_v57 = vadd.f32 %v11043_v63, %v3068_v6  ;;  %v4320_v34 = vpop.permute.xlu0 %4319  ;;  %v4458_v63 = vld [vmem:[#allocation3 + $0x5c] sm:$0xff]  ;;  %v11140_v28 = vld [vmem:[#allocation3 + $0xb4] sm:$0xff]  ;;  %3925 = vst.msk [vmem:[#allocation5 + $0x238] sm:$0xff] %vm678_vm2, %v3889_v52 }
 0x3be   : > { %4138 = vst.msk [vmem:[#allocation5 + $0x1c0] sm:$0xff] %vm1260_vm3, %v4042_v8  ;;  %v3752_v11 = vpop.permute.xlu1 %3751  ;;  %v2820_v4 = vpop.f32.mrf.mxu2  ;;  %v4856_v23 = vld [vmem:[#allocation5 + $0x168] sm:$0xff]  ;;  %v13412_v8 = vld [vmem:[#allocation22_spill] sm:$0xff] }
 0x3bf   : > { %4421 = vst.msk [vmem:[#allocation5 + $0x100] sm:$0xff] %vm1260_vm3, %v4320_v34  ;;  %v4834_v32 = vld [vmem:[#allocation5 + $0xb8] sm:$0xff]  ;;  %v3248_v47 = vmax.f32 %v3193_v57, 0.0  ;;  %v2821_v38 = vadd.f32 %v2820_v4, %v2696_v5  ;;  %v3681_v26 = vld [vmem:[#allocation3 + $0xb1] sm:$0xff]  ;;  %v2702_v55 = vadd.f32 %v10839_v60, %v13412_v8 }
 0x3c0   : > { %3849 = vst.msk [vmem:[#allocation5 + $0x190] sm:$0xff] %vm1260_vm3, %v3752_v11  ;;  %5340 = vmatmul.f32.gmra.mxu3 %v4852_v43  ;;  %5578 = vmatmul.f32.gmra.mxu1 %v4834_v32  ;;  %v4173_v43 = vld [vmem:[#allocation3 + $0x63] sm:$0xff] }
 0x3c1   : > { %v3541_v21 = vmul.f32 %v13409_v46, %v3248_v47  ;;  %v2946_v42 = vadd.f32 %v11060_v48, %v2821_v38  ;;  %4494 = vst.msk [vmem:[#allocation5 + $0x130] sm:$0xff] %vm678_vm2, %v4458_v63  ;;  %v5061_v48 = vld [vmem:[%s13323_s6 + $0x230] sm:$0xff]  ;;  %v2954_v59 = vpop.f32.mrf.mxu3 }
 0x3c2   : > { %5215 = vmatmul.f32.gmra.mxu2 %v4851_v49  ;;  %3636 = vst.msk [vmem:[#allocation5 + $0x208] sm:$0xff] %vm678_vm2, %v3600_v44  ;;  %v4739_v47 = vld [vmem:[#allocation3 + $0x26] sm:$0xff] }
 0x3c3   : > { %4059 = vrot.lane.b32.xlu2 %v3967_v45, %s8618_s17  ;;  %3577 = vst.msk [vmem:[#allocation3 + $0xe3] sm:$0xff] %vm678_vm2, %v3541_v21  ;;  %v3071_v17 = vadd.f32 %v11066_v2, %v2946_v42  ;;  %3773 = vrot.lane.b32.xlu0 %v3680_v13, %s8618_s17  ;;  %v13413_v38 = vld [vmem:[#allocation45_spill] sm:$0xff]  ;;  %v3682_v21 = vld [vmem:[#allocation3 + $0xb9] sm:$0xff] }
 0x3c4   : > { %4627 = vrot.lane.b32.xlu1 %v4539_v54, %s8618_s17  ;;  %5684 = vmatpush.msrb.mxu2 %v5061_v48  ;;  %4505 = vst.msk [vmem:[#allocation5 + $0x2e8] sm:$0xff] %vm678_vm2, %v11140_v28  ;;  %v11168_v13 = vld [vmem:[#allocation3 + $0xbc] sm:$0xff] }
 0x3c5   : > { %v4612_v30 = vpop.permute.xlu2 %4611  ;;  %v3196_v50 = vadd.f32 %v11077_v61, %v3071_v17  ;;  %v4038_v2 = vpop.permute.xlu0 %4037  ;;  %4209 = vst.msk [vmem:[#allocation5 + $0x1a0] sm:$0xff] %vm678_vm2, %v4173_v43  ;;  %v13414_v17 = vld [vmem:[#allocation24_spill] sm:$0xff] }
 0x3c6   : > { %4711 = vst.msk [vmem:[#allocation5 + $0x158] sm:$0xff] %vm1260_vm3, %v4612_v30  ;;  %v4322_v40 = vpop.permute.xlu1 %4321  ;;  %v4843_v41 = vld [vmem:[#allocation5 + $0x100] sm:$0xff]  ;;  %v2823_v1 = vpop.f32.mrf.mxu2  ;;  %v2705_v48 = vadd.f32 %v10839_v60, %v13414_v17 }
 0x3c7   : > { %4136 = vst.msk [vmem:[#allocation5 + $0x170] sm:$0xff] %vm1260_vm3, %v4038_v2  ;;  %5459 = vmatmul.f32.gmra.mxu0 %v4843_v41  ;;  %v3249_v39 = vmax.f32 %v3196_v50, 0.0  ;;  %v2824_v0 = vadd.f32 %v2823_v1, %v2699_v3  ;;  %v3201_v61 = vpop.f32.mrf.mxu1  ;;  %v4861_v42 = vld [vmem:[#allocation5 + $0x190] sm:$0xff]  ;;  %v4460_v50 = vld [vmem:[#allocation3 + $0x6c] sm:$0xff] }
 0x3c8   : > { %4422 = vst.msk [vmem:[#allocation5 + $0x128] sm:$0xff] %vm1260_vm3, %v4322_v40  ;;  %5581 = vmatmul.f32.gmra.mxu1 %v4839_v33  ;;  %v4853_v2 = vld [vmem:[#allocation5 + $0x150] sm:$0xff]  ;;  %v3604_v40 = vld [vmem:[#allocation3 + $0x88] sm:$0xff]  ;;  %v13415_v33 = vld [vmem:[#allocation47_spill] sm:$0xff] }
 0x3c9   : > { %v3542_v37 = vmul.f32 %v13411_v18, %v3249_v39  ;;  %v2949_v62 = vadd.f32 %v11091_v56, %v2824_v0  ;;  %4775 = vst.msk [vmem:[#allocation5 + $0x20] sm:$0xff] %vm678_vm2, %v4739_v47  ;;  %v2957_v1 = vpop.f32.mrf.mxu3  ;;  %v4866_v0 = vld [vmem:[#allocation5 + $0x1b8] sm:$0xff] }
 0x3ca   : > { %5218 = vmatmul.f32.gmra.mxu2 %v4856_v23  ;;  %4506 = vst.msk [vmem:[#allocation5 + $0x310] sm:$0xff] %vm678_vm2, %v11168_v13  ;;  %v3969_v18 = vld [vmem:[#allocation3 + $0xc2] sm:$0xff] }
 0x3cb   : > { %4629 = vrot.lane.b32.xlu2 %v4540_v25, %s8618_s17  ;;  %3578 = vst.msk [vmem:[#allocation3 + $0xeb] sm:$0xff] %vm678_vm2, %v3542_v37  ;;  %v3074_v6 = vadd.f32 %v11102_v15, %v2949_v62  ;;  %4343 = vrot.lane.b32.xlu0 %v11075_v12, %s8618_s17  ;;  %v3887_v15 = vld [vmem:[#allocation3 + $0x62] sm:$0xff] }
 0x3cc   : > { %3775 = vrot.lane.b32.xlu1 %v3681_v26, %s8618_s17  ;;  %3923 = vst.msk [vmem:[#allocation5 + $0x1e8] sm:$0xff] %vm678_vm2, %v3887_v15  ;;  %v11186_v62 = vld [vmem:[#allocation3 + $0xc4] sm:$0xff] }
 0x3cd   : > { %v3760_v56 = vpop.permute.xlu2 %3759  ;;  %v3199_v5 = vadd.f32 %v11110_v7, %v3074_v6  ;;  %v4608_v57 = vpop.permute.xlu0 %4607  ;;  %4496 = vst.msk [vmem:[#allocation5 + $0x180] sm:$0xff] %vm678_vm2, %v4460_v50  ;;  %v13416_v26 = vld [vmem:[#allocation28_spill] sm:$0xff] }
 0x3ce   : > { %3853 = vst.msk [vmem:[#allocation5 + $0x230] sm:$0xff] %vm1260_vm3, %v3760_v56  ;;  %v4040_v34 = vpop.permute.xlu1 %4039  ;;  %v4857_v11 = vld [vmem:[#allocation5 + $0x170] sm:$0xff]  ;;  %v2826_v12 = vpop.f32.mrf.mxu2 }
 0x3cf   : > { %4709 = vst.msk [vmem:[#allocation5 + $0x108] sm:$0xff] %vm1260_vm3, %v4608_v57  ;;  %5343 = vmatmul.f32.gmra.mxu3 %v4857_v11  ;;  %v4848_v4 = vld [vmem:[#allocation5 + $0x128] sm:$0xff]  ;;  %v3250_v32 = vmax.f32 %v3199_v5, 0.0  ;;  %v2827_v20 = vadd.f32 %v2826_v12, %v2702_v55  ;;  %v3079_v7 = vpop.f32.mrf.mxu0  ;;  %v3204_v45 = vpop.f32.mrf.mxu1  ;;  %v4867_v57 = vld [vmem:[#allocation5 + $0x1c0] sm:$0xff]  ;;  %v4177_v11 = vld [vmem:[#allocation3 + $0x83] sm:$0xff] }
 0x3d0   : > { %4137 = vst.msk [vmem:[#allocation5 + $0x198] sm:$0xff] %vm1260_vm3, %v4040_v34  ;;  %5462 = vmatmul.f32.gmra.mxu0 %v4848_v4  ;;  %v3602_v55 = vld [vmem:[#allocation3 + $0x78] sm:$0xff] }
 0x3d1   : > { %v3543_v63 = vmul.f32 %v13413_v38, %v3250_v32  ;;  %v2952_v46 = vadd.f32 %v2951_v35, %v2827_v20  ;;  %3640 = vst.msk [vmem:[#allocation5 + $0x2a8] sm:$0xff] %vm678_vm2, %v3604_v40  ;;  %v11195_v12 = vld [vmem:[#allocation3 + $0xd2] sm:$0xff]  ;;  %v3970_v32 = vld [vmem:[#allocation3 + $0xca] sm:$0xff]  ;;  %v2960_v47 = vpop.f32.mrf.mxu3  ;;  %v4542_v38 = vld [vmem:[#allocation3 + $0xbd] sm:$0xff] }
 0x3d2   : > { %5221 = vmatmul.f32.gmra.mxu2 %v4861_v42  ;;  %4507 = vst.msk [vmem:[#allocation5 + $0x338] sm:$0xff] %vm678_vm2, %v11186_v62 }
 0x3d3   : > { %3777 = vrot.lane.b32.xlu2 %v3682_v21, %s8618_s17  ;;  %3579 = vst.msk [vmem:[#allocation3 + $0xf3] sm:$0xff] %vm678_vm2, %v3543_v63  ;;  %v3077_v49 = vadd.f32 %v3076_v14, %v2952_v46  ;;  %4061 = vrot.lane.b32.xlu0 %v11117_v19, %s8618_s17  ;;  %v3888_v14 = vld [vmem:[#allocation3 + $0x6a] sm:$0xff]  ;;  %v4175_v46 = vld [vmem:[#allocation3 + $0x73] sm:$0xff]  ;;  %v5060_v21 = vld [vmem:[%s13323_s6 + $0x228] sm:$0xff] }
 0x3d4   : > { %4345 = vrot.lane.b32.xlu1 %v11100_v24, %s8618_s17  ;;  %3924 = vst.msk [vmem:[#allocation5 + $0x210] sm:$0xff] %vm678_vm2, %v3888_v14  ;;  %5685 = vmatpush.msrb.mxu2 %v5060_v21  ;;  %v13419_v14 = vld [vmem:[#allocation49_spill] sm:$0xff] }
 0x3d5   : > { %v4330_v54 = vpop.permute.xlu2 %4329  ;;  %v3202_v35 = vadd.f32 %v3201_v61, %v3077_v49  ;;  %v3756_v30 = vpop.permute.xlu0 %3755  ;;  %v4541_v61 = vld [vmem:[#allocation3 + $0xb5] sm:$0xff]  ;;  %3638 = vst.msk [vmem:[#allocation5 + $0x258] sm:$0xff] %vm678_vm2, %v3602_v55 }
 0x3d6   : > { %4426 = vst.msk [vmem:[#allocation5 + $0x1c8] sm:$0xff] %vm1260_vm3, %v4330_v54  ;;  %v4610_v53 = vpop.permute.xlu1 %4609  ;;  %v4844_v3 = vld [vmem:[#allocation5 + $0x108] sm:$0xff]  ;;  %v2829_v19 = vpop.f32.mrf.mxu2  ;;  %v13418_v54 = vld [vmem:[#allocation32_spill] sm:$0xff] }
 0x3d7   : > { %3851 = vst.msk [vmem:[#allocation5 + $0x1e0] sm:$0xff] %vm1260_vm3, %v3756_v30  ;;  %v4862_v24 = vld [vmem:[#allocation5 + $0x198] sm:$0xff]  ;;  %5584 = vmatmul.f32.gmra.mxu1 %v4844_v3  ;;  %v3251_v41 = vmax.f32 %v3202_v35, 0.0  ;;  %v2830_v29 = vadd.f32 %v2829_v19, %v2705_v48  ;;  %v3082_v44 = vpop.f32.mrf.mxu0  ;;  %v3207_v25 = vpop.f32.mrf.mxu1  ;;  %v11213_v49 = vld [vmem:[%s13322_s5] ss:$0 sm:$0xff]  ;;  %v3603_v3 = vld [vmem:[#allocation3 + $0x80] sm:$0xff] }
 0x3d8   : > { %4710 = vst.msk [vmem:[#allocation5 + $0x130] sm:$0xff] %vm1260_vm3, %v4610_v53  ;;  %5346 = vmatmul.f32.gmra.mxu3 %v4862_v24  ;;  %5465 = vmatmul.f32.gmra.mxu0 %v4853_v2  ;;  %v2711_v17 = vadd.f32 %v11213_v49, %v13418_v54  ;;  %v4854_v24 = vld [vmem:[#allocation5 + $0x158] sm:$0xff] }
 0x3d9   : > { %v3544_v52 = vmul.f32 %v13415_v33, %v3251_v41  ;;  %v2955_v39 = vadd.f32 %v2954_v59, %v2830_v29  ;;  %4213 = vst.msk [vmem:[#allocation5 + $0x240] sm:$0xff] %vm678_vm2, %v4177_v11  ;;  %v11219_v2 = vld [vmem:[#allocation3 + $0xcc] sm:$0xff] }
 0x3da   : > { %5224 = vmatmul.f32.gmra.mxu2 %v4866_v0  ;;  %3937 = vst.msk [vmem:[#allocation5 + $0x418] sm:$0xff] %vm678_vm2, %v11195_v12  ;;  %v4740_v29 = vld [vmem:[#allocation3 + $0x2e] sm:$0xff] }
 0x3db   : > { %4347 = vrot.lane.b32.xlu2 %v11140_v28, %s8618_s17  ;;  %3580 = vst.msk [vmem:[#allocation3 + $0xfb] sm:$0xff] %vm678_vm2, %v3544_v52  ;;  %v3080_v37 = vadd.f32 %v3079_v7, %v2955_v39  ;;  %4631 = vrot.lane.b32.xlu0 %v4541_v61, %s8618_s17  ;;  %v2708_v28 = vadd.f32 %v10839_v60, %v13416_v26  ;;  %v13417_v60 = vld [vmem:[#allocation50_spill] sm:$0xff]  ;;  %v3683_v7 = vld [vmem:[#allocation3 + $0xc1] sm:$0xff] }
 0x3dc   : > { %4063 = vrot.lane.b32.xlu1 %v3969_v18, %s8618_s17  ;;  %4211 = vst.msk [vmem:[#allocation5 + $0x1f0] sm:$0xff] %vm678_vm2, %v4175_v46  ;;  %v4543_v52 = vld [vmem:[#allocation3 + $0xc5] sm:$0xff]  ;;  %v3890_v61 = vld [vmem:[#allocation3 + $0x7a] sm:$0xff]  ;;  %v2963_v18 = vpop.f32.mrf.mxu3 }
 0x3dd   : > { %v4048_v23 = vpop.permute.xlu2 %4047  ;;  %v3205_v6 = vadd.f32 %v3204_v45, %v3080_v37  ;;  %v4326_v56 = vpop.permute.xlu0 %4325  ;;  %3639 = vst.msk [vmem:[#allocation5 + $0x280] sm:$0xff] %vm678_vm2, %v3603_v3  ;;  %v3684_v0 = vld [vmem:[#allocation3 + $0xc9] sm:$0xff] }
 0x3de   : > { %4141 = vst.msk [vmem:[#allocation5 + $0x238] sm:$0xff] %vm1260_vm3, %v4048_v23  ;;  %v3758_v8 = vpop.permute.xlu1 %3757  ;;  %v2832_v5 = vpop.f32.mrf.mxu2  ;;  %v4871_v20 = vld [vmem:[#allocation5 + $0x1e0] sm:$0xff] }
 0x3df   : > { %4424 = vst.msk [vmem:[#allocation5 + $0x178] sm:$0xff] %vm1260_vm3, %v4326_v56  ;;  %v4849_v34 = vld [vmem:[#allocation5 + $0x130] sm:$0xff]  ;;  %v3252_v15 = vmax.f32 %v3205_v6, 0.0  ;;  %v2833_v59 = vadd.f32 %v2832_v5, %v2708_v28  ;;  %v3085_v42 = vpop.f32.mrf.mxu0  ;;  %v3210_v50 = vpop.f32.mrf.mxu1 }
 0x3e0   : > { %3852 = vst.msk [vmem:[#allocation5 + $0x208] sm:$0xff] %vm1260_vm3, %v3758_v8  ;;  %5349 = vmatmul.f32.gmra.mxu3 %v4867_v57  ;;  %5587 = vmatmul.f32.gmra.mxu1 %v4849_v34  ;;  %v4176_v8 = vld [vmem:[#allocation3 + $0x7b] sm:$0xff] }
 0x3e1   : > { %v3545_v4 = vmul.f32 %v13417_v60, %v3252_v15  ;;  %v2958_v43 = vadd.f32 %v2957_v1, %v2833_v59  ;;  %4508 = vst.msk [vmem:[#allocation5 + $0x360] sm:$0xff] %vm678_vm2, %v11219_v2  ;;  %v3607_v57 = vld [vmem:[#allocation3 + $0xa0] sm:$0xff]  ;;  %v13421_v60 = vld [vmem:[#allocation51_spill] sm:$0xff] }
 0x3e2   : > { %5227 = vmatmul.f32.gmra.mxu2 %v4871_v20  ;;  %4776 = vst.msk [vmem:[#allocation5 + $0x48] sm:$0xff] %vm678_vm2, %v4740_v29  ;;  %v3891_v15 = vld [vmem:[#allocation3 + $0x82] sm:$0xff]  ;;  %v11261_v29 = vld [vmem:[#allocation3 + $0xea] sm:$0xff] }
 0x3e3   : > { %4065 = vrot.lane.b32.xlu2 %v3970_v32, %s8618_s17  ;;  %3581 = vst.msk [vmem:[#allocation3 + $0x103] sm:$0xff] %vm678_vm2, %v3545_v4  ;;  %v3083_v63 = vadd.f32 %v3082_v44, %v2958_v43  ;;  %3779 = vrot.lane.b32.xlu0 %v3683_v7, %s8618_s17  ;;  %v3685_v32 = vld [vmem:[#allocation3 + $0xd1] sm:$0xff]  ;;  %v4881_v20 = vld [vmem:[#allocation5 + $0x230] sm:$0xff] }
 0x3e4   : > { %4633 = vrot.lane.b32.xlu1 %v4542_v38, %s8618_s17  ;;  %3926 = vst.msk [vmem:[#allocation5 + $0x260] sm:$0xff] %vm678_vm2, %v3890_v61 }
 0x3e5   : > { %v4618_v45 = vpop.permute.xlu2 %4617  ;;  %v3208_v48 = vadd.f32 %v3207_v25, %v3083_v63  ;;  %v4044_v35 = vpop.permute.xlu0 %4043  ;;  %v13420_v25 = vld [vmem:[#allocation36_spill] sm:$0xff]  ;;  %4212 = vst.msk [vmem:[#allocation5 + $0x218] sm:$0xff] %vm678_vm2, %v4176_v8 }
 0x3e6   : > { %4714 = vst.msk [vmem:[#allocation5 + $0x1d0] sm:$0xff] %vm1260_vm3, %v4618_v45  ;;  %v4328_v30 = vpop.permute.xlu1 %4327  ;;  %v4858_v53 = vld [vmem:[#allocation5 + $0x178] sm:$0xff]  ;;  %v2835_v19 = vpop.f32.mrf.mxu2  ;;  %v2714_v23 = vadd.f32 %v11213_v49, %v13420_v25  ;;  %v13422_v63 = vld [vmem:[#allocation40_spill] sm:$0xff] }
 0x3e7   : > { %4139 = vst.msk [vmem:[#allocation5 + $0x1e8] sm:$0xff] %vm1260_vm3, %v4044_v35  ;;  %5468 = vmatmul.f32.gmra.mxu0 %v4858_v53  ;;  %v3253_v40 = vmax.f32 %v3208_v48, 0.0  ;;  %v2836_v41 = vadd.f32 %v2835_v19, %v2711_v17  ;;  %v4876_v39 = vld [vmem:[#allocation5 + $0x208] sm:$0xff]  ;;  %v3088_v55 = vpop.f32.mrf.mxu0  ;;  %v3213_v59 = vpop.f32.mrf.mxu1  ;;  %v2717_v46 = vadd.f32 %v11213_v49, %v13422_v63  ;;  %v3605_v17 = vld [vmem:[#allocation3 + $0x90] sm:$0xff]  ;;  %v4882_v25 = vld [vmem:[#allocation5 + $0x238] sm:$0xff] }
 0x3e8   : > { %4425 = vst.msk [vmem:[#allocation5 + $0x1a0] sm:$0xff] %vm1260_vm3, %v4328_v30  ;;  %5590 = vmatmul.f32.gmra.mxu1 %v4854_v24  ;;  %v2966_v48 = vpop.f32.mrf.mxu3  ;;  %v4180_v30 = vld [vmem:[#allocation3 + $0x9b] sm:$0xff] }
 0x3e9   : > { %v3546_v1 = vmul.f32 %v13419_v14, %v3253_v40  ;;  %v2961_v33 = vadd.f32 %v2960_v47, %v2836_v41  ;;  %v11240_v47 = vld [vmem:[#allocation3 + $0xd4] sm:$0xff]  ;;  %3643 = vst.msk [vmem:[#allocation5 + $0x320] sm:$0xff] %vm678_vm2, %v3607_v57 }
 0x3ea   : > { %5230 = vmatmul.f32.gmra.mxu2 %v4876_v39  ;;  %3927 = vst.msk [vmem:[#allocation5 + $0x288] sm:$0xff] %vm678_vm2, %v3891_v15  ;;  %v4544_v14 = vld [vmem:[#allocation3 + $0xcd] sm:$0xff] }
 0x3eb   : > { %4635 = vrot.lane.b32.xlu2 %v4543_v52, %s8618_s17  ;;  %3582 = vst.msk [vmem:[#allocation3 + $0x10b] sm:$0xff] %vm678_vm2, %v3546_v1  ;;  %v3086_v44 = vadd.f32 %v3085_v42, %v2961_v33  ;;  %4349 = vrot.lane.b32.xlu0 %v11168_v13, %s8618_s17  ;;  %v3972_v1 = vld [vmem:[#allocation3 + $0xda] sm:$0xff] }
 0x3ec   : > { %3781 = vrot.lane.b32.xlu1 %v3684_v0, %s8618_s17  ;;  %4509 = vst.msk [vmem:[#allocation5 + $0x388] sm:$0xff] %vm678_vm2, %v11240_v47  ;;  %v13423_v52 = vld [vmem:[#allocation44_spill] sm:$0xff] }
 0x3ed   : > { %v3766_v37 = vpop.permute.xlu2 %3765  ;;  %v3211_v26 = vadd.f32 %v3210_v50, %v3086_v44  ;;  %v4614_v28 = vpop.permute.xlu0 %4613  ;;  %v11257_v50 = vld [vmem:[#allocation3 + $0xdc] sm:$0xff]  ;;  %3641 = vst.msk [vmem:[#allocation5 + $0x2d0] sm:$0xff] %vm678_vm2, %v3605_v17  ;;  %v2720_v39 = vadd.f32 %v11213_v49, %v13423_v52  ;;  %v11278_v49 = vld [vmem:[#allocation3 + $0xe4] sm:$0xff] }
 0x3ee   : > { %3856 = vst.msk [vmem:[#allocation5 + $0x2a8] sm:$0xff] %vm1260_vm3, %v3766_v37  ;;  %v4046_v6 = vpop.permute.xlu1 %4045  ;;  %v4872_v56 = vld [vmem:[#allocation5 + $0x1e8] sm:$0xff]  ;;  %v2838_v13 = vpop.f32.mrf.mxu2 }
 0x3ef   : > { %4712 = vst.msk [vmem:[#allocation5 + $0x180] sm:$0xff] %vm1260_vm3, %v4614_v28  ;;  %5352 = vmatmul.f32.gmra.mxu3 %v4872_v56  ;;  %v4863_v5 = vld [vmem:[#allocation5 + $0x1a0] sm:$0xff]  ;;  %v3254_v34 = vmax.f32 %v3211_v26, 0.0  ;;  %v2839_v11 = vadd.f32 %v2838_v13, %v2714_v23  ;;  %v3091_v19 = vpop.f32.mrf.mxu0  ;;  %v3216_v24 = vpop.f32.mrf.mxu1  ;;  %v3606_v26 = vld [vmem:[#allocation3 + $0x98] sm:$0xff]  ;;  %v3973_v13 = vld [vmem:[#allocation3 + $0xe2] sm:$0xff] }
 0x3f0   : > { %4140 = vst.msk [vmem:[#allocation5 + $0x210] sm:$0xff] %vm1260_vm3, %v4046_v6  ;;  %5471 = vmatmul.f32.gmra.mxu0 %v4863_v5  ;;  %v2969_v56 = vpop.f32.mrf.mxu3  ;;  %v4741_v5 = vld [vmem:[#allocation3 + $0x36] sm:$0xff] }
 0x3f1   : > { %v3547_v4 = vmul.f32 %v13421_v60, %v3254_v34  ;;  %v2964_v43 = vadd.f32 %v2963_v18, %v2839_v11  ;;  %4216 = vst.msk [vmem:[#allocation5 + $0x2b8] sm:$0xff] %vm678_vm2, %v4180_v30  ;;  %v4178_v18 = vld [vmem:[#allocation3 + $0x8b] sm:$0xff]  ;;  %v3686_v34 = vld [vmem:[#allocation3 + $0xd9] sm:$0xff] }
 0x3f2   : > { %5233 = vmatmul.f32.gmra.mxu2 %v4881_v20  ;;  %4510 = vst.msk [vmem:[#allocation5 + $0x3b0] sm:$0xff] %vm678_vm2, %v11257_v50  ;;  %v4545_v11 = vld [vmem:[#allocation3 + $0xd5] sm:$0xff]  ;;  %v4546_v17 = vld [vmem:[#allocation3 + $0xdd] sm:$0xff] }
 0x3f3   : > { %3783 = vrot.lane.b32.xlu2 %v3685_v32, %s8618_s17  ;;  %3583 = vst.msk [vmem:[#allocation3 + $0x113] sm:$0xff] %vm678_vm2, %v3547_v4  ;;  %v3089_v7 = vadd.f32 %v3088_v55, %v2964_v43  ;;  %4067 = vrot.lane.b32.xlu0 %v11195_v12, %s8618_s17 }
 0x3f4   : > { %4351 = vrot.lane.b32.xlu1 %v11186_v62, %s8618_s17  ;;  %v4868_v62 = vld [vmem:[#allocation5 + $0x1c8] sm:$0xff]  ;;  %3940 = vst.msk [vmem:[#allocation5 + $0x490] sm:$0xff] %vm678_vm2, %v11261_v29 }
 0x3f5   : > { %v4336_v38 = vpop.permute.xlu2 %4335  ;;  %v3214_v21 = vadd.f32 %v3213_v59, %v3089_v7  ;;  %v3762_v42 = vpop.permute.xlu0 %3761  ;;  %4214 = vst.msk [vmem:[#allocation5 + $0x268] sm:$0xff] %vm678_vm2, %v4178_v18  ;;  %v5059_v59 = vld [vmem:[%s13323_s6 + $0x220] sm:$0xff] }
 0x3f6   : > { %4429 = vst.msk [vmem:[#allocation5 + $0x240] sm:$0xff] %vm1260_vm3, %v4336_v38  ;;  %v4616_v45 = vpop.permute.xlu1 %4615  ;;  %v4859_v54 = vld [vmem:[#allocation5 + $0x180] sm:$0xff]  ;;  %v2841_v12 = vpop.f32.mrf.mxu2  ;;  %5686 = vmatpush.msrb.mxu2 %v5059_v59  ;;  %v4896_v30 = vld [vmem:[#allocation5 + $0x2a8] sm:$0xff] }
 0x3f7   : > { %3854 = vst.msk [vmem:[#allocation5 + $0x258] sm:$0xff] %vm1260_vm3, %v3762_v42  ;;  %v4877_v35 = vld [vmem:[#allocation5 + $0x210] sm:$0xff]  ;;  %5593 = vmatmul.f32.gmra.mxu1 %v4859_v54  ;;  %v3255_v53 = vmax.f32 %v3214_v21, 0.0  ;;  %v2842_v3 = vadd.f32 %v2841_v12, %v2717_v46  ;;  %v3094_v57 = vpop.f32.mrf.mxu0  ;;  %v3219_v15 = vpop.f32.mrf.mxu1  ;;  %v3893_v7 = vld [vmem:[#allocation3 + $0x92] sm:$0xff] }
 0x3f8   : > { %4713 = vst.msk [vmem:[#allocation5 + $0x1a8] sm:$0xff] %vm1260_vm3, %v4616_v45  ;;  %5355 = vmatmul.f32.gmra.mxu3 %v4877_v35  ;;  %5474 = vmatmul.f32.gmra.mxu0 %v4868_v62  ;;  %v4869_v46 = vld [vmem:[#allocation5 + $0x1d0] sm:$0xff]  ;;  %v4179_v21 = vld [vmem:[#allocation3 + $0x93] sm:$0xff] }
 0x3f9   : > { %v3548_v40 = vmul.f32 %v10408_v22, %v3255_v53  ;;  %v2967_v41 = vadd.f32 %v2966_v48, %v2842_v3  ;;  %3642 = vst.msk [vmem:[#allocation5 + $0x2f8] sm:$0xff] %vm678_vm2, %v3606_v26  ;;  %v11298_v45 = vld [vmem:[#allocation3 + $0xec] sm:$0xff]  ;;  %v4742_v48 = vld [vmem:[#allocation3 + $0x3e] sm:$0xff]  ;;  %v4745_v18 = vld [vmem:[#allocation3 + $0x56] sm:$0xff] }
 0x3fa   : > { %4511 = vst.msk [vmem:[#allocation5 + $0x3d8] sm:$0xff] %vm678_vm2, %v11278_v49  ;;  %v3687_v12 = vld [vmem:[#allocation3 + $0xe1] sm:$0xff]  ;;  %v3689_v59 = vld [vmem:[#allocation3 + $0xf1] sm:$0xff] }
 0x3fb   : > { %4353 = vrot.lane.b32.xlu2 %v11219_v2, %s8618_s17  ;;  %3584 = vst.msk [vmem:[#allocation3 + $0x11b] sm:$0xff] %vm678_vm2, %v3548_v40  ;;  %4637 = vrot.lane.b32.xlu0 %v4544_v14, %s8618_s17  ;;  %v3092_v22 = vadd.f32 %v3091_v19, %v2967_v41  ;;  %v3894_v40 = vld [vmem:[#allocation3 + $0x9a] sm:$0xff]  ;;  %v3688_v41 = vld [vmem:[#allocation3 + $0xe9] sm:$0xff] }
 0x3fc   : > { %4069 = vrot.lane.b32.xlu1 %v3972_v1, %s8618_s17  ;;  %4777 = vst.msk [vmem:[#allocation5 + $0x70] sm:$0xff] %vm678_vm2, %v4741_v5  ;;  %v11318_v14 = vld [vmem:[#allocation3 + $0x102] sm:$0xff]  ;;  %v11327_v1 = vld [vmem:[#allocation3 + $0xf4] sm:$0xff] }
 0x3fd   : > { %v4054_v33 = vpop.permute.xlu2 %4053  ;;  %v3217_v0 = vadd.f32 %v3216_v24, %v3092_v22  ;;  %v4332_v2 = vpop.permute.xlu0 %4331  ;;  %3929 = vst.msk [vmem:[#allocation5 + $0x2d8] sm:$0xff] %vm678_vm2, %v3893_v7  ;;  %v3610_v24 = vld [vmem:[#allocation3 + $0xb8] sm:$0xff] }
 0x3fe   : > { %4144 = vst.msk [vmem:[#allocation5 + $0x2b0] sm:$0xff] %vm1260_vm3, %v4054_v33  ;;  %v3764_v44 = vpop.permute.xlu1 %3763  ;;  %v4886_v61 = vld [vmem:[#allocation5 + $0x258] sm:$0xff]  ;;  %v2844_v37 = vpop.f32.mrf.mxu2  ;;  %v4746_v5 = vld [vmem:[#allocation3 + $0x5e] sm:$0xff] }
 0x3ff   : > { %4427 = vst.msk [vmem:[#allocation5 + $0x1f0] sm:$0xff] %vm1260_vm3, %v4332_v2  ;;  %5236 = vmatmul.f32.gmra.mxu2 %v4886_v61  ;;  %v4864_v23 = vld [vmem:[#allocation5 + $0x1a8] sm:$0xff]  ;;  %v3256_v28 = vmax.f32 %v3217_v0, 0.0  ;;  %v2845_v6 = vadd.f32 %v2844_v37, %v2720_v39  ;;  %v3608_v0 = vld [vmem:[#allocation3 + $0xa8] sm:$0xff]  ;;  %v4883_v2 = vld [vmem:[#allocation5 + $0x240] sm:$0xff] }
 0x400   : > { %3855 = vst.msk [vmem:[#allocation5 + $0x280] sm:$0xff] %vm1260_vm3, %v3764_v44  ;;  %5358 = vmatmul.f32.gmra.mxu3 %v4882_v25  ;;  %5596 = vmatmul.f32.gmra.mxu1 %v4864_v23  ;;  %v4744_v44 = vld [vmem:[#allocation3 + $0x4e] sm:$0xff]  ;;  %v4547_v37 = vld [vmem:[#allocation3 + $0xe5] sm:$0xff]  ;;  %v11344_v23 = vld [vmem:[#allocation3 + $0xfc] sm:$0xff] }
 0x401   : > { %v3549_v8 = vmul.f32 %v10404_v58, %v3256_v28  ;;  %v2970_v55 = vadd.f32 %v2969_v56, %v2845_v6  ;;  %4215 = vst.msk [vmem:[#allocation5 + $0x290] sm:$0xff] %vm678_vm2, %v4179_v21  ;;  %v3975_v25 = vld [vmem:[#allocation3 + $0xf2] sm:$0xff]  ;;  %v4181_v56 = vld [vmem:[#allocation3 + $0xa3] sm:$0xff] }
 0x402   : > { %4512 = vst.msk [vmem:[#allocation5 + $0x400] sm:$0xff] %vm678_vm2, %v11298_v45  ;;  %v5058_v21 = vld [vmem:[%s13323_s6 + $0x218] sm:$0xff] }
 0x403   : > { %4071 = vrot.lane.b32.xlu2 %v3973_v13, %s8618_s17  ;;  %3585 = vst.msk [vmem:[#allocation3 + $0x123] sm:$0xff] %vm678_vm2, %v3549_v8  ;;  %3785 = vrot.lane.b32.xlu0 %v3686_v34, %s8618_s17  ;;  %v3095_v58 = vadd.f32 %v3094_v57, %v2970_v55  ;;  %v3609_v13 = vld [vmem:[#allocation3 + $0xb0] sm:$0xff]  ;;  %v4747_v57 = vld [vmem:[#allocation3 + $0x66] sm:$0xff]  ;;  %v3976_v34 = vld [vmem:[#allocation3 + $0xfa] sm:$0xff] }
 0x404   : > { %4639 = vrot.lane.b32.xlu1 %v4545_v11, %s8618_s17  ;;  %4778 = vst.msk [vmem:[#allocation5 + $0x98] sm:$0xff] %vm678_vm2, %v4742_v48  ;;  %v4748_v11 = vld [vmem:[#allocation3 + $0x6e] sm:$0xff]  ;;  %5687 = vmatpush.msrb.mxu2 %v5058_v21  ;;  %v3690_v48 = vld [vmem:[#allocation3 + $0xf9] sm:$0xff] }
 0x405   : > { %v4624_v60 = vpop.permute.xlu2 %4623  ;;  %v3220_v4 = vadd.f32 %v3219_v15, %v3095_v58  ;;  %v4050_v43 = vpop.permute.xlu0 %4049  ;;  %3646 = vst.msk [vmem:[#allocation5 + $0x398] sm:$0xff] %vm678_vm2, %v3610_v24  ;;  %v4897_v8 = vld [vmem:[#allocation5 + $0x2b0] sm:$0xff]  ;;  %v4548_v58 = vld [vmem:[#allocation3 + $0xed] sm:$0xff]  ;;  %v4753_v21 = vld [vmem:[#allocation3 + $0x96] sm:$0xff] }
 0x406   : > { %4717 = vst.msk [vmem:[#allocation5 + $0x248] sm:$0xff] %vm1260_vm3, %v4624_v60  ;;  %v4334_v32 = vpop.permute.xlu1 %4333  ;;  %v4873_v20 = vld [vmem:[#allocation5 + $0x1f0] sm:$0xff]  ;;  %v11295_v38 = vpop.f32.mrf.mxu2  ;;  %v3613_v24 = vld [vmem:[#allocation3 + $0xd0] sm:$0xff] }
 0x407   : > { %4142 = vst.msk [vmem:[#allocation5 + $0x260] sm:$0xff] %vm1260_vm3, %v4050_v43  ;;  %v4891_v63 = vld [vmem:[#allocation5 + $0x280] sm:$0xff]  ;;  %5477 = vmatmul.f32.gmra.mxu0 %v4873_v20  ;;  %v3257_v42 = vmax.f32 %v3220_v4, 0.0 }
 0x408   : > { %4428 = vst.msk [vmem:[#allocation5 + $0x218] sm:$0xff] %vm1260_vm3, %v4334_v32  ;;  %5239 = vmatmul.f32.gmra.mxu2 %v4891_v63  ;;  %5599 = vmatmul.f32.gmra.mxu1 %v4869_v46  ;;  %v3896_v20 = vld [vmem:[#allocation3 + $0xaa] sm:$0xff] }
 0x409   : > { %v3550_v54 = vmul.f32 %v10410_v9, %v3257_v42  ;;  %3930 = vst.msk [vmem:[#allocation5 + $0x300] sm:$0xff] %vm678_vm2, %v3894_v40  ;;  %v4182_v46 = vld [vmem:[#allocation3 + $0xab] sm:$0xff] }
 0x40a   : > { %3943 = vst.msk [vmem:[#allocation5 + $0x508] sm:$0xff] %vm678_vm2, %v11318_v14  ;;  %v11368_v42 = vld [vmem:[#allocation3 + $0x104] sm:$0xff]  ;;  %v3897_v40 = vld [vmem:[#allocation3 + $0xb2] sm:$0xff] }
 0x40b   : > { %4641 = vrot.lane.b32.xlu2 %v4546_v17, %s8618_s17  ;;  %3586 = vst.msk [vmem:[#allocation3 + $0x12b] sm:$0xff] %vm678_vm2, %v3550_v54  ;;  %4355 = vrot.lane.b32.xlu0 %v11240_v47, %s8618_s17  ;;  %v4743_v47 = vld [vmem:[#allocation3 + $0x46] sm:$0xff]  ;;  %v4749_v54 = vld [vmem:[#allocation3 + $0x76] sm:$0xff] }
 0x40c   : > { %3787 = vrot.lane.b32.xlu1 %v3687_v12, %s8618_s17  ;;  %4779 = vst.msk [vmem:[#allocation5 + $0xc0] sm:$0xff] %vm678_vm2, %v4743_v47  ;;  %v4549_v17 = vld [vmem:[#allocation3 + $0xf5] sm:$0xff]  ;;  %v3691_v47 = vld [vmem:[#allocation3 + $0x101] sm:$0xff] }
 0x40d   : > { %v3772_v35 = vpop.permute.xlu2 %3771  ;;  %v4620_v9 = vpop.permute.xlu0 %4619  ;;  %4513 = vst.msk [vmem:[#allocation5 + $0x428] sm:$0xff] %vm678_vm2, %v11327_v1  ;;  %v4884_v63 = vld [vmem:[#allocation5 + $0x248] sm:$0xff] }
 0x40e   : > { %3859 = vst.msk [vmem:[#allocation5 + $0x320] sm:$0xff] %vm1260_vm3, %v3772_v35  ;;  %v4052_v62 = vpop.permute.xlu1 %4051  ;;  %v4887_v53 = vld [vmem:[#allocation5 + $0x260] sm:$0xff]  ;;  %v11313_v3 = vpop.f32.mrf.mxu2 }
 0x40f   : > { %4715 = vst.msk [vmem:[#allocation5 + $0x1f8] sm:$0xff] %vm1260_vm3, %v4620_v9  ;;  %5361 = vmatmul.f32.gmra.mxu3 %v4887_v53  ;;  %v4878_v19 = vld [vmem:[#allocation5 + $0x218] sm:$0xff] }
 0x410   : > { %4143 = vst.msk [vmem:[#allocation5 + $0x288] sm:$0xff] %vm1260_vm3, %v4052_v62  ;;  %5242 = vmatmul.f32.gmra.mxu2 %v4896_v30  ;;  %5480 = vmatmul.f32.gmra.mxu0 %v4878_v19 }
 0x411   : > { %3644 = vst.msk [vmem:[#allocation5 + $0x348] sm:$0xff] %vm678_vm2, %v3608_v0 }
 0x412   : > { %4780 = vst.msk [vmem:[#allocation5 + $0xe8] sm:$0xff] %vm678_vm2, %v4744_v44  ;;  %v4751_v44 = vld [vmem:[#allocation3 + $0x86] sm:$0xff] }
 0x413   : > { %3789 = vrot.lane.b32.xlu2 %v3688_v41, %s8618_s17  ;;  %4073 = vrot.lane.b32.xlu0 %v11261_v29, %s8618_s17  ;;  %4781 = vst.msk [vmem:[#allocation5 + $0x110] sm:$0xff] %vm678_vm2, %v4745_v18  ;;  %v11387_v41 = vld [vmem:[#allocation3 + $0x11a] sm:$0xff] }
 0x414   : > { %4357 = vrot.lane.b32.xlu1 %v11257_v50, %s8618_s17  ;;  %v4183_v50 = vld [vmem:[#allocation3 + $0xb3] sm:$0xff]  ;;  %4514 = vst.msk [vmem:[#allocation5 + $0x450] sm:$0xff] %vm678_vm2, %v11344_v23  ;;  %v4550_v18 = vld [vmem:[#allocation3 + $0xfd] sm:$0xff] }
 0x415   : > { %v4342_v22 = vpop.permute.xlu2 %4341  ;;  %v3768_v33 = vpop.permute.xlu0 %3767  ;;  %4219 = vst.msk [vmem:[#allocation5 + $0x330] sm:$0xff] %vm678_vm2, %v4183_v50  ;;  %v4911_v30 = vld [vmem:[#allocation5 + $0x320] sm:$0xff] }
 0x416   : > { %4432 = vst.msk [vmem:[#allocation5 + $0x2b8] sm:$0xff] %vm1260_vm3, %v4342_v22  ;;  %v4622_v52 = vpop.permute.xlu1 %4621  ;;  %v4874_v39 = vld [vmem:[#allocation5 + $0x1f8] sm:$0xff]  ;;  %v11335_v61 = vpop.f32.mrf.mxu2 }
 0x417   : > { %3857 = vst.msk [vmem:[#allocation5 + $0x2d0] sm:$0xff] %vm1260_vm3, %v3768_v33  ;;  %v4892_v29 = vld [vmem:[#allocation5 + $0x288] sm:$0xff]  ;;  %5602 = vmatmul.f32.gmra.mxu1 %v4874_v39  ;;  %v11394_v22 = vld [vmem:[#allocation3 + $0x10c] sm:$0xff] }
 0x418   : > { %4716 = vst.msk [vmem:[#allocation5 + $0x220] sm:$0xff] %vm1260_vm3, %v4622_v52  ;;  %5364 = vmatmul.f32.gmra.mxu3 %v4892_v29  ;;  %5483 = vmatmul.f32.gmra.mxu0 %v4883_v2  ;;  %v3611_v29 = vld [vmem:[#allocation3 + $0xc0] sm:$0xff]  ;;  %v4186_v50 = vld [vmem:[#allocation3 + $0xcb] sm:$0xff] }
 0x419   : > { %4217 = vst.msk [vmem:[#allocation5 + $0x2e0] sm:$0xff] %vm678_vm2, %v4181_v56  ;;  %v4184_v56 = vld [vmem:[#allocation3 + $0xbb] sm:$0xff] }
 0x41a   : > { %3645 = vst.msk [vmem:[#allocation5 + $0x370] sm:$0xff] %vm678_vm2, %v3609_v13  ;;  %v4752_v13 = vld [vmem:[#allocation3 + $0x8e] sm:$0xff] }
 0x41b   : > { %4359 = vrot.lane.b32.xlu2 %v11278_v49, %s8618_s17  ;;  %4643 = vrot.lane.b32.xlu0 %v4547_v37, %s8618_s17  ;;  %4782 = vst.msk [vmem:[#allocation5 + $0x138] sm:$0xff] %vm678_vm2, %v4746_v5  ;;  %v3978_v37 = vld [vmem:[#allocation3 + $0x10a] sm:$0xff] }
 0x41c   : > { %4075 = vrot.lane.b32.xlu1 %v3975_v25, %s8618_s17  ;;  %4783 = vst.msk [vmem:[#allocation5 + $0x160] sm:$0xff] %vm678_vm2, %v4747_v57  ;;  %v11412_v25 = vld [vmem:[#allocation3 + $0x114] sm:$0xff] }
 0x41d   : > { %v4060_v26 = vpop.permute.xlu2 %4059  ;;  %v4338_v28 = vpop.permute.xlu0 %4337  ;;  %4784 = vst.msk [vmem:[#allocation5 + $0x188] sm:$0xff] %vm678_vm2, %v4748_v11  ;;  %v3979_v57 = vld [vmem:[#allocation3 + $0x112] sm:$0xff]  ;;  %v4551_v11 = vld [vmem:[#allocation3 + $0x105] sm:$0xff] }
 0x41e   : > { %4147 = vst.msk [vmem:[#allocation5 + $0x328] sm:$0xff] %vm1260_vm3, %v4060_v26  ;;  %v3770_v6 = vpop.permute.xlu1 %3769  ;;  %v4901_v49 = vld [vmem:[#allocation5 + $0x2d0] sm:$0xff]  ;;  %v11354_v15 = vpop.f32.mrf.mxu2 }
 0x41f   : > { %4430 = vst.msk [vmem:[#allocation5 + $0x268] sm:$0xff] %vm1260_vm3, %v4338_v28  ;;  %5245 = vmatmul.f32.gmra.mxu2 %v4901_v49  ;;  %v4879_v55 = vld [vmem:[#allocation5 + $0x220] sm:$0xff] }
 0x420   : > { %3858 = vst.msk [vmem:[#allocation5 + $0x2f8] sm:$0xff] %vm1260_vm3, %v3770_v6  ;;  %5367 = vmatmul.f32.gmra.mxu3 %v4897_v8  ;;  %5605 = vmatmul.f32.gmra.mxu1 %v4879_v55  ;;  %v3612_v55 = vld [vmem:[#allocation3 + $0xc8] sm:$0xff] }
 0x421   : > { %3932 = vst.msk [vmem:[#allocation5 + $0x350] sm:$0xff] %vm678_vm2, %v3896_v20 }
 0x422   : > { %4218 = vst.msk [vmem:[#allocation5 + $0x308] sm:$0xff] %vm678_vm2, %v4182_v46  ;;  %v5057_v46 = vld [vmem:[%s13323_s6 + $0x210] sm:$0xff] }
 0x423   : > { %4077 = vrot.lane.b32.xlu2 %v3976_v34, %s8618_s17  ;;  %3791 = vrot.lane.b32.xlu0 %v3689_v59, %s8618_s17  ;;  %4515 = vst.msk [vmem:[#allocation5 + $0x478] sm:$0xff] %vm678_vm2, %v11368_v42  ;;  %v3692_v34 = vld [vmem:[#allocation3 + $0x109] sm:$0xff]  ;;  %v11427_v59 = vld [vmem:[#allocation3 + $0x11c] sm:$0xff] }
 0x424   : > { %4645 = vrot.lane.b32.xlu1 %v4548_v58, %s8618_s17  ;;  %4785 = vst.msk [vmem:[#allocation5 + $0x1b0] sm:$0xff] %vm678_vm2, %v4749_v54  ;;  %5688 = vmatpush.msrb.mxu2 %v5057_v46  ;;  %v4552_v54 = vld [vmem:[#allocation3 + $0x10d] sm:$0xff]  ;;  %v11497_v46 = vpop.f32.mrf.mxu3 }
 0x425   : > { %v4630_v60 = vpop.permute.xlu2 %4629  ;;  %v4056_v4 = vpop.permute.xlu0 %4055  ;;  %3649 = vst.msk [vmem:[#allocation5 + $0x410] sm:$0xff] %vm678_vm2, %v3613_v24 }
 0x426   : > { %4720 = vst.msk [vmem:[#allocation5 + $0x2c0] sm:$0xff] %vm1260_vm3, %v4630_v60  ;;  %v4340_v43 = vpop.permute.xlu1 %4339  ;;  %v4888_v32 = vld [vmem:[#allocation5 + $0x268] sm:$0xff]  ;;  %v11379_v12 = vpop.f32.mrf.mxu2 }
 0x427   : > { %4145 = vst.msk [vmem:[#allocation5 + $0x2d8] sm:$0xff] %vm1260_vm3, %v4056_v4  ;;  %v4906_v7 = vld [vmem:[#allocation5 + $0x2f8] sm:$0xff]  ;;  %5486 = vmatmul.f32.gmra.mxu0 %v4888_v32 }
 0x428   : > { %4431 = vst.msk [vmem:[#allocation5 + $0x290] sm:$0xff] %vm1260_vm3, %v4340_v43  ;;  %5248 = vmatmul.f32.gmra.mxu2 %v4906_v7  ;;  %5608 = vmatmul.f32.gmra.mxu1 %v4884_v63  ;;  %v3899_v32 = vld [vmem:[#allocation3 + $0xc2] sm:$0xff] }
 0x429   : > { %3933 = vst.msk [vmem:[#allocation5 + $0x378] sm:$0xff] %vm678_vm2, %v3897_v40  ;;  %v4185_v63 = vld [vmem:[#allocation3 + $0xc3] sm:$0xff] }
 0x42a   : > { %3946 = vst.msk [vmem:[#allocation5 + $0x580] sm:$0xff] %vm678_vm2, %v11387_v41  ;;  %v3616_v40 = vld [vmem:[#allocation3 + $0xe8] sm:$0xff] }
 0x42b   : > { %4647 = vrot.lane.b32.xlu2 %v4549_v17, %s8618_s17  ;;  %4361 = vrot.lane.b32.xlu0 %v11298_v45, %s8618_s17  ;;  %v4750_v45 = vld [vmem:[#allocation3 + $0x7e] sm:$0xff]  ;;  %4516 = vst.msk [vmem:[#allocation5 + $0x4a0] sm:$0xff] %vm678_vm2, %v11394_v22 }
 0x42c   : > { %3793 = vrot.lane.b32.xlu1 %v3690_v48, %s8618_s17  ;;  %4786 = vst.msk [vmem:[#allocation5 + $0x1d8] sm:$0xff] %vm678_vm2, %v4750_v45  ;;  %v3693_v48 = vld [vmem:[#allocation3 + $0x111] sm:$0xff] }
 0x42d   : > { %v3778_v35 = vpop.permute.xlu2 %3777  ;;  %v4626_v9 = vpop.permute.xlu0 %4625  ;;  %3647 = vst.msk [vmem:[#allocation5 + $0x3c0] sm:$0xff] %vm678_vm2, %v3611_v29  ;;  %v4899_v7 = vld [vmem:[#allocation5 + $0x2c0] sm:$0xff] }
 0x42e   : > { %3862 = vst.msk [vmem:[#allocation5 + $0x398] sm:$0xff] %vm1260_vm3, %v3778_v35  ;;  %v4058_v62 = vpop.permute.xlu1 %4057  ;;  %v4902_v53 = vld [vmem:[#allocation5 + $0x2d8] sm:$0xff]  ;;  %v11401_v2 = vpop.f32.mrf.mxu2 }
 0x42f   : > { %4718 = vst.msk [vmem:[#allocation5 + $0x270] sm:$0xff] %vm1260_vm3, %v4626_v9  ;;  %5370 = vmatmul.f32.gmra.mxu3 %v4902_v53  ;;  %v4893_v19 = vld [vmem:[#allocation5 + $0x290] sm:$0xff]  ;;  %v11453_v45 = vld [vmem:[#allocation3 + $0x12c] sm:$0xff] }
 0x430   : > { %4146 = vst.msk [vmem:[#allocation5 + $0x300] sm:$0xff] %vm1260_vm3, %v4058_v62  ;;  %5251 = vmatmul.f32.gmra.mxu2 %v4911_v30  ;;  %5489 = vmatmul.f32.gmra.mxu0 %v4893_v19  ;;  %v11446_v35 = vld [vmem:[#allocation3 + $0x124] sm:$0xff] }
 0x431   : > { %4222 = vst.msk [vmem:[#allocation5 + $0x3a8] sm:$0xff] %vm678_vm2, %v4186_v50  ;;  %v3614_v50 = vld [vmem:[#allocation3 + $0xd8] sm:$0xff] }
 0x432   : > { %4787 = vst.msk [vmem:[#allocation5 + $0x200] sm:$0xff] %vm678_vm2, %v4751_v44 }
 0x433   : > { %3795 = vrot.lane.b32.xlu2 %v3691_v47, %s8618_s17  ;;  %4079 = vrot.lane.b32.xlu0 %v11318_v14, %s8618_s17  ;;  %4517 = vst.msk [vmem:[#allocation5 + $0x4c8] sm:$0xff] %vm678_vm2, %v11412_v25  ;;  %v4754_v47 = vld [vmem:[#allocation3 + $0x9e] sm:$0xff] }
 0x434   : > { %4363 = vrot.lane.b32.xlu1 %v11327_v1, %s8618_s17  ;;  %v4898_v1 = vld [vmem:[#allocation5 + $0x2b8] sm:$0xff]  ;;  %4220 = vst.msk [vmem:[#allocation5 + $0x358] sm:$0xff] %vm678_vm2, %v4184_v56  ;;  %v4187_v56 = vld [vmem:[#allocation3 + $0xd3] sm:$0xff] }
 0x435   : > { %v4348_v33 = vpop.permute.xlu2 %4347  ;;  %v3774_v52 = vpop.permute.xlu0 %3773  ;;  %3648 = vst.msk [vmem:[#allocation5 + $0x3e8] sm:$0xff] %vm678_vm2, %v3612_v55  ;;  %v4926_v53 = vld [vmem:[#allocation5 + $0x398] sm:$0xff] }
 0x436   : > { %4435 = vst.msk [vmem:[#allocation5 + $0x330] sm:$0xff] %vm1260_vm3, %v4348_v33  ;;  %v4628_v39 = vpop.permute.xlu1 %4627  ;;  %v4889_v0 = vld [vmem:[#allocation5 + $0x270] sm:$0xff]  ;;  %v11419_v5 = vpop.f32.mrf.mxu2 }
 0x437   : > { %3860 = vst.msk [vmem:[#allocation5 + $0x348] sm:$0xff] %vm1260_vm3, %v3774_v52  ;;  %v4907_v14 = vld [vmem:[#allocation5 + $0x300] sm:$0xff]  ;;  %5611 = vmatmul.f32.gmra.mxu1 %v4889_v0  ;;  %v3694_v33 = vld [vmem:[#allocation3 + $0x119] sm:$0xff]  ;;  %v4755_v52 = vld [vmem:[#allocation3 + $0xa6] sm:$0xff] }
 0x438   : > { %4719 = vst.msk [vmem:[#allocation5 + $0x298] sm:$0xff] %vm1260_vm3, %v4628_v39  ;;  %5373 = vmatmul.f32.gmra.mxu3 %v4907_v14  ;;  %5492 = vmatmul.f32.gmra.mxu0 %v4898_v1 }
 0x439   : > { %4788 = vst.msk [vmem:[#allocation5 + $0x228] sm:$0xff] %vm678_vm2, %v4752_v13  ;;  %v4756_v13 = vld [vmem:[#allocation3 + $0xae] sm:$0xff] }
 0x43a   : > { %4518 = vst.msk [vmem:[#allocation5 + $0x4f0] sm:$0xff] %vm678_vm2, %v11427_v59 }
 0x43b   : > { %4365 = vrot.lane.b32.xlu2 %v11344_v23, %s8618_s17  ;;  %4649 = vrot.lane.b32.xlu0 %v4550_v18, %s8618_s17  ;;  %v4912_v23 = vld [vmem:[#allocation5 + $0x328] sm:$0xff]  ;;  %3935 = vst.msk [vmem:[#allocation5 + $0x3c8] sm:$0xff] %vm678_vm2, %v3899_v32 }
 0x43c   : > { %4081 = vrot.lane.b32.xlu1 %v3978_v37, %s8618_s17  ;;  %4221 = vst.msk [vmem:[#allocation5 + $0x380] sm:$0xff] %vm678_vm2, %v4185_v63  ;;  %v4553_v18 = vld [vmem:[#allocation3 + $0x115] sm:$0xff]  ;;  %v3981_v37 = vld [vmem:[#allocation3 + $0x122] sm:$0xff] }
 0x43d   : > { %v4066_v26 = vpop.permute.xlu2 %4065  ;;  %v4344_v28 = vpop.permute.xlu0 %4343  ;;  %4789 = vst.msk [vmem:[#allocation5 + $0x250] sm:$0xff] %vm678_vm2, %v4753_v21  ;;  %v4913_v44 = vld [vmem:[#allocation5 + $0x330] sm:$0xff]  ;;  %v4556_v21 = vld [vmem:[#allocation3 + $0x12d] sm:$0xff] }
 0x43e   : > { %4150 = vst.msk [vmem:[#allocation5 + $0x3a0] sm:$0xff] %vm1260_vm3, %v4066_v26  ;;  %v3776_v6 = vpop.permute.xlu1 %3775  ;;  %v4916_v49 = vld [vmem:[#allocation5 + $0x348] sm:$0xff]  ;;  %v11439_v17 = vpop.f32.mrf.mxu2 }
 0x43f   : > { %4433 = vst.msk [vmem:[#allocation5 + $0x2e0] sm:$0xff] %vm1260_vm3, %v4344_v28  ;;  %5254 = vmatmul.f32.gmra.mxu2 %v4916_v49  ;;  %v4894_v8 = vld [vmem:[#allocation5 + $0x298] sm:$0xff]  ;;  %v3902_v32 = vld [vmem:[#allocation3 + $0xda] sm:$0xff] }
 0x440   : > { %3861 = vst.msk [vmem:[#allocation5 + $0x370] sm:$0xff] %vm1260_vm3, %v3776_v6  ;;  %5376 = vmatmul.f32.gmra.mxu3 %v4912_v23  ;;  %5614 = vmatmul.f32.gmra.mxu1 %v4894_v8  ;;  %v4188_v63 = vld [vmem:[#allocation3 + $0xdb] sm:$0xff] }
 0x441   : > { %4519 = vst.msk [vmem:[#allocation5 + $0x518] sm:$0xff] %vm678_vm2, %v11446_v35 }
 0x442   : > { %3652 = vst.msk [vmem:[#allocation5 + $0x488] sm:$0xff] %vm678_vm2, %v3616_v40  ;;  %v4758_v40 = vld [vmem:[#allocation3 + $0xbe] sm:$0xff] }
 0x443   : > { %4083 = vrot.lane.b32.xlu2 %v3979_v57, %s8618_s17  ;;  %3797 = vrot.lane.b32.xlu0 %v3692_v34, %s8618_s17  ;;  %4520 = vst.msk [vmem:[#allocation5 + $0x540] sm:$0xff] %vm678_vm2, %v11453_v45  ;;  %v3982_v57 = vld [vmem:[#allocation3 + $0x12a] sm:$0xff]  ;;  %v4554_v34 = vld [vmem:[#allocation3 + $0x11d] sm:$0xff] }
 0x444   : > { %4651 = vrot.lane.b32.xlu1 %v4551_v11, %s8618_s17  ;;  %4790 = vst.msk [vmem:[#allocation5 + $0x278] sm:$0xff] %vm678_vm2, %v4754_v47  ;;  %v4757_v11 = vld [vmem:[#allocation3 + $0xb6] sm:$0xff]  ;;  %v4555_v47 = vld [vmem:[#allocation3 + $0x125] sm:$0xff] }
 0x445   : > { %v4636_v58 = vpop.permute.xlu2 %4635  ;;  %v4062_v60 = vpop.permute.xlu0 %4061  ;;  %4791 = vst.msk [vmem:[#allocation5 + $0x2a0] sm:$0xff] %vm678_vm2, %v4755_v52  ;;  %v4927_v8 = vld [vmem:[#allocation5 + $0x3a0] sm:$0xff] }
 0x446   : > { %4723 = vst.msk [vmem:[#allocation5 + $0x338] sm:$0xff] %vm1260_vm3, %v4636_v58  ;;  %v4346_v4 = vpop.permute.xlu1 %4345  ;;  %v4903_v43 = vld [vmem:[#allocation5 + $0x2e0] sm:$0xff]  ;;  %v11465_v39 = vpop.f32.mrf.mxu2 }
 0x447   : > { %4148 = vst.msk [vmem:[#allocation5 + $0x350] sm:$0xff] %vm1260_vm3, %v4062_v60  ;;  %v4921_v20 = vld [vmem:[#allocation5 + $0x370] sm:$0xff]  ;;  %5495 = vmatmul.f32.gmra.mxu0 %v4903_v43  ;;  %v11522_v52 = vpop.f32.mrf.mxu3 }
 0x448   : > { %4434 = vst.msk [vmem:[#allocation5 + $0x308] sm:$0xff] %vm1260_vm3, %v4346_v4  ;;  %5257 = vmatmul.f32.gmra.mxu2 %v4921_v20  ;;  %5617 = vmatmul.f32.gmra.mxu1 %v4899_v7 }
 0x449   : > { %3650 = vst.msk [vmem:[#allocation5 + $0x438] sm:$0xff] %vm678_vm2, %v3614_v50  ;;  %v3617_v50 = vld [vmem:[#allocation3 + $0xf0] sm:$0xff] }
 0x44a   : > { %4223 = vst.msk [vmem:[#allocation5 + $0x3d0] sm:$0xff] %vm678_vm2, %v4187_v56 }
 0x44b   : > { %4653 = vrot.lane.b32.xlu2 %v4552_v54, %s8618_s17  ;;  %4367 = vrot.lane.b32.xlu0 %v11368_v42, %s8618_s17  ;;  %v3900_v42 = vld [vmem:[#allocation3 + $0xca] sm:$0xff]  ;;  %4792 = vst.msk [vmem:[#allocation5 + $0x2c8] sm:$0xff] %vm678_vm2, %v4756_v13 }
 0x44c   : > { %3799 = vrot.lane.b32.xlu1 %v3693_v48, %s8618_s17  ;;  %3936 = vst.msk [vmem:[#allocation5 + $0x3f0] sm:$0xff] %vm678_vm2, %v3900_v42  ;;  %v5884_v42 = vld [vmem:[%s13318_s1 + $0x30] sm:$0xff] }
 0x44d   : > { %v3784_v9 = vpop.permute.xlu2 %3783  ;;  %v4632_v62 = vpop.permute.xlu0 %4631  ;;  %4793 = vst.msk [vmem:[#allocation5 + $0x2f0] sm:$0xff] %vm678_vm2, %v4757_v11  ;;  %v4914_v7 = vld [vmem:[#allocation5 + $0x338] sm:$0xff]  ;;  %v3905_v11 = vld [vmem:[#allocation3 + $0xf2] sm:$0xff] }
 0x44e   : > { %3865 = vst.msk [vmem:[#allocation5 + $0x410] sm:$0xff] %vm1260_vm3, %v3784_v9  ;;  %v4064_v30 = vpop.permute.xlu1 %4063  ;;  %v4917_v19 = vld [vmem:[#allocation5 + $0x350] sm:$0xff]  ;;  %v11478_v23 = vpop.f32.mrf.mxu2 }
 0x44f   : > { %4721 = vst.msk [vmem:[#allocation5 + $0x2e8] sm:$0xff] %vm1260_vm3, %v4632_v62  ;;  %5379 = vmatmul.f32.gmra.mxu3 %v4917_v19  ;;  %v4908_v24 = vld [vmem:[#allocation5 + $0x308] sm:$0xff]  ;;  %v3619_v19 = vld [vmem:[#allocation3 + $0x100] sm:$0xff] }
 0x450   : > { %4149 = vst.msk [vmem:[#allocation5 + $0x378] sm:$0xff] %vm1260_vm3, %v4064_v30  ;;  %5260 = vmatmul.f32.gmra.mxu2 %v4926_v53  ;;  %5498 = vmatmul.f32.gmra.mxu0 %v4908_v24  ;;  %v3903_v24 = vld [vmem:[#allocation3 + $0xe2] sm:$0xff] }
 0x451   : > { %3938 = vst.msk [vmem:[#allocation5 + $0x440] sm:$0xff] %vm678_vm2, %v3902_v32  ;;  %v5891_v32 = vld [vmem:[%s13318_s1 + $0x68] sm:$0xff] }
 0x452   : > { %4224 = vst.msk [vmem:[#allocation5 + $0x3f8] sm:$0xff] %vm678_vm2, %v4188_v63 }
 0x453   : > { %3801 = vrot.lane.b32.xlu2 %v3694_v33, %s8618_s17  ;;  %4085 = vrot.lane.b32.xlu0 %v11387_v41, %s8618_s17  ;;  %3655 = vst.msk [vmem:[#allocation5 + $0x500] sm:$0xff] %vm678_vm2, %v3619_v19  ;;  %v4761_v19 = vld [vmem:[#allocation3 + $0xd6] sm:$0xff] }
 0x454   : > { %4369 = vrot.lane.b32.xlu1 %v11394_v22, %s8618_s17  ;;  %v4189_v22 = vld [vmem:[#allocation3 + $0xe3] sm:$0xff]  ;;  %3939 = vst.msk [vmem:[#allocation5 + $0x468] sm:$0xff] %vm678_vm2, %v3903_v24 }
 0x455   : > { %v4354_v0 = vpop.permute.xlu2 %4353  ;;  %v3780_v29 = vpop.permute.xlu0 %3779  ;;  %4225 = vst.msk [vmem:[#allocation5 + $0x420] sm:$0xff] %vm678_vm2, %v4189_v22  ;;  %v4941_v62 = vld [vmem:[#allocation5 + $0x410] sm:$0xff]  ;;  %v5892_v24 = vld [vmem:[%s13318_s1 + $0x70] sm:$0xff] }
 0x456   : > { %4438 = vst.msk [vmem:[#allocation5 + $0x3a8] sm:$0xff] %vm1260_vm3, %v4354_v0  ;;  %v4634_v14 = vpop.permute.xlu1 %4633  ;;  %v4904_v1 = vld [vmem:[#allocation5 + $0x2e8] sm:$0xff] }
 0x457   : > { %3863 = vst.msk [vmem:[#allocation5 + $0x3c0] sm:$0xff] %vm1260_vm3, %v3780_v29  ;;  %v4922_v41 = vld [vmem:[#allocation5 + $0x378] sm:$0xff]  ;;  %5620 = vmatmul.f32.gmra.mxu1 %v4904_v1  ;;  %v4192_v22 = vld [vmem:[#allocation3 + $0xfb] sm:$0xff] }
 0x458   : > { %4722 = vst.msk [vmem:[#allocation5 + $0x310] sm:$0xff] %vm1260_vm3, %v4634_v14  ;;  %5382 = vmatmul.f32.gmra.mxu3 %v4922_v41  ;;  %5501 = vmatmul.f32.gmra.mxu0 %v4913_v44 }
 0x459   : > { %4794 = vst.msk [vmem:[#allocation5 + $0x318] sm:$0xff] %vm678_vm2, %v4758_v40  ;;  %v5894_v40 = vld [vmem:[%s13318_s1 + $0x80] sm:$0xff] }
 0x45a   : > { %3653 = vst.msk [vmem:[#allocation5 + $0x4b0] sm:$0xff] %vm678_vm2, %v3617_v50 }
 0x45b   : > { %4371 = vrot.lane.b32.xlu2 %v11412_v25, %s8618_s17  ;;  %4655 = vrot.lane.b32.xlu0 %v4553_v18, %s8618_s17  ;;  %v3615_v25 = vld [vmem:[#allocation3 + $0xe0] sm:$0xff]  ;;  %v5886_v18 = vld [vmem:[%s13318_s1 + $0x40] sm:$0xff]  ;;  %4228 = vst.msk [vmem:[#allocation5 + $0x498] sm:$0xff] %vm678_vm2, %v4192_v22 }
 0x45c   : > { %4087 = vrot.lane.b32.xlu1 %v3981_v37, %s8618_s17  ;;  %3651 = vst.msk [vmem:[#allocation5 + $0x460] sm:$0xff] %vm678_vm2, %v3615_v25  ;;  %v4190_v37 = vld [vmem:[#allocation3 + $0xeb] sm:$0xff]  ;;  %v5895_v22 = vld [vmem:[%s13318_s1 + $0x88] sm:$0xff] }
 0x45d   : > { %v4072_v26 = vpop.permute.xlu2 %4071  ;;  %v4350_v28 = vpop.permute.xlu0 %4349  ;;  %v4928_v44 = vld [vmem:[#allocation5 + $0x3a8] sm:$0xff]  ;;  %4226 = vst.msk [vmem:[#allocation5 + $0x448] sm:$0xff] %vm678_vm2, %v4190_v37 }
 0x45e   : > { %4153 = vst.msk [vmem:[#allocation5 + $0x418] sm:$0xff] %vm1260_vm3, %v4072_v26  ;;  %v3782_v6 = vpop.permute.xlu1 %3781  ;;  %v4931_v49 = vld [vmem:[#allocation5 + $0x3c0] sm:$0xff]  ;;  %v5887_v26 = vld [vmem:[%s13318_s1 + $0x48] sm:$0xff] }
 0x45f   : > { %4436 = vst.msk [vmem:[#allocation5 + $0x358] sm:$0xff] %vm1260_vm3, %v4350_v28  ;;  %5263 = vmatmul.f32.gmra.mxu2 %v4931_v49  ;;  %v4909_v55 = vld [vmem:[#allocation5 + $0x310] sm:$0xff]  ;;  %v5888_v28 = vld [vmem:[%s13318_s1 + $0x50] sm:$0xff] }
 0x460   : > { %3864 = vst.msk [vmem:[#allocation5 + $0x3e8] sm:$0xff] %vm1260_vm3, %v3782_v6  ;;  %5385 = vmatmul.f32.gmra.mxu3 %v4927_v8  ;;  %5623 = vmatmul.f32.gmra.mxu1 %v4909_v55  ;;  %v4759_v6 = vld [vmem:[#allocation3 + $0xc6] sm:$0xff] }
 0x461   : > { %4795 = vst.msk [vmem:[#allocation5 + $0x340] sm:$0xff] %vm678_vm2, %v4759_v6  ;;  %v11598_v6 = vpop.f32.mrf.mxu1 }
 0x462   : > { %3941 = vst.msk [vmem:[#allocation5 + $0x4b8] sm:$0xff] %vm678_vm2, %v3905_v11 }
 0x463   : > { %4089 = vrot.lane.b32.xlu2 %v3982_v57, %s8618_s17  ;;  %4373 = vrot.lane.b32.xlu0 %v11427_v59, %s8618_s17  ;;  %v11493_v59 = vpop.f32.mrf.mxu2  ;;  %4797 = vst.msk [vmem:[#allocation5 + $0x390] sm:$0xff] %vm678_vm2, %v4761_v19 }
 0x464   : > { %4657 = vrot.lane.b32.xlu1 %v4554_v34, %s8618_s17  ;;  %v3618_v34 = vld [vmem:[#allocation3 + $0xf8] sm:$0xff] }
 0x465   : > { %v4642_v58 = vpop.permute.xlu2 %4641  ;;  %v4068_v60 = vpop.permute.xlu0 %4067  ;;  %v4942_v13 = vld [vmem:[#allocation5 + $0x418] sm:$0xff]  ;;  %3654 = vst.msk [vmem:[#allocation5 + $0x4d8] sm:$0xff] %vm678_vm2, %v3618_v34 }
 0x466   : > { %4726 = vst.msk [vmem:[#allocation5 + $0x3b0] sm:$0xff] %vm1260_vm3, %v4642_v58  ;;  %v4352_v4 = vpop.permute.xlu1 %4351  ;;  %v4918_v43 = vld [vmem:[#allocation5 + $0x358] sm:$0xff]  ;;  %v11544_v58 = vpop.f32.mrf.mxu3 }
 0x467   : > { %4151 = vst.msk [vmem:[#allocation5 + $0x3c8] sm:$0xff] %vm1260_vm3, %v4068_v60  ;;  %v4936_v20 = vld [vmem:[#allocation5 + $0x3e8] sm:$0xff]  ;;  %5504 = vmatmul.f32.gmra.mxu0 %v4918_v43  ;;  %v5889_v60 = vld [vmem:[%s13318_s1 + $0x58] sm:$0xff]  ;;  %v3620_v34 = vld [vmem:[#allocation3 + $0x108] sm:$0xff] }
 0x468   : > { %4437 = vst.msk [vmem:[#allocation5 + $0x380] sm:$0xff] %vm1260_vm3, %v4352_v4  ;;  %5266 = vmatmul.f32.gmra.mxu2 %v4936_v20  ;;  %5626 = vmatmul.f32.gmra.mxu1 %v4914_v7  ;;  %v4191_v4 = vld [vmem:[#allocation3 + $0xf3] sm:$0xff]  ;;  %v11558_v7 = vpop.f32.mrf.mxu0 }
 0x469   : > { %v5890_v43 = vld [vmem:[%s13318_s1 + $0x60] sm:$0xff]  ;;  %v4760_v20 = vld [vmem:[#allocation3 + $0xce] sm:$0xff]  ;;  %4227 = vst.msk [vmem:[#allocation5 + $0x470] sm:$0xff] %vm678_vm2, %v4191_v4 }
 0x46a   : > { %4796 = vst.msk [vmem:[#allocation5 + $0x368] sm:$0xff] %vm678_vm2, %v4760_v20  ;;  %v4195_v4 = vld [vmem:[#allocation3 + $0x113] sm:$0xff]  ;;  %v3908_v20 = vld [vmem:[#allocation3 + $0x10a] sm:$0xff] }
 0x46b   : > { %4377 = vrot.lane.b32.xlu2 %v11453_v45, %s8618_s17  ;;  %4661 = vrot.lane.b32.xlu0 %v4556_v21, %s8618_s17  ;;  %v5885_v45 = vld [vmem:[%s13318_s1 + $0x38] sm:$0xff]  ;;  %v11518_v33 = vpop.f32.mrf.mxu2  ;;  %3656 = vst.msk [vmem:[#allocation5 + $0x528] sm:$0xff] %vm678_vm2, %v3620_v34 }
 0x46c   : > { %4375 = vrot.lane.b32.xlu1 %v11446_v35, %s8618_s17  ;;  %v5056_v35 = vld [vmem:[%s13323_s6 + $0x208] sm:$0xff]  ;;  %4231 = vst.msk [vmem:[#allocation5 + $0x510] sm:$0xff] %vm678_vm2, %v4195_v4  ;;  %v4198_v34 = vld [vmem:[#allocation3 + $0x12b] sm:$0xff] }
 0x46d   : > { %v3790_v54 = vpop.permute.xlu2 %3789  ;;  %v4638_v48 = vpop.permute.xlu0 %4637  ;;  %5689 = vmatpush.msrb.mxu2 %v5056_v35  ;;  %v5893_v35 = vld [vmem:[%s13318_s1 + $0x78] sm:$0xff]  ;;  %3944 = vst.msk [vmem:[#allocation5 + $0x530] sm:$0xff] %vm678_vm2, %v3908_v20  ;;  %v5904_v4 = vld [vmem:[%s13318_s1 + $0xd0] sm:$0xff]  ;;  %v5906_v20 = vld [vmem:[%s13318_s1 + $0xe0] sm:$0xff] }
 0x46e   : > { %3868 = vst.msk [vmem:[#allocation5 + $0x488] sm:$0xff] %vm1260_vm3, %v3790_v54  ;;  %v4070_v9 = vpop.permute.xlu1 %4069  ;;  %v4932_v30 = vld [vmem:[#allocation5 + $0x3c8] sm:$0xff] }
 0x46f   : > { %4724 = vst.msk [vmem:[#allocation5 + $0x360] sm:$0xff] %vm1260_vm3, %v4638_v48  ;;  %5388 = vmatmul.f32.gmra.mxu3 %v4932_v30  ;;  %v4923_v53 = vld [vmem:[#allocation5 + $0x380] sm:$0xff] }
 0x470   : > { %4152 = vst.msk [vmem:[#allocation5 + $0x3f0] sm:$0xff] %vm1260_vm3, %v4070_v9  ;;  %5269 = vmatmul.f32.gmra.mxu2 %v4941_v62  ;;  %5507 = vmatmul.f32.gmra.mxu0 %v4923_v53  ;;  %v3906_v9 = vld [vmem:[#allocation3 + $0xfa] sm:$0xff] }
 0x471   : > { %v4929_v53 = vld [vmem:[#allocation5 + $0x3b0] sm:$0xff]  ;;  %3942 = vst.msk [vmem:[#allocation5 + $0x4e0] sm:$0xff] %vm678_vm2, %v3906_v9 }
 0x472   : > { %v4763_v9 = vld [vmem:[#allocation3 + $0xe6] sm:$0xff]  ;;  %4234 = vst.msk [vmem:[#allocation5 + $0x588] sm:$0xff] %vm678_vm2, %v4198_v34 }
 0x473   : > { %4659 = vrot.lane.b32.xlu2 %v4555_v47, %s8618_s17  ;;  %5946 = vperm.xlu0 %8596, %v5884_v42   ;;  %v11540_v49 = vpop.f32.mrf.mxu2  ;;  %v11578_v42 = vpop.f32.mrf.mxu3  ;;  %4799 = vst.msk [vmem:[#allocation5 + $0x3e0] sm:$0xff] %vm678_vm2, %v4763_v9 }
 0x474   : > { %5951 = vperm.xlu1 %8597, %v5885_v45   ;;  %13424 = vst [vmem:[#allocation23_spill] sm:$0xff] %v11540_v49  ;;  %v11580_v45 = vpop.f32.mrf.mxu0 }
 0x475   : > { %v4360_v0 = vpop.permute.xlu2 %4359  ;;  %v3786_v29 = vpop.permute.xlu0 %3785 }
 0x476   : > { %4441 = vst.msk [vmem:[#allocation5 + $0x420] sm:$0xff] %vm1260_vm3, %v4360_v0  ;;  %v4640_v14 = vpop.permute.xlu1 %4639  ;;  %v4919_v1 = vld [vmem:[#allocation5 + $0x360] sm:$0xff] }
 0x477   : > { %3866 = vst.msk [vmem:[#allocation5 + $0x438] sm:$0xff] %vm1260_vm3, %v3786_v29  ;;  %v4937_v41 = vld [vmem:[#allocation5 + $0x3f0] sm:$0xff]  ;;  %5629 = vmatmul.f32.gmra.mxu1 %v4919_v1 }
 0x478   : > { %4725 = vst.msk [vmem:[#allocation5 + $0x388] sm:$0xff] %vm1260_vm3, %v4640_v14  ;;  %5391 = vmatmul.f32.gmra.mxu3 %v4937_v41  ;;  %5510 = vmatmul.f32.gmra.mxu0 %v4928_v44  ;;  %v4956_v14 = vld [vmem:[#allocation5 + $0x488] sm:$0xff]  ;;  %v4193_v44 = vld [vmem:[#allocation3 + $0x103] sm:$0xff] }
 0x479   : > { %v3622_v41 = vld [vmem:[#allocation3 + $0x118] sm:$0xff]  ;;  %4229 = vst.msk [vmem:[#allocation5 + $0x4c0] sm:$0xff] %vm678_vm2, %v4193_v44  ;;  %v5903_v44 = vld [vmem:[%s13318_s1 + $0xc8] sm:$0xff] }
 0x47a   : > { %3658 = vst.msk [vmem:[#allocation5 + $0x578] sm:$0xff] %vm678_vm2, %v3622_v41  ;;  %v5902_v41 = vld [vmem:[%s13318_s1 + $0xc0] sm:$0xff] }
 0x47b   : > { %5956 = vperm.xlu2 %8598, %v5886_v18   ;;  %5961 = vperm.xlu0 %8596, %v5887_v26   ;;  %v11563_v62 = vpop.f32.mrf.mxu2  ;;  %v4762_v18 = vld [vmem:[#allocation3 + $0xde] sm:$0xff]  ;;  %v5896_v26 = vld [vmem:[%s13318_s1 + $0x90] sm:$0xff] }
 0x47c   : > { %5966 = vperm.xlu1 %8597, %v5888_v28   ;;  %13425 = vst [vmem:[#allocation6_spill] sm:$0xff] %v11563_v62  ;;  %v5897_v28 = vld [vmem:[%s13318_s1 + $0x98] sm:$0xff]  ;;  %v4840_v62 = vld [vmem:[#allocation5 + $0xe8] sm:$0xff] }
 0x47d   : > { %v4078_v56 = vpop.permute.xlu2 %4077  ;;  %v4356_v8 = vpop.permute.xlu0 %4355  ;;  %4798 = vst.msk [vmem:[#allocation5 + $0x3b8] sm:$0xff] %vm678_vm2, %v4762_v18 }
 0x47e   : > { %4156 = vst.msk [vmem:[#allocation5 + $0x490] sm:$0xff] %vm1260_vm3, %v4078_v56  ;;  %v3788_v55 = vpop.permute.xlu1 %3787  ;;  %v4946_v25 = vld [vmem:[#allocation5 + $0x438] sm:$0xff]  ;;  %v5055_v56 = vld [vmem:[%s13323_s6 + $0x200] sm:$0xff] }
 0x47f   : > { %4439 = vst.msk [vmem:[#allocation5 + $0x3d0] sm:$0xff] %vm1260_vm3, %v4356_v8  ;;  %5272 = vmatmul.f32.gmra.mxu2 %v4946_v25  ;;  %v4924_v57 = vld [vmem:[#allocation5 + $0x388] sm:$0xff]  ;;  %v11604_v8 = vpop.f32.mrf.mxu3 }
 0x480   : > { %3867 = vst.msk [vmem:[#allocation5 + $0x460] sm:$0xff] %vm1260_vm3, %v3788_v55  ;;  %5394 = vmatmul.f32.gmra.mxu3 %v4942_v13  ;;  %5632 = vmatmul.f32.gmra.mxu1 %v4924_v57 }
 0x481   : > { %5690 = vmatpush.msrb.mxu2 %v5055_v56 }
 0x483   : > { %5971 = vperm.xlu2 %8598, %v5889_v60   ;;  %5976 = vperm.xlu0 %8596, %v5890_v43   ;;  %v11588_v37 = vpop.f32.mrf.mxu2  ;;  %v4943_v60 = vld [vmem:[#allocation5 + $0x420] sm:$0xff]  ;;  %v11608_v43 = vpop.f32.mrf.mxu0 }
 0x484   : > { %5981 = vperm.xlu1 %8597, %v5891_v32   ;;  %13426 = vst [vmem:[#allocation26_spill] sm:$0xff] %v11588_v37  ;;  %v5898_v32 = vld [vmem:[%s13318_s1 + $0xa0] sm:$0xff]  ;;  %v4989_v37 = vld [vmem:[#allocation5 + $0x590] sm:$0xff] }
 0x485   : > { %v4648_v63 = vpop.permute.xlu2 %4647  ;;  %v4074_v21 = vpop.permute.xlu0 %4073 }
 0x486   : > { %4729 = vst.msk [vmem:[#allocation5 + $0x428] sm:$0xff] %vm1260_vm3, %v4648_v63  ;;  %v4358_v54 = vpop.permute.xlu1 %4357  ;;  %v4933_v48 = vld [vmem:[#allocation5 + $0x3d0] sm:$0xff] }
 0x487   : > { %4154 = vst.msk [vmem:[#allocation5 + $0x440] sm:$0xff] %vm1260_vm3, %v4074_v21  ;;  %v4951_v30 = vld [vmem:[#allocation5 + $0x460] sm:$0xff]  ;;  %5513 = vmatmul.f32.gmra.mxu0 %v4933_v48  ;;  %v5899_v21 = vld [vmem:[%s13318_s1 + $0xa8] sm:$0xff] }
 0x488   : > { %4440 = vst.msk [vmem:[#allocation5 + $0x3f8] sm:$0xff] %vm1260_vm3, %v4358_v54  ;;  %5275 = vmatmul.f32.gmra.mxu2 %v4951_v30  ;;  %5635 = vmatmul.f32.gmra.mxu1 %v4929_v53  ;;  %v5900_v54 = vld [vmem:[%s13318_s1 + $0xb0] sm:$0xff]  ;;  %v11626_v30 = vpop.f32.mrf.mxu1 }
 0x489   : > { %v4194_v48 = vld [vmem:[#allocation3 + $0x10b] sm:$0xff] }
 0x48a   : > { %4230 = vst.msk [vmem:[#allocation5 + $0x4e8] sm:$0xff] %vm678_vm2, %v4194_v48  ;;  %v4766_v48 = vld [vmem:[#allocation3 + $0xfe] sm:$0xff] }
 0x48b   : > { %5986 = vperm.xlu2 %8598, %v5892_v24   ;;  %5991 = vperm.xlu0 %8596, %v5893_v35   ;;  %v11614_v63 = vpop.f32.mrf.mxu2  ;;  %4802 = vst.msk [vmem:[#allocation5 + $0x458] sm:$0xff] %vm678_vm2, %v4766_v48  ;;  %v4768_v48 = vld [vmem:[#allocation3 + $0x10e] sm:$0xff] }
 0x48c   : > { %5996 = vperm.xlu1 %8597, %v5894_v40   ;;  %13427 = vst [vmem:[#allocation52_spill] sm:$0xff] %v11614_v63  ;;  %v3621_v40 = vld [vmem:[#allocation3 + $0x110] sm:$0xff] }
 0x48d   : > { %v3796_v47 = vpop.permute.xlu2 %3795  ;;  %v4644_v0 = vpop.permute.xlu0 %4643  ;;  %3657 = vst.msk [vmem:[#allocation5 + $0x550] sm:$0xff] %vm678_vm2, %v3621_v40  ;;  %v4197_v40 = vld [vmem:[#allocation3 + $0x123] sm:$0xff] }
 0x48e   : > { %3871 = vst.msk [vmem:[#allocation5 + $0x500] sm:$0xff] %vm1260_vm3, %v3796_v47  ;;  %v4076_v29 = vpop.permute.xlu1 %4075  ;;  %v4947_v1 = vld [vmem:[#allocation5 + $0x440] sm:$0xff]  ;;  %v4957_v47 = vld [vmem:[#allocation5 + $0x490] sm:$0xff] }
 0x48f   : > { %4727 = vst.msk [vmem:[#allocation5 + $0x3d8] sm:$0xff] %vm1260_vm3, %v4644_v0  ;;  %5397 = vmatmul.f32.gmra.mxu3 %v4947_v1  ;;  %v4938_v50 = vld [vmem:[#allocation5 + $0x3f8] sm:$0xff]  ;;  %v5901_v1 = vld [vmem:[%s13318_s1 + $0xb8] sm:$0xff] }
 0x490   : > { %4155 = vst.msk [vmem:[#allocation5 + $0x468] sm:$0xff] %vm1260_vm3, %v4076_v29  ;;  %5278 = vmatmul.f32.gmra.mxu2 %v4956_v14  ;;  %5516 = vmatmul.f32.gmra.mxu0 %v4938_v50  ;;  %v3909_v29 = vld [vmem:[#allocation3 + $0x112] sm:$0xff]  ;;  %v11631_v14 = vpop.f32.mrf.mxu3 }
 0x491   : > { %v4764_v50 = vld [vmem:[#allocation3 + $0xee] sm:$0xff]  ;;  %3945 = vst.msk [vmem:[#allocation5 + $0x558] sm:$0xff] %vm678_vm2, %v3909_v29  ;;  %v5907_v29 = vld [vmem:[%s13318_s1 + $0xe8] sm:$0xff] }
 0x492   : > { %4800 = vst.msk [vmem:[#allocation5 + $0x408] sm:$0xff] %vm678_vm2, %v4764_v50  ;;  %v5909_v50 = vld [vmem:[%s13318_s1 + $0xf8] sm:$0xff] }
 0x493   : > { %6001 = vperm.xlu2 %8598, %v5895_v22   ;;  %6006 = vperm.xlu0 %8596, %v5896_v26   ;;  %v11644_v22 = vpop.f32.mrf.mxu0  ;;  %v11647_v18 = vpop.f32.mrf.mxu2  ;;  %v4765_v26 = vld [vmem:[#allocation3 + $0xf6] sm:$0xff]  ;;  %4233 = vst.msk [vmem:[#allocation5 + $0x560] sm:$0xff] %vm678_vm2, %v4197_v40 }
 0x494   : > { %6011 = vperm.xlu1 %8597, %v5897_v28   ;;  %13428 = vst [vmem:[#allocation8_spill] sm:$0xff] %v11647_v18  ;;  %v4772_v18 = vld [vmem:[#allocation3 + $0x12e] sm:$0xff] }
 0x495   : > { %v4366_v55 = vpop.permute.xlu2 %4365  ;;  %v3792_v25 = vpop.permute.xlu0 %3791  ;;  %4801 = vst.msk [vmem:[#allocation5 + $0x430] sm:$0xff] %vm678_vm2, %v4765_v26  ;;  %v4767_v26 = vld [vmem:[#allocation3 + $0x106] sm:$0xff] }
 0x496   : > { %4444 = vst.msk [vmem:[#allocation5 + $0x498] sm:$0xff] %vm1260_vm3, %v4366_v55  ;;  %v4646_v13 = vpop.permute.xlu1 %4645  ;;  %v4934_v57 = vld [vmem:[#allocation5 + $0x3d8] sm:$0xff] }
 0x497   : > { %3869 = vst.msk [vmem:[#allocation5 + $0x4b0] sm:$0xff] %vm1260_vm3, %v3792_v25  ;;  %v4952_v11 = vld [vmem:[#allocation5 + $0x468] sm:$0xff]  ;;  %5638 = vmatmul.f32.gmra.mxu1 %v4934_v57 }
 0x498   : > { %4728 = vst.msk [vmem:[#allocation5 + $0x400] sm:$0xff] %vm1260_vm3, %v4646_v13  ;;  %5400 = vmatmul.f32.gmra.mxu3 %v4952_v11  ;;  %5519 = vmatmul.f32.gmra.mxu0 %v4943_v60  ;;  %v4944_v13 = vld [vmem:[#allocation5 + $0x428] sm:$0xff]  ;;  %v11653_v60 = vpop.f32.mrf.mxu1 }
 0x499   : > { %v4196_v11 = vld [vmem:[#allocation3 + $0x11b] sm:$0xff]  ;;  %4803 = vst.msk [vmem:[#allocation5 + $0x480] sm:$0xff] %vm678_vm2, %v4767_v26  ;;  %v5913_v26 = vld [vmem:[%s13318_s1 + $0x118] sm:$0xff] }
 0x49a   : > { %4232 = vst.msk [vmem:[#allocation5 + $0x538] sm:$0xff] %vm678_vm2, %v4196_v11 }
 0x49b   : > { %6016 = vperm.xlu2 %8598, %v5898_v32   ;;  %6021 = vperm.xlu0 %8596, %v5899_v21   ;;  %v5905_v32 = vld [vmem:[%s13318_s1 + $0xd8] sm:$0xff]  ;;  %v11666_v21 = vpop.f32.mrf.mxu3  ;;  %v11671_v9 = vpop.f32.mrf.mxu2  ;;  %4804 = vst.msk [vmem:[#allocation5 + $0x4a8] sm:$0xff] %vm678_vm2, %v4768_v48 }
 0x49c   : > { %6026 = vperm.xlu1 %8597, %v5900_v54   ;;  %v11669_v54 = vpop.f32.mrf.mxu0  ;;  %13429 = vst [vmem:[#allocation25_spill] sm:$0xff] %v11671_v9  ;;  %v4771_v9 = vld [vmem:[#allocation3 + $0x126] sm:$0xff] }
 0x49d   : > { %v4084_v53 = vpop.permute.xlu2 %4083  ;;  %v4362_v19 = vpop.permute.xlu0 %4361  ;;  %v4958_v34 = vld [vmem:[#allocation5 + $0x498] sm:$0xff]  ;;  %4807 = vst.msk [vmem:[#allocation5 + $0x520] sm:$0xff] %vm678_vm2, %v4771_v9 }
 0x49e   : > { %4159 = vst.msk [vmem:[#allocation5 + $0x508] sm:$0xff] %vm1260_vm3, %v4084_v53  ;;  %v3794_v24 = vpop.permute.xlu1 %3793  ;;  %v4961_v35 = vld [vmem:[#allocation5 + $0x4b0] sm:$0xff]  ;;  %v4850_v9 = vld [vmem:[#allocation5 + $0x138] sm:$0xff] }
 0x49f   : > { %4442 = vst.msk [vmem:[#allocation5 + $0x448] sm:$0xff] %vm1260_vm3, %v4362_v19  ;;  %5281 = vmatmul.f32.gmra.mxu2 %v4961_v35  ;;  %v4939_v0 = vld [vmem:[#allocation5 + $0x400] sm:$0xff] }
 0x4a0   : > { %3870 = vst.msk [vmem:[#allocation5 + $0x4d8] sm:$0xff] %vm1260_vm3, %v3794_v24  ;;  %5403 = vmatmul.f32.gmra.mxu3 %v4957_v47  ;;  %5641 = vmatmul.f32.gmra.mxu1 %v4939_v0  ;;  %v4971_v47 = vld [vmem:[#allocation5 + $0x500] sm:$0xff] }
 0x4a1   : > { %4808 = vst.msk [vmem:[#allocation5 + $0x548] sm:$0xff] %vm678_vm2, %v4772_v18 }
 0x4a3   : > { %6031 = vperm.xlu2 %8598, %v5901_v1   ;;  %6036 = vperm.xlu0 %8596, %v5902_v41   ;;  %v5908_v1 = vld [vmem:[%s13318_s1 + $0xf0] sm:$0xff]  ;;  %v11687_v41 = vpop.f32.mrf.mxu1 }
 0x4a4   : > { %6041 = vperm.xlu1 %8597, %v5903_v44   ;;  %v11689_v44 = vpop.f32.mrf.mxu3  ;;  %v11696_v11 = vpop.f32.mrf.mxu0 }
 0x4a5   : > { %v4654_v28 = vpop.permute.xlu2 %4653  ;;  %v4080_v56 = vpop.permute.xlu0 %4079 }
 0x4a6   : > { %4732 = vst.msk [vmem:[#allocation5 + $0x4a0] sm:$0xff] %vm1260_vm3, %v4654_v28  ;;  %v4364_v55 = vpop.permute.xlu1 %4363  ;;  %v4948_v25 = vld [vmem:[#allocation5 + $0x448] sm:$0xff]  ;;  %v11691_v28 = vpop.f32.mrf.mxu2 }
 0x4a7   : > { %4157 = vst.msk [vmem:[#allocation5 + $0x4b8] sm:$0xff] %vm1260_vm3, %v4080_v56  ;;  %v4966_v57 = vld [vmem:[#allocation5 + $0x4d8] sm:$0xff]  ;;  %5522 = vmatmul.f32.gmra.mxu0 %v4948_v25 }
 0x4a8   : > { %4443 = vst.msk [vmem:[#allocation5 + $0x470] sm:$0xff] %vm1260_vm3, %v4364_v55  ;;  %5284 = vmatmul.f32.gmra.mxu2 %v4966_v57  ;;  %5644 = vmatmul.f32.gmra.mxu1 %v4944_v13 }
 0x4a9   : > { %13430 = vst [vmem:[#allocation48_spill] sm:$0xff] %v11691_v28  ;;  %v4835_v28 = vld [vmem:[#allocation5 + $0xc0] sm:$0xff] }
 0x4ab   : > { %6046 = vperm.xlu2 %8598, %v5904_v4   ;;  %6051 = vperm.xlu0 %8596, %v5905_v32   ;;  %v5910_v4 = vld [vmem:[%s13318_s1 + $0x100] sm:$0xff]  ;;  %v5911_v32 = vld [vmem:[%s13318_s1 + $0x108] sm:$0xff] }
 0x4ac   : > { %6056 = vperm.xlu1 %8597, %v5906_v20   ;;  %v5912_v20 = vld [vmem:[%s13318_s1 + $0x110] sm:$0xff] }
 0x4ad   : > { %v3802_v53 = vpop.permute.xlu2 %3801  ;;  %v4650_v19 = vpop.permute.xlu0 %4649 }
 0x4ae   : > { %3874 = vst.msk [vmem:[#allocation5 + $0x578] sm:$0xff] %vm1260_vm3, %v3802_v53  ;;  %v4082_v24 = vpop.permute.xlu1 %4081  ;;  %v4962_v35 = vld [vmem:[#allocation5 + $0x4b8] sm:$0xff]  ;;  %v11708_v53 = vpop.f32.mrf.mxu1 }
 0x4af   : > { %4730 = vst.msk [vmem:[#allocation5 + $0x450] sm:$0xff] %vm1260_vm3, %v4650_v19  ;;  %5406 = vmatmul.f32.gmra.mxu3 %v4962_v35  ;;  %v4953_v0 = vld [vmem:[#allocation5 + $0x470] sm:$0xff] }
 0x4b0   : > { %4158 = vst.msk [vmem:[#allocation5 + $0x4e0] sm:$0xff] %vm1260_vm3, %v4082_v24  ;;  %5287 = vmatmul.f32.gmra.mxu2 %v4971_v47  ;;  %5525 = vmatmul.f32.gmra.mxu0 %v4953_v0  ;;  %v11712_v47 = vpop.f32.mrf.mxu3  ;;  %v4972_v0 = vld [vmem:[#allocation5 + $0x508] sm:$0xff] }
 0x4b3   : > { %6061 = vperm.xlu2 %8598, %v5907_v29   ;;  %6066 = vperm.xlu0 %8596, %v5908_v1   ;;  %v11715_v1 = vpop.f32.mrf.mxu0 }
 0x4b4   : > { %6071 = vperm.xlu1 %8597, %v5909_v50   ;;  %v11717_v50 = vpop.f32.mrf.mxu2 }
 0x4b5   : > { %v4372_v56 = vpop.permute.xlu2 %4371  ;;  %v3798_v55 = vpop.permute.xlu0 %3797  ;;  %13431 = vst [vmem:[#allocation10_spill] sm:$0xff] %v11717_v50  ;;  %v4830_v50 = vld [vmem:[#allocation5 + $0x98] sm:$0xff] }
 0x4b6   : > { %4447 = vst.msk [vmem:[#allocation5 + $0x510] sm:$0xff] %vm1260_vm3, %v4372_v56  ;;  %v4652_v25 = vpop.permute.xlu1 %4651  ;;  %v4949_v13 = vld [vmem:[#allocation5 + $0x450] sm:$0xff]  ;;  %v4769_v56 = vld [vmem:[#allocation3 + $0x116] sm:$0xff] }
 0x4b7   : > { %3872 = vst.msk [vmem:[#allocation5 + $0x528] sm:$0xff] %vm1260_vm3, %v3798_v55  ;;  %v4967_v57 = vld [vmem:[#allocation5 + $0x4e0] sm:$0xff]  ;;  %5647 = vmatmul.f32.gmra.mxu1 %v4949_v13 }
 0x4b8   : > { %4731 = vst.msk [vmem:[#allocation5 + $0x478] sm:$0xff] %vm1260_vm3, %v4652_v25  ;;  %5409 = vmatmul.f32.gmra.mxu3 %v4967_v57  ;;  %5528 = vmatmul.f32.gmra.mxu0 %v4958_v34 }
 0x4b9   : > { %4805 = vst.msk [vmem:[#allocation5 + $0x4d0] sm:$0xff] %vm678_vm2, %v4769_v56 }
 0x4bb   : > { %6076 = vperm.xlu2 %8598, %v5910_v4   ;;  %6081 = vperm.xlu0 %8596, %v5911_v32   ;;  %v4959_v4 = vld [vmem:[#allocation5 + $0x4a0] sm:$0xff]  ;;  %v11726_v32 = vpop.f32.mrf.mxu1  ;;  %v11731_v48 = vpop.f32.mrf.mxu0 }
 0x4bc   : > { %6086 = vperm.xlu1 %8597, %v5912_v20   ;;  %v13432_v20 = vmov 0.0  }
 0x4bd   : > { %v4090_v19 = vpop.permute.xlu2 %4089  ;;  %v4368_v24 = vpop.permute.xlu0 %4367  ;;  %5875 = vst.msk [vmem:[#allocation4 + $0x130] sm:$0xff] %vm5836_vm4, %v13432_v20 }
 0x4be   : > { %4162 = vst.msk [vmem:[#allocation5 + $0x580] sm:$0xff] %vm1260_vm3, %v4090_v19  ;;  %v3800_v35 = vpop.permute.xlu1 %3799  ;;  %v4976_v40 = vld [vmem:[#allocation5 + $0x528] sm:$0xff]  ;;  %v11733_v19 = vpop.f32.mrf.mxu2 }
 0x4bf   : > { %4445 = vst.msk [vmem:[#allocation5 + $0x4c0] sm:$0xff] %vm1260_vm3, %v4368_v24  ;;  %5290 = vmatmul.f32.gmra.mxu2 %v4976_v40  ;;  %v4954_v29 = vld [vmem:[#allocation5 + $0x478] sm:$0xff]  ;;  %v11737_v24 = vpop.f32.mrf.mxu3 }
 0x4c0   : > { %3873 = vst.msk [vmem:[#allocation5 + $0x550] sm:$0xff] %vm1260_vm3, %v3800_v35  ;;  %5412 = vmatmul.f32.gmra.mxu3 %v4972_v0  ;;  %5650 = vmatmul.f32.gmra.mxu1 %v4954_v29 }
 0x4c1   : > { %13433 = vst [vmem:[#allocation27_spill] sm:$0xff] %v11733_v19  ;;  %v4825_v19 = vld [vmem:[#allocation5 + $0x70] sm:$0xff] }
 0x4c2   : > { %5876 = vst.msk [vmem:[#allocation4 + $0x138] sm:$0xff] %vm5836_vm4, %v13432_v20 }
 0x4c3   : > { %6091 = vperm.xlu2 %8598, %v5913_v26   ;;  %5837 = vst.msk [vmem:[#allocation4] sm:$0xff] %vm5836_vm4, %v13432_v20  ;;  %v4986_v26 = vld [vmem:[#allocation5 + $0x578] sm:$0xff] }
 0x4c4   : > { %5838 = vst.msk [vmem:[#allocation4 + $0x8] sm:$0xff] %vm5836_vm4, %v13432_v20 }
 0x4c5   : > { %v4378_v55 = vpop.permute.xlu2 %4377  ;;  %v4086_v25 = vpop.permute.xlu0 %4085  ;;  %5839 = vst.msk [vmem:[#allocation4 + $0x10] sm:$0xff] %vm5836_vm4, %v13432_v20 }
 0x4c6   : > { %4450 = vst.msk [vmem:[#allocation5 + $0x588] sm:$0xff] %vm1260_vm3, %v4378_v55  ;;  %v4370_v13 = vpop.permute.xlu1 %4369  ;;  %v4963_v57 = vld [vmem:[#allocation5 + $0x4c0] sm:$0xff]  ;;  %v11748_v55 = vpop.f32.mrf.mxu1 }
 0x4c7   : > { %4160 = vst.msk [vmem:[#allocation5 + $0x530] sm:$0xff] %vm1260_vm3, %v4086_v25  ;;  %v4981_v34 = vld [vmem:[#allocation5 + $0x550] sm:$0xff]  ;;  %5531 = vmatmul.f32.gmra.mxu0 %v4963_v57  ;;  %v11752_v25 = vpop.f32.mrf.mxu2  ;;  %v11762_v57 = vpop.f32.mrf.mxu3 }
 0x4c8   : > { %4446 = vst.msk [vmem:[#allocation5 + $0x4e8] sm:$0xff] %vm1260_vm3, %v4370_v13  ;;  %5293 = vmatmul.f32.gmra.mxu2 %v4981_v34  ;;  %5653 = vmatmul.f32.gmra.mxu1 %v4959_v4  ;;  %v11758_v13 = vpop.f32.mrf.mxu0 }
 0x4c9   : > { %5840 = vst.msk [vmem:[#allocation4 + $0x18] sm:$0xff] %vm5836_vm4, %v13432_v20 }
 0x4ca   : > { %13434 = vst [vmem:[#allocation12_spill] sm:$0xff] %v11752_v25 }
 0x4cb   : > { %5841 = vst.msk [vmem:[#allocation4 + $0x20] sm:$0xff] %vm5836_vm4, %v13432_v20 }
 0x4cc   : > { %5842 = vst.msk [vmem:[#allocation4 + $0x28] sm:$0xff] %vm5836_vm4, %v13432_v20 }
 0x4cd   : > { %v4660_v35 = vpop.permute.xlu2 %4659  ;;  %v4656_v40 = vpop.permute.xlu0 %4655  ;;  %5843 = vst.msk [vmem:[#allocation4 + $0x30] sm:$0xff] %vm5836_vm4, %v13432_v20 }
 0x4ce   : > { %4735 = vst.msk [vmem:[#allocation5 + $0x518] sm:$0xff] %vm1260_vm3, %v4660_v35  ;;  %v4088_v0 = vpop.permute.xlu1 %4087  ;;  %v4977_v29 = vld [vmem:[#allocation5 + $0x530] sm:$0xff] }
 0x4cf   : > { %4733 = vst.msk [vmem:[#allocation5 + $0x4c8] sm:$0xff] %vm1260_vm3, %v4656_v40  ;;  %5415 = vmatmul.f32.gmra.mxu3 %v4977_v29  ;;  %v4968_v56 = vld [vmem:[#allocation5 + $0x4e8] sm:$0xff]  ;;  %v4815_v29 = vld [vmem:[#allocation5 + $0x20] sm:$0xff]  ;;  %v11790_v25 = vpop.f32.mrf.mxu3 }
 0x4d0   : > { %4161 = vst.msk [vmem:[#allocation5 + $0x558] sm:$0xff] %vm1260_vm3, %v4088_v0  ;;  %5296 = vmatmul.f32.gmra.mxu2 %v4986_v26  ;;  %5534 = vmatmul.f32.gmra.mxu0 %v4968_v56  ;;  %v4973_v0 = vld [vmem:[#allocation5 + $0x510] sm:$0xff]  ;;  %v11775_v26 = vpop.f32.mrf.mxu1  ;;  %v11779_v56 = vpop.f32.mrf.mxu0 }
 0x4d1   : > { %5844 = vst.msk [vmem:[#allocation4 + $0x38] sm:$0xff] %vm5836_vm4, %v13432_v20 }
 0x4d2   : > { %5845 = vst.msk [vmem:[#allocation4 + $0x40] sm:$0xff] %vm5836_vm4, %v13432_v20 }
 0x4d3   : > { %5846 = vst.msk [vmem:[#allocation4 + $0x48] sm:$0xff] %vm5836_vm4, %v13432_v20 }
 0x4d4   : > { %5847 = vst.msk [vmem:[#allocation4 + $0x50] sm:$0xff] %vm5836_vm4, %v13432_v20 }
 0x4d5   : > { %v4374_v34 = vpop.permute.xlu0 %4373  ;;  %5848 = vst.msk [vmem:[#allocation4 + $0x58] sm:$0xff] %vm5836_vm4, %v13432_v20 }
 0x4d6   : > { %v4658_v4 = vpop.permute.xlu1 %4657  ;;  %v4964_v35 = vld [vmem:[#allocation5 + $0x4c8] sm:$0xff]  ;;  %4448 = vst.msk [vmem:[#allocation5 + $0x538] sm:$0xff] %vm1260_vm3, %v4374_v34  ;;  %v11781_v34 = vpop.f32.mrf.mxu2 }
 0x4d7   : > { %v4982_v40 = vld [vmem:[#allocation5 + $0x558] sm:$0xff]  ;;  %5656 = vmatmul.f32.gmra.mxu1 %v4964_v35  ;;  %4734 = vst.msk [vmem:[#allocation5 + $0x4f0] sm:$0xff] %vm1260_vm3, %v4658_v4 }
 0x4d8   : > { %5418 = vmatmul.f32.gmra.mxu3 %v4982_v40  ;;  %5537 = vmatmul.f32.gmra.mxu0 %v4973_v0  ;;  %13435 = vst [vmem:[#allocation30_spill] sm:$0xff] %v11781_v34  ;;  %v4987_v0 = vld [vmem:[#allocation5 + $0x580] sm:$0xff]  ;;  %v4820_v34 = vld [vmem:[#allocation5 + $0x48] sm:$0xff] }
 0x4d9   : > { %8484 = vmatmul.msk.f32.vlgmr.msrb.gmra.mxu2 %vm678_vm2, %v4815_v29  ;;  %5849 = vst.msk [vmem:[#allocation4 + $0x60] sm:$0xff] %vm5836_vm4, %v13432_v20 }
 0x4da   : > { %5850 = vst.msk [vmem:[#allocation4 + $0x68] sm:$0xff] %vm5836_vm4, %v13432_v20 }
 0x4db   : > { %5851 = vst.msk [vmem:[#allocation4 + $0x70] sm:$0xff] %vm5836_vm4, %v13432_v20 }
 0x4dc   : > { %13436 = vst [vmem:[#allocation15_spill] sm:$0xff] %v11790_v25 }
 0x4dd   : > { %v4662_v4 = vpop.permute.xlu0 %4661  ;;  %v4978_v40 = vld [vmem:[#allocation5 + $0x538] sm:$0xff]  ;;  %5852 = vst.msk [vmem:[#allocation4 + $0x78] sm:$0xff] %vm5836_vm4, %v13432_v20 }
 0x4de   : > { %v4376_v35 = vpop.permute.xlu1 %4375  ;;  %4736 = vst.msk [vmem:[#allocation5 + $0x540] sm:$0xff] %vm1260_vm3, %v4662_v4  ;;  %v4969_v29 = vld [vmem:[#allocation5 + $0x4f0] sm:$0xff]  ;;  %v11802_v4 = vpop.f32.mrf.mxu1 }
 0x4df   : > { %4449 = vst.msk [vmem:[#allocation5 + $0x560] sm:$0xff] %vm1260_vm3, %v4376_v35  ;;  %5659 = vmatmul.f32.gmra.mxu1 %v4969_v29  ;;  %v7643_v35 = vld [vmem:[#allocation4 + $0x136] sm:$0xff]  ;;  %v4974_v29 = vld [vmem:[#allocation5 + $0x518] sm:$0xff] }
 0x4e0   : > { %5421 = vmatmul.f32.gmra.mxu3 %v4987_v0  ;;  %5540 = vmatmul.f32.gmra.mxu0 %v4978_v40  ;;  %5853 = vst.msk [vmem:[#allocation4 + $0x80] sm:$0xff] %vm5836_vm4, %v13432_v20  ;;  %v11806_v40 = vpop.f32.mrf.mxu0 }
 0x4e1   : > { %8485 = vmatmul.msk.f32.gmra.mxu2 %vm678_vm2, %v4820_v34  ;;  %5854 = vst.msk [vmem:[#allocation4 + $0x88] sm:$0xff] %vm5836_vm4, %v13432_v20  ;;  %v11808_v34 = vpop.f32.mrf.mxu2 }
 0x4e2   : > { %5855 = vst.msk [vmem:[#allocation4 + $0x90] sm:$0xff] %vm5836_vm4, %v13432_v20 }
 0x4e3   : > { %5856 = vst.msk [vmem:[#allocation4 + $0x98] sm:$0xff] %vm5836_vm4, %v13432_v20 }
 0x4e4   : > { %13437 = vst [vmem:[#allocation29_spill] sm:$0xff] %v11808_v34 }
 0x4e5   : > { %5857 = vst.msk [vmem:[#allocation4 + $0xa0] sm:$0xff] %vm5836_vm4, %v13432_v20  ;;  %v4979_v34 = vld [vmem:[#allocation5 + $0x540] sm:$0xff] }
 0x4e6   : > { %v4983_v0 = vld [vmem:[#allocation5 + $0x560] sm:$0xff]  ;;  %5858 = vst.msk [vmem:[#allocation4 + $0xa8] sm:$0xff] %vm5836_vm4, %v13432_v20 }
 0x4e7   : > { %7679 = vst.msk [vmem:[#allocation5 + $0x560] sm:$0xff] %vm5836_vm4, %v7643_v35  ;;  %5662 = vmatmul.f32.gmra.mxu1 %v4974_v29 }
 0x4e8   : > { %5543 = vmatmul.f32.gmra.mxu0 %v4983_v0  ;;  %5859 = vst.msk [vmem:[#allocation4 + $0xb0] sm:$0xff] %vm5836_vm4, %v13432_v20  ;;  %v11824_v0 = vpop.f32.mrf.mxu1  ;;  %v11834_v29 = vpop.f32.mrf.mxu0 }
 0x4e9   : > { %8486 = vmatmul.msk.f32.gmra.mxu2 %vm678_vm2, %v4825_v19  ;;  %5860 = vst.msk [vmem:[#allocation4 + $0xb8] sm:$0xff] %vm5836_vm4, %v13432_v20  ;;  %v11828_v35 = vpop.f32.mrf.mxu2  ;;  %v4988_v19 = vld [vmem:[#allocation5 + $0x588] sm:$0xff] }
 0x4ea   : > { %5861 = vst.msk [vmem:[#allocation4 + $0xc0] sm:$0xff] %vm5836_vm4, %v13432_v20 }
 0x4eb   : > { %5862 = vst.msk [vmem:[#allocation4 + $0xc8] sm:$0xff] %vm5836_vm4, %v13432_v20 }
 0x4ec   : > { %5863 = vst.msk [vmem:[#allocation4 + $0xd0] sm:$0xff] %vm5836_vm4, %v13432_v20 }
 0x4ed   : > { %13438 = vst [vmem:[#allocation7_spill] sm:$0xff] %v11828_v35  ;;  %v4984_v35 = vld [vmem:[#allocation5 + $0x568] sm:$0xff] }
 0x4ee   : > { %5864 = vst.msk [vmem:[#allocation4 + $0xd8] sm:$0xff] %vm5836_vm4, %v13432_v20 }
 0x4ef   : > { %5865 = vst.msk [vmem:[#allocation4 + $0xe0] sm:$0xff] %vm5836_vm4, %v13432_v20  ;;  %5665 = vmatmul.f32.gmra.mxu1 %v4979_v34 }
 0x4f0   : > { %13439 = vst [vmem:[#allocation31_spill] sm:$0xff] %v11834_v29  ;;  %5546 = vmatmul.f32.gmra.mxu0 %v4988_v19  ;;  %v11851_v19 = vpop.f32.mrf.mxu1 }
 0x4f1   : > { %5866 = vst.msk [vmem:[#allocation4 + $0xe8] sm:$0xff] %vm5836_vm4, %v13432_v20  ;;  %8487 = vmatmul.msk.f32.gmra.mxu2 %vm678_vm2, %v4830_v50  ;;  %v4770_v50 = vld [vmem:[#allocation3 + $0x11e] sm:$0xff]  ;;  %v11857_v34 = vpop.f32.mrf.mxu2 }
 0x4f2   : > { %5867 = vst.msk [vmem:[#allocation4 + $0xf0] sm:$0xff] %vm5836_vm4, %v13432_v20 }
 0x4f3   : > { %5868 = vst.msk [vmem:[#allocation4 + $0xf8] sm:$0xff] %vm5836_vm4, %v13432_v20 }
 0x4f4   : > { %5869 = vst.msk [vmem:[#allocation4 + $0x100] sm:$0xff] %vm5836_vm4, %v13432_v20 }
 0x4f5   : > { %5870 = vst.msk [vmem:[#allocation4 + $0x108] sm:$0xff] %vm5836_vm4, %v13432_v20 }
 0x4f6   : > { %5871 = vst.msk [vmem:[#allocation4 + $0x110] sm:$0xff] %vm5836_vm4, %v13432_v20 }
 0x4f7   : > { %5872 = vst.msk [vmem:[#allocation4 + $0x118] sm:$0xff] %vm5836_vm4, %v13432_v20  ;;  %5668 = vmatmul.f32.gmra.mxu1 %v4984_v35 }
 0x4f8   : > { %5873 = vst.msk [vmem:[#allocation4 + $0x120] sm:$0xff] %vm5836_vm4, %v13432_v20 }
 0x4f9   : > { %5874 = vst.msk [vmem:[#allocation4 + $0x128] sm:$0xff] %vm5836_vm4, %v13432_v20  ;;  %8488 = vmatmul.msk.f32.gmra.mxu2 %vm678_vm2, %v4835_v28  ;;  %v4845_v28 = vld [vmem:[#allocation5 + $0x110] sm:$0xff] }
 0x4fa   : > { %13440 = vst [vmem:[#allocation9_spill] sm:$0xff] %v11857_v34  ;;  %v11865_v34 = vpop.f32.mrf.mxu1 }
 0x4fb   : > { %5877 = vst.msk [vmem:[#allocation4 + $0x140] sm:$0xff] %vm5836_vm4, %v13432_v20  ;;  %v11869_v20 = vpop.f32.mrf.mxu2 }
 0x4fc   : > { %4806 = vst.msk [vmem:[#allocation5 + $0x4f8] sm:$0xff] %vm678_vm2, %v4770_v50  ;;  %v4855_v50 = vld [vmem:[#allocation5 + $0x160] sm:$0xff] }
 0x4fd   : > { %13441 = vst [vmem:[#allocation34_spill] sm:$0xff] %v11865_v34  ;;  %v11918_v34 = vpop.permute.xlu1 %5951 }
 0x4fe   : > { %13442 = vst [vmem:[#allocation11_spill] sm:$0xff] %v11869_v20 }
 0x4ff   : > { %5671 = vmatmul.f32.gmra.mxu1 %v4989_v37  ;;  %v4860_v37 = vld [vmem:[#allocation5 + $0x188] sm:$0xff] }
 0x501   : > { %8489 = vmatmul.msk.f32.gmra.mxu2 %vm678_vm2, %v4840_v62 }
 0x502   : > { %v7644_v63 = vld [vmem:[#allocation4 + $0x13e] sm:$0xff] }
 0x503   : > { %7680 = vst.msk [vmem:[#allocation5 + $0x588] sm:$0xff] %vm5836_vm4, %v7644_v63  ;;  %v11872_v35 = vpop.f32.mrf.mxu2  ;;  %v4865_v63 = vld [vmem:[#allocation5 + $0x1b0] sm:$0xff] }
 0x504   : > { %13443 = vst [vmem:[#allocation33_spill] sm:$0xff] %v11872_v35  ;;  %v4870_v35 = vld [vmem:[#allocation5 + $0x1d8] sm:$0xff] }
 0x509   : > { %8490 = vmatmul.msk.f32.gmra.mxu2 %vm678_vm2, %v4845_v28 }
 0x50b   : > { %v11875_v18 = vpop.f32.mrf.mxu2 }
 0x50c   : > { %13444 = vst [vmem:[#allocation13_spill] sm:$0xff] %v11875_v18  ;;  %v6238_v18 = vld [vmem:[#allocation4 + $0x1] sm:$0xff] }
 0x50d   : > { %6310 = vrot.lane.b32.xlu0 %v6238_v18, %s8619_s15  ;;  %v11903_v18 = vld [vmem:[%s13324_s7] ss:$0 sm:$0xff] }
 0x50e   : > { %v5199_v25 = vadd.f32 %v11903_v18, %v11335_v61 }
 0x511   : > { %8491 = vmatmul.msk.f32.gmra.mxu2 %vm678_vm2, %v4850_v9  ;;  %v4875_v9 = vld [vmem:[#allocation5 + $0x200] sm:$0xff] }
 0x513   : > { %v11878_v49 = vpop.f32.mrf.mxu2 }
 0x514   : > { %13445 = vst [vmem:[#allocation35_spill] sm:$0xff] %v11878_v49  ;;  %v6239_v49 = vld [vmem:[#allocation4 + $0x9] sm:$0xff] }
 0x515   : > { %6312 = vrot.lane.b32.xlu1 %v6239_v49, %s8619_s15 }
 0x519   : > { %8492 = vmatmul.msk.f32.gmra.mxu2 %vm678_vm2, %v4855_v50 }
 0x521   : > { %8493 = vmatmul.msk.f32.gmra.mxu2 %vm678_vm2, %v4860_v37  ;;  %v4880_v37 = vld [vmem:[#allocation5 + $0x228] sm:$0xff] }
 0x522   : > { %v11881_v62 = vpop.f32.mrf.mxu2 }
 0x523   : > { %13446 = vst [vmem:[#allocation14_spill] sm:$0xff] %v11881_v62 }
 0x529   : > { %8494 = vmatmul.msk.f32.gmra.mxu2 %vm678_vm2, %v4865_v63  ;;  %v6455_v63 = vld [vmem:[#allocation4 + $0x2] sm:$0xff] }
 0x52a   : > { %6527 = vrot.lane.b32.xlu0 %v6455_v63, %s8618_s17  ;;  %v11907_v63 = vpop.permute.xlu0 %5946 }
 0x52b   : > { %v11884_v28 = vpop.f32.mrf.mxu2 }
 0x52c   : > { %13447 = vst [vmem:[#allocation38_spill] sm:$0xff] %v11884_v28  ;;  %v5196_v28 = vadd.f32 %v11903_v18, %v11313_v3 }
 0x531   : > { %8495 = vmatmul.msk.f32.gmra.mxu2 %vm678_vm2, %v4870_v35  ;;  %v4885_v35 = vld [vmem:[#allocation5 + $0x250] sm:$0xff] }
 0x532   : > { %v11922_v29 = vpop.permute.xlu0 %5961 }
 0x533   : > { %v11888_v50 = vpop.f32.mrf.mxu2 }
 0x534   : > { %13448 = vst [vmem:[#allocation16_spill] sm:$0xff] %v11888_v50  ;;  %v6456_v50 = vld [vmem:[#allocation4 + $0xa] sm:$0xff] }
 0x535   : > { %6529 = vrot.lane.b32.xlu1 %v6456_v50, %s8618_s17  ;;  %v4895_v50 = vld [vmem:[#allocation5 + $0x2a0] sm:$0xff] }
 0x539   : > { %8496 = vmatmul.msk.f32.gmra.mxu2 %vm678_vm2, %v4875_v9 }
 0x53a   : > { %v11939_v61 = vpop.permute.xlu0 %5976 }
 0x541   : > { %8497 = vmatmul.msk.f32.gmra.mxu2 %vm678_vm2, %v4880_v37  ;;  %v4890_v37 = vld [vmem:[#allocation5 + $0x278] sm:$0xff] }
 0x542   : > { %v11892_v62 = vpop.f32.mrf.mxu2 }
 0x543   : > { %13449 = vst [vmem:[#allocation37_spill] sm:$0xff] %v11892_v62  ;;  %v5193_v62 = vadd.f32 %v11903_v18, %v11295_v38 }
 0x549   : > { %8498 = vmatmul.msk.f32.gmra.mxu2 %vm678_vm2, %v4885_v35  ;;  %v5318_v35 = vadd.f32 %v11497_v46, %v5193_v62 }
 0x54b   : > { %v11897_v9 = vpop.f32.mrf.mxu2  ;;  %v5443_v20 = vadd.f32 %v11558_v7, %v5318_v35 }
 0x54c   : > { %13450 = vst [vmem:[#allocation17_spill] sm:$0xff] %v11897_v9  ;;  %v11913_v9 = vpop.f32.mrf.mxu1 }
 0x54d   : > { %13452 = vst [vmem:[#allocation18_spill] sm:$0xff] %v11913_v9  ;;  %v5568_v38 = vadd.f32 %v11598_v6, %v5443_v20  ;;  %v4900_v9 = vld [vmem:[#allocation5 + $0x2c8] sm:$0xff]  ;;  %v11932_v6 = vpop.permute.xlu2 %5956 }
 0x551   : > { %8499 = vmatmul.msk.f32.gmra.mxu2 %vm678_vm2, %v4890_v37 }
 0x553   : > { %v11910_v49 = vpop.f32.mrf.mxu2 }
 0x554   : > { %13451 = vst [vmem:[#allocation39_spill] sm:$0xff] %v11910_v49  ;;  %v5321_v49 = vadd.f32 %v11522_v52, %v5196_v28  ;;  %v11928_v7 = vpop.f32.mrf.mxu1  ;;  %v5324_v28 = vadd.f32 %v11544_v58, %v5199_v25 }
 0x555   : > { %v11962_v58 = vpop.permute.xlu2 %5971 }
 0x556   : > { %v5446_v3 = vadd.f32 %v11580_v45, %v5321_v49 }
 0x558   : > { %v5571_v20 = vadd.f32 %v11626_v30, %v5446_v3 }
 0x559   : > { %8500 = vmatmul.msk.f32.gmra.mxu2 %vm678_vm2, %v4895_v50  ;;  %v11935_v50 = vpop.permute.xlu1 %5966 }
 0x55c   : > { %v5692_v37 = vpop.f32.mrf.mxu2  ;;  %v11947_v3 = vpop.f32.mrf.mxu1 }
 0x55d   : > { %v5693_v46 = vadd.f32 %v5692_v37, %v5568_v38  ;;  %v4905_v38 = vld [vmem:[#allocation5 + $0x2f0] sm:$0xff] }
 0x55f   : > { %v5800_v62 = vmax.f32 %v5693_v46, 0.0 }
 0x561   : > { %v6094_v35 = vmul.f32 %v10683_v31, %v5800_v62  ;;  %8501 = vmatmul.msk.f32.gmra.mxu2 %vm678_vm2, %v4900_v9  ;;  %v5202_v31 = vadd.f32 %v11903_v18, %v11354_v15  ;;  %v5449_v9 = vadd.f32 %v11608_v43, %v5324_v28  ;;  %v11955_v15 = vld [vmem:[%s13325_s8 + $0x118] sm:$0xff]  ;;  %v11966_v25 = vpop.permute.xlu1 %5981 }
 0x562   : > { %8199 = vmatpush.msrb.mxu1 %v11955_v15 }
 0x563   : > { %6130 = vst.msk [vmem:[#allocation4 + $0x13] sm:$0xff] %vm5836_vm4, %v6094_v35  ;;  %v5574_v62 = vadd.f32 %v11653_v60, %v5449_v9  ;;  %v5327_v60 = vadd.f32 %v11578_v42, %v5202_v31 }
 0x564   : > { %v5695_v52 = vpop.f32.mrf.mxu2 }
 0x565   : > { %v5696_v45 = vadd.f32 %v5695_v52, %v5571_v20  ;;  %v11971_v20 = vld [vmem:[%s13325_s8 + $0x108] sm:$0xff]  ;;  %v11974_v52 = vpop.permute.xlu0 %5991  ;;  %v5452_v42 = vadd.f32 %v11644_v22, %v5327_v60  ;;  %v11992_v22 = vpop.f32.mrf.mxu1 }
 0x567   : > { %v5801_v49 = vmax.f32 %v5696_v45, 0.0  ;;  %v11979_v45 = vld [vmem:[%s13325_s8 + $0x100] sm:$0xff] }
 0x569   : > { %v6095_v37 = vmul.f32 %v10718_v16, %v5801_v49  ;;  %8502 = vmatmul.msk.f32.gmra.mxu2 %vm678_vm2, %v4905_v38  ;;  %v11960_v16 = vld [vmem:[%s13325_s8 + $0x110] sm:$0xff]  ;;  %v5205_v38 = vadd.f32 %v11903_v18, %v11379_v12  ;;  %v11998_v60 = vpop.permute.xlu1 %5996 }
 0x56a   : > { %v6672_v30 = vld [vmem:[#allocation4 + $0x12] sm:$0xff]  ;;  %8200 = vmatpush.msrb.mxu1 %v11960_v16  ;;  %v4910_v49 = vld [vmem:[#allocation5 + $0x318] sm:$0xff] }
 0x56b   : > { %v6240_v46 = vld [vmem:[#allocation4 + $0x11] sm:$0xff]  ;;  %6131 = vst.msk [vmem:[#allocation4 + $0x1b] sm:$0xff] %vm5836_vm4, %v6095_v37  ;;  %6744 = vrot.lane.b32.xlu0 %v6672_v30, %s8620_s19 }
 0x56c   : > { %6314 = vrot.lane.b32.xlu2 %v6240_v46, %s8619_s15  ;;  %v5698_v43 = vpop.f32.mrf.mxu2  ;;  %8201 = vmatpush.msrb.mxu1 %v11971_v20  ;;  %v5577_v46 = vadd.f32 %v11687_v41, %v5452_v42  ;;  %v4915_v41 = vld [vmem:[#allocation5 + $0x340] sm:$0xff] }
 0x56d   : > { %v5699_v35 = vadd.f32 %v5698_v43, %v5574_v62  ;;  %v11996_v43 = vpop.permute.xlu2 %5986  ;;  %v12003_v42 = vpop.permute.xlu0 %6006 }
 0x56e   : > { %8202 = vmatpush.msrb.mxu1 %v11979_v45 }
 0x56f   : > { %v5802_v28 = vmax.f32 %v5699_v35, 0.0 }
 0x571   : > { %v6096_v31 = vmul.f32 %v10581_v27, %v5802_v28  ;;  %8503 = vmatmul.msk.f32.gmra.mxu2 %vm678_vm2, %v4910_v49  ;;  %v5330_v27 = vadd.f32 %v11604_v8, %v5205_v38  ;;  %v5208_v49 = vadd.f32 %v11903_v18, %v11401_v2 }
 0x572   : > { %v6961_v9 = vld [vmem:[#allocation4 + $0x14] sm:$0xff] }
 0x573   : > { %v6241_v37 = vld [vmem:[#allocation4 + $0x19] sm:$0xff]  ;;  %6132 = vst.msk [vmem:[#allocation4 + $0x23] sm:$0xff] %vm5836_vm4, %v6096_v31  ;;  %7033 = vrot.lane.b32.xlu1 %v6961_v9, %s8619_s15  ;;  %v5455_v28 = vadd.f32 %v11669_v54, %v5330_v27  ;;  %v5333_v54 = vadd.f32 %v11631_v14, %v5208_v49  ;;  %v4920_v27 = vld [vmem:[#allocation5 + $0x368] sm:$0xff]  ;;  %v5211_v14 = vadd.f32 %v11903_v18, %v11419_v5 }
 0x574   : > { %6316 = vrot.lane.b32.xlu0 %v6241_v37, %s8619_s15  ;;  %6531 = vrot.lane.b32.xlu2 %v6672_v30, %s8618_s17  ;;  %v5701_v12 = vpop.f32.mrf.mxu2  ;;  %v6458_v8 = vld [vmem:[#allocation4 + $0x1a] sm:$0xff] }
 0x575   : > { %v5702_v62 = vadd.f32 %v5701_v12, %v5577_v46  ;;  %v5580_v9 = vadd.f32 %v11708_v53, %v5455_v28  ;;  %v12015_v12 = vpop.permute.xlu2 %6001  ;;  %v5458_v53 = vadd.f32 %v11696_v11, %v5333_v54 }
 0x577   : > { %v5803_v35 = vmax.f32 %v5702_v62, 0.0  ;;  %v12018_v62 = vpop.permute.xlu1 %6011  ;;  %v5583_v49 = vadd.f32 %v11726_v32, %v5458_v53  ;;  %v4925_v32 = vld [vmem:[#allocation5 + $0x390] sm:$0xff] }
 0x579   : > { %v6097_v31 = vmul.f32 %v10747_v36, %v5803_v35  ;;  %8504 = vmatmul.msk.f32.gmra.mxu2 %vm678_vm2, %v4915_v41  ;;  %v12013_v36 = vpop.f32.mrf.mxu1 }
 0x57a   : > { %v6242_v30 = vld [vmem:[#allocation4 + $0x21] sm:$0xff] }
 0x57b   : > { %v6962_v38 = vld [vmem:[#allocation4 + $0x1c] sm:$0xff]  ;;  %6133 = vst.msk [vmem:[#allocation4 + $0x2b] sm:$0xff] %vm5836_vm4, %v6097_v31  ;;  %6318 = vrot.lane.b32.xlu1 %v6242_v30, %s8619_s15  ;;  %v12025_v30 = vpop.permute.xlu0 %6021 }
 0x57c   : > { %6533 = vrot.lane.b32.xlu0 %v6458_v8, %s8618_s17  ;;  %7035 = vrot.lane.b32.xlu2 %v6962_v38, %s8619_s15  ;;  %v5704_v2 = vpop.f32.mrf.mxu2  ;;  %v6459_v28 = vld [vmem:[#allocation4 + $0x22] sm:$0xff]  ;;  %v5336_v38 = vadd.f32 %v11666_v21, %v5211_v14  ;;  %v12056_v14 = vpop.f32.mrf.mxu0 }
 0x57d   : > { %v5705_v37 = vadd.f32 %v5704_v2, %v5580_v9 }
 0x57e   : > { %v5461_v2 = vadd.f32 %v11715_v1, %v5336_v38 }
 0x57f   : > { %v5804_v46 = vmax.f32 %v5705_v37, 0.0  ;;  %v12038_v37 = vpop.permute.xlu2 %6016  ;;  %v12043_v53 = vpop.permute.xlu1 %6026 }
 0x581   : > { %v6098_v35 = vmul.f32 %v10781_v51, %v5804_v46  ;;  %8505 = vmatmul.msk.f32.gmra.mxu2 %vm678_vm2, %v4920_v27  ;;  %v12033_v5 = vpop.f32.mrf.mxu1  ;;  %v5214_v46 = vadd.f32 %v11903_v18, %v11439_v17  ;;  %v5586_v27 = vadd.f32 %v11748_v55, %v5461_v2  ;;  %v5217_v2 = vadd.f32 %v11903_v18, %v11465_v39 }
 0x582   : > { %v7609_v41 = vld [vmem:[#allocation4 + $0x26] sm:$0xff] }
 0x583   : > { %v6243_v31 = vld [vmem:[#allocation4 + $0x29] sm:$0xff]  ;;  %7645 = vst.msk [vmem:[#allocation5 + $0x10] sm:$0xff] %vm5836_vm4, %v7609_v41  ;;  %6535 = vrot.lane.b32.xlu1 %v6459_v28, %s8618_s17  ;;  %v12051_v17 = vpop.permute.xlu0 %6036  ;;  %v12053_v41 = vpop.f32.mrf.mxu3 }
 0x584   : > { %6746 = vrot.lane.b32.xlu0 %v6458_v8, %s8620_s19  ;;  %6134 = vst.msk [vmem:[#allocation4 + $0x33] sm:$0xff] %vm5836_vm4, %v6098_v35  ;;  %6320 = vrot.lane.b32.xlu2 %v6243_v31, %s8619_s15  ;;  %v5707_v51 = vpop.f32.mrf.mxu2  ;;  %v7393_v21 = vld [vmem:[#allocation4 + $0x25] sm:$0xff]  ;;  %v5339_v31 = vadd.f32 %v11689_v44, %v5214_v46 }
 0x585   : > { %v5708_v11 = vadd.f32 %v5707_v51, %v5583_v49  ;;  %v4930_v51 = vld [vmem:[#allocation5 + $0x3b8] sm:$0xff] }
 0x586   : > { %v6963_v44 = vld [vmem:[#allocation4 + $0x24] sm:$0xff] }
 0x587   : > { %v5805_v9 = vmax.f32 %v5708_v11, 0.0  ;;  %v5464_v11 = vadd.f32 %v11731_v48, %v5339_v31  ;;  %v12068_v46 = vpop.permute.xlu2 %6031  ;;  %v12082_v31 = vpop.f32.mrf.mxu0 }
 0x589   : > { %v6099_v54 = vmul.f32 %v10625_v10, %v5805_v9  ;;  %8506 = vmatmul.msk.f32.gmra.mxu2 %vm678_vm2, %v4925_v32  ;;  %v6460_v10 = vld [vmem:[#allocation4 + $0x2a] sm:$0xff]  ;;  %v12058_v49 = vpop.f32.mrf.mxu1 }
 0x58a   : > { %v7683_v8 = vld [vmem:[#allocation5 + $0x10] sm:$0xff] }
 0x58b   : > { %6135 = vst.msk [vmem:[#allocation4 + $0x3b] sm:$0xff] %vm5836_vm4, %v6099_v54  ;;  %8520 = vmatmul.msk.f32.vlgmr.msrb.gmra.mxu1 %vm5836_vm4, %v7683_v8  ;;  %6748 = vrot.lane.b32.xlu1 %v6459_v28, %s8620_s19  ;;  %v7610_v1 = vld [vmem:[#allocation4 + $0x2e] sm:$0xff]  ;;  %v5589_v54 = vadd.f32 %v11775_v26, %v5464_v11  ;;  %v5342_v26 = vadd.f32 %v11712_v47, %v5217_v2 }
 0x58c   : > { %7465 = vrot.lane.b32.xlu0 %v7393_v21, %s8620_s19  ;;  %6537 = vrot.lane.b32.xlu2 %v6460_v10, %s8618_s17  ;;  %v5710_v35 = vpop.f32.mrf.mxu2  ;;  %7646 = vst.msk [vmem:[#allocation5 + $0x38] sm:$0xff] %vm5836_vm4, %v7610_v1  ;;  %v7394_v9 = vld [vmem:[#allocation4 + $0x2d] sm:$0xff]  ;;  %v12079_v1 = vpop.f32.mrf.mxu3  ;;  %v5220_v47 = vadd.f32 %v11903_v18, %v11478_v23 }
 0x58d   : > { %v5711_v55 = vadd.f32 %v5710_v35, %v5586_v27  ;;  %v12077_v27 = vpop.permute.xlu0 %6051  ;;  %v4935_v35 = vld [vmem:[#allocation5 + $0x3e0] sm:$0xff] }
 0x58e   : > { %v12088_v11 = vld [vmem:[#allocation4 + $0x2c] sm:$0xff] }
 0x58f   : > { %v5806_v28 = vmax.f32 %v5711_v55, 0.0  ;;  %v5467_v55 = vadd.f32 %v11758_v13, %v5342_v26  ;;  %v6244_v13 = vld [vmem:[#allocation4 + $0x31] sm:$0xff]  ;;  %v12100_v23 = vpop.permute.xlu2 %6046 }
 0x591   : > { %v6100_v38 = vmul.f32 %v11907_v63, %v5806_v28  ;;  %8507 = vmatmul.msk.f32.gmra.mxu2 %vm678_vm2, %v4930_v51  ;;  %v12073_v63 = vpop.permute.xlu1 %6041  ;;  %v12086_v51 = vpop.f32.mrf.mxu1 }
 0x592   : > { %v7611_v32 = vld [vmem:[#allocation4 + $0x36] sm:$0xff] }
 0x593   : > { %6136 = vst.msk [vmem:[#allocation4 + $0x43] sm:$0xff] %vm5836_vm4, %v6100_v38  ;;  %v7686_v8 = vld [vmem:[#allocation5 + $0x38] sm:$0xff]  ;;  %7467 = vrot.lane.b32.xlu1 %v7394_v9, %s8620_s19  ;;  %v5592_v9 = vadd.f32 %v11802_v4, %v5467_v55  ;;  %v5345_v4 = vadd.f32 %v11737_v24, %v5220_v47  ;;  %v5223_v55 = vadd.f32 %v11903_v18, %v11493_v59 }
 0x594   : > { %7037 = vrot.lane.b32.xlu0 %v6963_v44, %s8619_s15  ;;  %7249 = vrot.lane.b32.xlu2 %v6963_v44, %s8618_s17  ;;  %v5713_v48 = vpop.f32.mrf.mxu2  ;;  %7647 = vst.msk [vmem:[#allocation5 + $0x60] sm:$0xff] %vm5836_vm4, %v7611_v32  ;;  %v12110_v26 = vpop.f32.mrf.mxu3 }
 0x595   : > { %8521 = vmatmul.msk.f32.gmra.mxu1 %vm5836_vm4, %v7686_v8  ;;  %v5714_v39 = vadd.f32 %v5713_v48, %v5589_v54  ;;  %v4940_v8 = vld [vmem:[#allocation5 + $0x408] sm:$0xff]  ;;  %v5470_v48 = vadd.f32 %v11779_v56, %v5345_v4 }
 0x597   : > { %v5807_v21 = vmax.f32 %v5714_v39, 0.0  ;;  %v12106_v39 = vpop.permute.xlu0 %6066  ;;  %v5595_v24 = vadd.f32 %v11824_v0, %v5470_v48  ;;  %v5348_v0 = vadd.f32 %v11762_v57, %v5223_v55  ;;  %v6965_v48 = vld [vmem:[#allocation4 + $0x34] sm:$0xff]  ;;  %v5226_v57 = vadd.f32 %v11903_v18, %v11518_v33 }
 0x599   : > { %v6101_v28 = vmul.f32 %v11918_v34, %v5807_v21  ;;  %8508 = vmatmul.msk.f32.gmra.mxu2 %vm678_vm2, %v4935_v35  ;;  %v12103_v54 = vpop.permute.xlu1 %6056  ;;  %v6245_v21 = vld [vmem:[#allocation4 + $0x39] sm:$0xff]  ;;  %v12119_v47 = vpop.f32.mrf.mxu1 }
 0x59a   : > { %v7612_v38 = vld [vmem:[#allocation4 + $0x3e] sm:$0xff] }
 0x59b   : > { %6137 = vst.msk [vmem:[#allocation4 + $0x4b] sm:$0xff] %vm5836_vm4, %v6101_v28  ;;  %v7689_v32 = vld [vmem:[#allocation5 + $0x60] sm:$0xff]  ;;  %7039 = vrot.lane.b32.xlu1 %v12088_v11, %s8619_s15  ;;  %v12115_v28 = vpop.f32.mrf.mxu0 }
 0x59c   : > { %6750 = vrot.lane.b32.xlu2 %v6460_v10, %s8620_s19  ;;  %6322 = vrot.lane.b32.xlu0 %v6244_v13, %s8619_s15  ;;  %v5716_v34 = vpop.f32.mrf.mxu2  ;;  %7648 = vst.msk [vmem:[#allocation5 + $0x88] sm:$0xff] %vm5836_vm4, %v7612_v38  ;;  %v7395_v38 = vld [vmem:[#allocation4 + $0x35] sm:$0xff]  ;;  %v12126_v13 = vpop.permute.xlu2 %6061 }
 0x59d   : > { %8522 = vmatmul.msk.f32.gmra.mxu1 %vm5836_vm4, %v7689_v32  ;;  %v5717_v2 = vadd.f32 %v5716_v34, %v5592_v9  ;;  %v4945_v34 = vld [vmem:[#allocation5 + $0x430] sm:$0xff] }
 0x59f   : > { %v5808_v44 = vmax.f32 %v5717_v2, 0.0  ;;  %v5473_v2 = vadd.f32 %v11806_v40, %v5348_v0  ;;  %v12142_v40 = vpop.permute.xlu0 %6081  ;;  %v13454_v0 = vld [vmem:[#allocation15_spill] sm:$0xff] }
 0x5a0   : > { %13453 = vst [vmem:[#allocation42_spill] sm:$0xff] %v12142_v40 }
 0x5a1   : > { %v6102_v10 = vmul.f32 %v11932_v6, %v5808_v44  ;;  %8509 = vmatmul.msk.f32.gmra.mxu2 %vm678_vm2, %v4940_v8  ;;  %v6461_v6 = vld [vmem:[#allocation4 + $0x32] sm:$0xff]  ;;  %v12129_v4 = vpop.permute.xlu1 %6071  ;;  %v12133_v8 = vpop.f32.mrf.mxu3 }
 0x5a2   : > { %v7613_v35 = vld [vmem:[#allocation4 + $0x46] sm:$0xff] }
 0x5a3   : > { %6138 = vst.msk [vmem:[#allocation4 + $0x53] sm:$0xff] %vm5836_vm4, %v6102_v10  ;;  %v7692_v56 = vld [vmem:[#allocation5 + $0x88] sm:$0xff]  ;;  %6324 = vrot.lane.b32.xlu1 %v6245_v21, %s8619_s15  ;;  %v12135_v10 = vld [vmem:[#allocation4 + $0x3a] sm:$0xff]  ;;  %v12140_v55 = vpop.f32.mrf.mxu0 }
 0x5a4   : > { %7469 = vrot.lane.b32.xlu2 %v7395_v38, %s8620_s19  ;;  %6539 = vrot.lane.b32.xlu0 %v6461_v6, %s8618_s17  ;;  %v5719_v9 = vpop.f32.mrf.mxu2  ;;  %7649 = vst.msk [vmem:[#allocation5 + $0xb0] sm:$0xff] %vm5836_vm4, %v7613_v35  ;;  %v5598_v35 = vadd.f32 %v11851_v19, %v5473_v2  ;;  %v12150_v38 = vpop.f32.mrf.mxu1  ;;  %v7803_v19 = vld [vmem:[%s13325_s8 + $0x70] sm:$0xff]  ;;  %v13455_v2 = vld [vmem:[#allocation31_spill] sm:$0xff] }
 0x5a5   : > { %8523 = vmatmul.msk.f32.gmra.mxu1 %vm5836_vm4, %v7692_v56  ;;  %v5720_v59 = vadd.f32 %v5719_v9, %v5595_v24  ;;  %v6168_v24 = vld [vmem:[#allocation4 + $0x10] sm:$0xff]  ;;  %v7804_v56 = vld [vmem:[%s13325_s8 + $0x78] sm:$0xff] }
 0x5a6   : > { %6204 = vst.msk [vmem:[#allocation5 + $0x50] sm:$0xff] %vm5836_vm4, %v6168_v24  ;;  %7937 = vmatpush.msrb.mxu3 %v7804_v56  ;;  %v13456_v56 = vld [vmem:[#allocation34_spill] sm:$0xff] }
 0x5a7   : > { %v5809_v32 = vmax.f32 %v5720_v59, 0.0  ;;  %v7802_v59 = vld [vmem:[%s13325_s8 + $0x68] sm:$0xff] }
 0x5a8   : > { %7938 = vmatpush.msrb.mxu3 %v7803_v19  ;;  %v6166_v19 = vld [vmem:[#allocation4] sm:$0xff] }
 0x5a9   : > { %v6103_v44 = vmul.f32 %v11922_v29, %v5809_v32  ;;  %8510 = vmatmul.msk.f32.gmra.mxu2 %vm678_vm2, %v4945_v34  ;;  %v5351_v32 = vadd.f32 %v13454_v0, %v5226_v57  ;;  %v4950_v34 = vld [vmem:[#allocation5 + $0x458] sm:$0xff]  ;;  %v12171_v40 = vpop.permute.xlu1 %6086  ;;  %6202 = vst.msk [vmem:[#allocation5] sm:$0xff] %vm5836_vm4, %v6166_v19 }
 0x5aa   : > { %v7614_v21 = vld [vmem:[#allocation4 + $0x4e] sm:$0xff]  ;;  %7939 = vmatpush.msrb.mxu3 %v7802_v59  ;;  %v12178_v59 = vpop.f32.mrf.mxu3  ;;  %v7396_v19 = vld [vmem:[#allocation4 + $0x3d] sm:$0xff] }
 0x5ab   : > { %6139 = vst.msk [vmem:[#allocation4 + $0x5b] sm:$0xff] %vm5836_vm4, %v6103_v44  ;;  %v7695_v29 = vld [vmem:[#allocation5 + $0xb0] sm:$0xff]  ;;  %6541 = vrot.lane.b32.xlu1 %v12135_v10, %s8618_s17  ;;  %v5476_v44 = vadd.f32 %v13455_v2, %v5351_v32  ;;  %v7800_v32 = vld [vmem:[%s13325_s8 + $0x58] sm:$0xff] }
 0x5ac   : > { %7041 = vrot.lane.b32.xlu2 %v6965_v48, %s8619_s15  ;;  %7251 = vrot.lane.b32.xlu0 %v12088_v11, %s8618_s17  ;;  %v5722_v33 = vpop.f32.mrf.mxu2  ;;  %7650 = vst.msk [vmem:[#allocation5 + $0xd8] sm:$0xff] %vm5836_vm4, %v7614_v21 }
 0x5ad   : > { %8524 = vmatmul.msk.f32.gmra.mxu1 %vm5836_vm4, %v7695_v29  ;;  %v5723_v9 = vadd.f32 %v5722_v33, %v5598_v35  ;;  %v12168_v35 = vpop.permute.xlu2 %6076  ;;  %v6246_v29 = vld [vmem:[#allocation4 + $0x41] sm:$0xff]  ;;  %v5601_v33 = vadd.f32 %v13456_v56, %v5476_v44  ;;  %v7798_v56 = vld [vmem:[%s13325_s8 + $0x48] sm:$0xff] }
 0x5ae   : > { %v7799_v44 = vld [vmem:[%s13325_s8 + $0x50] sm:$0xff] }
 0x5af   : > { %v5810_v11 = vmax.f32 %v5723_v9, 0.0  ;;  %v6311_v9 = vpop.permute.xlu0 %6310 }
 0x5b0   : > { %6419 = vst.msk [vmem:[#allocation5] sm:$0xff] %vm6418_vm5, %v6311_v9 }
 0x5b1   : > { %v6104_v21 = vmul.f32 %v11935_v50, %v5810_v11  ;;  %8511 = vmatmul.msk.f32.gmra.mxu2 %vm678_vm2, %v4950_v34  ;;  %v7801_v50 = vld [vmem:[%s13325_s8 + $0x60] sm:$0xff]  ;;  %v12188_v34 = vpop.f32.mrf.mxu0 }
 0x5b2   : > { %v7615_v24 = vld [vmem:[#allocation4 + $0x56] sm:$0xff]  ;;  %7940 = vmatpush.msrb.mxu3 %v7801_v50  ;;  %v12205_v50 = vld [vmem:[#allocation4 + $0x42] sm:$0xff] }
 0x5b3   : > { %6140 = vst.msk [vmem:[#allocation4 + $0x63] sm:$0xff] %vm5836_vm4, %v6104_v21  ;;  %v7698_v57 = vld [vmem:[#allocation5 + $0xd8] sm:$0xff]  ;;  %7253 = vrot.lane.b32.xlu1 %v6965_v48, %s8618_s17  ;;  %v13457_v48 = vld [vmem:[#allocation23_spill] sm:$0xff] }
 0x5b4   : > { %6326 = vrot.lane.b32.xlu2 %v6246_v29, %s8619_s15  ;;  %6752 = vrot.lane.b32.xlu0 %v6461_v6, %s8620_s19  ;;  %v5725_v0 = vpop.f32.mrf.mxu2  ;;  %7651 = vst.msk [vmem:[#allocation5 + $0x100] sm:$0xff] %vm5836_vm4, %v7615_v24  ;;  %v5229_v11 = vadd.f32 %v11903_v18, %v13457_v48  ;;  %v12192_v6 = vpop.f32.mrf.mxu1  ;;  %v4955_v24 = vld [vmem:[#allocation5 + $0x480] sm:$0xff] }
 0x5b5   : > { %8525 = vmatmul.msk.f32.gmra.mxu1 %vm5836_vm4, %v7698_v57  ;;  %v5726_v2 = vadd.f32 %v5725_v0, %v5601_v33  ;;  %7941 = vmatpush.msrb.mxu3 %v7800_v32  ;;  %v13458_v0 = vld [vmem:[#allocation18_spill] sm:$0xff]  ;;  %v6313_v48 = vpop.permute.xlu1 %6312 }
 0x5b6   : > { %v5354_v21 = vadd.f32 %v12053_v41, %v5229_v11 }
 0x5b7   : > { %v5811_v29 = vmax.f32 %v5726_v2, 0.0  ;;  %7942 = vmatpush.msrb.mxu3 %v7799_v44  ;;  %v6528_v2 = vpop.permute.xlu0 %6527  ;;  %v13459_v44 = vld [vmem:[#allocation6_spill] sm:$0xff] }
 0x5b8   : > { %v5479_v33 = vadd.f32 %v12056_v14, %v5354_v21  ;;  %v6167_v14 = vld [vmem:[#allocation4 + $0x8] sm:$0xff]  ;;  %v5232_v21 = vadd.f32 %v11903_v18, %v13459_v44  ;;  %6636 = vst.msk [vmem:[#allocation5] sm:$0xff] %vm6635_vm6, %v6528_v2  ;;  %v7180_v44 = vld [vmem:[#allocation4 + $0x3c] sm:$0xff] }
 0x5b9   : > { %v6105_v57 = vmul.f32 %v11962_v58, %v5811_v29  ;;  %8512 = vmatmul.msk.f32.gmra.mxu2 %vm678_vm2, %v4955_v24  ;;  %7943 = vmatpush.msrb.mxu3 %v7798_v56  ;;  %v7797_v58 = vld [vmem:[%s13325_s8 + $0x40] sm:$0xff]  ;;  %v12223_v29 = vpop.permute.xlu2 %6091  ;;  %v6890_v56 = vld [vmem:[#allocation4 + $0x1b] sm:$0xff]  ;;  %6203 = vst.msk [vmem:[#allocation5 + $0x28] sm:$0xff] %vm5836_vm4, %v6167_v14 }
 0x5ba   : > { %v7616_v9 = vld [vmem:[#allocation4 + $0x5e] sm:$0xff]  ;;  %v5604_v41 = vadd.f32 %v13458_v0, %v5479_v33  ;;  %v12227_v33 = vpop.f32.mrf.mxu3  ;;  %6420 = vst.msk [vmem:[#allocation5 + $0x28] sm:$0xff] %vm6418_vm5, %v6313_v48 }
 0x5bb   : > { %6141 = vst.msk [vmem:[#allocation4 + $0x6b] sm:$0xff] %vm5836_vm4, %v6105_v57  ;;  %v7701_v32 = vld [vmem:[#allocation5 + $0x100] sm:$0xff]  ;;  %6754 = vrot.lane.b32.xlu1 %v12135_v10, %s8620_s19  ;;  %7944 = vmatpush.msrb.mxu3 %v7797_v58  ;;  %v7795_v57 = vld [vmem:[%s13325_s8 + $0x30] sm:$0xff]  ;;  %v7794_v58 = vld [vmem:[%s13325_s8 + $0x28] sm:$0xff] }
 0x5bc   : > { %6543 = vrot.lane.b32.xlu2 %v12205_v50, %s8618_s17  ;;  %7471 = vrot.lane.b32.xlu0 %v7396_v19, %s8620_s19  ;;  %v5728_v11 = vpop.f32.mrf.mxu2  ;;  %7652 = vst.msk [vmem:[#allocation5 + $0x128] sm:$0xff] %vm5836_vm4, %v7616_v9  ;;  %v7796_v10 = vld [vmem:[%s13325_s8 + $0x38] sm:$0xff]  ;;  %v5357_v19 = vadd.f32 %v12079_v1, %v5232_v21  ;;  %v12234_v9 = vpop.f32.mrf.mxu0 }
 0x5bd   : > { %8526 = vmatmul.msk.f32.gmra.mxu1 %vm5836_vm4, %v7701_v32  ;;  %v5729_v24 = vadd.f32 %v5728_v11, %v5604_v41  ;;  %7945 = vmatpush.msrb.mxu3 %v7796_v10  ;;  %v12237_v41 = vpop.f32.mrf.mxu1  ;;  %v4960_v32 = vld [vmem:[#allocation5 + $0x4a8] sm:$0xff]  ;;  %6926 = vst.msk [vmem:[#allocation5 + $0x30] sm:$0xff] %vm5836_vm4, %v6890_v56  ;;  %v7397_v1 = vld [vmem:[#allocation4 + $0x45] sm:$0xff]  ;;  %v6530_v21 = vpop.permute.xlu1 %6529 }
 0x5be   : > { %v5482_v14 = vadd.f32 %v12082_v31, %v5357_v19  ;;  %v7793_v31 = vld [vmem:[%s13325_s8 + $0x20] sm:$0xff]  ;;  %v7820_v56 = vld [vmem:[%s13325_s8 + $0xf8] sm:$0xff]  ;;  %6637 = vst.msk [vmem:[#allocation5 + $0x28] sm:$0xff] %vm6635_vm6, %v6530_v21 }
 0x5bf   : > { %v5812_v0 = vmax.f32 %v5729_v24, 0.0  ;;  %7946 = vmatpush.msrb.mxu3 %v7795_v57  ;;  %v7792_v24 = vld [vmem:[%s13325_s8 + $0x18] sm:$0xff]  ;;  %8062 = vmatpush.msrb.mxu0 %v7820_v56 }
 0x5c0   : > { %v5607_v48 = vadd.f32 %v11928_v7, %v5482_v14  ;;  %v6171_v7 = vld [vmem:[#allocation4 + $0x28] sm:$0xff]  ;;  %v7791_v14 = vld [vmem:[%s13325_s8 + $0x10] sm:$0xff] }
 0x5c1   : > { %v6106_v11 = vmul.f32 %v11939_v61, %v5812_v0  ;;  %8513 = vmatmul.msk.f32.gmra.mxu2 %vm678_vm2, %v4960_v32  ;;  %7947 = vmatpush.msrb.mxu3 %v7794_v58  ;;  %v13460_v57 = vld [vmem:[#allocation26_spill] sm:$0xff]  ;;  %6207 = vst.msk [vmem:[#allocation5 + $0xc8] sm:$0xff] %vm5836_vm4, %v6171_v7 }
 0x5c2   : > { %v7617_v2 = vld [vmem:[#allocation4 + $0x66] sm:$0xff]  ;;  %v5235_v19 = vadd.f32 %v11903_v18, %v13460_v57  ;;  %v12265_v58 = vpop.f32.mrf.mxu3 }
 0x5c3   : > { %6142 = vst.msk [vmem:[#allocation4 + $0x73] sm:$0xff] %vm5836_vm4, %v6106_v11  ;;  %v7704_v10 = vld [vmem:[#allocation5 + $0x128] sm:$0xff]  ;;  %7473 = vrot.lane.b32.xlu1 %v7397_v1, %s8620_s19  ;;  %7948 = vmatpush.msrb.mxu3 %v7793_v31 }
 0x5c4   : > { %7255 = vrot.lane.b32.xlu2 %v7180_v44, %s8618_s17  ;;  %7043 = vrot.lane.b32.xlu0 %v7180_v44, %s8619_s15  ;;  %v5731_v61 = vpop.f32.mrf.mxu2  ;;  %7653 = vst.msk [vmem:[#allocation5 + $0x150] sm:$0xff] %vm5836_vm4, %v7617_v2  ;;  %v5360_v11 = vadd.f32 %v12110_v26, %v5235_v19  ;;  %v12272_v1 = vpop.f32.mrf.mxu0  ;;  %v7790_v44 = vld [vmem:[%s13325_s8 + $0x8] sm:$0xff]  ;;  %v12283_v26 = vld [vmem:[#allocation4 + $0x44] sm:$0xff] }
 0x5c5   : > { %8527 = vmatmul.msk.f32.gmra.mxu1 %vm5836_vm4, %v7704_v10  ;;  %v5732_v0 = vadd.f32 %v5731_v61, %v5607_v48  ;;  %7949 = vmatpush.msrb.mxu3 %v7792_v24  ;;  %v12275_v48 = vpop.f32.mrf.mxu1  ;;  %v4965_v10 = vld [vmem:[#allocation5 + $0x4d0] sm:$0xff]  ;;  %v6247_v61 = vld [vmem:[#allocation4 + $0x49] sm:$0xff]  ;;  %v7819_v19 = vld [vmem:[%s13325_s8 + $0xf0] sm:$0xff] }
 0x5c6   : > { %v6315_v32 = vpop.permute.xlu2 %6314  ;;  %v5485_v31 = vadd.f32 %v12115_v28, %v5360_v11  ;;  %v6889_v28 = vld [vmem:[#allocation4 + $0x13] sm:$0xff]  ;;  %8063 = vmatpush.msrb.mxu0 %v7819_v19 }
 0x5c7   : > { %6421 = vst.msk [vmem:[#allocation5 + $0x50] sm:$0xff] %vm6418_vm5, %v6315_v32  ;;  %v5813_v2 = vmax.f32 %v5732_v0, 0.0  ;;  %7950 = vmatpush.msrb.mxu3 %v7791_v14  ;;  %v13461_v0 = vld [vmem:[#allocation52_spill] sm:$0xff] }
 0x5c8   : > { %v5610_v7 = vadd.f32 %v11947_v3, %v5485_v31  ;;  %v6169_v3 = vld [vmem:[#allocation4 + $0x18] sm:$0xff]  ;;  %v5238_v32 = vadd.f32 %v11903_v18, %v13461_v0  ;;  %6925 = vst.msk [vmem:[#allocation5 + $0x8] sm:$0xff] %vm5836_vm4, %v6889_v28  ;;  %v4970_v31 = vld [vmem:[#allocation5 + $0x4f8] sm:$0xff] }
 0x5c9   : > { %v6107_v21 = vmul.f32 %v11966_v25, %v5813_v2  ;;  %8514 = vmatmul.msk.f32.gmra.mxu2 %vm678_vm2, %v4965_v10  ;;  %7951 = vmatpush.msrb.mxu3 %v7790_v44  ;;  %v7789_v25 = vld [vmem:[%s13325_s8] sm:$0xff]  ;;  %6205 = vst.msk [vmem:[#allocation5 + $0x78] sm:$0xff] %vm5836_vm4, %v6169_v3 }
 0x5ca   : > { %v7618_v56 = vld [vmem:[#allocation4 + $0x6e] sm:$0xff]  ;;  %v5363_v2 = vadd.f32 %v12133_v8, %v5238_v32  ;;  %v12310_v44 = vpop.f32.mrf.mxu3  ;;  %v7815_v32 = vld [vmem:[%s13325_s8 + $0xd0] sm:$0xff] }
 0x5cb   : > { %6143 = vst.msk [vmem:[#allocation4 + $0x7b] sm:$0xff] %vm5836_vm4, %v6107_v21  ;;  %v7707_v24 = vld [vmem:[#allocation5 + $0x150] sm:$0xff]  ;;  %7045 = vrot.lane.b32.xlu1 %v12283_v26, %s8619_s15  ;;  %7952 = vmatpush.msrb.mxu3 %v7789_v25 }
 0x5cc   : > { %6756 = vrot.lane.b32.xlu2 %v12205_v50, %s8620_s19  ;;  %6328 = vrot.lane.b32.xlu0 %v6247_v61, %s8619_s15  ;;  %v5734_v57 = vpop.f32.mrf.mxu2  ;;  %7654 = vst.msk [vmem:[#allocation5 + $0x178] sm:$0xff] %vm5836_vm4, %v7618_v56  ;;  %v7818_v50 = vld [vmem:[%s13325_s8 + $0xe8] sm:$0xff]  ;;  %v5488_v21 = vadd.f32 %v12140_v55, %v5363_v2  ;;  %v12314_v61 = vpop.f32.mrf.mxu0  ;;  %v6170_v55 = vld [vmem:[#allocation4 + $0x20] sm:$0xff] }
 0x5cd   : > { %8528 = vmatmul.msk.f32.gmra.mxu1 %vm5836_vm4, %v7707_v24  ;;  %v5735_v14 = vadd.f32 %v5734_v57, %v5610_v7  ;;  %8578 = vmatpush.msra.mxu3 %v11955_v15  ;;  %v7398_v15 = vld [vmem:[#allocation4 + $0x4d] sm:$0xff]  ;;  %v12318_v7 = vpop.f32.mrf.mxu1  ;;  %6206 = vst.msk [vmem:[#allocation5 + $0xa0] sm:$0xff] %vm5836_vm4, %v6170_v55  ;;  %v7814_v2 = vld [vmem:[%s13325_s8 + $0xc8] sm:$0xff] }
 0x5ce   : > { %v6532_v11 = vpop.permute.xlu2 %6531  ;;  %8064 = vmatpush.msrb.mxu0 %v7818_v50  ;;  %v6248_v8 = vld [vmem:[#allocation4 + $0x51] sm:$0xff]  ;;  %v5613_v28 = vadd.f32 %v11992_v22, %v5488_v21 }
 0x5cf   : > { %v5814_v10 = vmax.f32 %v5735_v14, 0.0  ;;  %6638 = vst.msk [vmem:[#allocation5 + $0x50] sm:$0xff] %vm6635_vm6, %v6532_v11  ;;  %8579 = vmatpush.msra.mxu3 %v11960_v16  ;;  %v12320_v24 = vld [vmem:[#allocation4 + $0x4a] sm:$0xff]  ;;  %v13462_v22 = vld [vmem:[#allocation8_spill] sm:$0xff] }
 0x5d0   : > { %v5241_v3 = vadd.f32 %v11903_v18, %v13462_v22  ;;  %v4975_v11 = vld [vmem:[#allocation5 + $0x520] sm:$0xff] }
 0x5d1   : > { %v6108_v56 = vmul.f32 %v11996_v43, %v5814_v10  ;;  %8515 = vmatmul.msk.f32.gmra.mxu2 %vm678_vm2, %v4970_v31  ;;  %8580 = vmatpush.msra.mxu3 %v11971_v20  ;;  %v7817_v43 = vld [vmem:[%s13325_s8 + $0xe0] sm:$0xff]  ;;  %v7816_v20 = vld [vmem:[%s13325_s8 + $0xd8] sm:$0xff] }
 0x5d2   : > { %v7619_v25 = vld [vmem:[#allocation4 + $0x76] sm:$0xff]  ;;  %8065 = vmatpush.msrb.mxu0 %v7817_v43  ;;  %v5366_v14 = vadd.f32 %v12178_v59, %v5241_v3  ;;  %v12352_v21 = vpop.f32.mrf.mxu3 }
 0x5d3   : > { %6144 = vst.msk [vmem:[#allocation4 + $0x83] sm:$0xff] %vm5836_vm4, %v6108_v56  ;;  %v7710_v16 = vld [vmem:[#allocation5 + $0x178] sm:$0xff]  ;;  %6330 = vrot.lane.b32.xlu1 %v6248_v8, %s8619_s15  ;;  %8581 = vmatpush.msra.mxu3 %v11979_v45  ;;  %v12354_v45 = vld [vmem:[#allocation4 + $0x52] sm:$0xff] }
 0x5d4   : > { %7475 = vrot.lane.b32.xlu2 %v7398_v15, %s8620_s19  ;;  %6545 = vrot.lane.b32.xlu0 %v12320_v24, %s8618_s17  ;;  %v5737_v57 = vpop.f32.mrf.mxu2  ;;  %7655 = vst.msk [vmem:[#allocation5 + $0x1a0] sm:$0xff] %vm5836_vm4, %v7619_v25  ;;  %v5491_v10 = vadd.f32 %v12188_v34, %v5366_v14  ;;  %v12357_v15 = vpop.f32.mrf.mxu0  ;;  %v6968_v25 = vld [vmem:[#allocation4 + $0x4c] sm:$0xff] }
 0x5d5   : > { %8529 = vmatmul.msk.f32.gmra.mxu1 %vm5836_vm4, %v7710_v16  ;;  %v5738_v19 = vadd.f32 %v5737_v57, %v5613_v28  ;;  %8066 = vmatpush.msrb.mxu0 %v7816_v20  ;;  %v12365_v34 = vpop.f32.mrf.mxu1  ;;  %v7812_v28 = vld [vmem:[%s13325_s8 + $0xb8] sm:$0xff]  ;;  %v13463_v16 = vld [vmem:[#allocation25_spill] sm:$0xff] }
 0x5d6   : > { %v7036_v0 = vpop.permute.xlu2 %7035  ;;  %v5616_v56 = vadd.f32 %v12013_v36, %v5491_v10  ;;  %v5244_v43 = vadd.f32 %v11903_v18, %v13463_v16  ;;  %v4985_v16 = vld [vmem:[#allocation5 + $0x570] sm:$0xff] }
 0x5d7   : > { %v5815_v50 = vmax.f32 %v5738_v19, 0.0  ;;  %7142 = vst.msk [vmem:[#allocation5 + $0x30] sm:$0xff] %vm6418_vm5, %v7036_v0  ;;  %8067 = vmatpush.msrb.mxu0 %v7815_v32  ;;  %v4980_v19 = vld [vmem:[#allocation5 + $0x548] sm:$0xff]  ;;  %v7810_v0 = vld [vmem:[%s13325_s8 + $0xa8] sm:$0xff] }
 0x5d8   : > { %v5369_v22 = vadd.f32 %v12227_v33, %v5244_v43  ;;  %v7807_v43 = vld [vmem:[%s13325_s8 + $0x90] sm:$0xff] }
 0x5d9   : > { %v6109_v31 = vmul.f32 %v11974_v52, %v5815_v50  ;;  %8516 = vmatmul.msk.f32.gmra.mxu2 %vm678_vm2, %v4975_v11  ;;  %8068 = vmatpush.msrb.mxu0 %v7814_v2  ;;  %v7813_v52 = vld [vmem:[%s13325_s8 + $0xc0] sm:$0xff] }
 0x5da   : > { %v7620_v59 = vld [vmem:[#allocation4 + $0x7e] sm:$0xff]  ;;  %v5494_v32 = vadd.f32 %v12234_v9, %v5369_v22  ;;  %v12389_v50 = vpop.f32.mrf.mxu3 }
 0x5db   : > { %6145 = vst.msk [vmem:[#allocation4 + $0x8b] sm:$0xff] %vm5836_vm4, %v6109_v31  ;;  %v7713_v8 = vld [vmem:[#allocation5 + $0x1a0] sm:$0xff]  ;;  %6547 = vrot.lane.b32.xlu1 %v12354_v45, %s8618_s17  ;;  %8069 = vmatpush.msrb.mxu0 %v7813_v52  ;;  %v6249_v31 = vld [vmem:[#allocation4 + $0x59] sm:$0xff] }
 0x5dc   : > { %7047 = vrot.lane.b32.xlu2 %v6968_v25, %s8619_s15  ;;  %7257 = vrot.lane.b32.xlu0 %v12283_v26, %s8618_s17  ;;  %v5740_v36 = vpop.f32.mrf.mxu2  ;;  %7656 = vst.msk [vmem:[#allocation5 + $0x1c8] sm:$0xff] %vm5836_vm4, %v7620_v59  ;;  %v7811_v26 = vld [vmem:[%s13325_s8 + $0xb0] sm:$0xff]  ;;  %v5619_v33 = vadd.f32 %v12033_v5, %v5494_v32  ;;  %v12392_v2 = vpop.f32.mrf.mxu0  ;;  %v7808_v59 = vld [vmem:[%s13325_s8 + $0x98] sm:$0xff] }
 0x5dd   : > { %8530 = vmatmul.msk.f32.gmra.mxu1 %vm5836_vm4, %v7713_v8  ;;  %v5741_v55 = vadd.f32 %v5740_v36, %v5616_v56  ;;  %v6745_v57 = vpop.permute.xlu0 %6744  ;;  %8070 = vmatpush.msrb.mxu0 %v7812_v28  ;;  %v12399_v9 = vpop.f32.mrf.mxu1  ;;  %v13464_v56 = vld [vmem:[#allocation48_spill] sm:$0xff] }
 0x5de   : > { %6853 = vst.msk [vmem:[#allocation5] sm:$0xff] %vm6852_vm7, %v6745_v57  ;;  %v6321_v20 = vpop.permute.xlu2 %6320  ;;  %v5247_v8 = vadd.f32 %v11903_v18, %v13464_v56  ;;  %v7806_v18 = vld [vmem:[%s13325_s8 + $0x88] sm:$0xff] }
 0x5df   : > { %v5816_v3 = vmax.f32 %v5741_v55, 0.0  ;;  %6424 = vst.msk [vmem:[#allocation5 + $0xc8] sm:$0xff] %vm6418_vm5, %v6321_v20  ;;  %8071 = vmatpush.msrb.mxu0 %v7811_v26  ;;  %v12424_v22 = vld [vmem:[#allocation4 + $0x5a] sm:$0xff] }
 0x5e0   : > { %v5372_v55 = vadd.f32 %v12265_v58, %v5247_v8  ;;  %v7399_v58 = vld [vmem:[#allocation4 + $0x55] sm:$0xff] }
 0x5e1   : > { %v6110_v14 = vmul.f32 %v11998_v60, %v5816_v3  ;;  %8517 = vmatmul.msk.f32.gmra.mxu2 %vm678_vm2, %v4980_v19  ;;  %8072 = vmatpush.msrb.mxu0 %v7810_v0  ;;  %v7809_v60 = vld [vmem:[%s13325_s8 + $0xa0] sm:$0xff] }
 0x5e2   : > { %v7621_v11 = vld [vmem:[#allocation4 + $0x86] sm:$0xff]  ;;  %v5497_v20 = vadd.f32 %v12272_v1, %v5372_v55  ;;  %v12433_v32 = vpop.f32.mrf.mxu3  ;;  %v6893_v56 = vld [vmem:[#allocation4 + $0x33] sm:$0xff] }
 0x5e3   : > { %6146 = vst.msk [vmem:[#allocation4 + $0x93] sm:$0xff] %vm5836_vm4, %v6110_v14  ;;  %v7716_v10 = vld [vmem:[#allocation5 + $0x1c8] sm:$0xff]  ;;  %7259 = vrot.lane.b32.xlu1 %v6968_v25, %s8618_s17  ;;  %8073 = vmatpush.msrb.mxu0 %v7809_v60  ;;  %v6891_v1 = vld [vmem:[#allocation4 + $0x23] sm:$0xff] }
 0x5e4   : > { %6332 = vrot.lane.b32.xlu2 %v6249_v31, %s8619_s15  ;;  %6758 = vrot.lane.b32.xlu0 %v12320_v24, %s8620_s19  ;;  %v5743_v5 = vpop.f32.mrf.mxu2  ;;  %7657 = vst.msk [vmem:[#allocation5 + $0x1f0] sm:$0xff] %vm5836_vm4, %v7621_v11  ;;  %v5622_v19 = vadd.f32 %v12058_v49, %v5497_v20  ;;  %v13465_v14 = vld [vmem:[#allocation10_spill] sm:$0xff]  ;;  %v12448_v60 = vpop.f32.mrf.mxu0  ;;  %v7183_v55 = vld [vmem:[#allocation4 + $0x54] sm:$0xff] }
 0x5e5   : > { %8531 = vmatmul.msk.f32.gmra.mxu1 %vm5836_vm4, %v7716_v10  ;;  %v5744_v25 = vadd.f32 %v5743_v5, %v5619_v33  ;;  %v7034_v52 = vpop.permute.xlu1 %7033  ;;  %v7681_v28 = vld [vmem:[#allocation5] sm:$0xff]  ;;  %8074 = vmatpush.msrb.mxu0 %v7808_v59  ;;  %6927 = vst.msk [vmem:[#allocation5 + $0x58] sm:$0xff] %vm5836_vm4, %v6891_v1  ;;  %v4990_v59 = vld [vmem:[#allocation5 + $0x598] sm:$0xff]  ;;  %v6172_v1 = vld [vmem:[#allocation4 + $0x30] sm:$0xff] }
 0x5e6   : > { %v6317_v36 = vpop.permute.xlu0 %6316  ;;  %7141 = vst.msk [vmem:[#allocation5 + $0x8] sm:$0xff] %vm6418_vm5, %v7034_v52  ;;  %v6538_v24 = vpop.permute.xlu2 %6537  ;;  %7953 = vmatmul.f32.vlgmr.msrb.gmra.mxu3 %v7681_v28 }
 0x5e7   : > { %v5817_v57 = vmax.f32 %v5744_v25, 0.0  ;;  %6422 = vst.msk [vmem:[#allocation5 + $0x78] sm:$0xff] %vm6418_vm5, %v6317_v36  ;;  %8075 = vmatpush.msrb.mxu0 %v7807_v43  ;;  %v12452_v25 = vpop.f32.mrf.mxu1 }
 0x5e8   : > { %6641 = vst.msk [vmem:[#allocation5 + $0xc8] sm:$0xff] %vm6635_vm6, %v6538_v24  ;;  %v7400_v24 = vld [vmem:[#allocation4 + $0x5d] sm:$0xff] }
 0x5e9   : > { %v6111_v26 = vmul.f32 %v12015_v12, %v5817_v57  ;;  %8518 = vmatmul.msk.f32.gmra.mxu2 %vm678_vm2, %v4985_v16  ;;  %8076 = vmatpush.msrb.mxu0 %v7806_v18  ;;  %v7805_v12 = vld [vmem:[%s13325_s8 + $0x80] sm:$0xff]  ;;  %6929 = vst.msk [vmem:[#allocation5 + $0xa8] sm:$0xff] %vm5836_vm4, %v6893_v56  ;;  %v6174_v57 = vld [vmem:[#allocation4 + $0x40] sm:$0xff]  ;;  %v13467_v56 = vld [vmem:[#allocation12_spill] sm:$0xff] }
 0x5ea   : > { %v7622_v3 = vld [vmem:[#allocation4 + $0x8e] sm:$0xff]  ;;  %6210 = vst.msk [vmem:[#allocation5 + $0x140] sm:$0xff] %vm5836_vm4, %v6174_v57 }
 0x5eb   : > { %6147 = vst.msk [vmem:[#allocation4 + $0x9b] sm:$0xff] %vm5836_vm4, %v6111_v26  ;;  %v7719_v0 = vld [vmem:[#allocation5 + $0x1f0] sm:$0xff]  ;;  %6760 = vrot.lane.b32.xlu1 %v12354_v45, %s8620_s19  ;;  %v12442_v45 = vld [vmem:[%s13324_s7] ss:$0 sm:$0xff]  ;;  %8077 = vmatpush.msrb.mxu0 %v7805_v12 }
 0x5ec   : > { %6549 = vrot.lane.b32.xlu2 %v12424_v22, %s8618_s17  ;;  %7477 = vrot.lane.b32.xlu0 %v7399_v58, %s8620_s19  ;;  %v5746_v49 = vpop.f32.mrf.mxu2  ;;  %7658 = vst.msk [vmem:[#allocation5 + $0x218] sm:$0xff] %vm5836_vm4, %v7622_v3  ;;  %v5250_v11 = vadd.f32 %v12442_v45, %v13465_v14  ;;  %v6892_v3 = vld [vmem:[#allocation4 + $0x2b] sm:$0xff] }
 0x5ed   : > { %8532 = vmatmul.msk.f32.gmra.mxu1 %vm5836_vm4, %v7719_v0  ;;  %v5747_v33 = vadd.f32 %v5746_v49, %v5622_v19  ;;  %v6319_v10 = vpop.permute.xlu1 %6318  ;;  %v12472_v0 = vpop.f32.mrf.mxu3  ;;  %6928 = vst.msk [vmem:[#allocation5 + $0x80] sm:$0xff] %vm5836_vm4, %v6892_v3 }
 0x5ee   : > { %v6534_v31 = vpop.permute.xlu0 %6533  ;;  %6423 = vst.msk [vmem:[#allocation5 + $0xa0] sm:$0xff] %vm6418_vm5, %v6319_v10  ;;  %v7250_v5 = vpop.permute.xlu2 %7249  ;;  %v5375_v8 = vadd.f32 %v12310_v44, %v5250_v11  ;;  %v12483_v10 = vld [vmem:[#allocation4 + $0x5c] sm:$0xff] }
 0x5ef   : > { %v5818_v52 = vmax.f32 %v5747_v33, 0.0  ;;  %6639 = vst.msk [vmem:[#allocation5 + $0x78] sm:$0xff] %vm6635_vm6, %v6534_v31  ;;  %v12475_v49 = vpop.f32.mrf.mxu0  ;;  %v12479_v11 = vpop.f32.mrf.mxu1 }
 0x5f0   : > { %7357 = vst.msk [vmem:[#allocation5 + $0x8] sm:$0xff] %vm6635_vm6, %v7250_v5  ;;  %v5500_v36 = vadd.f32 %v12314_v61, %v5375_v8  ;;  %v13466_v61 = vld [vmem:[#allocation27_spill] sm:$0xff]  ;;  %v5256_v8 = vadd.f32 %v12442_v45, %v13467_v56 }
 0x5f1   : > { %v6112_v28 = vmul.f32 %v12003_v42, %v5818_v52  ;;  %8519 = vmatmul.msk.f32.gmra.mxu2 %vm678_vm2, %v4990_v59  ;;  %v5253_v18 = vadd.f32 %v12442_v45, %v13466_v61  ;;  %6208 = vst.msk [vmem:[#allocation5 + $0xf0] sm:$0xff] %vm5836_vm4, %v6172_v1  ;;  %v6173_v59 = vld [vmem:[#allocation4 + $0x38] sm:$0xff]  ;;  %v6251_v61 = vld [vmem:[#allocation4 + $0x69] sm:$0xff] }
 0x5f2   : > { %v7623_v16 = vld [vmem:[#allocation4 + $0x96] sm:$0xff]  ;;  %v5625_v43 = vadd.f32 %v12086_v51, %v5500_v36  ;;  %6209 = vst.msk [vmem:[#allocation5 + $0x118] sm:$0xff] %vm5836_vm4, %v6173_v59 }
 0x5f3   : > { %6148 = vst.msk [vmem:[#allocation4 + $0xa3] sm:$0xff] %vm5836_vm4, %v6112_v28  ;;  %v7722_v44 = vld [vmem:[#allocation5 + $0x218] sm:$0xff]  ;;  %7479 = vrot.lane.b32.xlu1 %v7400_v24, %s8620_s19  ;;  %v5378_v19 = vadd.f32 %v12352_v21, %v5253_v18  ;;  %v5381_v24 = vadd.f32 %v12389_v50, %v5256_v8 }
 0x5f4   : > { %7261 = vrot.lane.b32.xlu2 %v7183_v55, %s8618_s17  ;;  %7049 = vrot.lane.b32.xlu0 %v7183_v55, %s8619_s15  ;;  %v5749_v42 = vpop.f32.mrf.mxu2  ;;  %7659 = vst.msk [vmem:[#allocation5 + $0x240] sm:$0xff] %vm5836_vm4, %v7623_v16 }
 0x5f5   : > { %8533 = vmatmul.msk.f32.gmra.mxu1 %vm5836_vm4, %v7722_v44  ;;  %v5750_v51 = vadd.f32 %v5749_v42, %v5625_v43  ;;  %v6536_v20 = vpop.permute.xlu1 %6535  ;;  %v5503_v14 = vadd.f32 %v12357_v15, %v5378_v19  ;;  %v6250_v15 = vld [vmem:[#allocation4 + $0x61] sm:$0xff]  ;;  %v12502_v16 = vpop.f32.mrf.mxu3  ;;  %v5506_v55 = vadd.f32 %v12392_v2, %v5381_v24 }
 0x5f6   : > { %v6747_v26 = vpop.permute.xlu0 %6746  ;;  %6640 = vst.msk [vmem:[#allocation5 + $0xa0] sm:$0xff] %vm6635_vm6, %v6536_v20  ;;  %v6751_v58 = vpop.permute.xlu2 %6750  ;;  %v7401_v20 = vld [vmem:[#allocation4 + $0x65] sm:$0xff] }
 0x5f7   : > { %v5819_v12 = vmax.f32 %v5750_v51, 0.0  ;;  %6854 = vst.msk [vmem:[#allocation5 + $0x28] sm:$0xff] %vm6852_vm7, %v6747_v26  ;;  %v5628_v31 = vadd.f32 %v12119_v47, %v5503_v14  ;;  %v12505_v44 = vpop.f32.mrf.mxu0  ;;  %v12508_v57 = vpop.f32.mrf.mxu1  ;;  %v5631_v51 = vadd.f32 %v12150_v38, %v5506_v55  ;;  %v6467_v26 = vld [vmem:[#allocation4 + $0x62] sm:$0xff] }
 0x5f8   : > { %6856 = vst.msk [vmem:[#allocation5 + $0x78] sm:$0xff] %vm6852_vm7, %v6751_v58  ;;  %v13468_v58 = vld [vmem:[#allocation30_spill] sm:$0xff] }
 0x5f9   : > { %v6113_v33 = vmul.f32 %v12018_v62, %v5819_v12 }
 0x5fa   : > { %v7624_v21 = vld [vmem:[#allocation4 + $0x9e] sm:$0xff] }
 0x5fb   : > { %6149 = vst.msk [vmem:[#allocation4 + $0xab] sm:$0xff] %vm5836_vm4, %v6113_v33  ;;  %v7725_v5 = vld [vmem:[#allocation5 + $0x240] sm:$0xff]  ;;  %7051 = vrot.lane.b32.xlu1 %v12483_v10, %s8619_s15 }
 0x5fc   : > { %6762 = vrot.lane.b32.xlu2 %v12424_v22, %s8620_s19  ;;  %6334 = vrot.lane.b32.xlu0 %v6250_v15, %s8619_s15  ;;  %v5752_v62 = vpop.f32.mrf.mxu2  ;;  %7660 = vst.msk [vmem:[#allocation5 + $0x268] sm:$0xff] %vm5836_vm4, %v7624_v21 }
 0x5fd   : > { %8534 = vmatmul.msk.f32.gmra.mxu1 %vm5836_vm4, %v7725_v5  ;;  %v5753_v47 = vadd.f32 %v5752_v62, %v5628_v31  ;;  %v6749_v52 = vpop.permute.xlu1 %6748  ;;  %v12526_v5 = vpop.f32.mrf.mxu3  ;;  %v6468_v62 = vld [vmem:[#allocation4 + $0x6a] sm:$0xff] }
 0x5fe   : > { %6855 = vst.msk [vmem:[#allocation5 + $0x50] sm:$0xff] %vm6852_vm7, %v6749_v52  ;;  %v7466_v36 = vpop.permute.xlu0 %7465  ;;  %v12499_v28 = vpop.permute.xlu2 %7469  ;;  %v7684_v22 = vld [vmem:[#allocation5 + $0x28] sm:$0xff]  ;;  %v6971_v52 = vld [vmem:[#allocation4 + $0x64] sm:$0xff] }
 0x5ff   : > { %v5820_v43 = vmax.f32 %v5753_v47, 0.0  ;;  %7573 = vst.msk [vmem:[#allocation5 + $0x8] sm:$0xff] %vm6852_vm7, %v7466_v36  ;;  %7956 = vmatmul.f32.gmra.mxu3 %v7684_v22  ;;  %v12529_v59 = vpop.f32.mrf.mxu0  ;;  %v7690_v55 = vld [vmem:[#allocation5 + $0x78] sm:$0xff] }
 0x601   : > { %v6114_v42 = vmul.f32 %v12038_v37, %v5820_v43  ;;  %v5259_v37 = vadd.f32 %v12442_v45, %v13468_v58  ;;  %v6252_v58 = vld [vmem:[#allocation4 + $0x71] sm:$0xff] }
 0x602   : > { %v7625_v18 = vld [vmem:[#allocation4 + $0xa6] sm:$0xff] }
 0x603   : > { %6150 = vst.msk [vmem:[#allocation4 + $0xb3] sm:$0xff] %vm5836_vm4, %v6114_v42  ;;  %v7728_v50 = vld [vmem:[#allocation5 + $0x268] sm:$0xff]  ;;  %6336 = vrot.lane.b32.xlu1 %v6251_v61, %s8619_s15  ;;  %v5384_v33 = vadd.f32 %v12433_v32, %v5259_v37  ;;  %v12532_v32 = vpop.f32.mrf.mxu1 }
 0x604   : > { %7481 = vrot.lane.b32.xlu2 %v7401_v20, %s8620_s19  ;;  %6551 = vrot.lane.b32.xlu0 %v6467_v26, %s8618_s17  ;;  %v5755_v2 = vpop.f32.mrf.mxu2  ;;  %7661 = vst.msk [vmem:[#allocation5 + $0x290] sm:$0xff] %vm5836_vm4, %v7625_v18 }
 0x605   : > { %8535 = vmatmul.msk.f32.gmra.mxu1 %vm5836_vm4, %v7728_v50  ;;  %v5756_v38 = vadd.f32 %v5755_v2, %v5631_v51  ;;  %v12520_v3 = vpop.permute.xlu1 %7467  ;;  %v7687_v19 = vld [vmem:[#allocation5 + $0x50] sm:$0xff]  ;;  %v5509_v31 = vadd.f32 %v12448_v60, %v5384_v33  ;;  %v13469_v60 = vld [vmem:[#allocation29_spill] sm:$0xff]  ;;  %v12549_v50 = vpop.f32.mrf.mxu3 }
 0x606   : > { %v7038_v12 = vpop.permute.xlu0 %7037  ;;  %v7042_v1 = vpop.permute.xlu2 %7041  ;;  %v7682_v14 = vld [vmem:[#allocation5 + $0x8] sm:$0xff]  ;;  %v5262_v36 = vadd.f32 %v12442_v45, %v13469_v60 }
 0x607   : > { %v5821_v21 = vmax.f32 %v5756_v38, 0.0  ;;  %7143 = vst.msk [vmem:[#allocation5 + $0x58] sm:$0xff] %vm6418_vm5, %v7038_v12  ;;  %7959 = vmatmul.f32.gmra.mxu3 %v7687_v19  ;;  %8078 = vmatmul.f32.vlgmr.msrb.gmra.mxu0 %v7682_v14  ;;  %v5634_v8 = vadd.f32 %v12192_v6, %v5509_v31  ;;  %v12570_v31 = vld [vmem:[#allocation4 + $0x72] sm:$0xff] }
 0x608   : > { %7145 = vst.msk [vmem:[#allocation5 + $0xa8] sm:$0xff] %vm6418_vm5, %v7042_v1  ;;  %v5387_v42 = vadd.f32 %v12472_v0, %v5262_v36  ;;  %v12554_v0 = vpop.f32.mrf.mxu0 }
 0x609   : > { %v6115_v15 = vmul.f32 %v12025_v30, %v5821_v21 }
 0x60a   : > { %v7626_v56 = vld [vmem:[#allocation4 + $0xae] sm:$0xff] }
 0x60b   : > { %6151 = vst.msk [vmem:[#allocation4 + $0xbb] sm:$0xff] %vm5836_vm4, %v6115_v15  ;;  %v7731_v47 = vld [vmem:[#allocation5 + $0x290] sm:$0xff]  ;;  %6553 = vrot.lane.b32.xlu1 %v6468_v62, %s8618_s17  ;;  %v12561_v38 = vpop.f32.mrf.mxu1 }
 0x60c   : > { %7053 = vrot.lane.b32.xlu2 %v6971_v52, %s8619_s15  ;;  %7263 = vrot.lane.b32.xlu0 %v12483_v10, %s8618_s17  ;;  %v5758_v30 = vpop.f32.mrf.mxu2  ;;  %7662 = vst.msk [vmem:[#allocation5 + $0x2b8] sm:$0xff] %vm5836_vm4, %v7626_v56  ;;  %v5512_v10 = vadd.f32 %v12475_v49, %v5387_v42 }
 0x60d   : > { %8536 = vmatmul.msk.f32.gmra.mxu1 %vm5836_vm4, %v7731_v47  ;;  %v5759_v6 = vadd.f32 %v5758_v30, %v5634_v8  ;;  %v7040_v22 = vpop.permute.xlu1 %7039  ;;  %v6896_v47 = vld [vmem:[#allocation4 + $0x4b] sm:$0xff] }
 0x60e   : > { %v6327_v24 = vpop.permute.xlu2 %6326  ;;  %7144 = vst.msk [vmem:[#allocation5 + $0x80] sm:$0xff] %vm6418_vm5, %v7040_v22  ;;  %v6323_v43 = vpop.permute.xlu0 %6322  ;;  %v5637_v20 = vadd.f32 %v12237_v41, %v5512_v10  ;;  %v7403_v10 = vld [vmem:[#allocation4 + $0x75] sm:$0xff] }
 0x60f   : > { %v5822_v61 = vmax.f32 %v5759_v6, 0.0  ;;  %6427 = vst.msk [vmem:[#allocation5 + $0x140] sm:$0xff] %vm6418_vm5, %v6327_v24  ;;  %7962 = vmatmul.f32.gmra.mxu3 %v7690_v55  ;;  %v6894_v55 = vld [vmem:[#allocation4 + $0x3b] sm:$0xff] }
 0x610   : > { %6425 = vst.msk [vmem:[#allocation5 + $0xf0] sm:$0xff] %vm6418_vm5, %v6323_v43  ;;  %v12583_v30 = vpop.f32.mrf.mxu0 }
 0x611   : > { %v6116_v18 = vmul.f32 %v12043_v53, %v5822_v61  ;;  %v13470_v53 = vld [vmem:[#allocation7_spill] sm:$0xff]  ;;  %6932 = vst.msk [vmem:[#allocation5 + $0x120] sm:$0xff] %vm5836_vm4, %v6896_v47 }
 0x612   : > { %v7627_v51 = vld [vmem:[#allocation4 + $0xb6] sm:$0xff]  ;;  %v5265_v37 = vadd.f32 %v12442_v45, %v13470_v53  ;;  %6930 = vst.msk [vmem:[#allocation5 + $0xd0] sm:$0xff] %vm5836_vm4, %v6894_v55 }
 0x613   : > { %6152 = vst.msk [vmem:[#allocation4 + $0xc3] sm:$0xff] %vm5836_vm4, %v6116_v18  ;;  %v7734_v2 = vld [vmem:[#allocation5 + $0x2b8] sm:$0xff]  ;;  %7265 = vrot.lane.b32.xlu1 %v6971_v52, %s8618_s17  ;;  %v12575_v52 = vpop.f32.mrf.mxu3  ;;  %v12589_v24 = vpop.f32.mrf.mxu1 }
 0x614   : > { %6338 = vrot.lane.b32.xlu2 %v6252_v58, %s8619_s15  ;;  %6764 = vrot.lane.b32.xlu0 %v6467_v26, %s8620_s19  ;;  %v5761_v49 = vpop.f32.mrf.mxu2  ;;  %7663 = vst.msk [vmem:[#allocation5 + $0x2e0] sm:$0xff] %vm5836_vm4, %v7627_v51  ;;  %v5390_v14 = vadd.f32 %v12502_v16, %v5265_v37  ;;  %v7402_v16 = vld [vmem:[#allocation4 + $0x6d] sm:$0xff] }
 0x615   : > { %8537 = vmatmul.msk.f32.gmra.mxu1 %vm5836_vm4, %v7734_v2  ;;  %v5762_v41 = vadd.f32 %v5761_v49, %v5637_v20  ;;  %v6325_v19 = vpop.permute.xlu1 %6324  ;;  %v7186_v20 = vld [vmem:[#allocation4 + $0x6c] sm:$0xff]  ;;  %v6177_v2 = vld [vmem:[#allocation4 + $0x58] sm:$0xff] }
 0x616   : > { %v6544_v12 = vpop.permute.xlu2 %6543  ;;  %6426 = vst.msk [vmem:[#allocation5 + $0x118] sm:$0xff] %vm6418_vm5, %v6325_v19  ;;  %v6540_v1 = vpop.permute.xlu0 %6539  ;;  %v5515_v26 = vadd.f32 %v12505_v44, %v5390_v14  ;;  %v13471_v44 = vld [vmem:[#allocation9_spill] sm:$0xff] }
 0x617   : > { %v5823_v33 = vmax.f32 %v5762_v41, 0.0  ;;  %6644 = vst.msk [vmem:[#allocation5 + $0x140] sm:$0xff] %vm6635_vm6, %v6544_v12  ;;  %v6895_v12 = vld [vmem:[#allocation4 + $0x43] sm:$0xff] }
 0x618   : > { %6642 = vst.msk [vmem:[#allocation5 + $0xf0] sm:$0xff] %vm6635_vm6, %v6540_v1  ;;  %v5640_v56 = vadd.f32 %v12275_v48, %v5515_v26  ;;  %v5268_v48 = vadd.f32 %v12442_v45, %v13471_v44  ;;  %v12610_v41 = vpop.f32.mrf.mxu0  ;;  %v6176_v44 = vld [vmem:[#allocation4 + $0x50] sm:$0xff] }
 0x619   : > { %v6117_v21 = vmul.f32 %v12068_v46, %v5823_v33  ;;  %6213 = vst.msk [vmem:[#allocation5 + $0x1b8] sm:$0xff] %vm5836_vm4, %v6177_v2 }
 0x61a   : > { %v7628_v15 = vld [vmem:[#allocation4 + $0xbe] sm:$0xff]  ;;  %v5393_v22 = vadd.f32 %v12526_v5, %v5268_v48  ;;  %6931 = vst.msk [vmem:[#allocation5 + $0xf8] sm:$0xff] %vm5836_vm4, %v6895_v12 }
 0x61b   : > { %6153 = vst.msk [vmem:[#allocation4 + $0xcb] sm:$0xff] %vm5836_vm4, %v6117_v21  ;;  %v7737_v8 = vld [vmem:[#allocation5 + $0x2e0] sm:$0xff]  ;;  %6766 = vrot.lane.b32.xlu1 %v6468_v62, %s8620_s19  ;;  %v12613_v1 = vpop.f32.mrf.mxu3  ;;  %v12618_v26 = vpop.f32.mrf.mxu1 }
 0x61c   : > { %6555 = vrot.lane.b32.xlu2 %v12570_v31, %s8618_s17  ;;  %7483 = vrot.lane.b32.xlu0 %v7402_v16, %s8620_s19  ;;  %v5764_v46 = vpop.f32.mrf.mxu2  ;;  %7664 = vst.msk [vmem:[#allocation5 + $0x308] sm:$0xff] %vm5836_vm4, %v7628_v15  ;;  %v5518_v42 = vadd.f32 %v12529_v59, %v5393_v22  ;;  %v13473_v16 = vld [vmem:[#allocation33_spill] sm:$0xff] }
 0x61d   : > { %8538 = vmatmul.msk.f32.gmra.mxu1 %vm5836_vm4, %v7737_v8  ;;  %v5765_v62 = vadd.f32 %v5764_v46, %v5640_v56  ;;  %v6542_v60 = vpop.permute.xlu1 %6541  ;;  %v6175_v56 = vld [vmem:[#allocation4 + $0x48] sm:$0xff]  ;;  %v5274_v47 = vadd.f32 %v12442_v45, %v13473_v16  ;;  %6212 = vst.msk [vmem:[#allocation5 + $0x190] sm:$0xff] %vm5836_vm4, %v6176_v44 }
 0x61e   : > { %v7256_v36 = vpop.permute.xlu2 %7255  ;;  %6643 = vst.msk [vmem:[#allocation5 + $0x118] sm:$0xff] %vm6635_vm6, %v6542_v60  ;;  %v7252_v6 = vpop.permute.xlu0 %7251  ;;  %v5643_v5 = vadd.f32 %v12318_v7, %v5518_v42 }
 0x61f   : > { %v5824_v43 = vmax.f32 %v5765_v62, 0.0  ;;  %7360 = vst.msk [vmem:[#allocation5 + $0x80] sm:$0xff] %vm6635_vm6, %v7256_v36  ;;  %v5399_v62 = vadd.f32 %v12575_v52, %v5274_v47 }
 0x620   : > { %7358 = vst.msk [vmem:[#allocation5 + $0x30] sm:$0xff] %vm6635_vm6, %v7252_v6 }
 0x621   : > { %v6118_v61 = vmul.f32 %v12051_v17, %v5824_v43  ;;  %7574 = vst.msk [vmem:[#allocation5 + $0x30] sm:$0xff] %vm6852_vm7, %v12520_v3  ;;  %v13472_v3 = vld [vmem:[#allocation11_spill] sm:$0xff]  ;;  %v5524_v22 = vadd.f32 %v12583_v30, %v5399_v62  ;;  %v5529_v43 = vpop.f32.mrf.mxu0  ;;  %v13474_v30 = vld [vmem:[#allocation13_spill] sm:$0xff] }
 0x622   : > { %v7629_v18 = vld [vmem:[#allocation4 + $0xc6] sm:$0xff]  ;;  %v5271_v59 = vadd.f32 %v12442_v45, %v13472_v3  ;;  %6211 = vst.msk [vmem:[#allocation5 + $0x168] sm:$0xff] %vm5836_vm4, %v6175_v56  ;;  %v5277_v2 = vadd.f32 %v12442_v45, %v13474_v30 }
 0x623   : > { %6154 = vst.msk [vmem:[#allocation4 + $0xd3] sm:$0xff] %vm5836_vm4, %v6118_v61  ;;  %v7740_v51 = vld [vmem:[#allocation5 + $0x308] sm:$0xff]  ;;  %7485 = vrot.lane.b32.xlu1 %v7403_v10, %s8620_s19  ;;  %v5404_v42 = vpop.f32.mrf.mxu3  ;;  %v6254_v61 = vld [vmem:[#allocation4 + $0x81] sm:$0xff]  ;;  %v12646_v52 = vpop.f32.mrf.mxu1 }
 0x624   : > { %7267 = vrot.lane.b32.xlu2 %v7186_v20, %s8618_s17  ;;  %7055 = vrot.lane.b32.xlu0 %v7186_v20, %s8619_s15  ;;  %v5767_v17 = vpop.f32.mrf.mxu2  ;;  %7665 = vst.msk [vmem:[#allocation5 + $0x330] sm:$0xff] %vm5836_vm4, %v7629_v18  ;;  %v5396_v37 = vadd.f32 %v12549_v50, %v5271_v59  ;;  %v12622_v50 = vld [vmem:[#allocation4 + $0x74] sm:$0xff]  ;;  %v5649_v18 = vadd.f32 %v12399_v9, %v5524_v22  ;;  %v12694_v30 = vld [vmem:[#allocation4 + $0x8a] sm:$0xff] }
 0x625   : > { %8539 = vmatmul.msk.f32.gmra.mxu1 %vm5836_vm4, %v7740_v51  ;;  %v5768_v7 = vadd.f32 %v5767_v17, %v5643_v5  ;;  %v7254_v58 = vpop.permute.xlu1 %7253  ;;  %v7404_v51 = vld [vmem:[#allocation4 + $0x7d] sm:$0xff] }
 0x626   : > { %v6757_v49 = vpop.permute.xlu2 %6756  ;;  %7359 = vst.msk [vmem:[#allocation5 + $0x58] sm:$0xff] %vm6635_vm6, %v7254_v58  ;;  %v6753_v53 = vpop.permute.xlu0 %6752  ;;  %v5521_v33 = vadd.f32 %v12554_v0, %v5396_v37  ;;  %v6253_v0 = vld [vmem:[#allocation4 + $0x79] sm:$0xff] }
 0x627   : > { %v5825_v19 = vmax.f32 %v5768_v7, 0.0  ;;  %6859 = vst.msk [vmem:[#allocation5 + $0xf0] sm:$0xff] %vm6852_vm7, %v6757_v49  ;;  %v6470_v20 = vld [vmem:[#allocation4 + $0x7a] sm:$0xff]  ;;  %v5402_v49 = vadd.f32 %v12613_v1, %v5277_v2 }
 0x628   : > { %7575 = vst.msk [vmem:[#allocation5 + $0x58] sm:$0xff] %vm6852_vm7, %v12499_v28  ;;  %v7685_v14 = vld [vmem:[#allocation5 + $0x30] sm:$0xff]  ;;  %v5646_v8 = vadd.f32 %v12365_v34, %v5521_v33  ;;  %v6471_v33 = vld [vmem:[#allocation4 + $0x82] sm:$0xff] }
 0x629   : > { %v6119_v21 = vmul.f32 %v12073_v63, %v5825_v19  ;;  %6857 = vst.msk [vmem:[#allocation5 + $0xa0] sm:$0xff] %vm6852_vm7, %v6753_v53  ;;  %8081 = vmatmul.f32.gmra.mxu0 %v7685_v14  ;;  %v5527_v37 = vadd.f32 %v12610_v41, %v5402_v49  ;;  %v5532_v19 = vpop.f32.mrf.mxu0  ;;  %v13475_v41 = vld [vmem:[#allocation35_spill] sm:$0xff] }
 0x62a   : > { %v7630_v15 = vld [vmem:[#allocation4 + $0xce] sm:$0xff] }
 0x62b   : > { %6155 = vst.msk [vmem:[#allocation4 + $0xdb] sm:$0xff] %vm5836_vm4, %v6119_v21  ;;  %v7743_v28 = vld [vmem:[#allocation5 + $0x330] sm:$0xff]  ;;  %7057 = vrot.lane.b32.xlu1 %v12622_v50, %s8619_s15  ;;  %v5407_v14 = vpop.f32.mrf.mxu3  ;;  %v12664_v56 = vpop.f32.mrf.mxu1 }
 0x62c   : > { %6768 = vrot.lane.b32.xlu2 %v12570_v31, %s8620_s19  ;;  %6340 = vrot.lane.b32.xlu0 %v6253_v0, %s8619_s15  ;;  %v5770_v63 = vpop.f32.mrf.mxu2  ;;  %7666 = vst.msk [vmem:[#allocation5 + $0x358] sm:$0xff] %vm5836_vm4, %v7630_v15  ;;  %v5652_v15 = vadd.f32 %v12452_v25, %v5527_v37 }
 0x62d   : > { %8540 = vmatmul.msk.f32.gmra.mxu1 %vm5836_vm4, %v7743_v28  ;;  %v5771_v34 = vadd.f32 %v5770_v63, %v5646_v8  ;;  %v6755_v46 = vpop.permute.xlu1 %6754  ;;  %v6974_v8 = vld [vmem:[#allocation4 + $0x7c] sm:$0xff]  ;;  %v5280_v28 = vadd.f32 %v12442_v45, %v13475_v41  ;;  %v7406_v41 = vld [vmem:[#allocation4 + $0x8d] sm:$0xff] }
 0x62e   : > { %v12637_v48 = vpop.permute.xlu2 %7475  ;;  %6858 = vst.msk [vmem:[#allocation5 + $0xc8] sm:$0xff] %vm6852_vm7, %v6755_v46  ;;  %v7472_v31 = vpop.permute.xlu0 %7471 }
 0x62f   : > { %v5826_v60 = vmax.f32 %v5771_v34, 0.0  ;;  %7576 = vst.msk [vmem:[#allocation5 + $0x80] sm:$0xff] %vm6852_vm7, %v7472_v31  ;;  %v7688_v36 = vld [vmem:[#allocation5 + $0x58] sm:$0xff]  ;;  %v5405_v47 = vadd.f32 %v5404_v42, %v5280_v28 }
 0x630   : > { %v7693_v6 = vld [vmem:[#allocation5 + $0xa0] sm:$0xff] }
 0x631   : > { %v6120_v55 = vmul.f32 %v12100_v23, %v5826_v60  ;;  %7965 = vmatmul.f32.gmra.mxu3 %v7693_v6  ;;  %8084 = vmatmul.f32.gmra.mxu0 %v7688_v36  ;;  %v5530_v46 = vadd.f32 %v5529_v43, %v5405_v47  ;;  %v5535_v60 = vpop.f32.mrf.mxu0  ;;  %v6255_v6 = vld [vmem:[#allocation4 + $0x89] sm:$0xff] }
 0x632   : > { %v7631_v10 = vld [vmem:[#allocation4 + $0xd6] sm:$0xff] }
 0x633   : > { %6156 = vst.msk [vmem:[#allocation4 + $0xe3] sm:$0xff] %vm5836_vm4, %v6120_v55  ;;  %v7746_v5 = vld [vmem:[#allocation5 + $0x358] sm:$0xff]  ;;  %6342 = vrot.lane.b32.xlu1 %v6254_v61, %s8619_s15  ;;  %v5655_v62 = vadd.f32 %v12479_v11, %v5530_v46  ;;  %v5410_v22 = vpop.f32.mrf.mxu3  ;;  %v12687_v42 = vpop.f32.mrf.mxu1 }
 0x634   : > { %7487 = vrot.lane.b32.xlu2 %v7404_v51, %s8620_s19  ;;  %6557 = vrot.lane.b32.xlu0 %v6470_v20, %s8618_s17  ;;  %v5773_v23 = vpop.f32.mrf.mxu2  ;;  %7667 = vst.msk [vmem:[#allocation5 + $0x380] sm:$0xff] %vm5836_vm4, %v7631_v10 }
 0x635   : > { %8541 = vmatmul.msk.f32.gmra.mxu1 %vm5836_vm4, %v7746_v5  ;;  %v5774_v9 = vadd.f32 %v5773_v23, %v5649_v18  ;;  %v12656_v17 = vpop.permute.xlu1 %7473  ;;  %v7696_v7 = vld [vmem:[#allocation5 + $0xc8] sm:$0xff] }
 0x636   : > { %v7048_v3 = vpop.permute.xlu2 %7047  ;;  %v7044_v59 = vpop.permute.xlu0 %7043  ;;  %v7691_v58 = vld [vmem:[#allocation5 + $0x80] sm:$0xff] }
 0x637   : > { %v5827_v53 = vmax.f32 %v5774_v9, 0.0  ;;  %7148 = vst.msk [vmem:[#allocation5 + $0x120] sm:$0xff] %vm6418_vm5, %v7048_v3 }
 0x638   : > { %7146 = vst.msk [vmem:[#allocation5 + $0xd0] sm:$0xff] %vm6418_vm5, %v7044_v59  ;;  %v7405_v59 = vld [vmem:[#allocation4 + $0x85] sm:$0xff] }
 0x639   : > { %v6121_v12 = vmul.f32 %v12077_v27, %v5827_v53  ;;  %7968 = vmatmul.f32.gmra.mxu3 %v7696_v7  ;;  %8087 = vmatmul.f32.gmra.mxu0 %v7691_v58  ;;  %v6899_v7 = vld [vmem:[#allocation4 + $0x63] sm:$0xff]  ;;  %v5538_v53 = vpop.f32.mrf.mxu0 }
 0x63a   : > { %v7632_v21 = vld [vmem:[#allocation4 + $0xde] sm:$0xff]  ;;  %6935 = vst.msk [vmem:[#allocation5 + $0x198] sm:$0xff] %vm5836_vm4, %v6899_v7 }
 0x63b   : > { %6157 = vst.msk [vmem:[#allocation4 + $0xeb] sm:$0xff] %vm5836_vm4, %v6121_v12  ;;  %v7749_v1 = vld [vmem:[#allocation5 + $0x380] sm:$0xff]  ;;  %6559 = vrot.lane.b32.xlu1 %v6471_v33, %s8618_s17 }
 0x63c   : > { %7059 = vrot.lane.b32.xlu2 %v6974_v8, %s8619_s15  ;;  %7269 = vrot.lane.b32.xlu0 %v12622_v50, %s8618_s17  ;;  %v5776_v27 = vpop.f32.mrf.mxu2  ;;  %7668 = vst.msk [vmem:[#allocation5 + $0x3a8] sm:$0xff] %vm5836_vm4, %v7632_v21  ;;  %v7699_v50 = vld [vmem:[#allocation5 + $0xf0] sm:$0xff]  ;;  %v12708_v21 = vpop.f32.mrf.mxu1 }
 0x63d   : > { %8542 = vmatmul.msk.f32.gmra.mxu1 %vm5836_vm4, %v7749_v1  ;;  %v5777_v25 = vadd.f32 %v5776_v27, %v5652_v15  ;;  %v7046_v0 = vpop.permute.xlu1 %7045  ;;  %v6897_v1 = vld [vmem:[#allocation4 + $0x53] sm:$0xff] }
 0x63e   : > { %v6333_v63 = vpop.permute.xlu2 %6332  ;;  %7147 = vst.msk [vmem:[#allocation5 + $0xf8] sm:$0xff] %vm6418_vm5, %v7046_v0  ;;  %v6329_v16 = vpop.permute.xlu0 %6328 }
 0x63f   : > { %v5828_v34 = vmax.f32 %v5777_v25, 0.0  ;;  %6430 = vst.msk [vmem:[#allocation5 + $0x1b8] sm:$0xff] %vm6418_vm5, %v6333_v63  ;;  %v7189_v63 = vld [vmem:[#allocation4 + $0x84] sm:$0xff] }
 0x640   : > { %6428 = vst.msk [vmem:[#allocation5 + $0x168] sm:$0xff] %vm6418_vm5, %v6329_v16  ;;  %v6180_v16 = vld [vmem:[#allocation4 + $0x70] sm:$0xff] }
 0x641   : > { %v6122_v44 = vmul.f32 %v12103_v54, %v5828_v34  ;;  %7971 = vmatmul.f32.gmra.mxu3 %v7699_v50  ;;  %v13476_v54 = vld [vmem:[#allocation14_spill] sm:$0xff]  ;;  %6933 = vst.msk [vmem:[#allocation5 + $0x148] sm:$0xff] %vm5836_vm4, %v6897_v1  ;;  %v13480_v1 = vld [vmem:[#allocation17_spill] sm:$0xff] }
 0x642   : > { %v7633_v31 = vld [vmem:[#allocation4 + $0xe6] sm:$0xff]  ;;  %v5283_v43 = vadd.f32 %v12442_v45, %v13476_v54  ;;  %6216 = vst.msk [vmem:[#allocation5 + $0x230] sm:$0xff] %vm5836_vm4, %v6180_v16 }
 0x643   : > { %6158 = vst.msk [vmem:[#allocation4 + $0xf3] sm:$0xff] %vm5836_vm4, %v6122_v44  ;;  %v7752_v36 = vld [vmem:[#allocation5 + $0x3a8] sm:$0xff]  ;;  %7271 = vrot.lane.b32.xlu1 %v6974_v8, %s8618_s17 }
 0x644   : > { %6344 = vrot.lane.b32.xlu2 %v6255_v6, %s8619_s15  ;;  %6770 = vrot.lane.b32.xlu0 %v6470_v20, %s8620_s19  ;;  %v5779_v55 = vpop.f32.mrf.mxu2  ;;  %7669 = vst.msk [vmem:[#allocation5 + $0x3d0] sm:$0xff] %vm5836_vm4, %v7633_v31  ;;  %v5408_v5 = vadd.f32 %v5407_v14, %v5283_v43  ;;  %v12734_v43 = vld [vmem:[#allocation4 + $0x8c] sm:$0xff] }
 0x645   : > { %8543 = vmatmul.msk.f32.gmra.mxu1 %vm5836_vm4, %v7752_v36  ;;  %v5780_v11 = vadd.f32 %v5779_v55, %v5655_v62  ;;  %v6331_v61 = vpop.permute.xlu1 %6330  ;;  %v5541_v36 = vpop.f32.mrf.mxu0 }
 0x646   : > { %v6550_v10 = vpop.permute.xlu2 %6549  ;;  %6429 = vst.msk [vmem:[#allocation5 + $0x190] sm:$0xff] %vm6418_vm5, %v6331_v61  ;;  %v6546_v18 = vpop.permute.xlu0 %6545  ;;  %v5533_v20 = vadd.f32 %v5532_v19, %v5408_v5  ;;  %v6178_v61 = vld [vmem:[#allocation4 + $0x60] sm:$0xff] }
 0x647   : > { %v5829_v51 = vmax.f32 %v5780_v11, 0.0  ;;  %6647 = vst.msk [vmem:[#allocation5 + $0x1b8] sm:$0xff] %vm6635_vm6, %v6550_v10  ;;  %v12730_v55 = vpop.f32.mrf.mxu1  ;;  %v13479_v5 = vld [vmem:[#allocation37_spill] sm:$0xff] }
 0x648   : > { %6645 = vst.msk [vmem:[#allocation5 + $0x168] sm:$0xff] %vm6635_vm6, %v6546_v18  ;;  %v5658_v9 = vadd.f32 %v12508_v57, %v5533_v20  ;;  %v6256_v18 = vld [vmem:[#allocation4 + $0x91] sm:$0xff] }
 0x649   : > { %v6123_v23 = vmul.f32 %v12126_v13, %v5829_v51  ;;  %v13477_v13 = vld [vmem:[#allocation38_spill] sm:$0xff]  ;;  %v5292_v51 = vadd.f32 %v12442_v45, %v13479_v5  ;;  %6214 = vst.msk [vmem:[#allocation5 + $0x1e0] sm:$0xff] %vm5836_vm4, %v6178_v61 }
 0x64a   : > { %v7634_v2 = vld [vmem:[#allocation4 + $0xee] sm:$0xff]  ;;  %v5286_v49 = vadd.f32 %v12442_v45, %v13477_v13 }
 0x64b   : > { %6159 = vst.msk [vmem:[#allocation4 + $0xfb] sm:$0xff] %vm5836_vm4, %v6123_v23  ;;  %v7755_v3 = vld [vmem:[#allocation5 + $0x3d0] sm:$0xff]  ;;  %6772 = vrot.lane.b32.xlu1 %v6471_v33, %s8620_s19  ;;  %v5413_v33 = vpop.f32.mrf.mxu3  ;;  %v6179_v23 = vld [vmem:[#allocation4 + $0x68] sm:$0xff] }
 0x64c   : > { %6561 = vrot.lane.b32.xlu2 %v12694_v30, %s8618_s17  ;;  %7489 = vrot.lane.b32.xlu0 %v7405_v59, %s8620_s19  ;;  %v5782_v58 = vpop.f32.mrf.mxu2  ;;  %7670 = vst.msk [vmem:[#allocation5 + $0x3f8] sm:$0xff] %vm5836_vm4, %v7634_v2  ;;  %v5411_v14 = vadd.f32 %v5410_v22, %v5286_v49 }
 0x64d   : > { %8544 = vmatmul.msk.f32.gmra.mxu1 %vm5836_vm4, %v7755_v3  ;;  %v5783_v57 = vadd.f32 %v5782_v58, %v5658_v9  ;;  %v6548_v37 = vpop.permute.xlu1 %6547  ;;  %6215 = vst.msk [vmem:[#allocation5 + $0x208] sm:$0xff] %vm5836_vm4, %v6179_v23 }
 0x64e   : > { %v7262_v19 = vpop.permute.xlu2 %7261  ;;  %6646 = vst.msk [vmem:[#allocation5 + $0x190] sm:$0xff] %vm6635_vm6, %v6548_v37  ;;  %v7258_v12 = vpop.permute.xlu0 %7257  ;;  %v5536_v8 = vadd.f32 %v5535_v60, %v5411_v14  ;;  %v6898_v60 = vld [vmem:[#allocation4 + $0x5b] sm:$0xff] }
 0x64f   : > { %v5830_v15 = vmax.f32 %v5783_v57, 0.0  ;;  %7363 = vst.msk [vmem:[#allocation5 + $0xf8] sm:$0xff] %vm6635_vm6, %v7262_v19  ;;  %v6257_v57 = vld [vmem:[#allocation4 + $0x99] sm:$0xff] }
 0x650   : > { %7361 = vst.msk [vmem:[#allocation5 + $0xa8] sm:$0xff] %vm6635_vm6, %v7258_v12  ;;  %v5661_v25 = vadd.f32 %v12532_v32, %v5536_v8  ;;  %v12756_v12 = vpop.f32.mrf.mxu1  ;;  %v5295_v8 = vadd.f32 %v12442_v45, %v13480_v1 }
 0x651   : > { %v6124_v27 = vmul.f32 %v12106_v39, %v5830_v15  ;;  %7577 = vst.msk [vmem:[#allocation5 + $0xa8] sm:$0xff] %vm6852_vm7, %v12656_v17  ;;  %v13478_v17 = vld [vmem:[#allocation16_spill] sm:$0xff] }
 0x652   : > { %v7635_v28 = vld [vmem:[#allocation4 + $0xf6] sm:$0xff]  ;;  %v5289_v47 = vadd.f32 %v12442_v45, %v13478_v17  ;;  %6934 = vst.msk [vmem:[#allocation5 + $0x170] sm:$0xff] %vm5836_vm4, %v6898_v60  ;;  %v13481_v17 = vld [vmem:[#allocation42_spill] sm:$0xff] }
 0x653   : > { %6160 = vst.msk [vmem:[#allocation4 + $0x103] sm:$0xff] %vm5836_vm4, %v6124_v27  ;;  %v7758_v0 = vld [vmem:[#allocation5 + $0x3f8] sm:$0xff]  ;;  %7491 = vrot.lane.b32.xlu1 %v7406_v41, %s8620_s19  ;;  %v5416_v31 = vpop.f32.mrf.mxu3  ;;  %v6473_v15 = vld [vmem:[#allocation4 + $0x92] sm:$0xff] }
 0x654   : > { %7273 = vrot.lane.b32.xlu2 %v7189_v63, %s8618_s17  ;;  %7061 = vrot.lane.b32.xlu0 %v7189_v63, %s8619_s15  ;;  %v5785_v39 = vpop.f32.mrf.mxu2  ;;  %7671 = vst.msk [vmem:[#allocation5 + $0x420] sm:$0xff] %vm5836_vm4, %v7635_v28  ;;  %v5414_v44 = vadd.f32 %v5413_v33, %v5289_v47  ;;  %v5417_v9 = vadd.f32 %v5416_v31, %v5292_v51  ;;  %v7407_v33 = vld [vmem:[#allocation4 + $0x95] sm:$0xff] }
 0x655   : > { %8545 = vmatmul.msk.f32.gmra.mxu1 %vm5836_vm4, %v7758_v0  ;;  %v5786_v32 = vadd.f32 %v5785_v39, %v5661_v25  ;;  %v7260_v34 = vpop.permute.xlu1 %7259  ;;  %v6977_v31 = vld [vmem:[#allocation4 + $0x94] sm:$0xff] }
 0x656   : > { %v6763_v50 = vpop.permute.xlu2 %6762  ;;  %7362 = vst.msk [vmem:[#allocation5 + $0xd0] sm:$0xff] %vm6635_vm6, %v7260_v34  ;;  %v6759_v46 = vpop.permute.xlu0 %6758  ;;  %v5539_v22 = vadd.f32 %v5538_v53, %v5414_v44  ;;  %v5542_v13 = vadd.f32 %v5541_v36, %v5417_v9  ;;  %v13482_v36 = vld [vmem:[#allocation39_spill] sm:$0xff]  ;;  %v6902_v9 = vld [vmem:[#allocation4 + $0x7b] sm:$0xff] }
 0x657   : > { %v5831_v62 = vmax.f32 %v5786_v32, 0.0  ;;  %6862 = vst.msk [vmem:[#allocation5 + $0x168] sm:$0xff] %vm6852_vm7, %v6763_v50  ;;  %v5544_v53 = vpop.f32.mrf.mxu0  ;;  %v6474_v32 = vld [vmem:[#allocation4 + $0x9a] sm:$0xff] }
 0x658   : > { %7578 = vst.msk [vmem:[#allocation5 + $0xd0] sm:$0xff] %vm6852_vm7, %v12637_v48  ;;  %v7694_v6 = vld [vmem:[#allocation5 + $0xa8] sm:$0xff]  ;;  %v5664_v10 = vadd.f32 %v12561_v38, %v5539_v22  ;;  %v5667_v19 = vadd.f32 %v12589_v24, %v5542_v13  ;;  %v12780_v22 = vpop.f32.mrf.mxu1 }
 0x659   : > { %v6125_v54 = vmul.f32 %v12129_v4, %v5831_v62  ;;  %6860 = vst.msk [vmem:[#allocation5 + $0x118] sm:$0xff] %vm6852_vm7, %v6759_v46  ;;  %8090 = vmatmul.f32.gmra.mxu0 %v7694_v6  ;;  %v5298_v6 = vadd.f32 %v12442_v45, %v13482_v36 }
 0x65a   : > { %v7636_v11 = vld [vmem:[#allocation4 + $0xfe] sm:$0xff]  ;;  %6938 = vst.msk [vmem:[#allocation5 + $0x210] sm:$0xff] %vm5836_vm4, %v6902_v9 }
 0x65b   : > { %6161 = vst.msk [vmem:[#allocation4 + $0x10b] sm:$0xff] %vm5836_vm4, %v6125_v54  ;;  %v7761_v48 = vld [vmem:[#allocation5 + $0x420] sm:$0xff]  ;;  %7063 = vrot.lane.b32.xlu1 %v12734_v43, %s8619_s15  ;;  %v5419_v58 = vpop.f32.mrf.mxu3 }
 0x65c   : > { %6774 = vrot.lane.b32.xlu2 %v12694_v30, %s8620_s19  ;;  %6346 = vrot.lane.b32.xlu0 %v6256_v18, %s8619_s15  ;;  %v5788_v4 = vpop.f32.mrf.mxu2  ;;  %7672 = vst.msk [vmem:[#allocation5 + $0x448] sm:$0xff] %vm5836_vm4, %v7636_v11  ;;  %v5420_v63 = vadd.f32 %v5419_v58, %v5295_v8  ;;  %v7409_v8 = vld [vmem:[#allocation4 + $0xa5] sm:$0xff] }
 0x65d   : > { %8546 = vmatmul.msk.f32.gmra.mxu1 %vm5836_vm4, %v7761_v48  ;;  %v5789_v38 = vadd.f32 %v5788_v4, %v5664_v10  ;;  %v6761_v20 = vpop.permute.xlu1 %6760 }
 0x65e   : > { %v12749_v2 = vpop.permute.xlu2 %7481  ;;  %6861 = vst.msk [vmem:[#allocation5 + $0x140] sm:$0xff] %vm6852_vm7, %v6761_v20  ;;  %v7478_v30 = vpop.permute.xlu0 %7477  ;;  %v5545_v39 = vadd.f32 %v5544_v53, %v5420_v63  ;;  %v6475_v53 = vld [vmem:[#allocation4 + $0xa2] sm:$0xff] }
 0x65f   : > { %v5832_v3 = vmax.f32 %v5789_v38, 0.0  ;;  %7579 = vst.msk [vmem:[#allocation5 + $0xf8] sm:$0xff] %vm6852_vm7, %v7478_v30  ;;  %v7697_v59 = vld [vmem:[#allocation5 + $0xd0] sm:$0xff]  ;;  %v5547_v62 = vpop.f32.mrf.mxu0  ;;  %v6258_v38 = vld [vmem:[#allocation4 + $0xa1] sm:$0xff] }
 0x660   : > { %v7702_v7 = vld [vmem:[#allocation5 + $0x118] sm:$0xff]  ;;  %v5670_v46 = vadd.f32 %v12618_v26, %v5545_v39 }
 0x661   : > { %v6126_v49 = vmul.f32 %v12168_v35, %v5832_v3  ;;  %7974 = vmatmul.f32.gmra.mxu3 %v7702_v7  ;;  %8093 = vmatmul.f32.gmra.mxu0 %v7697_v59  ;;  %v12795_v3 = vpop.f32.mrf.mxu1  ;;  %v6900_v7 = vld [vmem:[#allocation4 + $0x6b] sm:$0xff]  ;;  %v7192_v63 = vld [vmem:[#allocation4 + $0x9c] sm:$0xff] }
 0x662   : > { %v7637_v37 = vld [vmem:[#allocation4 + $0x106] sm:$0xff]  ;;  %6936 = vst.msk [vmem:[#allocation5 + $0x1c0] sm:$0xff] %vm5836_vm4, %v6900_v7 }
 0x663   : > { %6162 = vst.msk [vmem:[#allocation4 + $0x113] sm:$0xff] %vm5836_vm4, %v6126_v49  ;;  %v7764_v14 = vld [vmem:[#allocation5 + $0x448] sm:$0xff]  ;;  %6348 = vrot.lane.b32.xlu1 %v6257_v57, %s8619_s15  ;;  %v5422_v50 = vpop.f32.mrf.mxu3  ;;  %v7408_v57 = vld [vmem:[#allocation4 + $0x9d] sm:$0xff] }
 0x664   : > { %7493 = vrot.lane.b32.xlu2 %v7407_v33, %s8620_s19  ;;  %6563 = vrot.lane.b32.xlu0 %v6473_v15, %s8618_s17  ;;  %v5791_v35 = vpop.f32.mrf.mxu2  ;;  %7673 = vst.msk [vmem:[#allocation5 + $0x470] sm:$0xff] %vm5836_vm4, %v7637_v37  ;;  %v5423_v10 = vadd.f32 %v5422_v50, %v5298_v6  ;;  %v6183_v37 = vld [vmem:[#allocation4 + $0x88] sm:$0xff]  ;;  %v12813_v33 = vld [vmem:[%s13326_s9] ss:$0 sm:$0xff] }
 0x665   : > { %8547 = vmatmul.msk.f32.gmra.mxu1 %vm5836_vm4, %v7764_v14  ;;  %v5792_v24 = vadd.f32 %v5791_v35, %v5667_v19  ;;  %v12766_v27 = vpop.permute.xlu1 %7479  ;;  %v7705_v25 = vld [vmem:[#allocation5 + $0x140] sm:$0xff]  ;;  %6219 = vst.msk [vmem:[#allocation5 + $0x2a8] sm:$0xff] %vm5836_vm4, %v6183_v37 }
 0x666   : > { %v7054_v41 = vpop.permute.xlu2 %7053  ;;  %v7050_v28 = vpop.permute.xlu0 %7049  ;;  %v7700_v0 = vld [vmem:[#allocation5 + $0xf8] sm:$0xff]  ;;  %v5548_v18 = vadd.f32 %v5547_v62, %v5423_v10 }
 0x667   : > { %v5833_v16 = vmax.f32 %v5792_v24, 0.0  ;;  %7151 = vst.msk [vmem:[#allocation5 + $0x198] sm:$0xff] %vm6418_vm5, %v7054_v41  ;;  %v6182_v62 = vld [vmem:[#allocation4 + $0x80] sm:$0xff] }
 0x668   : > { %7149 = vst.msk [vmem:[#allocation5 + $0x148] sm:$0xff] %vm6418_vm5, %v7050_v28  ;;  %v5673_v5 = vadd.f32 %v12646_v52, %v5548_v18  ;;  %v6181_v28 = vld [vmem:[#allocation4 + $0x78] sm:$0xff] }
 0x669   : > { %v6127_v47 = vmul.f32 %v13481_v17, %v5833_v16  ;;  %7977 = vmatmul.f32.gmra.mxu3 %v7705_v25  ;;  %8096 = vmatmul.f32.gmra.mxu0 %v7700_v0  ;;  %v12817_v1 = vpop.f32.mrf.mxu1  ;;  %6217 = vst.msk [vmem:[#allocation5 + $0x258] sm:$0xff] %vm5836_vm4, %v6181_v28 }
 0x66a   : > { %v7638_v34 = vld [vmem:[#allocation4 + $0x10e] sm:$0xff]  ;;  %6218 = vst.msk [vmem:[#allocation5 + $0x280] sm:$0xff] %vm5836_vm4, %v6182_v62  ;;  %v7412_v62 = vld [vmem:[#allocation4 + $0xbd] sm:$0xff] }
 0x66b   : > { %6163 = vst.msk [vmem:[#allocation4 + $0x11b] sm:$0xff] %vm5836_vm4, %v6127_v47  ;;  %v7767_v44 = vld [vmem:[#allocation5 + $0x470] sm:$0xff]  ;;  %6565 = vrot.lane.b32.xlu1 %v6474_v32, %s8618_s17  ;;  %v7954_v35 = vpop.f32.mrf.mxu3 }
 0x66c   : > { %7065 = vrot.lane.b32.xlu2 %v6977_v31, %s8619_s15  ;;  %7275 = vrot.lane.b32.xlu0 %v12734_v43, %s8618_s17  ;;  %v5794_v60 = vpop.f32.mrf.mxu2  ;;  %7674 = vst.msk [vmem:[#allocation5 + $0x498] sm:$0xff] %vm5836_vm4, %v7638_v34  ;;  %v7708_v43 = vld [vmem:[#allocation5 + $0x168] sm:$0xff]  ;;  %v7955_v25 = vadd.f32 %v12813_v33, %v7954_v35 }
 0x66d   : > { %8548 = vmatmul.msk.f32.gmra.mxu1 %vm5836_vm4, %v7767_v44  ;;  %v5795_v26 = vadd.f32 %v5794_v60, %v5670_v46  ;;  %v7052_v54 = vpop.permute.xlu1 %7051  ;;  %v6979_v46 = vld [vmem:[#allocation4 + $0xa4] sm:$0xff] }
 0x66e   : > { %v6339_v11 = vpop.permute.xlu2 %6338  ;;  %7150 = vst.msk [vmem:[#allocation5 + $0x170] sm:$0xff] %vm6418_vm5, %v7052_v54  ;;  %v6335_v61 = vpop.permute.xlu0 %6334  ;;  %v7410_v54 = vld [vmem:[#allocation4 + $0xad] sm:$0xff] }
 0x66f   : > { %v5834_v48 = vmax.f32 %v5795_v26, 0.0  ;;  %6433 = vst.msk [vmem:[#allocation5 + $0x230] sm:$0xff] %vm6418_vm5, %v6339_v11  ;;  %v6260_v26 = vld [vmem:[#allocation4 + $0xb1] sm:$0xff] }
 0x670   : > { %6431 = vst.msk [vmem:[#allocation5 + $0x1e0] sm:$0xff] %vm6418_vm5, %v6335_v61  ;;  %v6476_v11 = vld [vmem:[#allocation4 + $0xaa] sm:$0xff] }
 0x671   : > { %v6128_v45 = vmul.f32 %v12171_v40, %v5834_v48  ;;  %7980 = vmatmul.f32.gmra.mxu3 %v7708_v43  ;;  %v12845_v44 = vpop.f32.mrf.mxu1 }
 0x672   : > { %v7639_v4 = vld [vmem:[#allocation4 + $0x116] sm:$0xff] }
 0x673   : > { %6164 = vst.msk [vmem:[#allocation4 + $0x123] sm:$0xff] %vm5836_vm4, %v6128_v45  ;;  %v7770_v51 = vld [vmem:[#allocation5 + $0x498] sm:$0xff]  ;;  %7277 = vrot.lane.b32.xlu1 %v6977_v31, %s8618_s17  ;;  %v6259_v31 = vld [vmem:[#allocation4 + $0xa9] sm:$0xff] }
 0x674   : > { %6350 = vrot.lane.b32.xlu2 %v6258_v38, %s8619_s15  ;;  %6776 = vrot.lane.b32.xlu0 %v6473_v15, %s8620_s19  ;;  %v5797_v20 = vpop.f32.mrf.mxu2  ;;  %7675 = vst.msk [vmem:[#allocation5 + $0x4c0] sm:$0xff] %vm5836_vm4, %v7639_v4  ;;  %v6901_v15 = vld [vmem:[#allocation4 + $0x73] sm:$0xff] }
 0x675   : > { %8549 = vmatmul.msk.f32.gmra.mxu1 %vm5836_vm4, %v7770_v51  ;;  %v5798_v40 = vadd.f32 %v5797_v20, %v5673_v5  ;;  %v6337_v23 = vpop.permute.xlu1 %6336  ;;  %6937 = vst.msk [vmem:[#allocation5 + $0x1e8] sm:$0xff] %vm5836_vm4, %v6901_v15  ;;  %v6477_v5 = vld [vmem:[#allocation4 + $0xb2] sm:$0xff]  ;;  %v6186_v15 = vld [vmem:[#allocation4 + $0xa0] sm:$0xff] }
 0x676   : > { %v6556_v30 = vpop.permute.xlu2 %6555  ;;  %6432 = vst.msk [vmem:[#allocation5 + $0x208] sm:$0xff] %vm6418_vm5, %v6337_v23  ;;  %v6552_v52 = vpop.permute.xlu0 %6551  ;;  %v6980_v51 = vld [vmem:[#allocation4 + $0xac] sm:$0xff] }
 0x677   : > { %v5835_v59 = vmax.f32 %v5798_v40, 0.0  ;;  %6650 = vst.msk [vmem:[#allocation5 + $0x230] sm:$0xff] %vm6635_vm6, %v6556_v30 }
 0x678   : > { %6648 = vst.msk [vmem:[#allocation5 + $0x1e0] sm:$0xff] %vm6635_vm6, %v6552_v52  ;;  %v6261_v52 = vld [vmem:[#allocation4 + $0xb9] sm:$0xff] }
 0x679   : > { %v6129_v58 = vmul.f32 %v12223_v29, %v5835_v59  ;;  %v12859_v10 = vpop.f32.mrf.mxu1  ;;  %6222 = vst.msk [vmem:[#allocation5 + $0x320] sm:$0xff] %vm5836_vm4, %v6186_v15 }
 0x67a   : > { %v7640_v13 = vld [vmem:[#allocation4 + $0x11e] sm:$0xff] }
 0x67b   : > { %6165 = vst.msk [vmem:[#allocation4 + $0x12b] sm:$0xff] %vm5836_vm4, %v6129_v58  ;;  %v7773_v49 = vld [vmem:[#allocation5 + $0x4c0] sm:$0xff]  ;;  %6778 = vrot.lane.b32.xlu1 %v6474_v32, %s8620_s19 }
 0x67c   : > { %6567 = vrot.lane.b32.xlu2 %v6475_v53, %s8618_s17  ;;  %7495 = vrot.lane.b32.xlu0 %v7408_v57, %s8620_s19  ;;  %7676 = vst.msk [vmem:[#allocation5 + $0x4e8] sm:$0xff] %vm5836_vm4, %v7640_v13  ;;  %v6905_v13 = vld [vmem:[#allocation4 + $0x93] sm:$0xff]  ;;  %v6903_v57 = vld [vmem:[#allocation4 + $0x83] sm:$0xff] }
 0x67d   : > { %8550 = vmatmul.msk.f32.gmra.mxu1 %vm5836_vm4, %v7773_v49  ;;  %v6554_v29 = vpop.permute.xlu1 %6553  ;;  %6941 = vst.msk [vmem:[#allocation5 + $0x288] sm:$0xff] %vm5836_vm4, %v6905_v13 }
 0x67e   : > { %v7268_v19 = vpop.permute.xlu2 %7267  ;;  %6649 = vst.msk [vmem:[#allocation5 + $0x208] sm:$0xff] %vm6635_vm6, %v6554_v29  ;;  %v7264_v14 = vpop.permute.xlu0 %7263 }
 0x67f   : > { %7366 = vst.msk [vmem:[#allocation5 + $0x170] sm:$0xff] %vm6635_vm6, %v7268_v19  ;;  %v6478_v19 = vld [vmem:[#allocation4 + $0xba] sm:$0xff] }
 0x680   : > { %7364 = vst.msk [vmem:[#allocation5 + $0x120] sm:$0xff] %vm6635_vm6, %v7264_v14  ;;  %v7411_v14 = vld [vmem:[#allocation4 + $0xb5] sm:$0xff] }
 0x681   : > { %7580 = vst.msk [vmem:[#allocation5 + $0x120] sm:$0xff] %vm6852_vm7, %v12766_v27 }
 0x682   : > { %v7641_v24 = vld [vmem:[#allocation4 + $0x126] sm:$0xff]  ;;  %v7642_v41 = vld [vmem:[#allocation4 + $0x12e] sm:$0xff]  ;;  %v7957_v38 = vpop.f32.mrf.mxu3  ;;  %6939 = vst.msk [vmem:[#allocation5 + $0x238] sm:$0xff] %vm5836_vm4, %v6903_v57 }
 0x683   : > { %v7776_v0 = vld [vmem:[#allocation5 + $0x4e8] sm:$0xff]  ;;  %7497 = vrot.lane.b32.xlu1 %v7409_v8, %s8620_s19  ;;  %7677 = vst.msk [vmem:[#allocation5 + $0x510] sm:$0xff] %vm5836_vm4, %v7641_v24  ;;  %v7958_v9 = vadd.f32 %v12813_v33, %v7957_v38  ;;  %v7413_v38 = vld [vmem:[#allocation4 + $0xc5] sm:$0xff] }
 0x684   : > { %v8079_v16 = vpop.f32.mrf.mxu0  ;;  %7279 = vrot.lane.b32.xlu2 %v7192_v63, %s8618_s17  ;;  %7067 = vrot.lane.b32.xlu0 %v7192_v63, %s8619_s15  ;;  %7678 = vst.msk [vmem:[#allocation5 + $0x538] sm:$0xff] %vm5836_vm4, %v7642_v41  ;;  %v6184_v63 = vld [vmem:[#allocation4 + $0x90] sm:$0xff] }
 0x685   : > { %v8080_v27 = vadd.f32 %v8079_v16, %v7955_v25  ;;  %8551 = vmatmul.msk.f32.gmra.mxu1 %vm5836_vm4, %v7776_v0  ;;  %v7266_v39 = vpop.permute.xlu1 %7265  ;;  %v6904_v25 = vld [vmem:[#allocation4 + $0x8b] sm:$0xff]  ;;  %6220 = vst.msk [vmem:[#allocation5 + $0x2d0] sm:$0xff] %vm5836_vm4, %v6184_v63 }
 0x686   : > { %v6769_v17 = vpop.permute.xlu2 %6768  ;;  %7365 = vst.msk [vmem:[#allocation5 + $0x148] sm:$0xff] %vm6635_vm6, %v7266_v39  ;;  %v6765_v47 = vpop.permute.xlu0 %6764  ;;  %v7195_v39 = vld [vmem:[#allocation4 + $0xb4] sm:$0xff] }
 0x687   : > { %v8205_v32 = vadd.f32 %v12664_v56, %v8080_v27  ;;  %6865 = vst.msk [vmem:[#allocation5 + $0x1e0] sm:$0xff] %vm6852_vm7, %v6769_v17  ;;  %v6479_v27 = vld [vmem:[#allocation4 + $0xc2] sm:$0xff] }
 0x688   : > { %7581 = vst.msk [vmem:[#allocation5 + $0x148] sm:$0xff] %vm6852_vm7, %v12749_v2  ;;  %v7703_v34 = vld [vmem:[#allocation5 + $0x120] sm:$0xff] }
 0x689   : > { %8313 = vst.msk [vmem:[%s12835_s28] sm:$0xff] %vm8312_vm8, %v8205_v32  ;;  %8099 = vmatmul.f32.gmra.mxu0 %v7703_v34 }
 0x68a   : > { %6863 = vst.msk [vmem:[#allocation5 + $0x190] sm:$0xff] %vm6852_vm7, %v6765_v47  ;;  %v7779_v50 = vld [vmem:[#allocation5 + $0x510] sm:$0xff]  ;;  %v7960_v37 = vpop.f32.mrf.mxu3 }
 0x68b   : > { %7069 = vrot.lane.b32.xlu1 %v6979_v46, %s8619_s15  ;;  %v7782_v61 = vld [vmem:[#allocation5 + $0x538] sm:$0xff]  ;;  %v7961_v35 = vadd.f32 %v12813_v33, %v7960_v37  ;;  %6940 = vst.msk [vmem:[#allocation5 + $0x260] sm:$0xff] %vm5836_vm4, %v6904_v25  ;;  %v6188_v37 = vld [vmem:[#allocation4 + $0xb0] sm:$0xff] }
 0x68c   : > { %6780 = vrot.lane.b32.xlu2 %v6475_v53, %s8620_s19  ;;  %6352 = vrot.lane.b32.xlu0 %v6259_v31, %s8619_s15  ;;  %6224 = vst.msk [vmem:[#allocation5 + $0x370] sm:$0xff] %vm5836_vm4, %v6188_v37 }
 0x68d   : > { %8552 = vmatmul.msk.f32.gmra.mxu1 %vm5836_vm4, %v7779_v50  ;;  %v6767_v56 = vpop.permute.xlu1 %6766 }
 0x68e   : > { %v12852_v2 = vpop.permute.xlu2 %7487  ;;  %6864 = vst.msk [vmem:[#allocation5 + $0x1b8] sm:$0xff] %vm6852_vm7, %v6767_v56  ;;  %v7484_v60 = vpop.permute.xlu0 %7483  ;;  %v7717_v30 = vld [vmem:[#allocation5 + $0x1e0] sm:$0xff] }
 0x68f   : > { %7582 = vst.msk [vmem:[#allocation5 + $0x170] sm:$0xff] %vm6852_vm7, %v7484_v60  ;;  %v7706_v36 = vld [vmem:[#allocation5 + $0x148] sm:$0xff]  ;;  %v6262_v56 = vld [vmem:[#allocation4 + $0xc1] sm:$0xff]  ;;  %v6185_v60 = vld [vmem:[#allocation4 + $0x98] sm:$0xff] }
 0x690   : > { %6221 = vst.msk [vmem:[#allocation5 + $0x2f8] sm:$0xff] %vm5836_vm4, %v6185_v60  ;;  %v6190_v60 = vld [vmem:[#allocation4 + $0xc0] sm:$0xff] }
 0x691   : > { %v7711_v6 = vld [vmem:[#allocation5 + $0x190] sm:$0xff]  ;;  %8102 = vmatmul.f32.gmra.mxu0 %v7706_v36  ;;  %6226 = vst.msk [vmem:[#allocation5 + $0x3c0] sm:$0xff] %vm5836_vm4, %v6190_v60 }
 0x692   : > { %7983 = vmatmul.f32.gmra.mxu3 %v7711_v6  ;;  %v7963_v16 = vpop.f32.mrf.mxu3 }
 0x693   : > { %6354 = vrot.lane.b32.xlu1 %v6260_v26, %s8619_s15 }
 0x694   : > { %7499 = vrot.lane.b32.xlu2 %v7410_v54, %s8620_s19  ;;  %6569 = vrot.lane.b32.xlu0 %v6476_v11, %s8618_s17 }
 0x695   : > { %8553 = vmatmul.msk.f32.gmra.mxu1 %vm5836_vm4, %v7782_v61  ;;  %v7486_v48 = vpop.permute.xlu1 %7485  ;;  %v7714_v4 = vld [vmem:[#allocation5 + $0x1b8] sm:$0xff]  ;;  %v6480_v61 = vld [vmem:[#allocation4 + $0xca] sm:$0xff] }
 0x696   : > { %v7060_v43 = vpop.permute.xlu2 %7059  ;;  %v7056_v18 = vpop.permute.xlu0 %7055  ;;  %v7709_v45 = vld [vmem:[#allocation5 + $0x170] sm:$0xff] }
 0x697   : > { %7154 = vst.msk [vmem:[#allocation5 + $0x210] sm:$0xff] %vm6418_vm5, %v7060_v43 }
 0x698   : > { %7152 = vst.msk [vmem:[#allocation5 + $0x1c0] sm:$0xff] %vm6418_vm5, %v7056_v18 }
 0x699   : > { %8105 = vmatmul.f32.gmra.mxu0 %v7709_v45  ;;  %v6907_v45 = vld [vmem:[#allocation4 + $0xa3] sm:$0xff] }
 0x69a   : > { %7986 = vmatmul.f32.gmra.mxu3 %v7714_v4  ;;  %6943 = vst.msk [vmem:[#allocation5 + $0x2d8] sm:$0xff] %vm5836_vm4, %v6907_v45 }
 0x69b   : > { %6571 = vrot.lane.b32.xlu1 %v6477_v5, %s8618_s17 }
 0x69c   : > { %7071 = vrot.lane.b32.xlu2 %v6980_v51, %s8619_s15  ;;  %7281 = vrot.lane.b32.xlu0 %v6979_v46, %s8618_s17 }
 0x69d   : > { %v7058_v20 = vpop.permute.xlu1 %7057 }
 0x69e   : > { %v6345_v40 = vpop.permute.xlu2 %6344  ;;  %7153 = vst.msk [vmem:[#allocation5 + $0x1e8] sm:$0xff] %vm6418_vm5, %v7058_v20  ;;  %v6341_v23 = vpop.permute.xlu0 %6340 }
 0x69f   : > { %6436 = vst.msk [vmem:[#allocation5 + $0x2a8] sm:$0xff] %vm6418_vm5, %v6345_v40 }
 0x6a0   : > { %6434 = vst.msk [vmem:[#allocation5 + $0x258] sm:$0xff] %vm6418_vm5, %v6341_v23 }
 0x6a2   : > { %7989 = vmatmul.f32.gmra.mxu3 %v7717_v30  ;;  %v6908_v30 = vld [vmem:[#allocation4 + $0xab] sm:$0xff] }
 0x6a3   : > { %7283 = vrot.lane.b32.xlu1 %v6980_v51, %s8618_s17  ;;  %v6263_v51 = vld [vmem:[#allocation4 + $0xc9] sm:$0xff]  ;;  %6944 = vst.msk [vmem:[#allocation5 + $0x300] sm:$0xff] %vm5836_vm4, %v6908_v30  ;;  %v6986_v30 = vld [vmem:[#allocation4 + $0xdc] sm:$0xff] }
 0x6a4   : > { %6356 = vrot.lane.b32.xlu2 %v6261_v52, %s8619_s15  ;;  %6782 = vrot.lane.b32.xlu0 %v6476_v11, %s8620_s19  ;;  %v6982_v11 = vld [vmem:[#allocation4 + $0xbc] sm:$0xff] }
 0x6a5   : > { %v6343_v59 = vpop.permute.xlu1 %6342 }
 0x6a6   : > { %v8082_v7 = vpop.f32.mrf.mxu0  ;;  %v6562_v58 = vpop.permute.xlu2 %6561  ;;  %6435 = vst.msk [vmem:[#allocation5 + $0x280] sm:$0xff] %vm6418_vm5, %v6343_v59 }
 0x6a7   : > { %v8083_v49 = vadd.f32 %v8082_v7, %v7958_v9  ;;  %6653 = vst.msk [vmem:[#allocation5 + $0x2a8] sm:$0xff] %vm6635_vm6, %v6562_v58  ;;  %v6558_v53 = vpop.permute.xlu0 %6557  ;;  %v6187_v9 = vld [vmem:[#allocation4 + $0xa8] sm:$0xff] }
 0x6a8   : > { %6651 = vst.msk [vmem:[#allocation5 + $0x258] sm:$0xff] %vm6635_vm6, %v6558_v53  ;;  %v6983_v7 = vld [vmem:[#allocation4 + $0xc4] sm:$0xff]  ;;  %v7414_v58 = vld [vmem:[#allocation4 + $0xcd] sm:$0xff] }
 0x6a9   : > { %v8208_v29 = vadd.f32 %v12687_v42, %v8083_v49  ;;  %6223 = vst.msk [vmem:[#allocation5 + $0x348] sm:$0xff] %vm5836_vm4, %v6187_v9 }
 0x6ab   : > { %8314 = vst.msk [vmem:[%s12835_s28 + $0x8] sm:$0xff] %vm8312_vm8, %v8208_v29  ;;  %6784 = vrot.lane.b32.xlu1 %v6477_v5, %s8620_s19 }
 0x6ac   : > { %6573 = vrot.lane.b32.xlu2 %v6478_v19, %s8618_s17  ;;  %7501 = vrot.lane.b32.xlu0 %v7411_v14, %s8620_s19  ;;  %v6909_v14 = vld [vmem:[#allocation4 + $0xb3] sm:$0xff] }
 0x6ad   : > { %v6560_v8 = vpop.permute.xlu1 %6559  ;;  %6945 = vst.msk [vmem:[#allocation5 + $0x328] sm:$0xff] %vm5836_vm4, %v6909_v14 }
 0x6ae   : > { %v8085_v42 = vpop.f32.mrf.mxu0  ;;  %v7274_v24 = vpop.permute.xlu2 %7273  ;;  %6652 = vst.msk [vmem:[#allocation5 + $0x280] sm:$0xff] %vm6635_vm6, %v6560_v8  ;;  %v6264_v8 = vld [vmem:[#allocation4 + $0xd1] sm:$0xff] }
 0x6af   : > { %v8086_v41 = vadd.f32 %v8085_v42, %v7961_v35  ;;  %7369 = vst.msk [vmem:[#allocation5 + $0x1e8] sm:$0xff] %vm6635_vm6, %v7274_v24  ;;  %v7270_v28 = vpop.permute.xlu0 %7269  ;;  %v6984_v42 = vld [vmem:[#allocation4 + $0xcc] sm:$0xff]  ;;  %v6189_v24 = vld [vmem:[#allocation4 + $0xb8] sm:$0xff] }
 0x6b0   : > { %7367 = vst.msk [vmem:[#allocation5 + $0x198] sm:$0xff] %vm6635_vm6, %v7270_v28 }
 0x6b1   : > { %v8211_v0 = vadd.f32 %v12708_v21, %v8086_v41  ;;  %7583 = vst.msk [vmem:[#allocation5 + $0x198] sm:$0xff] %vm6852_vm7, %v7486_v48  ;;  %v7964_v21 = vadd.f32 %v12813_v33, %v7963_v16  ;;  %v6910_v16 = vld [vmem:[#allocation4 + $0xbb] sm:$0xff] }
 0x6b2   : > { %6225 = vst.msk [vmem:[#allocation5 + $0x398] sm:$0xff] %vm5836_vm4, %v6189_v24 }
 0x6b3   : > { %8315 = vst.msk [vmem:[%s12835_s28 + $0x10] sm:$0xff] %vm8312_vm8, %v8211_v0  ;;  %6575 = vrot.lane.b32.xlu1 %v6479_v27, %s8618_s17 }
 0x6b4   : > { %7285 = vrot.lane.b32.xlu2 %v7195_v39, %s8618_s17  ;;  %7073 = vrot.lane.b32.xlu0 %v7195_v39, %s8619_s15  ;;  %v7966_v40 = vpop.f32.mrf.mxu3  ;;  %6946 = vst.msk [vmem:[#allocation5 + $0x350] sm:$0xff] %vm5836_vm4, %v6910_v16 }
 0x6b5   : > { %v7272_v17 = vpop.permute.xlu1 %7271  ;;  %v7967_v13 = vadd.f32 %v12813_v33, %v7966_v40  ;;  %v6266_v40 = vld [vmem:[#allocation4 + $0xe1] sm:$0xff] }
 0x6b6   : > { %v8088_v47 = vpop.f32.mrf.mxu0  ;;  %v6775_v32 = vpop.permute.xlu2 %6774  ;;  %7368 = vst.msk [vmem:[#allocation5 + $0x1c0] sm:$0xff] %vm6635_vm6, %v7272_v17  ;;  %v6265_v17 = vld [vmem:[#allocation4 + $0xd9] sm:$0xff] }
 0x6b7   : > { %v8089_v34 = vadd.f32 %v8088_v47, %v7964_v21  ;;  %6868 = vst.msk [vmem:[#allocation5 + $0x258] sm:$0xff] %vm6852_vm7, %v6775_v32  ;;  %v6771_v50 = vpop.permute.xlu0 %6770  ;;  %v6481_v21 = vld [vmem:[#allocation4 + $0xd2] sm:$0xff] }
 0x6b8   : > { %7584 = vst.msk [vmem:[#allocation5 + $0x1c0] sm:$0xff] %vm6852_vm7, %v12852_v2  ;;  %v7712_v46 = vld [vmem:[#allocation5 + $0x198] sm:$0xff] }
 0x6b9   : > { %v8214_v31 = vadd.f32 %v12730_v55, %v8089_v34  ;;  %6866 = vst.msk [vmem:[#allocation5 + $0x208] sm:$0xff] %vm6852_vm7, %v6771_v50  ;;  %8108 = vmatmul.f32.gmra.mxu0 %v7712_v46  ;;  %v6906_v55 = vld [vmem:[#allocation4 + $0x9b] sm:$0xff] }
 0x6ba   : > { %6942 = vst.msk [vmem:[#allocation5 + $0x2b0] sm:$0xff] %vm5836_vm4, %v6906_v55  ;;  %v7199_v55 = vld [vmem:[#allocation4 + $0xd4] sm:$0xff] }
 0x6bb   : > { %8316 = vst.msk [vmem:[%s12835_s28 + $0x18] sm:$0xff] %vm8312_vm8, %v8214_v31  ;;  %7503 = vrot.lane.b32.xlu1 %v7412_v62, %s8620_s19  ;;  %v6911_v31 = vld [vmem:[#allocation4 + $0xc3] sm:$0xff] }
 0x6bc   : > { %6786 = vrot.lane.b32.xlu2 %v6478_v19, %s8620_s19  ;;  %6358 = vrot.lane.b32.xlu0 %v6262_v56, %s8619_s15  ;;  %v7969_v15 = vpop.f32.mrf.mxu3  ;;  %6947 = vst.msk [vmem:[#allocation5 + $0x378] sm:$0xff] %vm5836_vm4, %v6911_v31 }
 0x6bd   : > { %v6773_v2 = vpop.permute.xlu1 %6772  ;;  %v7970_v41 = vadd.f32 %v12813_v33, %v7969_v15  ;;  %v6915_v15 = vld [vmem:[#allocation4 + $0xe3] sm:$0xff] }
 0x6be   : > { %v12912_v36 = vpop.permute.xlu2 %7493  ;;  %6867 = vst.msk [vmem:[#allocation5 + $0x230] sm:$0xff] %vm6852_vm7, %v6773_v2  ;;  %v7726_v59 = vld [vmem:[#allocation5 + $0x258] sm:$0xff]  ;;  %v7415_v2 = vld [vmem:[#allocation4 + $0xd5] sm:$0xff] }
 0x6bf   : > { %v7490_v6 = vpop.permute.xlu0 %7489  ;;  %v7715_v26 = vld [vmem:[#allocation5 + $0x1c0] sm:$0xff]  ;;  %6951 = vst.msk [vmem:[#allocation5 + $0x418] sm:$0xff] %vm5836_vm4, %v6915_v15 }
 0x6c0   : > { %7585 = vst.msk [vmem:[#allocation5 + $0x1e8] sm:$0xff] %vm6852_vm7, %v7490_v6  ;;  %v7720_v54 = vld [vmem:[#allocation5 + $0x208] sm:$0xff]  ;;  %v6191_v6 = vld [vmem:[#allocation4 + $0xc8] sm:$0xff] }
 0x6c1   : > { %7992 = vmatmul.f32.gmra.mxu3 %v7720_v54  ;;  %8111 = vmatmul.f32.gmra.mxu0 %v7715_v26  ;;  %v6912_v26 = vld [vmem:[#allocation4 + $0xcb] sm:$0xff]  ;;  %6227 = vst.msk [vmem:[#allocation5 + $0x3e8] sm:$0xff] %vm5836_vm4, %v6191_v6 }
 0x6c2   : > { %6948 = vst.msk [vmem:[#allocation5 + $0x3a0] sm:$0xff] %vm5836_vm4, %v6912_v26  ;;  %v7418_v6 = vld [vmem:[#allocation4 + $0xed] sm:$0xff] }
 0x6c3   : > { %7075 = vrot.lane.b32.xlu1 %v6982_v11, %s8619_s15  ;;  %v13049_v26 = vld [vmem:[#allocation4 + $0xf4] sm:$0xff] }
 0x6c4   : > { %6577 = vrot.lane.b32.xlu2 %v6480_v61, %s8618_s17  ;;  %7287 = vrot.lane.b32.xlu0 %v6982_v11, %s8618_s17  ;;  %v7972_v39 = vpop.f32.mrf.mxu3 }
 0x6c5   : > { %v12920_v48 = vpop.permute.xlu1 %7491  ;;  %v7723_v18 = vld [vmem:[#allocation5 + $0x230] sm:$0xff]  ;;  %v7973_v47 = vadd.f32 %v12813_v33, %v7972_v39 }
 0x6c6   : > { %v7066_v43 = vpop.permute.xlu2 %7065 }
 0x6c7   : > { %7157 = vst.msk [vmem:[#allocation5 + $0x288] sm:$0xff] %vm6418_vm5, %v7066_v43  ;;  %v7062_v4 = vpop.permute.xlu0 %7061  ;;  %v7718_v5 = vld [vmem:[#allocation5 + $0x1e8] sm:$0xff]  ;;  %v12983_v43 = vld [vmem:[#allocation4 + $0xda] sm:$0xff] }
 0x6c8   : > { %7155 = vst.msk [vmem:[#allocation5 + $0x238] sm:$0xff] %vm6418_vm5, %v7062_v4 }
 0x6c9   : > { %7995 = vmatmul.f32.gmra.mxu3 %v7723_v18  ;;  %8114 = vmatmul.f32.gmra.mxu0 %v7718_v5  ;;  %v6192_v5 = vld [vmem:[#allocation4 + $0xd0] sm:$0xff] }
 0x6ca   : > { %6228 = vst.msk [vmem:[#allocation5 + $0x410] sm:$0xff] %vm5836_vm4, %v6192_v5 }
 0x6cb   : > { %6360 = vrot.lane.b32.xlu1 %v6263_v51, %s8619_s15 }
 0x6cc   : > { %7505 = vrot.lane.b32.xlu2 %v7413_v38, %s8620_s19  ;;  %6788 = vrot.lane.b32.xlu0 %v6479_v27, %s8620_s19 }
 0x6cd   : > { %v7064_v20 = vpop.permute.xlu1 %7063 }
 0x6ce   : > { %v6351_v23 = vpop.permute.xlu2 %6350  ;;  %7156 = vst.msk [vmem:[#allocation5 + $0x260] sm:$0xff] %vm6418_vm5, %v7064_v20  ;;  %v6913_v20 = vld [vmem:[#allocation4 + $0xd3] sm:$0xff] }
 0x6cf   : > { %6439 = vst.msk [vmem:[#allocation5 + $0x320] sm:$0xff] %vm6418_vm5, %v6351_v23  ;;  %v6347_v52 = vpop.permute.xlu0 %6346  ;;  %v12994_v23 = vld [vmem:[#allocation4 + $0xe2] sm:$0xff] }
 0x6d0   : > { %6437 = vst.msk [vmem:[#allocation5 + $0x2d0] sm:$0xff] %vm6418_vm5, %v6347_v52 }
 0x6d1   : > { %7998 = vmatmul.f32.gmra.mxu3 %v7726_v59  ;;  %6949 = vst.msk [vmem:[#allocation5 + $0x3c8] sm:$0xff] %vm5836_vm4, %v6913_v20  ;;  %v6919_v20 = vld [vmem:[#allocation4 + $0x103] sm:$0xff] }
 0x6d2   : > { %6955 = vst.msk [vmem:[#allocation5 + $0x4b8] sm:$0xff] %vm5836_vm4, %v6919_v20 }
 0x6d3   : > { %7289 = vrot.lane.b32.xlu1 %v6983_v7, %s8618_s17 }
 0x6d4   : > { %7077 = vrot.lane.b32.xlu2 %v6983_v7, %s8619_s15  ;;  %7507 = vrot.lane.b32.xlu0 %v7414_v58, %s8620_s19  ;;  %v6193_v58 = vld [vmem:[#allocation4 + $0xd8] sm:$0xff] }
 0x6d5   : > { %v6349_v49 = vpop.permute.xlu1 %6348  ;;  %6229 = vst.msk [vmem:[#allocation5 + $0x438] sm:$0xff] %vm5836_vm4, %v6193_v58 }
 0x6d6   : > { %v8091_v53 = vpop.f32.mrf.mxu0  ;;  %v6568_v57 = vpop.permute.xlu2 %6567  ;;  %6438 = vst.msk [vmem:[#allocation5 + $0x2f8] sm:$0xff] %vm6418_vm5, %v6349_v49 }
 0x6d7   : > { %v8092_v29 = vadd.f32 %v8091_v53, %v7967_v13  ;;  %6656 = vst.msk [vmem:[#allocation5 + $0x320] sm:$0xff] %vm6635_vm6, %v6568_v57  ;;  %v6564_v19 = vpop.permute.xlu0 %6563  ;;  %v6914_v13 = vld [vmem:[#allocation4 + $0xdb] sm:$0xff]  ;;  %v6267_v53 = vld [vmem:[#allocation4 + $0xe9] sm:$0xff] }
 0x6d8   : > { %6654 = vst.msk [vmem:[#allocation5 + $0x2d0] sm:$0xff] %vm6635_vm6, %v6564_v19  ;;  %v7417_v57 = vld [vmem:[#allocation4 + $0xe5] sm:$0xff] }
 0x6d9   : > { %v8217_v35 = vadd.f32 %v12756_v12, %v8092_v29  ;;  %6950 = vst.msk [vmem:[#allocation5 + $0x3f0] sm:$0xff] %vm5836_vm4, %v6914_v13  ;;  %v6199_v13 = vld [vmem:[#allocation4 + $0x108] sm:$0xff] }
 0x6da   : > { %6235 = vst.msk [vmem:[#allocation5 + $0x528] sm:$0xff] %vm5836_vm4, %v6199_v13  ;;  %v7207_v13 = vld [vmem:[#allocation4 + $0x114] sm:$0xff] }
 0x6db   : > { %8317 = vst.msk [vmem:[%s12835_s28 + $0x20] sm:$0xff] %vm8312_vm8, %v8217_v35  ;;  %6790 = vrot.lane.b32.xlu1 %v6480_v61, %s8620_s19 }
 0x6dc   : > { %6362 = vrot.lane.b32.xlu2 %v6264_v8, %s8619_s15  ;;  %7079 = vrot.lane.b32.xlu0 %v6984_v42, %s8619_s15 }
 0x6dd   : > { %v6566_v28 = vpop.permute.xlu1 %6565 }
 0x6de   : > { %v8094_v12 = vpop.f32.mrf.mxu0  ;;  %v7280_v25 = vpop.permute.xlu2 %7279  ;;  %6655 = vst.msk [vmem:[#allocation5 + $0x2f8] sm:$0xff] %vm6635_vm6, %v6566_v28  ;;  %v13014_v28 = vld [vmem:[#allocation4 + $0xea] sm:$0xff] }
 0x6df   : > { %v8095_v0 = vadd.f32 %v8094_v12, %v7970_v41  ;;  %7372 = vst.msk [vmem:[#allocation5 + $0x260] sm:$0xff] %vm6635_vm6, %v7280_v25  ;;  %v7276_v63 = vpop.permute.xlu0 %7275  ;;  %v7201_v12 = vld [vmem:[#allocation4 + $0xe4] sm:$0xff]  ;;  %v6268_v25 = vld [vmem:[#allocation4 + $0xf1] sm:$0xff] }
 0x6e0   : > { %7370 = vst.msk [vmem:[#allocation5 + $0x210] sm:$0xff] %vm6635_vm6, %v7276_v63 }
 0x6e1   : > { %v8220_v27 = vadd.f32 %v12780_v22, %v8095_v0  ;;  %7586 = vst.msk [vmem:[#allocation5 + $0x210] sm:$0xff] %vm6852_vm7, %v12920_v48  ;;  %v7416_v48 = vld [vmem:[#allocation4 + $0xdd] sm:$0xff] }
 0x6e3   : > { %8318 = vst.msk [vmem:[%s12835_s28 + $0x28] sm:$0xff] %vm8312_vm8, %v8220_v27  ;;  %6579 = vrot.lane.b32.xlu1 %v6481_v21, %s8618_s17 }
 0x6e4   : > { %7291 = vrot.lane.b32.xlu2 %v6984_v42, %s8618_s17  ;;  %6364 = vrot.lane.b32.xlu0 %v6265_v17, %s8619_s15  ;;  %v7975_v9 = vpop.f32.mrf.mxu3  ;;  %v6194_v42 = vld [vmem:[#allocation4 + $0xe0] sm:$0xff] }
 0x6e5   : > { %v7278_v32 = vpop.permute.xlu1 %7277  ;;  %v7976_v37 = vadd.f32 %v12813_v33, %v7975_v9  ;;  %6230 = vst.msk [vmem:[#allocation5 + $0x460] sm:$0xff] %vm5836_vm4, %v6194_v42 }
 0x6e6   : > { %v8097_v22 = vpop.f32.mrf.mxu0  ;;  %v6781_v34 = vpop.permute.xlu2 %6780  ;;  %7371 = vst.msk [vmem:[#allocation5 + $0x238] sm:$0xff] %vm6635_vm6, %v7278_v32 }
 0x6e7   : > { %v8098_v50 = vadd.f32 %v8097_v22, %v7973_v47  ;;  %6871 = vst.msk [vmem:[#allocation5 + $0x2d0] sm:$0xff] %vm6852_vm7, %v6781_v34  ;;  %v6777_v46 = vpop.permute.xlu0 %6776  ;;  %v6916_v47 = vld [vmem:[#allocation4 + $0xeb] sm:$0xff] }
 0x6e8   : > { %7587 = vst.msk [vmem:[#allocation5 + $0x238] sm:$0xff] %vm6852_vm7, %v12912_v36  ;;  %v7721_v62 = vld [vmem:[#allocation5 + $0x210] sm:$0xff]  ;;  %v7202_v22 = vld [vmem:[#allocation4 + $0xec] sm:$0xff] }
 0x6e9   : > { %v8223_v56 = vadd.f32 %v12795_v3, %v8098_v50  ;;  %6869 = vst.msk [vmem:[#allocation5 + $0x280] sm:$0xff] %vm6852_vm7, %v6777_v46  ;;  %8117 = vmatmul.f32.gmra.mxu0 %v7721_v62 }
 0x6ea   : > { %6952 = vst.msk [vmem:[#allocation5 + $0x440] sm:$0xff] %vm5836_vm4, %v6916_v47  ;;  %v6201_v47 = vld [vmem:[#allocation4 + $0x118] sm:$0xff] }
 0x6eb   : > { %8319 = vst.msk [vmem:[%s12835_s28 + $0x30] sm:$0xff] %vm8312_vm8, %v8223_v56  ;;  %7509 = vrot.lane.b32.xlu1 %v7415_v2, %s8620_s19  ;;  %v6196_v56 = vld [vmem:[#allocation4 + $0xf0] sm:$0xff] }
 0x6ec   : > { %6792 = vrot.lane.b32.xlu2 %v6481_v21, %s8620_s19  ;;  %7293 = vrot.lane.b32.xlu0 %v7199_v55, %s8618_s17  ;;  %v7978_v24 = vpop.f32.mrf.mxu3  ;;  %v6195_v21 = vld [vmem:[#allocation4 + $0xe8] sm:$0xff]  ;;  %6232 = vst.msk [vmem:[#allocation5 + $0x4b0] sm:$0xff] %vm5836_vm4, %v6196_v56 }
 0x6ed   : > { %v6779_v36 = vpop.permute.xlu1 %6778  ;;  %v7979_v0 = vadd.f32 %v12813_v33, %v7978_v24  ;;  %6231 = vst.msk [vmem:[#allocation5 + $0x488] sm:$0xff] %vm5836_vm4, %v6195_v21 }
 0x6ee   : > { %v12976_v3 = vpop.permute.xlu2 %7499  ;;  %6870 = vst.msk [vmem:[#allocation5 + $0x2a8] sm:$0xff] %vm6852_vm7, %v6779_v36  ;;  %v7735_v49 = vld [vmem:[#allocation5 + $0x2d0] sm:$0xff] }
 0x6ef   : > { %v7496_v54 = vpop.permute.xlu0 %7495  ;;  %v7724_v11 = vld [vmem:[#allocation5 + $0x238] sm:$0xff]  ;;  %6237 = vst.msk [vmem:[#allocation5 + $0x578] sm:$0xff] %vm5836_vm4, %v6201_v47 }
 0x6f0   : > { %7588 = vst.msk [vmem:[#allocation5 + $0x260] sm:$0xff] %vm6852_vm7, %v7496_v54  ;;  %v7729_v61 = vld [vmem:[#allocation5 + $0x280] sm:$0xff]  ;;  %v6269_v36 = vld [vmem:[#allocation4 + $0xf9] sm:$0xff] }
 0x6f1   : > { %8001 = vmatmul.f32.gmra.mxu3 %v7729_v61  ;;  %8120 = vmatmul.f32.gmra.mxu0 %v7724_v11  ;;  %v6197_v54 = vld [vmem:[#allocation4 + $0xf8] sm:$0xff]  ;;  %v7209_v47 = vld [vmem:[#allocation4 + $0x124] sm:$0xff] }
 0x6f2   : > { %v6918_v11 = vld [vmem:[#allocation4 + $0xfb] sm:$0xff]  ;;  %6233 = vst.msk [vmem:[#allocation5 + $0x4d8] sm:$0xff] %vm5836_vm4, %v6197_v54  ;;  %v7206_v54 = vld [vmem:[#allocation4 + $0x10c] sm:$0xff] }
 0x6f3   : > { %7081 = vrot.lane.b32.xlu1 %v7199_v55, %s8619_s15  ;;  %v6917_v55 = vld [vmem:[#allocation4 + $0xf3] sm:$0xff]  ;;  %6954 = vst.msk [vmem:[#allocation5 + $0x490] sm:$0xff] %vm5836_vm4, %v6918_v11 }
 0x6f4   : > { %7511 = vrot.lane.b32.xlu2 %v7416_v48, %s8620_s19  ;;  %6794 = vrot.lane.b32.xlu0 %v12983_v43, %s8620_s19  ;;  %v7981_v32 = vpop.f32.mrf.mxu3  ;;  %6953 = vst.msk [vmem:[#allocation5 + $0x468] sm:$0xff] %vm5836_vm4, %v6917_v55 }
 0x6f5   : > { %v12988_v18 = vpop.permute.xlu1 %7497  ;;  %v7732_v4 = vld [vmem:[#allocation5 + $0x2a8] sm:$0xff] }
 0x6f6   : > { %v7072_v45 = vpop.permute.xlu2 %7071 }
 0x6f7   : > { %7160 = vst.msk [vmem:[#allocation5 + $0x300] sm:$0xff] %vm6418_vm5, %v7072_v45  ;;  %v7068_v51 = vpop.permute.xlu0 %7067  ;;  %v7727_v38 = vld [vmem:[#allocation5 + $0x260] sm:$0xff] }
 0x6f8   : > { %7158 = vst.msk [vmem:[#allocation5 + $0x2b0] sm:$0xff] %vm6418_vm5, %v7068_v51  ;;  %v6271_v45 = vld [vmem:[#allocation4 + $0x109] sm:$0xff] }
 0x6f9   : > { %8004 = vmatmul.f32.gmra.mxu3 %v7732_v4  ;;  %8123 = vmatmul.f32.gmra.mxu0 %v7727_v38  ;;  %v6198_v38 = vld [vmem:[#allocation4 + $0x100] sm:$0xff] }
 0x6fa   : > { %6234 = vst.msk [vmem:[#allocation5 + $0x500] sm:$0xff] %vm5836_vm4, %v6198_v38 }
 0x6fb   : > { %6366 = vrot.lane.b32.xlu1 %v6266_v40, %s8619_s15 }
 0x6fc   : > { %6796 = vrot.lane.b32.xlu2 %v12994_v23, %s8620_s19  ;;  %7083 = vrot.lane.b32.xlu0 %v6986_v30, %s8619_s15 }
 0x6fd   : > { %v7070_v52 = vpop.permute.xlu1 %7069 }
 0x6fe   : > { %v6357_v59 = vpop.permute.xlu2 %6356  ;;  %7159 = vst.msk [vmem:[#allocation5 + $0x2d8] sm:$0xff] %vm6418_vm5, %v7070_v52  ;;  %v6270_v52 = vld [vmem:[#allocation4 + $0x101] sm:$0xff] }
 0x6ff   : > { %6442 = vst.msk [vmem:[#allocation5 + $0x398] sm:$0xff] %vm6418_vm5, %v6357_v59  ;;  %v6353_v7 = vpop.permute.xlu0 %6352 }
 0x700   : > { %6440 = vst.msk [vmem:[#allocation5 + $0x348] sm:$0xff] %vm6418_vm5, %v6353_v7 }
 0x701   : > { %8007 = vmatmul.f32.gmra.mxu3 %v7735_v49 }
 0x703   : > { %7295 = vrot.lane.b32.xlu1 %v6986_v30, %s8618_s17 }
 0x704   : > { %6368 = vrot.lane.b32.xlu2 %v6267_v53, %s8619_s15  ;;  %7513 = vrot.lane.b32.xlu0 %v7417_v57, %s8620_s19  ;;  %v6920_v53 = vld [vmem:[#allocation4 + $0x10b] sm:$0xff] }
 0x705   : > { %v6355_v29 = vpop.permute.xlu1 %6354  ;;  %v6272_v57 = vld [vmem:[#allocation4 + $0x111] sm:$0xff]  ;;  %6956 = vst.msk [vmem:[#allocation5 + $0x4e0] sm:$0xff] %vm5836_vm4, %v6920_v53 }
 0x706   : > { %v8100_v19 = vpop.f32.mrf.mxu0  ;;  %v6574_v14 = vpop.permute.xlu2 %6573  ;;  %6441 = vst.msk [vmem:[#allocation5 + $0x370] sm:$0xff] %vm6418_vm5, %v6355_v29  ;;  %v13080_v29 = vld [vmem:[#allocation4 + $0xfc] sm:$0xff] }
 0x707   : > { %v8101_v35 = vadd.f32 %v8100_v19, %v7976_v37  ;;  %6659 = vst.msk [vmem:[#allocation5 + $0x398] sm:$0xff] %vm6635_vm6, %v6574_v14  ;;  %v6570_v8 = vpop.permute.xlu0 %6569  ;;  %v8234_v37 = vpop.f32.mrf.mxu1  ;;  %v7420_v19 = vld [vmem:[#allocation4 + $0xfd] sm:$0xff] }
 0x708   : > { %6657 = vst.msk [vmem:[#allocation5 + $0x348] sm:$0xff] %vm6635_vm6, %v6570_v8 }
 0x709   : > { %v8226_v41 = vadd.f32 %v12817_v1, %v8101_v35 }
 0x70b   : > { %8320 = vst.msk [vmem:[%s12835_s28 + $0x38] sm:$0xff] %vm8312_vm8, %v8226_v41  ;;  %6798 = vrot.lane.b32.xlu1 %v13014_v28, %s8620_s19  ;;  %v6200_v41 = vld [vmem:[#allocation4 + $0x110] sm:$0xff] }
 0x70c   : > { %7297 = vrot.lane.b32.xlu2 %v7201_v12, %s8618_s17  ;;  %6370 = vrot.lane.b32.xlu0 %v6268_v25, %s8619_s15  ;;  %6236 = vst.msk [vmem:[#allocation5 + $0x550] sm:$0xff] %vm5836_vm4, %v6200_v41 }
 0x70d   : > { %v6572_v1 = vpop.permute.xlu1 %6571 }
 0x70e   : > { %v8103_v63 = vpop.f32.mrf.mxu0  ;;  %v7286_v16 = vpop.permute.xlu2 %7285  ;;  %6658 = vst.msk [vmem:[#allocation5 + $0x370] sm:$0xff] %vm6635_vm6, %v6572_v1  ;;  %v13095_v1 = vld [vmem:[#allocation4 + $0xfa] sm:$0xff] }
 0x70f   : > { %v8104_v27 = vadd.f32 %v8103_v63, %v7979_v0  ;;  %7375 = vst.msk [vmem:[#allocation5 + $0x2d8] sm:$0xff] %vm6635_vm6, %v7286_v16  ;;  %v7282_v39 = vpop.permute.xlu0 %7281  ;;  %v6921_v0 = vld [vmem:[#allocation4 + $0x113] sm:$0xff]  ;;  %v8237_v63 = vpop.f32.mrf.mxu1 }
 0x710   : > { %7373 = vst.msk [vmem:[#allocation5 + $0x288] sm:$0xff] %vm6635_vm6, %v7282_v39 }
 0x711   : > { %v8229_v17 = vadd.f32 %v12845_v44, %v8104_v27  ;;  %7589 = vst.msk [vmem:[#allocation5 + $0x288] sm:$0xff] %vm6852_vm7, %v12988_v18  ;;  %v7982_v44 = vadd.f32 %v12813_v33, %v7981_v32  ;;  %v7419_v18 = vld [vmem:[#allocation4 + $0xf5] sm:$0xff] }
 0x712   : > { %6957 = vst.msk [vmem:[#allocation5 + $0x508] sm:$0xff] %vm5836_vm4, %v6921_v0 }
 0x713   : > { %8321 = vst.msk [vmem:[%s12835_s28 + $0x40] sm:$0xff] %vm8312_vm8, %v8229_v17  ;;  %7299 = vrot.lane.b32.xlu1 %v7202_v22, %s8618_s17 }
 0x714   : > { %7085 = vrot.lane.b32.xlu2 %v7201_v12, %s8619_s15  ;;  %6581 = vrot.lane.b32.xlu0 %v12983_v43, %s8618_s17 }
 0x715   : > { %v7284_v34 = vpop.permute.xlu1 %7283  ;;  %v7984_v59 = vpop.f32.mrf.mxu3 }
 0x716   : > { %v8106_v50 = vpop.f32.mrf.mxu0  ;;  %v6787_v46 = vpop.permute.xlu2 %6786  ;;  %7374 = vst.msk [vmem:[#allocation5 + $0x2b0] sm:$0xff] %vm6635_vm6, %v7284_v34  ;;  %v7985_v14 = vadd.f32 %v12813_v33, %v7984_v59 }
 0x717   : > { %v8107_v31 = vadd.f32 %v8106_v50, %v7982_v44  ;;  %6874 = vst.msk [vmem:[#allocation5 + $0x348] sm:$0xff] %vm6852_vm7, %v6787_v46  ;;  %v6783_v62 = vpop.permute.xlu0 %6782  ;;  %v6922_v44 = vld [vmem:[#allocation4 + $0x11b] sm:$0xff]  ;;  %v7205_v50 = vld [vmem:[#allocation4 + $0x104] sm:$0xff] }
 0x718   : > { %7590 = vst.msk [vmem:[#allocation5 + $0x2b0] sm:$0xff] %vm6852_vm7, %v12976_v3  ;;  %v7730_v60 = vld [vmem:[#allocation5 + $0x288] sm:$0xff]  ;;  %v6273_v46 = vld [vmem:[#allocation4 + $0x119] sm:$0xff] }
 0x719   : > { %v8232_v2 = vadd.f32 %v12859_v10, %v8107_v31  ;;  %6872 = vst.msk [vmem:[#allocation5 + $0x2f8] sm:$0xff] %vm6852_vm7, %v6783_v62  ;;  %8126 = vmatmul.f32.gmra.mxu0 %v7730_v60 }
 0x71a   : > { %6958 = vst.msk [vmem:[#allocation5 + $0x530] sm:$0xff] %vm5836_vm4, %v6922_v44 }
 0x71b   : > { %8322 = vst.msk [vmem:[%s12835_s28 + $0x48] sm:$0xff] %vm8312_vm8, %v8232_v2  ;;  %6372 = vrot.lane.b32.xlu1 %v6269_v36, %s8619_s15  ;;  %v6923_v36 = vld [vmem:[#allocation4 + $0x123] sm:$0xff] }
 0x71c   : > { %7515 = vrot.lane.b32.xlu2 %v7418_v6, %s8620_s19  ;;  %7301 = vrot.lane.b32.xlu0 %v13049_v26, %s8618_s17  ;;  %v8240_v6 = vpop.f32.mrf.mxu1  ;;  %6959 = vst.msk [vmem:[#allocation5 + $0x558] sm:$0xff] %vm5836_vm4, %v6923_v36 }
 0x71d   : > { %v6785_v10 = vpop.permute.xlu1 %6784  ;;  %v7987_v12 = vpop.f32.mrf.mxu3 }
 0x71e   : > { %v13055_v3 = vpop.permute.xlu2 %6577  ;;  %6873 = vst.msk [vmem:[#allocation5 + $0x320] sm:$0xff] %vm6852_vm7, %v6785_v10  ;;  %v7744_v49 = vld [vmem:[#allocation5 + $0x348] sm:$0xff]  ;;  %v7988_v16 = vadd.f32 %v12813_v33, %v7987_v12 }
 0x71f   : > { %v7502_v61 = vpop.permute.xlu0 %7501  ;;  %v7733_v48 = vld [vmem:[#allocation5 + $0x2b0] sm:$0xff] }
 0x720   : > { %7591 = vst.msk [vmem:[#allocation5 + $0x2d8] sm:$0xff] %vm6852_vm7, %v7502_v61  ;;  %v7738_v43 = vld [vmem:[#allocation5 + $0x2f8] sm:$0xff] }
 0x721   : > { %8010 = vmatmul.f32.gmra.mxu3 %v7738_v43  ;;  %8129 = vmatmul.f32.gmra.mxu0 %v7733_v48 }
 0x723   : > { %7517 = vrot.lane.b32.xlu1 %v7419_v18, %s8620_s19  ;;  %v6924_v18 = vld [vmem:[#allocation4 + $0x12b] sm:$0xff] }
 0x724   : > { %6583 = vrot.lane.b32.xlu2 %v12994_v23, %s8618_s17  ;;  %6376 = vrot.lane.b32.xlu0 %v6271_v45, %s8619_s15  ;;  %v13071_v23 = vld [vmem:[#allocation4 + $0xf2] sm:$0xff]  ;;  %6960 = vst.msk [vmem:[#allocation5 + $0x580] sm:$0xff] %vm5836_vm4, %v6924_v18 }
 0x725   : > { %v6576_v4 = vpop.permute.xlu1 %6575  ;;  %v7741_v51 = vld [vmem:[#allocation5 + $0x320] sm:$0xff]  ;;  %v7990_v34 = vpop.f32.mrf.mxu3 }
 0x726   : > { %v13065_v5 = vpop.permute.xlu2 %7505  ;;  %v7991_v31 = vadd.f32 %v12813_v33, %v7990_v34  ;;  %v6702_v33 = vld [vmem:[#allocation4 + $0x102] sm:$0xff]  ;;  %v7422_v45 = vld [vmem:[#allocation4 + $0x10d] sm:$0xff] }
 0x727   : > { %v7074_v40 = vpop.permute.xlu0 %7073  ;;  %v7736_v30 = vld [vmem:[#allocation5 + $0x2d8] sm:$0xff] }
 0x728   : > { %7161 = vst.msk [vmem:[#allocation5 + $0x328] sm:$0xff] %vm6418_vm5, %v7074_v40 }
 0x729   : > { %8013 = vmatmul.f32.gmra.mxu3 %v7741_v51  ;;  %8132 = vmatmul.f32.gmra.mxu0 %v7736_v30  ;;  %v7423_v30 = vld [vmem:[#allocation4 + $0x115] sm:$0xff] }
 0x72b   : > { %7087 = vrot.lane.b32.xlu1 %v7202_v22, %s8619_s15 }
 0x72c   : > { %6374 = vrot.lane.b32.xlu2 %v6270_v52, %s8619_s15  ;;  %6800 = vrot.lane.b32.xlu0 %v13071_v23, %s8620_s19 }
 0x72d   : > { %v7504_v9 = vpop.permute.xlu1 %7503 }
 0x72e   : > { %v7078_v7 = vpop.permute.xlu2 %7077 }
 0x72f   : > { %7163 = vst.msk [vmem:[#allocation5 + $0x378] sm:$0xff] %vm6418_vm5, %v7078_v7  ;;  %v6359_v58 = vpop.permute.xlu0 %6358 }
 0x730   : > { %6443 = vst.msk [vmem:[#allocation5 + $0x3c0] sm:$0xff] %vm6418_vm5, %v6359_v58  ;;  %v8243_v58 = vpop.f32.mrf.mxu1 }
 0x731   : > { %6660 = vst.msk [vmem:[#allocation5 + $0x3c0] sm:$0xff] %vm6635_vm6, %v6576_v4  ;;  %8016 = vmatmul.f32.gmra.mxu3 %v7744_v49  ;;  %v6703_v4 = vld [vmem:[#allocation4 + $0x10a] sm:$0xff] }
 0x732   : > { %v13155_v49 = vld [vmem:[%s13326_s9] ss:$0 sm:$0xff] }
 0x733   : > { %6378 = vrot.lane.b32.xlu1 %v6272_v57, %s8619_s15 }
 0x734   : > { %7303 = vrot.lane.b32.xlu2 %v13080_v29, %s8618_s17  ;;  %7519 = vrot.lane.b32.xlu0 %v7420_v19, %s8620_s19 }
 0x735   : > { %v7076_v15 = vpop.permute.xlu1 %7075 }
 0x736   : > { %v8109_v35 = vpop.f32.mrf.mxu0  ;;  %v6363_v8 = vpop.permute.xlu2 %6362  ;;  %7162 = vst.msk [vmem:[#allocation5 + $0x350] sm:$0xff] %vm6418_vm5, %v7076_v15 }
 0x737   : > { %v8110_v42 = vadd.f32 %v8109_v35, %v7985_v14  ;;  %6445 = vst.msk [vmem:[#allocation5 + $0x410] sm:$0xff] %vm6418_vm5, %v6363_v8  ;;  %v7288_v24 = vpop.permute.xlu0 %7287 }
 0x738   : > { %7376 = vst.msk [vmem:[#allocation5 + $0x300] sm:$0xff] %vm6635_vm6, %v7288_v24  ;;  %v6704_v24 = vld [vmem:[#allocation4 + $0x112] sm:$0xff]  ;;  %v8246_v41 = vpop.f32.mrf.mxu1 }
 0x739   : > { %v8235_v25 = vadd.f32 %v8234_v37, %v8110_v42  ;;  %7592 = vst.msk [vmem:[#allocation5 + $0x300] sm:$0xff] %vm6852_vm7, %v7504_v9  ;;  %v7208_v42 = vld [vmem:[#allocation4 + $0x11c] sm:$0xff] }
 0x73b   : > { %8323 = vst.msk [vmem:[%s12835_s28 + $0x50] sm:$0xff] %vm8312_vm8, %v8235_v25  ;;  %6585 = vrot.lane.b32.xlu1 %v13014_v28, %s8618_s17 }
 0x73c   : > { %6802 = vrot.lane.b32.xlu2 %v13095_v1, %s8620_s19  ;;  %7089 = vrot.lane.b32.xlu0 %v13049_v26, %s8619_s15 }
 0x73d   : > { %v6361_v27 = vpop.permute.xlu1 %6360 }
 0x73e   : > { %v8112_v39 = vpop.f32.mrf.mxu0  ;;  %v7292_v21 = vpop.permute.xlu2 %7291  ;;  %6444 = vst.msk [vmem:[#allocation5 + $0x3e8] sm:$0xff] %vm6418_vm5, %v6361_v27 }
 0x73f   : > { %v8113_v17 = vadd.f32 %v8112_v39, %v7988_v16  ;;  %7378 = vst.msk [vmem:[#allocation5 + $0x350] sm:$0xff] %vm6635_vm6, %v7292_v21  ;;  %v6789_v28 = vpop.permute.xlu0 %6788 }
 0x740   : > { %6661 = vst.msk [vmem:[#allocation5 + $0x3e8] sm:$0xff] %vm6635_vm6, %v13055_v3  ;;  %v7739_v32 = vld [vmem:[#allocation5 + $0x300] sm:$0xff] }
 0x741   : > { %v8238_v22 = vadd.f32 %v8237_v63, %v8113_v17  ;;  %6875 = vst.msk [vmem:[#allocation5 + $0x370] sm:$0xff] %vm6852_vm7, %v6789_v28  ;;  %8135 = vmatmul.f32.gmra.mxu0 %v7739_v32  ;;  %v7421_v3 = vld [vmem:[#allocation4 + $0x105] sm:$0xff]  ;;  %v6705_v17 = vld [vmem:[#allocation4 + $0x11a] sm:$0xff] }
 0x742   : > { %v7424_v28 = vld [vmem:[#allocation4 + $0x11d] sm:$0xff] }
 0x743   : > { %8324 = vst.msk [vmem:[%s12835_s28 + $0x58] sm:$0xff] %vm8312_vm8, %v8238_v22  ;;  %7305 = vrot.lane.b32.xlu1 %v7205_v50, %s8618_s17 }
 0x744   : > { %6380 = vrot.lane.b32.xlu2 %v6273_v46, %s8619_s15  ;;  %6587 = vrot.lane.b32.xlu0 %v13071_v23, %s8618_s17  ;;  %v7993_v9 = vpop.f32.mrf.mxu3 }
 0x745   : > { %v7290_v62 = vpop.permute.xlu1 %7289  ;;  %v7994_v53 = vadd.f32 %v13155_v49, %v7993_v9 }
 0x746   : > { %v8115_v56 = vpop.f32.mrf.mxu0  ;;  %v6793_v60 = vpop.permute.xlu2 %6792  ;;  %7377 = vst.msk [vmem:[#allocation5 + $0x328] sm:$0xff] %vm6635_vm6, %v7290_v62 }
 0x747   : > { %v8116_v2 = vadd.f32 %v8115_v56, %v7991_v31  ;;  %6877 = vst.msk [vmem:[#allocation5 + $0x3c0] sm:$0xff] %vm6852_vm7, %v6793_v60  ;;  %v7508_v55 = vpop.permute.xlu0 %7507  ;;  %v8249_v62 = vpop.f32.mrf.mxu1  ;;  %v7425_v60 = vld [vmem:[#allocation4 + $0x125] sm:$0xff] }
 0x748   : > { %7593 = vst.msk [vmem:[#allocation5 + $0x328] sm:$0xff] %vm6852_vm7, %v13065_v5  ;;  %v7747_v26 = vld [vmem:[#allocation5 + $0x370] sm:$0xff] }
 0x749   : > { %v8241_v10 = vadd.f32 %v8240_v6, %v8116_v2  ;;  %7594 = vst.msk [vmem:[#allocation5 + $0x350] sm:$0xff] %vm6852_vm7, %v7508_v55  ;;  %8019 = vmatmul.f32.gmra.mxu3 %v7747_v26  ;;  %v6706_v2 = vld [vmem:[#allocation4 + $0x122] sm:$0xff] }
 0x74b   : > { %8325 = vst.msk [vmem:[%s12835_s28 + $0x60] sm:$0xff] %vm8312_vm8, %v8241_v10  ;;  %6804 = vrot.lane.b32.xlu1 %v6702_v33, %s8620_s19  ;;  %v7426_v10 = vld [vmem:[#allocation4 + $0x12d] sm:$0xff] }
 0x74c   : > { %7521 = vrot.lane.b32.xlu2 %v7421_v3, %s8620_s19  ;;  %7307 = vrot.lane.b32.xlu0 %v7206_v54, %s8618_s17  ;;  %v7996_v15 = vpop.f32.mrf.mxu3 }
 0x74d   : > { %v6791_v11 = vpop.permute.xlu1 %6790  ;;  %v7997_v12 = vadd.f32 %v13155_v49, %v7996_v15 }
 0x74e   : > { %v13130_v61 = vpop.permute.xlu2 %7511  ;;  %6876 = vst.msk [vmem:[#allocation5 + $0x398] sm:$0xff] %vm6852_vm7, %v6791_v11  ;;  %v7753_v23 = vld [vmem:[#allocation5 + $0x3c0] sm:$0xff] }
 0x74f   : > { %v7080_v48 = vpop.permute.xlu0 %7079  ;;  %v7742_v43 = vld [vmem:[#allocation5 + $0x328] sm:$0xff] }
 0x750   : > { %7164 = vst.msk [vmem:[#allocation5 + $0x3a0] sm:$0xff] %vm6418_vm5, %v7080_v48  ;;  %8138 = vmatmul.f32.gmra.mxu0 %v7742_v43  ;;  %v7745_v40 = vld [vmem:[#allocation5 + $0x350] sm:$0xff] }
 0x753   : > { %7523 = vrot.lane.b32.xlu1 %v7422_v45, %s8620_s19 }
 0x754   : > { %7091 = vrot.lane.b32.xlu2 %v13080_v29, %s8619_s15  ;;  %6806 = vrot.lane.b32.xlu0 %v6703_v4, %s8620_s19  ;;  %v7999_v21 = vpop.f32.mrf.mxu3 }
 0x755   : > { %v6580_v5 = vpop.permute.xlu1 %6579  ;;  %v7750_v51 = vld [vmem:[#allocation5 + $0x398] sm:$0xff]  ;;  %v8000_v32 = vadd.f32 %v13155_v49, %v7999_v21 }
 0x756   : > { %v6797_v38 = vpop.permute.xlu2 %6796  ;;  %6662 = vst.msk [vmem:[#allocation5 + $0x410] sm:$0xff] %vm6635_vm6, %v6580_v5  ;;  %8022 = vmatmul.f32.gmra.mxu3 %v7750_v51  ;;  %v7211_v5 = vld [vmem:[#allocation4 + $0x134] sm:$0xff] }
 0x757   : > { %6879 = vst.msk [vmem:[#allocation5 + $0x410] sm:$0xff] %vm6852_vm7, %v6797_v38  ;;  %v6365_v20 = vpop.permute.xlu0 %6364  ;;  %v8252_v38 = vpop.f32.mrf.mxu1 }
 0x758   : > { %6446 = vst.msk [vmem:[#allocation5 + $0x438] sm:$0xff] %vm6418_vm5, %v6365_v20  ;;  %8141 = vmatmul.f32.gmra.mxu0 %v7745_v40  ;;  %v6707_v20 = vld [vmem:[#allocation4 + $0x12a] sm:$0xff] }
 0x75b   : > { %7093 = vrot.lane.b32.xlu1 %v7205_v50, %s8619_s15 }
 0x75c   : > { %6589 = vrot.lane.b32.xlu2 %v13095_v1, %s8618_s17  ;;  %7525 = vrot.lane.b32.xlu0 %v7423_v30, %s8620_s19 }
 0x75d   : > { %v7510_v52 = vpop.permute.xlu1 %7509 }
 0x75e   : > { %v6369_v59 = vpop.permute.xlu2 %6368  ;;  %8025 = vmatmul.f32.gmra.mxu3 %v7753_v23  ;;  %v7759_v31 = vld [vmem:[#allocation5 + $0x410] sm:$0xff] }
 0x75f   : > { %6448 = vst.msk [vmem:[#allocation5 + $0x488] sm:$0xff] %vm6418_vm5, %v6369_v59  ;;  %v7294_v7 = vpop.permute.xlu0 %7293 }
 0x760   : > { %7379 = vst.msk [vmem:[#allocation5 + $0x378] sm:$0xff] %vm6635_vm6, %v7294_v7 }
 0x761   : > { %7595 = vst.msk [vmem:[#allocation5 + $0x378] sm:$0xff] %vm6852_vm7, %v7510_v52 }
 0x763   : > { %6591 = vrot.lane.b32.xlu1 %v6702_v33, %s8618_s17 }
 0x764   : > { %7309 = vrot.lane.b32.xlu2 %v7207_v13, %s8618_s17  ;;  %7095 = vrot.lane.b32.xlu0 %v7206_v54, %s8619_s15 }
 0x765   : > { %v7082_v57 = vpop.permute.xlu1 %7081 }
 0x766   : > { %v8118_v37 = vpop.f32.mrf.mxu0  ;;  %v7298_v29 = vpop.permute.xlu2 %7297  ;;  %7165 = vst.msk [vmem:[#allocation5 + $0x3c8] sm:$0xff] %vm6418_vm5, %v7082_v57 }
 0x767   : > { %v8119_v19 = vadd.f32 %v8118_v37, %v7994_v53  ;;  %7381 = vst.msk [vmem:[#allocation5 + $0x3c8] sm:$0xff] %vm6635_vm6, %v7298_v29  ;;  %v6795_v14 = vpop.permute.xlu0 %6794  ;;  %v7427_v53 = vld [vmem:[#allocation4 + $0x135] sm:$0xff]  ;;  %v8255_v57 = vpop.f32.mrf.mxu1 }
 0x768   : > { %6878 = vst.msk [vmem:[#allocation5 + $0x3e8] sm:$0xff] %vm6852_vm7, %v6795_v14  ;;  %v7748_v35 = vld [vmem:[#allocation5 + $0x378] sm:$0xff] }
 0x769   : > { %v8244_v8 = vadd.f32 %v8243_v58, %v8119_v19  ;;  %8144 = vmatmul.f32.gmra.mxu0 %v7748_v35  ;;  %v7212_v58 = vld [vmem:[#allocation4 + $0x13c] sm:$0xff] }
 0x76b   : > { %8326 = vst.msk [vmem:[%s12835_s28 + $0x68] sm:$0xff] %vm8312_vm8, %v8244_v8  ;;  %7311 = vrot.lane.b32.xlu1 %v7208_v42, %s8618_s17 }
 0x76c   : > { %6808 = vrot.lane.b32.xlu2 %v6704_v24, %s8620_s19  ;;  %6593 = vrot.lane.b32.xlu0 %v6703_v4, %s8618_s17 }
 0x76d   : > { %v6367_v25 = vpop.permute.xlu1 %6366 }
 0x76e   : > { %v8121_v0 = vpop.f32.mrf.mxu0  ;;  %v7086_v1 = vpop.permute.xlu2 %7085  ;;  %6447 = vst.msk [vmem:[#allocation5 + $0x460] sm:$0xff] %vm6418_vm5, %v6367_v25 }
 0x76f   : > { %v8122_v63 = vadd.f32 %v8121_v0, %v7997_v12  ;;  %7167 = vst.msk [vmem:[#allocation5 + $0x418] sm:$0xff] %vm6418_vm5, %v7086_v1  ;;  %v7084_v16 = vpop.permute.xlu0 %7083  ;;  %v7756_v27 = vld [vmem:[#allocation5 + $0x3e8] sm:$0xff] }
 0x770   : > { %7166 = vst.msk [vmem:[#allocation5 + $0x3f0] sm:$0xff] %vm6418_vm5, %v7084_v16  ;;  %8028 = vmatmul.f32.gmra.mxu3 %v7756_v27  ;;  %v8258_v27 = vpop.f32.mrf.mxu1 }
 0x771   : > { %v8247_v39 = vadd.f32 %v8246_v41, %v8122_v63 }
 0x773   : > { %8327 = vst.msk [vmem:[%s12835_s28 + $0x70] sm:$0xff] %vm8312_vm8, %v8247_v39  ;;  %6810 = vrot.lane.b32.xlu1 %v6705_v17, %s8620_s19 }
 0x774   : > { %7527 = vrot.lane.b32.xlu2 %v7424_v28, %s8620_s19  ;;  %7313 = vrot.lane.b32.xlu0 %v7209_v47, %s8618_s17  ;;  %v8002_v43 = vpop.f32.mrf.mxu3 }
 0x775   : > { %v7296_v22 = vpop.permute.xlu1 %7295  ;;  %v8003_v40 = vadd.f32 %v13155_v49, %v8002_v43 }
 0x776   : > { %v8124_v44 = vpop.f32.mrf.mxu0  ;;  %v7516_v34 = vpop.permute.xlu2 %7515  ;;  %7380 = vst.msk [vmem:[#allocation5 + $0x3a0] sm:$0xff] %vm6635_vm6, %v7296_v22 }
 0x777   : > { %v8125_v50 = vadd.f32 %v8124_v44, %v8000_v32  ;;  %7596 = vst.msk [vmem:[#allocation5 + $0x3a0] sm:$0xff] %vm6852_vm7, %v13130_v61  ;;  %v7514_v46 = vpop.permute.xlu0 %7513  ;;  %v7210_v61 = vld [vmem:[#allocation4 + $0x12c] sm:$0xff] }
 0x778   : > { %7597 = vst.msk [vmem:[#allocation5 + $0x3c8] sm:$0xff] %vm6852_vm7, %v7514_v46  ;;  %8031 = vmatmul.f32.gmra.mxu3 %v7759_v31 }
 0x779   : > { %v8250_v56 = vadd.f32 %v8249_v62, %v8125_v50 }
 0x77b   : > { %8328 = vst.msk [vmem:[%s12835_s28 + $0x78] sm:$0xff] %vm8312_vm8, %v8250_v56  ;;  %7529 = vrot.lane.b32.xlu1 %v7425_v60, %s8620_s19 }
 0x77c   : > { %7097 = vrot.lane.b32.xlu2 %v7207_v13, %s8619_s15  ;;  %6812 = vrot.lane.b32.xlu0 %v6706_v2, %s8620_s19  ;;  %v8005_v7 = vpop.f32.mrf.mxu3 }
 0x77d   : > { %v6799_v55 = vpop.permute.xlu1 %6798  ;;  %v8006_v37 = vadd.f32 %v13155_v49, %v8005_v7 }
 0x77e   : > { %v6584_v36 = vpop.permute.xlu2 %6583  ;;  %v7751_v6 = vld [vmem:[#allocation5 + $0x3a0] sm:$0xff] }
 0x77f   : > { %6664 = vst.msk [vmem:[#allocation5 + $0x460] sm:$0xff] %vm6635_vm6, %v6584_v36  ;;  %v6371_v26 = vpop.permute.xlu0 %6370  ;;  %8147 = vmatmul.f32.gmra.mxu0 %v7751_v6  ;;  %v7754_v54 = vld [vmem:[#allocation5 + $0x3c8] sm:$0xff]  ;;  %v8261_v6 = vpop.f32.mrf.mxu1 }
 0x780   : > { %6449 = vst.msk [vmem:[#allocation5 + $0x4b0] sm:$0xff] %vm6418_vm5, %v6371_v26 }
 0x783   : > { %7099 = vrot.lane.b32.xlu1 %v7208_v42, %s8619_s15 }
 0x784   : > { %6595 = vrot.lane.b32.xlu2 %v6704_v24, %s8618_s17  ;;  %7531 = vrot.lane.b32.xlu0 %v7426_v10, %s8620_s19  ;;  %v7428_v24 = vld [vmem:[#allocation4 + $0x13d] sm:$0xff]  ;;  %v8008_v41 = vpop.f32.mrf.mxu3 }
 0x785   : > { %v7300_v33 = vpop.permute.xlu1 %7299  ;;  %v8009_v12 = vadd.f32 %v13155_v49, %v8008_v41 }
 0x786   : > { %v6375_v3 = vpop.permute.xlu2 %6374  ;;  %7382 = vst.msk [vmem:[#allocation5 + $0x3f0] sm:$0xff] %vm6635_vm6, %v7300_v33 }
 0x787   : > { %6451 = vst.msk [vmem:[#allocation5 + $0x500] sm:$0xff] %vm6418_vm5, %v6375_v3  ;;  %v6582_v11 = vpop.permute.xlu0 %6581  ;;  %8150 = vmatmul.f32.gmra.mxu0 %v7754_v54 }
 0x788   : > { %7598 = vst.msk [vmem:[#allocation5 + $0x3f0] sm:$0xff] %vm6852_vm7, %v7516_v34 }
 0x789   : > { %6663 = vst.msk [vmem:[#allocation5 + $0x438] sm:$0xff] %vm6635_vm6, %v6582_v11 }
 0x78a   : > { %6880 = vst.msk [vmem:[#allocation5 + $0x438] sm:$0xff] %vm6852_vm7, %v6799_v55 }
 0x78b   : > { %6597 = vrot.lane.b32.xlu1 %v6705_v17, %s8618_s17 }
 0x78c   : > { %7315 = vrot.lane.b32.xlu2 %v7210_v61, %s8618_s17  ;;  %7101 = vrot.lane.b32.xlu0 %v7209_v47, %s8619_s15 }
 0x78d   : > { %v6373_v48 = vpop.permute.xlu1 %6372 }
 0x78e   : > { %v7304_v18 = vpop.permute.xlu2 %7303  ;;  %6450 = vst.msk [vmem:[#allocation5 + $0x4d8] sm:$0xff] %vm6418_vm5, %v6373_v48 }
 0x78f   : > { %v7302_v45 = vpop.permute.xlu0 %7301  ;;  %v7757_v4 = vld [vmem:[#allocation5 + $0x3f0] sm:$0xff] }
 0x790   : > { %7383 = vst.msk [vmem:[#allocation5 + $0x418] sm:$0xff] %vm6635_vm6, %v7302_v45  ;;  %8153 = vmatmul.f32.gmra.mxu0 %v7757_v4 }
 0x791   : > { %v7762_v51 = vld [vmem:[#allocation5 + $0x438] sm:$0xff] }
 0x792   : > { %8034 = vmatmul.f32.gmra.mxu3 %v7762_v51 }
 0x793   : > { %7317 = vrot.lane.b32.xlu1 %v7211_v5, %s8618_s17 }
 0x794   : > { %6814 = vrot.lane.b32.xlu2 %v6707_v20, %s8620_s19  ;;  %7103 = vrot.lane.b32.xlu0 %v7210_v61, %s8619_s15  ;;  %v8264_v61 = vpop.f32.mrf.mxu1 }
 0x795   : > { %v7518_v30 = vpop.permute.xlu1 %7517 }
 0x796   : > { %v8127_v52 = vpop.f32.mrf.mxu0  ;;  %v6803_v23 = vpop.permute.xlu2 %6802  ;;  %7599 = vst.msk [vmem:[#allocation5 + $0x418] sm:$0xff] %vm6852_vm7, %v7518_v30 }
 0x797   : > { %v8128_v9 = vadd.f32 %v8127_v52, %v8003_v40  ;;  %v6377_v59 = vpop.permute.xlu0 %6376 }
 0x798   : > { %6452 = vst.msk [vmem:[#allocation5 + $0x528] sm:$0xff] %vm6418_vm5, %v6377_v59 }
 0x799   : > { %v8253_v13 = vadd.f32 %v8252_v38, %v8128_v9 }
 0x79b   : > { %8329 = vst.msk [vmem:[%s12835_s28 + $0x80] sm:$0xff] %vm8312_vm8, %v8253_v13  ;;  %7319 = vrot.lane.b32.xlu1 %v7212_v58, %s8618_s17 }
 0x79c   : > { %7533 = vrot.lane.b32.xlu2 %v7427_v53, %s8620_s19  ;;  %v8267_v7 = vpop.f32.mrf.mxu1 }
 0x79d   : > { %v7088_v29 = vpop.permute.xlu1 %7087  ;;  %v7760_v19 = vld [vmem:[#allocation5 + $0x418] sm:$0xff] }
 0x79e   : > { %v8130_v14 = vpop.f32.mrf.mxu0  ;;  %v6381_v15 = vpop.permute.xlu2 %6380  ;;  %7168 = vst.msk [vmem:[#allocation5 + $0x440] sm:$0xff] %vm6418_vm5, %v7088_v29  ;;  %8156 = vmatmul.f32.gmra.mxu0 %v7760_v19 }
 0x79f   : > { %v8131_v35 = vadd.f32 %v8130_v14, %v8006_v37  ;;  %6454 = vst.msk [vmem:[#allocation5 + $0x578] sm:$0xff] %vm6418_vm5, %v6381_v15  ;;  %v6801_v8 = vpop.permute.xlu0 %6800 }
 0x7a0   : > { %7384 = vst.msk [vmem:[#allocation5 + $0x440] sm:$0xff] %vm6635_vm6, %v7304_v18 }
 0x7a1   : > { %v8256_v42 = vadd.f32 %v8255_v57, %v8131_v35  ;;  %6881 = vst.msk [vmem:[#allocation5 + $0x460] sm:$0xff] %vm6852_vm7, %v6801_v8 }
 0x7a3   : > { %8330 = vst.msk [vmem:[%s12835_s28 + $0x88] sm:$0xff] %vm8312_vm8, %v8256_v42 }
 0x7a4   : > { %7535 = vrot.lane.b32.xlu2 %v7428_v24, %s8620_s19  ;;  %v8011_v46 = vpop.f32.mrf.mxu3 }
 0x7a5   : > { %v6379_v25 = vpop.permute.xlu1 %6378  ;;  %v8012_v31 = vadd.f32 %v13155_v49, %v8011_v46 }
 0x7a6   : > { %v8133_v0 = vpop.f32.mrf.mxu0  ;;  %v7522_v1 = vpop.permute.xlu2 %7521  ;;  %6453 = vst.msk [vmem:[#allocation5 + $0x550] sm:$0xff] %vm6418_vm5, %v6379_v25 }
 0x7a7   : > { %v8134_v63 = vadd.f32 %v8133_v0, %v8009_v12  ;;  %v7520_v16 = vpop.permute.xlu0 %7519  ;;  %v8270_v12 = vpop.f32.mrf.mxu1 }
 0x7a8   : > { %7600 = vst.msk [vmem:[#allocation5 + $0x440] sm:$0xff] %vm6852_vm7, %v7520_v16  ;;  %v7765_v39 = vld [vmem:[#allocation5 + $0x460] sm:$0xff] }
 0x7a9   : > { %v8259_v21 = vadd.f32 %v8258_v27, %v8134_v63  ;;  %8037 = vmatmul.f32.gmra.mxu3 %v7765_v39  ;;  %v7785_v27 = vld [vmem:[#allocation5 + $0x560] sm:$0xff] }
 0x7aa   : > { %8554 = vmatmul.msk.f32.gmra.mxu1 %vm5836_vm4, %v7785_v27 }
 0x7ab   : > { %8331 = vst.msk [vmem:[%s12835_s28 + $0x90] sm:$0xff] %vm8312_vm8, %v8259_v21 }
 0x7ac   : > { %v8014_v54 = vpop.f32.mrf.mxu3 }
 0x7ad   : > { %v6586_v17 = vpop.permute.xlu1 %6585  ;;  %v8015_v48 = vadd.f32 %v13155_v49, %v8014_v54 }
 0x7ae   : > { %v7092_v28 = vpop.permute.xlu2 %7091  ;;  %6665 = vst.msk [vmem:[#allocation5 + $0x488] sm:$0xff] %vm6635_vm6, %v6586_v17 }
 0x7af   : > { %7170 = vst.msk [vmem:[#allocation5 + $0x490] sm:$0xff] %vm6418_vm5, %v7092_v28  ;;  %v7090_v47 = vpop.permute.xlu0 %7089  ;;  %v7763_v32 = vld [vmem:[#allocation5 + $0x440] sm:$0xff] }
 0x7b0   : > { %6882 = vst.msk [vmem:[#allocation5 + $0x488] sm:$0xff] %vm6852_vm7, %v6803_v23  ;;  %8159 = vmatmul.f32.gmra.mxu0 %v7763_v32 }
 0x7b1   : > { %7169 = vst.msk [vmem:[#allocation5 + $0x468] sm:$0xff] %vm6418_vm5, %v7090_v47 }
 0x7b4   : > { %v8017_v40 = vpop.f32.mrf.mxu3 }
 0x7b5   : > { %v7306_v22 = vpop.permute.xlu1 %7305  ;;  %v8018_v30 = vadd.f32 %v13155_v49, %v8017_v40 }
 0x7b6   : > { %v6590_v44 = vpop.permute.xlu2 %6589  ;;  %7385 = vst.msk [vmem:[#allocation5 + $0x468] sm:$0xff] %vm6635_vm6, %v7306_v22  ;;  %v8273_v22 = vpop.f32.mrf.mxu1 }
 0x7b7   : > { %6667 = vst.msk [vmem:[#allocation5 + $0x4d8] sm:$0xff] %vm6635_vm6, %v6590_v44  ;;  %v6588_v34 = vpop.permute.xlu0 %6587  ;;  %v7768_v50 = vld [vmem:[#allocation5 + $0x488] sm:$0xff] }
 0x7b8   : > { %7601 = vst.msk [vmem:[#allocation5 + $0x468] sm:$0xff] %vm6852_vm7, %v7522_v1  ;;  %8040 = vmatmul.f32.gmra.mxu3 %v7768_v50 }
 0x7b9   : > { %6666 = vst.msk [vmem:[#allocation5 + $0x4b0] sm:$0xff] %vm6635_vm6, %v6588_v34 }
 0x7bd   : > { %v6805_v62 = vpop.permute.xlu1 %6804 }
 0x7be   : > { %v8136_v56 = vpop.f32.mrf.mxu0  ;;  %v7310_v60 = vpop.permute.xlu2 %7309  ;;  %6883 = vst.msk [vmem:[#allocation5 + $0x4b0] sm:$0xff] %vm6852_vm7, %v6805_v62 }
 0x7bf   : > { %v8137_v2 = vadd.f32 %v8136_v56, %v8012_v31  ;;  %v7308_v55 = vpop.permute.xlu0 %7307  ;;  %v7766_v36 = vld [vmem:[#allocation5 + $0x468] sm:$0xff] }
 0x7c0   : > { %7386 = vst.msk [vmem:[#allocation5 + $0x490] sm:$0xff] %vm6635_vm6, %v7308_v55  ;;  %8162 = vmatmul.f32.gmra.mxu0 %v7766_v36 }
 0x7c1   : > { %v8262_v26 = vadd.f32 %v8261_v6, %v8137_v2  ;;  %v8276_v6 = vpop.f32.mrf.mxu1 }
 0x7c3   : > { %8332 = vst.msk [vmem:[%s12835_s28 + $0x98] sm:$0xff] %vm8312_vm8, %v8262_v26 }
 0x7c5   : > { %v7524_v10 = vpop.permute.xlu1 %7523  ;;  %v7771_v33 = vld [vmem:[#allocation5 + $0x4b0] sm:$0xff] }
 0x7c6   : > { %v6809_v3 = vpop.permute.xlu2 %6808  ;;  %7602 = vst.msk [vmem:[#allocation5 + $0x490] sm:$0xff] %vm6852_vm7, %v7524_v10  ;;  %8043 = vmatmul.f32.gmra.mxu3 %v7771_v33 }
 0x7c7   : > { %v6807_v11 = vpop.permute.xlu0 %6806 }
 0x7c8   : > { %6884 = vst.msk [vmem:[#allocation5 + $0x4d8] sm:$0xff] %vm6852_vm7, %v6807_v11 }
 0x7cc   : > { %v8020_v14 = vpop.f32.mrf.mxu3 }
 0x7cd   : > { %v8139_v43 = vpop.f32.mrf.mxu0  ;;  %v7094_v18 = vpop.permute.xlu1 %7093  ;;  %v7769_v45 = vld [vmem:[#allocation5 + $0x490] sm:$0xff]  ;;  %v8021_v15 = vadd.f32 %v13155_v49, %v8020_v14 }
 0x7ce   : > { %v8140_v4 = vadd.f32 %v8139_v43, %v8015_v48  ;;  %v7528_v5 = vpop.permute.xlu2 %7527  ;;  %7171 = vst.msk [vmem:[#allocation5 + $0x4b8] sm:$0xff] %vm6418_vm5, %v7094_v18  ;;  %8165 = vmatmul.f32.gmra.mxu0 %v7769_v45  ;;  %v7788_v43 = vld [vmem:[#allocation5 + $0x588] sm:$0xff] }
 0x7cf   : > { %7387 = vst.msk [vmem:[#allocation5 + $0x4b8] sm:$0xff] %vm6635_vm6, %v7310_v60  ;;  %v7526_v51 = vpop.permute.xlu0 %7525  ;;  %v7774_v38 = vld [vmem:[#allocation5 + $0x4d8] sm:$0xff] }
 0x7d0   : > { %v8265_v20 = vadd.f32 %v8264_v61, %v8140_v4  ;;  %7603 = vst.msk [vmem:[#allocation5 + $0x4b8] sm:$0xff] %vm6852_vm7, %v7526_v51  ;;  %8046 = vmatmul.f32.gmra.mxu3 %v7774_v38  ;;  %v8279_v51 = vpop.f32.mrf.mxu1 }
 0x7d2   : > { %8333 = vst.msk [vmem:[%s12835_s28 + $0xa0] sm:$0xff] %vm8312_vm8, %v8265_v20 }
 0x7d5   : > { %v8142_v52 = vpop.f32.mrf.mxu0  ;;  %v6592_v23 = vpop.permute.xlu1 %6591 }
 0x7d6   : > { %v8143_v9 = vadd.f32 %v8142_v52, %v8018_v30  ;;  %v7098_v59 = vpop.permute.xlu2 %7097  ;;  %6668 = vst.msk [vmem:[#allocation5 + $0x500] sm:$0xff] %vm6635_vm6, %v6592_v23 }
 0x7d7   : > { %7173 = vst.msk [vmem:[#allocation5 + $0x508] sm:$0xff] %vm6418_vm5, %v7098_v59  ;;  %v7096_v58 = vpop.permute.xlu0 %7095  ;;  %v7772_v13 = vld [vmem:[#allocation5 + $0x4b8] sm:$0xff] }
 0x7d8   : > { %v8268_v53 = vadd.f32 %v8267_v7, %v8143_v9  ;;  %6885 = vst.msk [vmem:[#allocation5 + $0x500] sm:$0xff] %vm6852_vm7, %v6809_v3  ;;  %8168 = vmatmul.f32.gmra.mxu0 %v7772_v13  ;;  %v8282_v9 = vpop.f32.mrf.mxu1 }
 0x7d9   : > { %7172 = vst.msk [vmem:[#allocation5 + $0x4e0] sm:$0xff] %vm6418_vm5, %v7096_v58  ;;  %v8023_v17 = vpop.f32.mrf.mxu3 }
 0x7da   : > { %8334 = vst.msk [vmem:[%s12835_s28 + $0xa8] sm:$0xff] %vm8312_vm8, %v8268_v53  ;;  %v8024_v44 = vadd.f32 %v13155_v49, %v8023_v17 }
 0x7dd   : > { %v7312_v57 = vpop.permute.xlu1 %7311 }
 0x7de   : > { %v6596_v37 = vpop.permute.xlu2 %6595  ;;  %7388 = vst.msk [vmem:[#allocation5 + $0x4e0] sm:$0xff] %vm6635_vm6, %v7312_v57 }
 0x7df   : > { %6670 = vst.msk [vmem:[#allocation5 + $0x550] sm:$0xff] %vm6635_vm6, %v6596_v37  ;;  %v6594_v29 = vpop.permute.xlu0 %6593  ;;  %v7777_v19 = vld [vmem:[#allocation5 + $0x500] sm:$0xff] }
 0x7e0   : > { %7604 = vst.msk [vmem:[#allocation5 + $0x4e0] sm:$0xff] %vm6852_vm7, %v7528_v5  ;;  %8049 = vmatmul.f32.gmra.mxu3 %v7777_v19  ;;  %v8285_v57 = vpop.f32.mrf.mxu1 }
 0x7e1   : > { %6669 = vst.msk [vmem:[#allocation5 + $0x528] sm:$0xff] %vm6635_vm6, %v6594_v29  ;;  %v8026_v60 = vpop.f32.mrf.mxu3 }
 0x7e2   : > { %v8027_v55 = vadd.f32 %v13155_v49, %v8026_v60 }
 0x7e5   : > { %v6811_v35 = vpop.permute.xlu1 %6810 }
 0x7e6   : > { %v8145_v8 = vpop.f32.mrf.mxu0  ;;  %6886 = vst.msk [vmem:[#allocation5 + $0x528] sm:$0xff] %vm6852_vm7, %v6811_v35  ;;  %v7316_v16 = vpop.permute.xlu2 %7315 }
 0x7e7   : > { %v8146_v42 = vadd.f32 %v8145_v8, %v8021_v15  ;;  %v7314_v24 = vpop.permute.xlu0 %7313  ;;  %v7775_v41 = vld [vmem:[#allocation5 + $0x4e0] sm:$0xff] }
 0x7e8   : > { %7389 = vst.msk [vmem:[#allocation5 + $0x508] sm:$0xff] %vm6635_vm6, %v7314_v24  ;;  %8171 = vmatmul.f32.gmra.mxu0 %v7775_v41  ;;  %v8288_v35 = vpop.f32.mrf.mxu1 }
 0x7e9   : > { %v8271_v25 = vadd.f32 %v8270_v12, %v8146_v42 }
 0x7eb   : > { %8335 = vst.msk [vmem:[%s12835_s28 + $0xb0] sm:$0xff] %vm8312_vm8, %v8271_v25 }
 0x7ed   : > { %v7530_v0 = vpop.permute.xlu1 %7529  ;;  %v7780_v1 = vld [vmem:[#allocation5 + $0x528] sm:$0xff] }
 0x7ee   : > { %7605 = vst.msk [vmem:[#allocation5 + $0x508] sm:$0xff] %vm6852_vm7, %v7530_v0  ;;  %8052 = vmatmul.f32.gmra.mxu3 %v7780_v1  ;;  %v6815_v32 = vpop.permute.xlu2 %6814 }
 0x7ef   : > { %v6813_v63 = vpop.permute.xlu0 %6812 }
 0x7f0   : > { %6887 = vst.msk [vmem:[#allocation5 + $0x550] sm:$0xff] %vm6852_vm7, %v6813_v63  ;;  %v8291_v25 = vpop.f32.mrf.mxu1 }
 0x7f3   : > { %v8029_v11 = vpop.f32.mrf.mxu3 }
 0x7f4   : > { %v8030_v61 = vadd.f32 %v13155_v49, %v8029_v11 }
 0x7f5   : > { %v7100_v39 = vpop.permute.xlu1 %7099  ;;  %v7778_v21 = vld [vmem:[#allocation5 + $0x508] sm:$0xff] }
 0x7f6   : > { %7174 = vst.msk [vmem:[#allocation5 + $0x530] sm:$0xff] %vm6418_vm5, %v7100_v39  ;;  %8174 = vmatmul.f32.gmra.mxu0 %v7778_v21  ;;  %v7534_v2 = vpop.permute.xlu2 %7533 }
 0x7f7   : > { %7390 = vst.msk [vmem:[#allocation5 + $0x530] sm:$0xff] %vm6635_vm6, %v7316_v16  ;;  %v7532_v28 = vpop.permute.xlu0 %7531  ;;  %v7783_v47 = vld [vmem:[#allocation5 + $0x550] sm:$0xff] }
 0x7f8   : > { %7606 = vst.msk [vmem:[#allocation5 + $0x530] sm:$0xff] %vm6852_vm7, %v7532_v28  ;;  %8055 = vmatmul.f32.gmra.mxu3 %v7783_v47  ;;  %v8294_v39 = vpop.f32.mrf.mxu1 }
 0x7fb   : > { %v8032_v40 = vpop.f32.mrf.mxu3 }
 0x7fc   : > { %v8148_v34 = vpop.f32.mrf.mxu0  ;;  %v8033_v30 = vadd.f32 %v13155_v49, %v8032_v40 }
 0x7fd   : > { %v8149_v50 = vadd.f32 %v8148_v34, %v8024_v44  ;;  %v6598_v46 = vpop.permute.xlu1 %6597 }
 0x7fe   : > { %6671 = vst.msk [vmem:[#allocation5 + $0x578] sm:$0xff] %vm6635_vm6, %v6598_v46  ;;  %v7536_v48 = vpop.permute.xlu2 %7535 }
 0x7ff   : > { %v8274_v31 = vadd.f32 %v8273_v22, %v8149_v50  ;;  %6888 = vst.msk [vmem:[#allocation5 + $0x578] sm:$0xff] %vm6852_vm7, %v6815_v32  ;;  %v7102_v62 = vpop.permute.xlu0 %7101  ;;  %v7781_v56 = vld [vmem:[#allocation5 + $0x530] sm:$0xff] }
 0x800   : > { %7175 = vst.msk [vmem:[#allocation5 + $0x558] sm:$0xff] %vm6418_vm5, %v7102_v62  ;;  %8177 = vmatmul.f32.gmra.mxu0 %v7781_v56  ;;  %v8297_v22 = vpop.f32.mrf.mxu1 }
 0x801   : > { %8336 = vst.msk [vmem:[%s12835_s28 + $0xb8] sm:$0xff] %vm8312_vm8, %v8274_v31 }
 0x804   : > { %v8151_v36 = vpop.f32.mrf.mxu0 }
 0x805   : > { %v8152_v26 = vadd.f32 %v8151_v36, %v8027_v55  ;;  %v7318_v10 = vpop.permute.xlu1 %7317 }
 0x806   : > { %7391 = vst.msk [vmem:[#allocation5 + $0x558] sm:$0xff] %vm6635_vm6, %v7318_v10  ;;  %v7786_v33 = vld [vmem:[#allocation5 + $0x578] sm:$0xff] }
 0x807   : > { %v8277_v3 = vadd.f32 %v8276_v6, %v8152_v26  ;;  %v7104_v54 = vpop.permute.xlu0 %7103  ;;  %7607 = vst.msk [vmem:[#allocation5 + $0x558] sm:$0xff] %vm6852_vm7, %v7534_v2  ;;  %8058 = vmatmul.f32.gmra.mxu3 %v7786_v33 }
 0x808   : > { %7176 = vst.msk [vmem:[#allocation5 + $0x580] sm:$0xff] %vm6418_vm5, %v7104_v54  ;;  %v8300_v62 = vpop.f32.mrf.mxu1 }
 0x809   : > { %8337 = vst.msk [vmem:[%s12835_s28 + $0xc0] sm:$0xff] %vm8312_vm8, %v8277_v3 }
 0x80d   : > { %v8154_v18 = vpop.f32.mrf.mxu0  ;;  %v7320_v45 = vpop.permute.xlu1 %7319 }
 0x80e   : > { %v8155_v4 = vadd.f32 %v8154_v18, %v8030_v61  ;;  %7392 = vst.msk [vmem:[#allocation5 + $0x580] sm:$0xff] %vm6635_vm6, %v7320_v45  ;;  %v7784_v5 = vld [vmem:[#allocation5 + $0x558] sm:$0xff] }
 0x80f   : > { %7608 = vst.msk [vmem:[#allocation5 + $0x580] sm:$0xff] %vm6852_vm7, %v7536_v48  ;;  %8180 = vmatmul.f32.gmra.mxu0 %v7784_v5  ;;  %8555 = vmatmul.msk.f32.vlgmr.msra.gmra.mxu3 %vm5836_vm4, %v7788_v43 }
 0x810   : > { %v8280_v38 = vadd.f32 %v8279_v51, %v8155_v4  ;;  %v8303_v6 = vpop.f32.mrf.mxu1 }
 0x812   : > { %8338 = vst.msk [vmem:[%s12835_s28 + $0xc8] sm:$0xff] %vm8312_vm8, %v8280_v38 }
 0x815   : > { %v8035_v7 = vpop.f32.mrf.mxu3 }
 0x816   : > { %v7787_v20 = vld [vmem:[#allocation5 + $0x580] sm:$0xff]  ;;  %v8036_v58 = vadd.f32 %v13155_v49, %v8035_v7 }
 0x817   : > { %8183 = vmatmul.f32.gmra.mxu0 %v7787_v20 }
 0x81b   : > { %v8157_v52 = vpop.f32.mrf.mxu0 }
 0x81c   : > { %v8158_v23 = vadd.f32 %v8157_v52, %v8033_v30 }
 0x81e   : > { %v8283_v59 = vadd.f32 %v8282_v9, %v8158_v23 }
 0x820   : > { %8339 = vst.msk [vmem:[%s12835_s28 + $0xd0] sm:$0xff] %vm8312_vm8, %v8283_v59 }
 0x827   : > { %v8306_v3 = vpop.f32.mrf.mxu1 }
 0x82c   : > { %v8038_v29 = vpop.f32.mrf.mxu3 }
 0x82d   : > { %v8160_v13 = vpop.f32.mrf.mxu0  ;;  %v8039_v19 = vadd.f32 %v13155_v49, %v8038_v29 }
 0x82e   : > { %v8161_v53 = vadd.f32 %v8160_v13, %v8036_v58 }
 0x830   : > { %v8286_v37 = vadd.f32 %v8285_v57, %v8161_v53 }
 0x832   : > { %8340 = vst.msk [vmem:[%s12835_s28 + $0xd8] sm:$0xff] %vm8312_vm8, %v8286_v37 }
 0x83b   : > { %v8041_v42 = vpop.f32.mrf.mxu3 }
 0x83c   : > { %v8042_v24 = vadd.f32 %v13155_v49, %v8041_v42 }
 0x83d   : > { %v8163_v14 = vpop.f32.mrf.mxu0 }
 0x83e   : > { %v8164_v15 = vadd.f32 %v8163_v14, %v8039_v19 }
 0x840   : > { %v8289_v8 = vadd.f32 %v8288_v35, %v8164_v15 }
 0x842   : > { %8341 = vst.msk [vmem:[%s12835_s28 + $0xe0] sm:$0xff] %vm8312_vm8, %v8289_v8 }
 0x849   : > { %v8044_v1 = vpop.f32.mrf.mxu3 }
 0x84a   : > { %v8045_v63 = vadd.f32 %v13155_v49, %v8044_v1 }
 0x84b   : > { %v8166_v41 = vpop.f32.mrf.mxu0 }
 0x84c   : > { %v8167_v12 = vadd.f32 %v8166_v41, %v8042_v24 }
 0x84e   : > { %v8292_v0 = vadd.f32 %v8291_v25, %v8167_v12 }
 0x850   : > { %8342 = vst.msk [vmem:[%s12835_s28 + $0xe8] sm:$0xff] %vm8312_vm8, %v8292_v0 }
 0x853   : > { %v8047_v17 = vpop.f32.mrf.mxu3 }
 0x854   : > { %v8048_v28 = vadd.f32 %v13155_v49, %v8047_v17 }
 0x855   : > { %v8169_v16 = vpop.f32.mrf.mxu0 }
 0x856   : > { %v8170_v27 = vadd.f32 %v8169_v16, %v8045_v63 }
 0x858   : > { %v8295_v21 = vadd.f32 %v8294_v39, %v8170_v27 }
 0x85a   : > { %8343 = vst.msk [vmem:[%s12835_s28 + $0xf0] sm:$0xff] %vm8312_vm8, %v8295_v21 }
 0x863   : > { %v8050_v34 = vpop.f32.mrf.mxu3 }
 0x864   : > { %v8051_v50 = vadd.f32 %v13155_v49, %v8050_v34 }
 0x865   : > { %v8172_v47 = vpop.f32.mrf.mxu0 }
 0x866   : > { %v8173_v32 = vadd.f32 %v8172_v47, %v8048_v28 }
 0x868   : > { %v8298_v44 = vadd.f32 %v8297_v22, %v8173_v32 }
 0x86a   : > { %8344 = vst.msk [vmem:[%s12835_s28 + $0xf8] sm:$0xff] %vm8312_vm8, %v8298_v44 }
 0x871   : > { %v8053_v60 = vpop.f32.mrf.mxu3 }
 0x872   : > { %v8054_v2 = vadd.f32 %v13155_v49, %v8053_v60 }
 0x873   : > { %v8175_v46 = vpop.f32.mrf.mxu0 }
 0x874   : > { %v8176_v31 = vadd.f32 %v8175_v46, %v8051_v50 }
 0x876   : > { %v8301_v56 = vadd.f32 %v8300_v62, %v8176_v31 }
 0x878   : > { %8345 = vst.msk [vmem:[%s12835_s28 + $0x100] sm:$0xff] %vm8312_vm8, %v8301_v56 }
 0x87b   : > { %v8056_v10 = vpop.f32.mrf.mxu3 }
 0x87c   : > { %v8057_v33 = vadd.f32 %v13155_v49, %v8056_v10 }
 0x87d   : > { %v8178_v55 = vpop.f32.mrf.mxu0 }
 0x87e   : > { %v8179_v36 = vadd.f32 %v8178_v55, %v8054_v2 }
 0x880   : > { %v8304_v26 = vadd.f32 %v8303_v6, %v8179_v36 }
 0x882   : > { %8346 = vst.msk [vmem:[%s12835_s28 + $0x108] sm:$0xff] %vm8312_vm8, %v8304_v26 }
 0x88a   : > { %v8059_v54 = vpop.f32.mrf.mxu3 }
 0x88b   : > { %v8060_v43 = vadd.f32 %v13155_v49, %v8059_v54 }
 0x88c   : > { %v8181_v11 = vpop.f32.mrf.mxu0 }
 0x88d   : > { %v8182_v61 = vadd.f32 %v8181_v11, %v8057_v33 }
 0x88f   : > { %v8307_v48 = vadd.f32 %v8306_v3, %v8182_v61 }
 0x891   : > { %8347 = vst.msk [vmem:[%s12835_s28 + $0x110] sm:$0xff] %vm8312_vm8, %v8307_v48 }
 0x892   : > { %v8309_v45 = vpop.f32.mrf.mxu3 }
 0x894   : > { %v8184_v18 = vpop.f32.mrf.mxu0 }
 0x895   : > { %v8185_v4 = vadd.f32 %v8184_v18, %v8060_v43 }
 0x897   : > { %v8310_v5 = vadd.f32 %v8309_v45, %v8185_v4 }
 0x899   : > { %8348 = vst.msk [vmem:[%s12835_s28 + $0x118] sm:$0xff] %vm8312_vm8, %v8310_v5 }
 0x89a PF: > { %s20_s13 = sadd.s32 1, %s8614_s13  }
 0x89b   : > { %p17_p4 = scmp.ge.s32.totalorder %s20_s13, 4  }
 0x89d   :  { %19 = sbr.rel (!%p17_p4) target bundleno = 1 (0x1), region = 90 }

</bundles_post_ra>
